<compile_context>
chip_gen: v7x
topology: tpu7x:2x2x1
jax: 0.10.0
libtpu: 0.0.40
codegen_flags: <defaults>
</compile_context>

<pallas_src>
import numpy as np
import jax
import jax.numpy as jnp
from jax import lax
from jax.experimental import pallas as pl
from jax.experimental.pallas import tpu as pltpu

BN_EPS = 1e-5


# --------------------------------------------------------------------------- params

def init_params(key, in_channels, out_channels, hiddens, k=3):
    """Parameters mirroring the PyTorch module (xavier_uniform conv, zero bias,
    BN gamma=1 beta=0, training mode)."""
    ch_down = [in_channels] + list(hiddens)
    n_down = len(ch_down) - 1
    ch_up = list(hiddens)[::-1] + [out_channels]
    n_up = len(ch_up) - 2

    conv_defs = []
    for i in range(n_down):
        conv_defs.append((f"conv_enc_{i}_1", ch_down[i], ch_down[i + 1]))
        conv_defs.append((f"conv_enc_{i}_2", ch_down[i + 1], ch_down[i + 1]))
    for i in range(n_up):
        conv_defs.append((f"upconv_dec_{i}", ch_up[i], ch_up[i + 1]))
        conv_defs.append((f"conv_dec_{i}_1", ch_up[i], ch_up[i + 1]))
        conv_defs.append((f"conv_dec_{i}_2", ch_up[i + 1], ch_up[i + 1]))
        if i == n_up - 1:
            conv_defs.append((f"conv_dec_{i}_3", ch_up[i + 1], ch_up[i + 1]))
    conv_defs.append(("conv_out", ch_up[-2], ch_up[-1]))

    params = {}
    keys = jax.random.split(key, len(conv_defs))
    for kk, (name, cin, cout) in zip(keys, conv_defs):
        fan_in, fan_out = cin * k * k, cout * k * k
        bound = float(np.sqrt(6.0 / (fan_in + fan_out)))
        w = jax.random.uniform(kk, (k, k, cin, cout), jnp.float32, -bound, bound)
        b = jnp.zeros((cout,), jnp.float32)
        params[name] = (w, b)
    for i in range(n_down):
        c = ch_down[i + 1]
        params[f"bn_enc_{i}"] = (jnp.ones((c,), jnp.float32), jnp.zeros((c,), jnp.float32))
    for i in range(n_up):
        c = ch_up[i + 1]
        params[f"bn_dec_{i}"] = (jnp.ones((c,), jnp.float32), jnp.zeros((c,), jnp.float32))
    return params, n_down, n_up


# ------------------------------------------------------- operand (weight-layout) prep

def build_operands(params, *, N, H0, W0, in_channels, out_channels, hiddens):
    """Precompute (once, outside the jitted hot path) every matrix the fused
    kernel needs: banded conv matrices, tiled biases, row-shift / pooling
    selection / BN group-average / bilinear interpolation matrices."""
    ch_down = [in_channels] + list(hiddens)
    n_down = len(ch_down) - 1
    ch_up = list(hiddens)[::-1] + [out_channels]
    n_up = len(ch_up) - 2

    ops, plan = [], {}

    def add(name, arr):
        assert name not in plan, name
        plan[name] = len(ops)
        ops.append(jnp.asarray(arr, jnp.float32))

    def add_rowshift(H):
        # (N*H, N*H) block-diagonal: picks row y+dy within the same image, else 0.
        for dy in (-1, 1):
            name = f"rowshift:{H}:{dy}"
            if name not in plan:
                add(name, np.kron(np.eye(N, dtype=np.float32),
                                  np.eye(H, k=dy, dtype=np.float32)))

    def add_rowavg(H):
        name = f"rowavg:{H}"
        if name not in plan:
            R = N * H
            add(name, np.full((R, R), 1.0 / R, dtype=np.float32))

    def conv_band_mats(w, W):
        # w: (3, 3, Cin, Cout)  ->  {dy: (W*Cin, W*Cout)} block-banded matrices.
        # M_dy[xi*Cin+ci, xo*Cout+co] = w[dy+1, (xi-xo)+1, ci, co] for |xi-xo|<=1.
        mats = {}
        for dy in (-1, 0, 1):
            m = None
            for dx in (-1, 0, 1):
                d = np.eye(W, k=-dx, dtype=np.float32)       # D[xi, xo]=1 iff xi-xo=dx
                blk = jnp.kron(jnp.asarray(d), w[dy + 1, dx + 1])
                m = blk if m is None else m + blk
            mats[dy] = m
        return mats

    def add_conv(prefix, pname, W):
        w, b = params[pname]
        for dy, m in conv_band_mats(w, W).items():
            add(f"{prefix}:M{dy}", m)
        add(f"{prefix}:b", jnp.tile(b, W)[None, :])

    def add_conv_split(prefix, pname, W, c_skip):
        # torch.cat([skip, x], dim=1) -> split the conv weight into skip / x halves.
        w, b = params[pname]
        for dy, m in conv_band_mats(w[:, :, :c_skip, :], W).items():
            add(f"{prefix}:Ma{dy}", m)
        for dy, m in conv_band_mats(w[:, :, c_skip:, :], W).items():
            add(f"{prefix}:Mb{dy}", m)
        add(f"{prefix}:b", jnp.tile(b, W)[None, :])

    def add_bn(prefix, pname, W, C):
        g, bt = params[pname]
        # Same-channel group-average across the W lane blocks.
        add(f"{prefix}:G", np.kron(np.ones((W, W), np.float32),
                                   np.eye(C, dtype=np.float32)) / np.float32(W))
        add(f"{prefix}:g", jnp.tile(g, W)[None, :])
        add(f"{prefix}:bt", jnp.tile(bt, W)[None, :])

    def add_pool(prefix, H, W, C):
        R = N * H
        add(f"{prefix}:rshift", np.eye(R, k=1, dtype=np.float32))
        rsel = np.zeros((R // 2, R), np.float32)
        rsel[np.arange(R // 2), 2 * np.arange(R // 2)] = 1.0
        add(f"{prefix}:rsel", rsel)
        WC = W * C
        add(f"{prefix}:cshift", np.eye(WC, k=-C, dtype=np.float32))
        csel = np.zeros((WC, (W // 2) * C), np.float32)
        for wo in range(W // 2):
            for c in range(C):
                csel[2 * wo * C + c, wo * C + c] = 1.0
        add(f"{prefix}:csel", csel)

    def interp_matrix(n_out, n_in):
        # F.interpolate(mode='bilinear', align_corners=True) weights, one axis.
        m = np.zeros((n_out, n_in), np.float32)
        scale = 0.0 if n_out == 1 else (n_in - 1) / (n_out - 1)
        for o in range(n_out):
            src = o * scale
            i0 = min(int(np.floor(src)), n_in - 1)
            i1 = min(i0 + 1, n_in - 1)
            frac = np.float32(src - i0)
            m[o, i0] += np.float32(1.0) - frac
            m[o, i1] += frac
        return m

    def add_upsample(prefix, Hi, Wi, Ho, Wo, C):
        uh = interp_matrix(Ho, Hi)
        uw = interp_matrix(Wo, Wi)
        add(f"{prefix}:R", np.kron(np.eye(N, dtype=np.float32), uh))
        add(f"{prefix}:W", np.kron(uw.T, np.eye(C, dtype=np.float32)))

    H, W = H0, W0
    skip_meta = []
    for i in range(n_down):
        add_rowshift(H)
        add_rowavg(H)
        add_conv(f"enc_{i}_1", f"conv_enc_{i}_1", W)
        add_conv(f"enc_{i}_2", f"conv_enc_{i}_2", W)
        add_bn(f"bn_enc_{i}", f"bn_enc_{i}", W, ch_down[i + 1])
        if i != n_down - 1:
            skip_meta.append((H, W, ch_down[i + 1]))
            add_pool(f"pool_{i}", H, W, ch_down[i + 1])
            H //= 2
            W //= 2
    for i in range(n_up):
        Hs, Ws, Cs = skip_meta.pop()
        add_upsample(f"up_{i}", H, W, Hs, Ws, ch_up[i])
        H, W = Hs, Ws
        add_rowshift(H)
        add_rowavg(H)
        add_conv(f"upconv_{i}", f"upconv_dec_{i}", W)
        add_conv_split(f"dec_{i}_1", f"conv_dec_{i}_1", W, Cs)
        add_conv(f"dec_{i}_2", f"conv_dec_{i}_2", W)
        if i == n_up - 1:
            add_conv(f"dec_{i}_3", f"conv_dec_{i}_3", W)
        add_bn(f"bn_dec_{i}", f"bn_dec_{i}", W, ch_up[i + 1])
    add_conv("out", "conv_out", W)
    # Same-pixel indicator (softmax over the channel group inside each lane block).
    add("smax:G", np.kron(np.eye(W, dtype=np.float32),
                          np.ones((out_channels, out_channels), np.float32)))

    meta = dict(N=N, H0=H0, W0=W0, n_down=n_down, n_up=n_up,
                out_channels=out_channels)
    return ops, plan, meta


# ----------------------------------------------------------------------- fused kernel

def make_unet_kernel(plan, meta):
    H0, W0 = meta["H0"], meta["W0"]
    n_down, n_up = meta["n_down"], meta["n_up"]
    co = meta["out_channels"]

    def kernel(*refs):
        x_ref = refs[0]
        o_ref = refs[-1]
        cref = refs[1:-1]

        def cget(name):
            return cref[plan[name]][...]

        def mm(a, b):
            return jnp.dot(a, b, preferred_element_type=jnp.float32)

        def shifted(x2d, H, dy):
            if dy == 0:
                return x2d
            return mm(cget(f"rowshift:{H}:{dy}"), x2d)

        def conv3x3(x2d, prefix, H, relu=True):
            acc = None
            for dy in (-1, 0, 1):
                t = mm(shifted(x2d, H, dy), cget(f"{prefix}:M{dy}"))
                acc = t if acc is None else acc + t
            acc = acc + cget(f"{prefix}:b")
            return jnp.maximum(acc, 0.0) if relu else acc

        def conv3x3_concat(skip2d, x2d, prefix, H, relu=True):
            acc = None
            for dy in (-1, 0, 1):
                t = (mm(shifted(skip2d, H, dy), cget(f"{prefix}:Ma{dy}")) +
                     mm(shifted(x2d, H, dy), cget(f"{prefix}:Mb{dy}")))
                acc = t if acc is None else acc + t
            acc = acc + cget(f"{prefix}:b")
            return jnp.maximum(acc, 0.0) if relu else acc

        def batchnorm(x2d, prefix, H):
            # Training-mode batch stats over (N, H, W), biased variance.
            ravg = cget(f"rowavg:{H}")
            grp = cget(f"{prefix}:G")
            mean = mm(mm(ravg, x2d), grp)
            d = x2d - mean
            var = mm(mm(ravg, d * d), grp)
            return d * lax.rsqrt(var + BN_EPS) * cget(f"{prefix}:g") + cget(f"{prefix}:bt")

        def maxpool2x2(x2d, prefix):
            t = jnp.maximum(x2d, mm(cget(f"{prefix}:rshift"), x2d))
            t = mm(cget(f"{prefix}:rsel"), t)
            t = jnp.maximum(t, mm(t, cget(f"{prefix}:cshift")))
            return mm(t, cget(f"{prefix}:csel"))

        def upsample(x2d, prefix):
            return mm(cget(f"{prefix}:R"), mm(x2d, cget(f"{prefix}:W")))

        x = x_ref[...]                      # (N*H0, W0*Cin), lane-dense f32
        H, W = H0, W0
        skips = []
        # ---- encoder ----
        for i in range(n_down):
            x = conv3x3(x, f"enc_{i}_1", H)
            x = conv3x3(x, f"enc_{i}_2", H)
            x = batchnorm(x, f"bn_enc_{i}", H)
            # Dropout2d(p=0) == identity.
            if i != n_down - 1:
                skips.append((x, H, W))
                x = maxpool2x2(x, f"pool_{i}")
                H //= 2
                W //= 2
        # ---- decoder ----
        for i in range(n_up):
            skip, Hs, Ws = skips.pop()
            x = upsample(x, f"up_{i}")
            H, W = Hs, Ws
            x = conv3x3(x, f"upconv_{i}", H)
            x = conv3x3_concat(skip, x, f"dec_{i}_1", H)
            x = conv3x3(x, f"dec_{i}_2", H)
            if i == n_up - 1:
                x = conv3x3(x, f"dec_{i}_3", H)
            x = batchnorm(x, f"bn_dec_{i}", H)
        # ---- output conv + Softmax(dim=channels) ----
        z = conv3x3(x, "out", H, relu=False)
        gs = cget("smax:G")                 # (W*co, W*co) same-pixel indicator
        # Subtract the per-pixel mean (softmax is shift-invariant per group;
        # guarantees exp-args bounded and denominator >= 1) — keeps the
        # lane-dense layout without an in-kernel relayout reshape.
        zc = z - mm(z, gs) * (1.0 / co)
        e = jnp.exp(zc)
        o_ref[...] = e / mm(e, gs)

    return kernel


def unet_pallas_forward(x_nchw, operands, plan, meta):
    N, cin, H, W = x_nchw.shape
    co = meta["out_channels"]
    x2d = jnp.transpose(x_nchw.astype(jnp.float32), (0, 2, 3, 1)).reshape(N * H, W * cin)
    vmem = pl.BlockSpec(memory_space=pltpu.MemorySpace.VMEM)
    y2d = pl.pallas_call(
        make_unet_kernel(plan, meta),
        out_shape=jax.ShapeDtypeStruct((N * H, W * co), jnp.float32),
        in_specs=[vmem] * (1 + len(operands)),
        out_specs=vmem,
    )(x2d, *operands)
    y = y2d.reshape(N, H, W, co)
    return jnp.transpose(y, (0, 3, 1, 2))     # back to NCHW


# ------------------------------------------------------------ pure-JAX reference (XLA)

def unet_reference(x_nchw, params, *, in_channels, out_channels, hiddens):
    ch_down = [in_channels] + list(hiddens)
    n_down = len(ch_down) - 1
    ch_up = list(hiddens)[::-1] + [out_channels]
    n_up = len(ch_up) - 2

    def conv(x, name, relu=True):
        w, b = params[name]
        y = lax.conv_general_dilated(
            x, w, window_strides=(1, 1), padding="SAME",
            dimension_numbers=("NHWC", "HWIO", "NHWC"),
            precision=lax.Precision.HIGHEST)
        y = y + b[None, None, None, :]
        return jnp.maximum(y, 0.0) if relu else y

    def bn(x, name):
        g, bt = params[name]
        mean = jnp.mean(x, axis=(0, 1, 2), keepdims=True)
        var = jnp.mean(jnp.square(x - mean), axis=(0, 1, 2), keepdims=True)
        return (x - mean) * lax.rsqrt(var + BN_EPS) * g[None, None, None, :] \
            + bt[None, None, None, :]

    def pool(x):
        n, h, w, c = x.shape
        return jnp.max(x.reshape(n, h // 2, 2, w // 2, 2, c), axis=(2, 4))

    def upsample(x, out_hw):
        n, hi, wi, c = x.shape
        ho, wo = out_hw

        def grid(n_out, n_in):
            if n_out == 1:
                src = jnp.zeros((n_out,), jnp.float32)
            else:
                src = jnp.arange(n_out, dtype=jnp.float32) * ((n_in - 1) / (n_out - 1))
            i0 = jnp.clip(jnp.floor(src).astype(jnp.int32), 0, n_in - 1)
            i1 = jnp.minimum(i0 + 1, n_in - 1)
            return i0, i1, src - i0.astype(jnp.float32)

        y0, y1, wy = grid(ho, hi)
        x0, x1, wx = grid(wo, wi)
        wy = wy[None, :, None, None]
        wx = wx[None, None, :, None]
        top = x[:, y0][:, :, x0] * (1 - wx) + x[:, y0][:, :, x1] * wx
        bot = x[:, y1][:, :, x0] * (1 - wx) + x[:, y1][:, :, x1] * wx
        return top * (1 - wy) + bot * wy

    x = jnp.transpose(x_nchw.astype(jnp.float32), (0, 2, 3, 1))
    skips = []
    for i in range(n_down):
        x = conv(x, f"conv_enc_{i}_1")
        x = conv(x, f"conv_enc_{i}_2")
        x = bn(x, f"bn_enc_{i}")
        if i != n_down - 1:
            skips.append(x)
            x = pool(x)
    for i in range(n_up):
        skip = skips.pop()
        x = upsample(x, skip.shape[1:3])
        x = conv(x, f"upconv_dec_{i}")
        x = jnp.concatenate([skip, x], axis=-1)
        x = conv(x, f"conv_dec_{i}_1")
        x = conv(x, f"conv_dec_{i}_2")
        if i == n_up - 1:
            x = conv(x, f"conv_dec_{i}_3")
        x = bn(x, f"bn_dec_{i}")
    z = conv(x, "conv_out", relu=False)
    z = z - jnp.max(z, axis=-1, keepdims=True)
    e = jnp.exp(z)
    y = e / jnp.sum(e, axis=-1, keepdims=True)
    return jnp.transpose(y, (0, 3, 1, 2))


# ------------------------------------------------------------------------------- main

if __name__ == "__main__":
    IN_CH, OUT_CH = 3, 9
    HIDDENS = [8, 16]
    N, H, W = 2, 16, 16

    key = jax.random.PRNGKey(0)
    kx, kp = jax.random.split(key)
    params, n_down, n_up = init_params(kp, IN_CH, OUT_CH, HIDDENS)

    # PyTorch-style NCHW input.
    x = jax.random.normal(kx, (N, IN_CH, H, W), dtype=jnp.float32)

    # One-time weight/layout prep (outside the jitted hot path).
    operands, plan, meta = build_operands(
        params, N=N, H0=H, W0=W,
        in_channels=IN_CH, out_channels=OUT_CH, hiddens=HIDDENS)

    fwd = jax.jit(lambda inp, ops: unet_pallas_forward(inp, ops, plan, meta))
    y = jax.block_until_ready(fwd(x, operands))

    assert y.shape == (N, OUT_CH, H, W), y.shape
    assert bool(jnp.all(jnp.isfinite(y)))
    assert bool(jnp.allclose(jnp.sum(y, axis=1), 1.0, atol=1e-5))

    # Numerical check against an independent pure-JAX (XLA) implementation of the
    # same module semantics. Expected max abs diff ~1e-5 (tolerance leaves margin
    # for MXU f32 multi-pass rounding differences).
    y_ref = jax.jit(lambda inp: unet_reference(
        inp, params, in_channels=IN_CH, out_channels=OUT_CH, hiddens=HIDDENS))(x)
    max_err = float(jnp.max(jnp.abs(y - y_ref)))
    assert max_err < 2e-2, f"kernel deviates from pure-JAX reference: {max_err}"

    print("KERNEL_OK")
</pallas_src>

<mosaic_0001>
module attributes {stable_mosaic.version = 11 : i64} {
  func.func @kernel(%arg0: memref<32x48xf32, #tpu.memory_space<vmem>>, %arg1: memref<32x32xf32, #tpu.memory_space<vmem>>, %arg2: memref<32x32xf32, #tpu.memory_space<vmem>>, %arg3: memref<32x32xf32, #tpu.memory_space<vmem>>, %arg4: memref<48x128xf32, #tpu.memory_space<vmem>>, %arg5: memref<48x128xf32, #tpu.memory_space<vmem>>, %arg6: memref<48x128xf32, #tpu.memory_space<vmem>>, %arg7: memref<1x128xf32, #tpu.memory_space<vmem>>, %arg8: memref<128x128xf32, #tpu.memory_space<vmem>>, %arg9: memref<128x128xf32, #tpu.memory_space<vmem>>, %arg10: memref<128x128xf32, #tpu.memory_space<vmem>>, %arg11: memref<1x128xf32, #tpu.memory_space<vmem>>, %arg12: memref<128x128xf32, #tpu.memory_space<vmem>>, %arg13: memref<1x128xf32, #tpu.memory_space<vmem>>, %arg14: memref<1x128xf32, #tpu.memory_space<vmem>>, %arg15: memref<32x32xf32, #tpu.memory_space<vmem>>, %arg16: memref<16x32xf32, #tpu.memory_space<vmem>>, %arg17: memref<128x128xf32, #tpu.memory_space<vmem>>, %arg18: memref<128x64xf32, #tpu.memory_space<vmem>>, %arg19: memref<16x16xf32, #tpu.memory_space<vmem>>, %arg20: memref<16x16xf32, #tpu.memory_space<vmem>>, %arg21: memref<16x16xf32, #tpu.memory_space<vmem>>, %arg22: memref<64x128xf32, #tpu.memory_space<vmem>>, %arg23: memref<64x128xf32, #tpu.memory_space<vmem>>, %arg24: memref<64x128xf32, #tpu.memory_space<vmem>>, %arg25: memref<1x128xf32, #tpu.memory_space<vmem>>, %arg26: memref<128x128xf32, #tpu.memory_space<vmem>>, %arg27: memref<128x128xf32, #tpu.memory_space<vmem>>, %arg28: memref<128x128xf32, #tpu.memory_space<vmem>>, %arg29: memref<1x128xf32, #tpu.memory_space<vmem>>, %arg30: memref<128x128xf32, #tpu.memory_space<vmem>>, %arg31: memref<1x128xf32, #tpu.memory_space<vmem>>, %arg32: memref<1x128xf32, #tpu.memory_space<vmem>>, %arg33: memref<32x16xf32, #tpu.memory_space<vmem>>, %arg34: memref<128x256xf32, #tpu.memory_space<vmem>>, %arg35: memref<256x128xf32, #tpu.memory_space<vmem>>, %arg36: memref<256x128xf32, #tpu.memory_space<vmem>>, %arg37: memref<256x128xf32, #tpu.memory_space<vmem>>, %arg38: memref<1x128xf32, #tpu.memory_space<vmem>>, %arg39: memref<128x128xf32, #tpu.memory_space<vmem>>, %arg40: memref<128x128xf32, #tpu.memory_space<vmem>>, %arg41: memref<128x128xf32, #tpu.memory_space<vmem>>, %arg42: memref<128x128xf32, #tpu.memory_space<vmem>>, %arg43: memref<128x128xf32, #tpu.memory_space<vmem>>, %arg44: memref<128x128xf32, #tpu.memory_space<vmem>>, %arg45: memref<1x128xf32, #tpu.memory_space<vmem>>, %arg46: memref<128x128xf32, #tpu.memory_space<vmem>>, %arg47: memref<128x128xf32, #tpu.memory_space<vmem>>, %arg48: memref<128x128xf32, #tpu.memory_space<vmem>>, %arg49: memref<1x128xf32, #tpu.memory_space<vmem>>, %arg50: memref<128x128xf32, #tpu.memory_space<vmem>>, %arg51: memref<128x128xf32, #tpu.memory_space<vmem>>, %arg52: memref<128x128xf32, #tpu.memory_space<vmem>>, %arg53: memref<1x128xf32, #tpu.memory_space<vmem>>, %arg54: memref<128x128xf32, #tpu.memory_space<vmem>>, %arg55: memref<1x128xf32, #tpu.memory_space<vmem>>, %arg56: memref<1x128xf32, #tpu.memory_space<vmem>>, %arg57: memref<128x144xf32, #tpu.memory_space<vmem>>, %arg58: memref<128x144xf32, #tpu.memory_space<vmem>>, %arg59: memref<128x144xf32, #tpu.memory_space<vmem>>, %arg60: memref<1x144xf32, #tpu.memory_space<vmem>>, %arg61: memref<144x144xf32, #tpu.memory_space<vmem>>, %arg62: memref<32x144xf32, #tpu.memory_space<vmem>>) attributes {dimension_semantics = [], scalar_prefetch = 0 : i64, scratch_operands = 0 : i64, tpu.core_type = #tpu.core_type<tc>} {
    %c0 = arith.constant 0 : index
    %c0_0 = arith.constant 0 : index
    %0 = vector.load %arg0[%c0, %c0_0] : memref<32x48xf32, #tpu.memory_space<vmem>>, vector<32x48xf32>
    %c0_1 = arith.constant 0 : index
    %c0_2 = arith.constant 0 : index
    %1 = vector.load %arg1[%c0_1, %c0_2] : memref<32x32xf32, #tpu.memory_space<vmem>>, vector<32x32xf32>
    %cst = arith.constant dense<0.000000e+00> : vector<32x48xf32>
    %2 = tpu.matmul %1, %0, %cst {dimension_numbers = #tpu.dot_dimension_numbers<[1], [0], [0], [1], [0, 0, 1, 1], [], []>} : vector<32x32xf32>, vector<32x48xf32>, vector<32x48xf32> -> vector<32x48xf32>
    %c0_3 = arith.constant 0 : index
    %c0_4 = arith.constant 0 : index
    %3 = vector.load %arg4[%c0_3, %c0_4] : memref<48x128xf32, #tpu.memory_space<vmem>>, vector<48x128xf32>
    %cst_5 = arith.constant dense<0.000000e+00> : vector<32x128xf32>
    %4 = tpu.matmul %2, %3, %cst_5 {dimension_numbers = #tpu.dot_dimension_numbers<[1], [0], [0], [1], [0, 0, 1, 1], [], []>} : vector<32x48xf32>, vector<48x128xf32>, vector<32x128xf32> -> vector<32x128xf32>
    %c0_6 = arith.constant 0 : index
    %c0_7 = arith.constant 0 : index
    %5 = vector.load %arg5[%c0_6, %c0_7] : memref<48x128xf32, #tpu.memory_space<vmem>>, vector<48x128xf32>
    %cst_8 = arith.constant dense<0.000000e+00> : vector<32x128xf32>
    %6 = tpu.matmul %0, %5, %cst_8 {dimension_numbers = #tpu.dot_dimension_numbers<[1], [0], [0], [1], [0, 0, 1, 1], [], []>} : vector<32x48xf32>, vector<48x128xf32>, vector<32x128xf32> -> vector<32x128xf32>
    %7 = arith.addf %4, %6 : vector<32x128xf32>
    %c0_9 = arith.constant 0 : index
    %c0_10 = arith.constant 0 : index
    %8 = vector.load %arg2[%c0_9, %c0_10] : memref<32x32xf32, #tpu.memory_space<vmem>>, vector<32x32xf32>
    %cst_11 = arith.constant dense<0.000000e+00> : vector<32x48xf32>
    %9 = tpu.matmul %8, %0, %cst_11 {dimension_numbers = #tpu.dot_dimension_numbers<[1], [0], [0], [1], [0, 0, 1, 1], [], []>} : vector<32x32xf32>, vector<32x48xf32>, vector<32x48xf32> -> vector<32x48xf32>
    %c0_12 = arith.constant 0 : index
    %c0_13 = arith.constant 0 : index
    %10 = vector.load %arg6[%c0_12, %c0_13] : memref<48x128xf32, #tpu.memory_space<vmem>>, vector<48x128xf32>
    %cst_14 = arith.constant dense<0.000000e+00> : vector<32x128xf32>
    %11 = tpu.matmul %9, %10, %cst_14 {dimension_numbers = #tpu.dot_dimension_numbers<[1], [0], [0], [1], [0, 0, 1, 1], [], []>} : vector<32x48xf32>, vector<48x128xf32>, vector<32x128xf32> -> vector<32x128xf32>
    %12 = arith.addf %7, %11 : vector<32x128xf32>
    %c0_15 = arith.constant 0 : index
    %c0_16 = arith.constant 0 : index
    %13 = vector.load %arg7[%c0_15, %c0_16] : memref<1x128xf32, #tpu.memory_space<vmem>>, vector<1x128xf32>
    %14 = vector.broadcast %13 : vector<1x128xf32> to vector<32x128xf32>
    %15 = arith.addf %12, %14 : vector<32x128xf32>
    %cst_17 = arith.constant 0.000000e+00 : f32
    %16 = vector.broadcast %cst_17 : f32 to vector<32x128xf32>
    %17 = arith.maximumf %15, %16 : vector<32x128xf32>
    %c0_18 = arith.constant 0 : index
    %c0_19 = arith.constant 0 : index
    %18 = vector.load %arg1[%c0_18, %c0_19] : memref<32x32xf32, #tpu.memory_space<vmem>>, vector<32x32xf32>
    %cst_20 = arith.constant dense<0.000000e+00> : vector<32x128xf32>
    %19 = tpu.matmul %18, %17, %cst_20 {dimension_numbers = #tpu.dot_dimension_numbers<[1], [0], [0], [1], [0, 0, 1, 1], [], []>} : vector<32x32xf32>, vector<32x128xf32>, vector<32x128xf32> -> vector<32x128xf32>
    %c0_21 = arith.constant 0 : index
    %c0_22 = arith.constant 0 : index
    %20 = vector.load %arg8[%c0_21, %c0_22] : memref<128x128xf32, #tpu.memory_space<vmem>>, vector<128x128xf32>
    %cst_23 = arith.constant dense<0.000000e+00> : vector<32x128xf32>
    %21 = tpu.matmul %19, %20, %cst_23 {dimension_numbers = #tpu.dot_dimension_numbers<[1], [0], [0], [1], [0, 0, 1, 1], [], []>} : vector<32x128xf32>, vector<128x128xf32>, vector<32x128xf32> -> vector<32x128xf32>
    %c0_24 = arith.constant 0 : index
    %c0_25 = arith.constant 0 : index
    %22 = vector.load %arg9[%c0_24, %c0_25] : memref<128x128xf32, #tpu.memory_space<vmem>>, vector<128x128xf32>
    %cst_26 = arith.constant dense<0.000000e+00> : vector<32x128xf32>
    %23 = tpu.matmul %17, %22, %cst_26 {dimension_numbers = #tpu.dot_dimension_numbers<[1], [0], [0], [1], [0, 0, 1, 1], [], []>} : vector<32x128xf32>, vector<128x128xf32>, vector<32x128xf32> -> vector<32x128xf32>
    %24 = arith.addf %21, %23 : vector<32x128xf32>
    %c0_27 = arith.constant 0 : index
    %c0_28 = arith.constant 0 : index
    %25 = vector.load %arg2[%c0_27, %c0_28] : memref<32x32xf32, #tpu.memory_space<vmem>>, vector<32x32xf32>
    %cst_29 = arith.constant dense<0.000000e+00> : vector<32x128xf32>
    %26 = tpu.matmul %25, %17, %cst_29 {dimension_numbers = #tpu.dot_dimension_numbers<[1], [0], [0], [1], [0, 0, 1, 1], [], []>} : vector<32x32xf32>, vector<32x128xf32>, vector<32x128xf32> -> vector<32x128xf32>
    %c0_30 = arith.constant 0 : index
    %c0_31 = arith.constant 0 : index
    %27 = vector.load %arg10[%c0_30, %c0_31] : memref<128x128xf32, #tpu.memory_space<vmem>>, vector<128x128xf32>
    %cst_32 = arith.constant dense<0.000000e+00> : vector<32x128xf32>
    %28 = tpu.matmul %26, %27, %cst_32 {dimension_numbers = #tpu.dot_dimension_numbers<[1], [0], [0], [1], [0, 0, 1, 1], [], []>} : vector<32x128xf32>, vector<128x128xf32>, vector<32x128xf32> -> vector<32x128xf32>
    %29 = arith.addf %24, %28 : vector<32x128xf32>
    %c0_33 = arith.constant 0 : index
    %c0_34 = arith.constant 0 : index
    %30 = vector.load %arg11[%c0_33, %c0_34] : memref<1x128xf32, #tpu.memory_space<vmem>>, vector<1x128xf32>
    %31 = vector.broadcast %30 : vector<1x128xf32> to vector<32x128xf32>
    %32 = arith.addf %29, %31 : vector<32x128xf32>
    %cst_35 = arith.constant 0.000000e+00 : f32
    %33 = vector.broadcast %cst_35 : f32 to vector<32x128xf32>
    %34 = arith.maximumf %32, %33 : vector<32x128xf32>
    %c0_36 = arith.constant 0 : index
    %c0_37 = arith.constant 0 : index
    %35 = vector.load %arg3[%c0_36, %c0_37] : memref<32x32xf32, #tpu.memory_space<vmem>>, vector<32x32xf32>
    %c0_38 = arith.constant 0 : index
    %c0_39 = arith.constant 0 : index
    %36 = vector.load %arg12[%c0_38, %c0_39] : memref<128x128xf32, #tpu.memory_space<vmem>>, vector<128x128xf32>
    %cst_40 = arith.constant dense<0.000000e+00> : vector<32x128xf32>
    %37 = tpu.matmul %35, %34, %cst_40 {dimension_numbers = #tpu.dot_dimension_numbers<[1], [0], [0], [1], [0, 0, 1, 1], [], []>} : vector<32x32xf32>, vector<32x128xf32>, vector<32x128xf32> -> vector<32x128xf32>
    %cst_41 = arith.constant dense<0.000000e+00> : vector<32x128xf32>
    %38 = tpu.matmul %37, %36, %cst_41 {dimension_numbers = #tpu.dot_dimension_numbers<[1], [0], [0], [1], [0, 0, 1, 1], [], []>} : vector<32x128xf32>, vector<128x128xf32>, vector<32x128xf32> -> vector<32x128xf32>
    %39 = arith.subf %34, %38 : vector<32x128xf32>
    %40 = arith.mulf %39, %39 : vector<32x128xf32>
    %cst_42 = arith.constant dense<0.000000e+00> : vector<32x128xf32>
    %41 = tpu.matmul %35, %40, %cst_42 {dimension_numbers = #tpu.dot_dimension_numbers<[1], [0], [0], [1], [0, 0, 1, 1], [], []>} : vector<32x32xf32>, vector<32x128xf32>, vector<32x128xf32> -> vector<32x128xf32>
    %cst_43 = arith.constant dense<0.000000e+00> : vector<32x128xf32>
    %42 = tpu.matmul %41, %36, %cst_43 {dimension_numbers = #tpu.dot_dimension_numbers<[1], [0], [0], [1], [0, 0, 1, 1], [], []>} : vector<32x128xf32>, vector<128x128xf32>, vector<32x128xf32> -> vector<32x128xf32>
    %cst_44 = arith.constant 9.99999974E-6 : f32
    %43 = vector.broadcast %cst_44 : f32 to vector<32x128xf32>
    %44 = arith.addf %42, %43 : vector<32x128xf32>
    %45 = math.rsqrt %44 : vector<32x128xf32>
    %46 = arith.mulf %39, %45 : vector<32x128xf32>
    %c0_45 = arith.constant 0 : index
    %c0_46 = arith.constant 0 : index
    %47 = vector.load %arg13[%c0_45, %c0_46] : memref<1x128xf32, #tpu.memory_space<vmem>>, vector<1x128xf32>
    %48 = vector.broadcast %47 : vector<1x128xf32> to vector<32x128xf32>
    %49 = arith.mulf %46, %48 : vector<32x128xf32>
    %c0_47 = arith.constant 0 : index
    %c0_48 = arith.constant 0 : index
    %50 = vector.load %arg14[%c0_47, %c0_48] : memref<1x128xf32, #tpu.memory_space<vmem>>, vector<1x128xf32>
    %51 = vector.broadcast %50 : vector<1x128xf32> to vector<32x128xf32>
    %52 = arith.addf %49, %51 : vector<32x128xf32>
    %c0_49 = arith.constant 0 : index
    %c0_50 = arith.constant 0 : index
    %53 = vector.load %arg15[%c0_49, %c0_50] : memref<32x32xf32, #tpu.memory_space<vmem>>, vector<32x32xf32>
    %cst_51 = arith.constant dense<0.000000e+00> : vector<32x128xf32>
    %54 = tpu.matmul %53, %52, %cst_51 {dimension_numbers = #tpu.dot_dimension_numbers<[1], [0], [0], [1], [0, 0, 1, 1], [], []>} : vector<32x32xf32>, vector<32x128xf32>, vector<32x128xf32> -> vector<32x128xf32>
    %55 = arith.maximumf %52, %54 : vector<32x128xf32>
    %c0_52 = arith.constant 0 : index
    %c0_53 = arith.constant 0 : index
    %56 = vector.load %arg16[%c0_52, %c0_53] : memref<16x32xf32, #tpu.memory_space<vmem>>, vector<16x32xf32>
    %cst_54 = arith.constant dense<0.000000e+00> : vector<16x128xf32>
    %57 = tpu.matmul %56, %55, %cst_54 {dimension_numbers = #tpu.dot_dimension_numbers<[1], [0], [0], [1], [0, 0, 1, 1], [], []>} : vector<16x32xf32>, vector<32x128xf32>, vector<16x128xf32> -> vector<16x128xf32>
    %c0_55 = arith.constant 0 : index
    %c0_56 = arith.constant 0 : index
    %58 = vector.load %arg17[%c0_55, %c0_56] : memref<128x128xf32, #tpu.memory_space<vmem>>, vector<128x128xf32>
    %cst_57 = arith.constant dense<0.000000e+00> : vector<16x128xf32>
    %59 = tpu.matmul %57, %58, %cst_57 {dimension_numbers = #tpu.dot_dimension_numbers<[1], [0], [0], [1], [0, 0, 1, 1], [], []>} : vector<16x128xf32>, vector<128x128xf32>, vector<16x128xf32> -> vector<16x128xf32>
    %60 = arith.maximumf %57, %59 : vector<16x128xf32>
    %c0_58 = arith.constant 0 : index
    %c0_59 = arith.constant 0 : index
    %61 = vector.load %arg18[%c0_58, %c0_59] : memref<128x64xf32, #tpu.memory_space<vmem>>, vector<128x64xf32>
    %cst_60 = arith.constant dense<0.000000e+00> : vector<16x64xf32>
    %62 = tpu.matmul %60, %61, %cst_60 {dimension_numbers = #tpu.dot_dimension_numbers<[1], [0], [0], [1], [0, 0, 1, 1], [], []>} : vector<16x128xf32>, vector<128x64xf32>, vector<16x64xf32> -> vector<16x64xf32>
    %c0_61 = arith.constant 0 : index
    %c0_62 = arith.constant 0 : index
    %63 = vector.load %arg19[%c0_61, %c0_62] : memref<16x16xf32, #tpu.memory_space<vmem>>, vector<16x16xf32>
    %cst_63 = arith.constant dense<0.000000e+00> : vector<16x64xf32>
    %64 = tpu.matmul %63, %62, %cst_63 {dimension_numbers = #tpu.dot_dimension_numbers<[1], [0], [0], [1], [0, 0, 1, 1], [], []>} : vector<16x16xf32>, vector<16x64xf32>, vector<16x64xf32> -> vector<16x64xf32>
    %c0_64 = arith.constant 0 : index
    %c0_65 = arith.constant 0 : index
    %65 = vector.load %arg22[%c0_64, %c0_65] : memref<64x128xf32, #tpu.memory_space<vmem>>, vector<64x128xf32>
    %cst_66 = arith.constant dense<0.000000e+00> : vector<16x128xf32>
    %66 = tpu.matmul %64, %65, %cst_66 {dimension_numbers = #tpu.dot_dimension_numbers<[1], [0], [0], [1], [0, 0, 1, 1], [], []>} : vector<16x64xf32>, vector<64x128xf32>, vector<16x128xf32> -> vector<16x128xf32>
    %c0_67 = arith.constant 0 : index
    %c0_68 = arith.constant 0 : index
    %67 = vector.load %arg23[%c0_67, %c0_68] : memref<64x128xf32, #tpu.memory_space<vmem>>, vector<64x128xf32>
    %cst_69 = arith.constant dense<0.000000e+00> : vector<16x128xf32>
    %68 = tpu.matmul %62, %67, %cst_69 {dimension_numbers = #tpu.dot_dimension_numbers<[1], [0], [0], [1], [0, 0, 1, 1], [], []>} : vector<16x64xf32>, vector<64x128xf32>, vector<16x128xf32> -> vector<16x128xf32>
    %69 = arith.addf %66, %68 : vector<16x128xf32>
    %c0_70 = arith.constant 0 : index
    %c0_71 = arith.constant 0 : index
    %70 = vector.load %arg20[%c0_70, %c0_71] : memref<16x16xf32, #tpu.memory_space<vmem>>, vector<16x16xf32>
    %cst_72 = arith.constant dense<0.000000e+00> : vector<16x64xf32>
    %71 = tpu.matmul %70, %62, %cst_72 {dimension_numbers = #tpu.dot_dimension_numbers<[1], [0], [0], [1], [0, 0, 1, 1], [], []>} : vector<16x16xf32>, vector<16x64xf32>, vector<16x64xf32> -> vector<16x64xf32>
    %c0_73 = arith.constant 0 : index
    %c0_74 = arith.constant 0 : index
    %72 = vector.load %arg24[%c0_73, %c0_74] : memref<64x128xf32, #tpu.memory_space<vmem>>, vector<64x128xf32>
    %cst_75 = arith.constant dense<0.000000e+00> : vector<16x128xf32>
    %73 = tpu.matmul %71, %72, %cst_75 {dimension_numbers = #tpu.dot_dimension_numbers<[1], [0], [0], [1], [0, 0, 1, 1], [], []>} : vector<16x64xf32>, vector<64x128xf32>, vector<16x128xf32> -> vector<16x128xf32>
    %74 = arith.addf %69, %73 : vector<16x128xf32>
    %c0_76 = arith.constant 0 : index
    %c0_77 = arith.constant 0 : index
    %75 = vector.load %arg25[%c0_76, %c0_77] : memref<1x128xf32, #tpu.memory_space<vmem>>, vector<1x128xf32>
    %76 = vector.broadcast %75 : vector<1x128xf32> to vector<16x128xf32>
    %77 = arith.addf %74, %76 : vector<16x128xf32>
    %cst_78 = arith.constant 0.000000e+00 : f32
    %78 = vector.broadcast %cst_78 : f32 to vector<16x128xf32>
    %79 = arith.maximumf %77, %78 : vector<16x128xf32>
    %c0_79 = arith.constant 0 : index
    %c0_80 = arith.constant 0 : index
    %80 = vector.load %arg19[%c0_79, %c0_80] : memref<16x16xf32, #tpu.memory_space<vmem>>, vector<16x16xf32>
    %cst_81 = arith.constant dense<0.000000e+00> : vector<16x128xf32>
    %81 = tpu.matmul %80, %79, %cst_81 {dimension_numbers = #tpu.dot_dimension_numbers<[1], [0], [0], [1], [0, 0, 1, 1], [], []>} : vector<16x16xf32>, vector<16x128xf32>, vector<16x128xf32> -> vector<16x128xf32>
    %c0_82 = arith.constant 0 : index
    %c0_83 = arith.constant 0 : index
    %82 = vector.load %arg26[%c0_82, %c0_83] : memref<128x128xf32, #tpu.memory_space<vmem>>, vector<128x128xf32>
    %cst_84 = arith.constant dense<0.000000e+00> : vector<16x128xf32>
    %83 = tpu.matmul %81, %82, %cst_84 {dimension_numbers = #tpu.dot_dimension_numbers<[1], [0], [0], [1], [0, 0, 1, 1], [], []>} : vector<16x128xf32>, vector<128x128xf32>, vector<16x128xf32> -> vector<16x128xf32>
    %c0_85 = arith.constant 0 : index
    %c0_86 = arith.constant 0 : index
    %84 = vector.load %arg27[%c0_85, %c0_86] : memref<128x128xf32, #tpu.memory_space<vmem>>, vector<128x128xf32>
    %cst_87 = arith.constant dense<0.000000e+00> : vector<16x128xf32>
    %85 = tpu.matmul %79, %84, %cst_87 {dimension_numbers = #tpu.dot_dimension_numbers<[1], [0], [0], [1], [0, 0, 1, 1], [], []>} : vector<16x128xf32>, vector<128x128xf32>, vector<16x128xf32> -> vector<16x128xf32>
    %86 = arith.addf %83, %85 : vector<16x128xf32>
    %c0_88 = arith.constant 0 : index
    %c0_89 = arith.constant 0 : index
    %87 = vector.load %arg20[%c0_88, %c0_89] : memref<16x16xf32, #tpu.memory_space<vmem>>, vector<16x16xf32>
    %cst_90 = arith.constant dense<0.000000e+00> : vector<16x128xf32>
    %88 = tpu.matmul %87, %79, %cst_90 {dimension_numbers = #tpu.dot_dimension_numbers<[1], [0], [0], [1], [0, 0, 1, 1], [], []>} : vector<16x16xf32>, vector<16x128xf32>, vector<16x128xf32> -> vector<16x128xf32>
    %c0_91 = arith.constant 0 : index
    %c0_92 = arith.constant 0 : index
    %89 = vector.load %arg28[%c0_91, %c0_92] : memref<128x128xf32, #tpu.memory_space<vmem>>, vector<128x128xf32>
    %cst_93 = arith.constant dense<0.000000e+00> : vector<16x128xf32>
    %90 = tpu.matmul %88, %89, %cst_93 {dimension_numbers = #tpu.dot_dimension_numbers<[1], [0], [0], [1], [0, 0, 1, 1], [], []>} : vector<16x128xf32>, vector<128x128xf32>, vector<16x128xf32> -> vector<16x128xf32>
    %91 = arith.addf %86, %90 : vector<16x128xf32>
    %c0_94 = arith.constant 0 : index
    %c0_95 = arith.constant 0 : index
    %92 = vector.load %arg29[%c0_94, %c0_95] : memref<1x128xf32, #tpu.memory_space<vmem>>, vector<1x128xf32>
    %93 = vector.broadcast %92 : vector<1x128xf32> to vector<16x128xf32>
    %94 = arith.addf %91, %93 : vector<16x128xf32>
    %cst_96 = arith.constant 0.000000e+00 : f32
    %95 = vector.broadcast %cst_96 : f32 to vector<16x128xf32>
    %96 = arith.maximumf %94, %95 : vector<16x128xf32>
    %c0_97 = arith.constant 0 : index
    %c0_98 = arith.constant 0 : index
    %97 = vector.load %arg21[%c0_97, %c0_98] : memref<16x16xf32, #tpu.memory_space<vmem>>, vector<16x16xf32>
    %c0_99 = arith.constant 0 : index
    %c0_100 = arith.constant 0 : index
    %98 = vector.load %arg30[%c0_99, %c0_100] : memref<128x128xf32, #tpu.memory_space<vmem>>, vector<128x128xf32>
    %cst_101 = arith.constant dense<0.000000e+00> : vector<16x128xf32>
    %99 = tpu.matmul %97, %96, %cst_101 {dimension_numbers = #tpu.dot_dimension_numbers<[1], [0], [0], [1], [0, 0, 1, 1], [], []>} : vector<16x16xf32>, vector<16x128xf32>, vector<16x128xf32> -> vector<16x128xf32>
    %cst_102 = arith.constant dense<0.000000e+00> : vector<16x128xf32>
    %100 = tpu.matmul %99, %98, %cst_102 {dimension_numbers = #tpu.dot_dimension_numbers<[1], [0], [0], [1], [0, 0, 1, 1], [], []>} : vector<16x128xf32>, vector<128x128xf32>, vector<16x128xf32> -> vector<16x128xf32>
    %101 = arith.subf %96, %100 : vector<16x128xf32>
    %102 = arith.mulf %101, %101 : vector<16x128xf32>
    %cst_103 = arith.constant dense<0.000000e+00> : vector<16x128xf32>
    %103 = tpu.matmul %97, %102, %cst_103 {dimension_numbers = #tpu.dot_dimension_numbers<[1], [0], [0], [1], [0, 0, 1, 1], [], []>} : vector<16x16xf32>, vector<16x128xf32>, vector<16x128xf32> -> vector<16x128xf32>
    %cst_104 = arith.constant dense<0.000000e+00> : vector<16x128xf32>
    %104 = tpu.matmul %103, %98, %cst_104 {dimension_numbers = #tpu.dot_dimension_numbers<[1], [0], [0], [1], [0, 0, 1, 1], [], []>} : vector<16x128xf32>, vector<128x128xf32>, vector<16x128xf32> -> vector<16x128xf32>
    %cst_105 = arith.constant 9.99999974E-6 : f32
    %105 = vector.broadcast %cst_105 : f32 to vector<16x128xf32>
    %106 = arith.addf %104, %105 : vector<16x128xf32>
    %107 = math.rsqrt %106 : vector<16x128xf32>
    %108 = arith.mulf %101, %107 : vector<16x128xf32>
    %c0_106 = arith.constant 0 : index
    %c0_107 = arith.constant 0 : index
    %109 = vector.load %arg31[%c0_106, %c0_107] : memref<1x128xf32, #tpu.memory_space<vmem>>, vector<1x128xf32>
    %110 = vector.broadcast %109 : vector<1x128xf32> to vector<16x128xf32>
    %111 = arith.mulf %108, %110 : vector<16x128xf32>
    %c0_108 = arith.constant 0 : index
    %c0_109 = arith.constant 0 : index
    %112 = vector.load %arg32[%c0_108, %c0_109] : memref<1x128xf32, #tpu.memory_space<vmem>>, vector<1x128xf32>
    %113 = vector.broadcast %112 : vector<1x128xf32> to vector<16x128xf32>
    %114 = arith.addf %111, %113 : vector<16x128xf32>
    %c0_110 = arith.constant 0 : index
    %c0_111 = arith.constant 0 : index
    %115 = vector.load %arg33[%c0_110, %c0_111] : memref<32x16xf32, #tpu.memory_space<vmem>>, vector<32x16xf32>
    %c0_112 = arith.constant 0 : index
    %c0_113 = arith.constant 0 : index
    %116 = vector.load %arg34[%c0_112, %c0_113] : memref<128x256xf32, #tpu.memory_space<vmem>>, vector<128x256xf32>
    %cst_114 = arith.constant dense<0.000000e+00> : vector<16x256xf32>
    %117 = tpu.matmul %114, %116, %cst_114 {dimension_numbers = #tpu.dot_dimension_numbers<[1], [0], [0], [1], [0, 0, 1, 1], [], []>} : vector<16x128xf32>, vector<128x256xf32>, vector<16x256xf32> -> vector<16x256xf32>
    %cst_115 = arith.constant dense<0.000000e+00> : vector<32x256xf32>
    %118 = tpu.matmul %115, %117, %cst_115 {dimension_numbers = #tpu.dot_dimension_numbers<[1], [0], [0], [1], [0, 0, 1, 1], [], []>} : vector<32x16xf32>, vector<16x256xf32>, vector<32x256xf32> -> vector<32x256xf32>
    %c0_116 = arith.constant 0 : index
    %c0_117 = arith.constant 0 : index
    %119 = vector.load %arg1[%c0_116, %c0_117] : memref<32x32xf32, #tpu.memory_space<vmem>>, vector<32x32xf32>
    %cst_118 = arith.constant dense<0.000000e+00> : vector<32x256xf32>
    %120 = tpu.matmul %119, %118, %cst_118 {dimension_numbers = #tpu.dot_dimension_numbers<[1], [0], [0], [1], [0, 0, 1, 1], [], []>} : vector<32x32xf32>, vector<32x256xf32>, vector<32x256xf32> -> vector<32x256xf32>
    %c0_119 = arith.constant 0 : index
    %c0_120 = arith.constant 0 : index
    %121 = vector.load %arg35[%c0_119, %c0_120] : memref<256x128xf32, #tpu.memory_space<vmem>>, vector<256x128xf32>
    %cst_121 = arith.constant dense<0.000000e+00> : vector<32x128xf32>
    %122 = tpu.matmul %120, %121, %cst_121 {dimension_numbers = #tpu.dot_dimension_numbers<[1], [0], [0], [1], [0, 0, 1, 1], [], []>} : vector<32x256xf32>, vector<256x128xf32>, vector<32x128xf32> -> vector<32x128xf32>
    %c0_122 = arith.constant 0 : index
    %c0_123 = arith.constant 0 : index
    %123 = vector.load %arg36[%c0_122, %c0_123] : memref<256x128xf32, #tpu.memory_space<vmem>>, vector<256x128xf32>
    %cst_124 = arith.constant dense<0.000000e+00> : vector<32x128xf32>
    %124 = tpu.matmul %118, %123, %cst_124 {dimension_numbers = #tpu.dot_dimension_numbers<[1], [0], [0], [1], [0, 0, 1, 1], [], []>} : vector<32x256xf32>, vector<256x128xf32>, vector<32x128xf32> -> vector<32x128xf32>
    %125 = arith.addf %122, %124 : vector<32x128xf32>
    %c0_125 = arith.constant 0 : index
    %c0_126 = arith.constant 0 : index
    %126 = vector.load %arg2[%c0_125, %c0_126] : memref<32x32xf32, #tpu.memory_space<vmem>>, vector<32x32xf32>
    %cst_127 = arith.constant dense<0.000000e+00> : vector<32x256xf32>
    %127 = tpu.matmul %126, %118, %cst_127 {dimension_numbers = #tpu.dot_dimension_numbers<[1], [0], [0], [1], [0, 0, 1, 1], [], []>} : vector<32x32xf32>, vector<32x256xf32>, vector<32x256xf32> -> vector<32x256xf32>
    %c0_128 = arith.constant 0 : index
    %c0_129 = arith.constant 0 : index
    %128 = vector.load %arg37[%c0_128, %c0_129] : memref<256x128xf32, #tpu.memory_space<vmem>>, vector<256x128xf32>
    %cst_130 = arith.constant dense<0.000000e+00> : vector<32x128xf32>
    %129 = tpu.matmul %127, %128, %cst_130 {dimension_numbers = #tpu.dot_dimension_numbers<[1], [0], [0], [1], [0, 0, 1, 1], [], []>} : vector<32x256xf32>, vector<256x128xf32>, vector<32x128xf32> -> vector<32x128xf32>
    %130 = arith.addf %125, %129 : vector<32x128xf32>
    %c0_131 = arith.constant 0 : index
    %c0_132 = arith.constant 0 : index
    %131 = vector.load %arg38[%c0_131, %c0_132] : memref<1x128xf32, #tpu.memory_space<vmem>>, vector<1x128xf32>
    %132 = vector.broadcast %131 : vector<1x128xf32> to vector<32x128xf32>
    %133 = arith.addf %130, %132 : vector<32x128xf32>
    %cst_133 = arith.constant 0.000000e+00 : f32
    %134 = vector.broadcast %cst_133 : f32 to vector<32x128xf32>
    %135 = arith.maximumf %133, %134 : vector<32x128xf32>
    %c0_134 = arith.constant 0 : index
    %c0_135 = arith.constant 0 : index
    %136 = vector.load %arg1[%c0_134, %c0_135] : memref<32x32xf32, #tpu.memory_space<vmem>>, vector<32x32xf32>
    %cst_136 = arith.constant dense<0.000000e+00> : vector<32x128xf32>
    %137 = tpu.matmul %136, %52, %cst_136 {dimension_numbers = #tpu.dot_dimension_numbers<[1], [0], [0], [1], [0, 0, 1, 1], [], []>} : vector<32x32xf32>, vector<32x128xf32>, vector<32x128xf32> -> vector<32x128xf32>
    %c0_137 = arith.constant 0 : index
    %c0_138 = arith.constant 0 : index
    %138 = vector.load %arg39[%c0_137, %c0_138] : memref<128x128xf32, #tpu.memory_space<vmem>>, vector<128x128xf32>
    %cst_139 = arith.constant dense<0.000000e+00> : vector<32x128xf32>
    %139 = tpu.matmul %137, %138, %cst_139 {dimension_numbers = #tpu.dot_dimension_numbers<[1], [0], [0], [1], [0, 0, 1, 1], [], []>} : vector<32x128xf32>, vector<128x128xf32>, vector<32x128xf32> -> vector<32x128xf32>
    %c0_140 = arith.constant 0 : index
    %c0_141 = arith.constant 0 : index
    %140 = vector.load %arg1[%c0_140, %c0_141] : memref<32x32xf32, #tpu.memory_space<vmem>>, vector<32x32xf32>
    %cst_142 = arith.constant dense<0.000000e+00> : vector<32x128xf32>
    %141 = tpu.matmul %140, %135, %cst_142 {dimension_numbers = #tpu.dot_dimension_numbers<[1], [0], [0], [1], [0, 0, 1, 1], [], []>} : vector<32x32xf32>, vector<32x128xf32>, vector<32x128xf32> -> vector<32x128xf32>
    %c0_143 = arith.constant 0 : index
    %c0_144 = arith.constant 0 : index
    %142 = vector.load %arg42[%c0_143, %c0_144] : memref<128x128xf32, #tpu.memory_space<vmem>>, vector<128x128xf32>
    %cst_145 = arith.constant dense<0.000000e+00> : vector<32x128xf32>
    %143 = tpu.matmul %141, %142, %cst_145 {dimension_numbers = #tpu.dot_dimension_numbers<[1], [0], [0], [1], [0, 0, 1, 1], [], []>} : vector<32x128xf32>, vector<128x128xf32>, vector<32x128xf32> -> vector<32x128xf32>
    %144 = arith.addf %139, %143 : vector<32x128xf32>
    %c0_146 = arith.constant 0 : index
    %c0_147 = arith.constant 0 : index
    %145 = vector.load %arg40[%c0_146, %c0_147] : memref<128x128xf32, #tpu.memory_space<vmem>>, vector<128x128xf32>
    %cst_148 = arith.constant dense<0.000000e+00> : vector<32x128xf32>
    %146 = tpu.matmul %52, %145, %cst_148 {dimension_numbers = #tpu.dot_dimension_numbers<[1], [0], [0], [1], [0, 0, 1, 1], [], []>} : vector<32x128xf32>, vector<128x128xf32>, vector<32x128xf32> -> vector<32x128xf32>
    %c0_149 = arith.constant 0 : index
    %c0_150 = arith.constant 0 : index
    %147 = vector.load %arg43[%c0_149, %c0_150] : memref<128x128xf32, #tpu.memory_space<vmem>>, vector<128x128xf32>
    %cst_151 = arith.constant dense<0.000000e+00> : vector<32x128xf32>
    %148 = tpu.matmul %135, %147, %cst_151 {dimension_numbers = #tpu.dot_dimension_numbers<[1], [0], [0], [1], [0, 0, 1, 1], [], []>} : vector<32x128xf32>, vector<128x128xf32>, vector<32x128xf32> -> vector<32x128xf32>
    %149 = arith.addf %146, %148 : vector<32x128xf32>
    %150 = arith.addf %144, %149 : vector<32x128xf32>
    %c0_152 = arith.constant 0 : index
    %c0_153 = arith.constant 0 : index
    %151 = vector.load %arg2[%c0_152, %c0_153] : memref<32x32xf32, #tpu.memory_space<vmem>>, vector<32x32xf32>
    %cst_154 = arith.constant dense<0.000000e+00> : vector<32x128xf32>
    %152 = tpu.matmul %151, %52, %cst_154 {dimension_numbers = #tpu.dot_dimension_numbers<[1], [0], [0], [1], [0, 0, 1, 1], [], []>} : vector<32x32xf32>, vector<32x128xf32>, vector<32x128xf32> -> vector<32x128xf32>
    %c0_155 = arith.constant 0 : index
    %c0_156 = arith.constant 0 : index
    %153 = vector.load %arg41[%c0_155, %c0_156] : memref<128x128xf32, #tpu.memory_space<vmem>>, vector<128x128xf32>
    %cst_157 = arith.constant dense<0.000000e+00> : vector<32x128xf32>
    %154 = tpu.matmul %152, %153, %cst_157 {dimension_numbers = #tpu.dot_dimension_numbers<[1], [0], [0], [1], [0, 0, 1, 1], [], []>} : vector<32x128xf32>, vector<128x128xf32>, vector<32x128xf32> -> vector<32x128xf32>
    %c0_158 = arith.constant 0 : index
    %c0_159 = arith.constant 0 : index
    %155 = vector.load %arg2[%c0_158, %c0_159] : memref<32x32xf32, #tpu.memory_space<vmem>>, vector<32x32xf32>
    %cst_160 = arith.constant dense<0.000000e+00> : vector<32x128xf32>
    %156 = tpu.matmul %155, %135, %cst_160 {dimension_numbers = #tpu.dot_dimension_numbers<[1], [0], [0], [1], [0, 0, 1, 1], [], []>} : vector<32x32xf32>, vector<32x128xf32>, vector<32x128xf32> -> vector<32x128xf32>
    %c0_161 = arith.constant 0 : index
    %c0_162 = arith.constant 0 : index
    %157 = vector.load %arg44[%c0_161, %c0_162] : memref<128x128xf32, #tpu.memory_space<vmem>>, vector<128x128xf32>
    %cst_163 = arith.constant dense<0.000000e+00> : vector<32x128xf32>
    %158 = tpu.matmul %156, %157, %cst_163 {dimension_numbers = #tpu.dot_dimension_numbers<[1], [0], [0], [1], [0, 0, 1, 1], [], []>} : vector<32x128xf32>, vector<128x128xf32>, vector<32x128xf32> -> vector<32x128xf32>
    %159 = arith.addf %154, %158 : vector<32x128xf32>
    %160 = arith.addf %150, %159 : vector<32x128xf32>
    %c0_164 = arith.constant 0 : index
    %c0_165 = arith.constant 0 : index
    %161 = vector.load %arg45[%c0_164, %c0_165] : memref<1x128xf32, #tpu.memory_space<vmem>>, vector<1x128xf32>
    %162 = vector.broadcast %161 : vector<1x128xf32> to vector<32x128xf32>
    %163 = arith.addf %160, %162 : vector<32x128xf32>
    %cst_166 = arith.constant 0.000000e+00 : f32
    %164 = vector.broadcast %cst_166 : f32 to vector<32x128xf32>
    %165 = arith.maximumf %163, %164 : vector<32x128xf32>
    %c0_167 = arith.constant 0 : index
    %c0_168 = arith.constant 0 : index
    %166 = vector.load %arg1[%c0_167, %c0_168] : memref<32x32xf32, #tpu.memory_space<vmem>>, vector<32x32xf32>
    %cst_169 = arith.constant dense<0.000000e+00> : vector<32x128xf32>
    %167 = tpu.matmul %166, %165, %cst_169 {dimension_numbers = #tpu.dot_dimension_numbers<[1], [0], [0], [1], [0, 0, 1, 1], [], []>} : vector<32x32xf32>, vector<32x128xf32>, vector<32x128xf32> -> vector<32x128xf32>
    %c0_170 = arith.constant 0 : index
    %c0_171 = arith.constant 0 : index
    %168 = vector.load %arg46[%c0_170, %c0_171] : memref<128x128xf32, #tpu.memory_space<vmem>>, vector<128x128xf32>
    %cst_172 = arith.constant dense<0.000000e+00> : vector<32x128xf32>
    %169 = tpu.matmul %167, %168, %cst_172 {dimension_numbers = #tpu.dot_dimension_numbers<[1], [0], [0], [1], [0, 0, 1, 1], [], []>} : vector<32x128xf32>, vector<128x128xf32>, vector<32x128xf32> -> vector<32x128xf32>
    %c0_173 = arith.constant 0 : index
    %c0_174 = arith.constant 0 : index
    %170 = vector.load %arg47[%c0_173, %c0_174] : memref<128x128xf32, #tpu.memory_space<vmem>>, vector<128x128xf32>
    %cst_175 = arith.constant dense<0.000000e+00> : vector<32x128xf32>
    %171 = tpu.matmul %165, %170, %cst_175 {dimension_numbers = #tpu.dot_dimension_numbers<[1], [0], [0], [1], [0, 0, 1, 1], [], []>} : vector<32x128xf32>, vector<128x128xf32>, vector<32x128xf32> -> vector<32x128xf32>
    %172 = arith.addf %169, %171 : vector<32x128xf32>
    %c0_176 = arith.constant 0 : index
    %c0_177 = arith.constant 0 : index
    %173 = vector.load %arg2[%c0_176, %c0_177] : memref<32x32xf32, #tpu.memory_space<vmem>>, vector<32x32xf32>
    %cst_178 = arith.constant dense<0.000000e+00> : vector<32x128xf32>
    %174 = tpu.matmul %173, %165, %cst_178 {dimension_numbers = #tpu.dot_dimension_numbers<[1], [0], [0], [1], [0, 0, 1, 1], [], []>} : vector<32x32xf32>, vector<32x128xf32>, vector<32x128xf32> -> vector<32x128xf32>
    %c0_179 = arith.constant 0 : index
    %c0_180 = arith.constant 0 : index
    %175 = vector.load %arg48[%c0_179, %c0_180] : memref<128x128xf32, #tpu.memory_space<vmem>>, vector<128x128xf32>
    %cst_181 = arith.constant dense<0.000000e+00> : vector<32x128xf32>
    %176 = tpu.matmul %174, %175, %cst_181 {dimension_numbers = #tpu.dot_dimension_numbers<[1], [0], [0], [1], [0, 0, 1, 1], [], []>} : vector<32x128xf32>, vector<128x128xf32>, vector<32x128xf32> -> vector<32x128xf32>
    %177 = arith.addf %172, %176 : vector<32x128xf32>
    %c0_182 = arith.constant 0 : index
    %c0_183 = arith.constant 0 : index
    %178 = vector.load %arg49[%c0_182, %c0_183] : memref<1x128xf32, #tpu.memory_space<vmem>>, vector<1x128xf32>
    %179 = vector.broadcast %178 : vector<1x128xf32> to vector<32x128xf32>
    %180 = arith.addf %177, %179 : vector<32x128xf32>
    %cst_184 = arith.constant 0.000000e+00 : f32
    %181 = vector.broadcast %cst_184 : f32 to vector<32x128xf32>
    %182 = arith.maximumf %180, %181 : vector<32x128xf32>
    %c0_185 = arith.constant 0 : index
    %c0_186 = arith.constant 0 : index
    %183 = vector.load %arg1[%c0_185, %c0_186] : memref<32x32xf32, #tpu.memory_space<vmem>>, vector<32x32xf32>
    %cst_187 = arith.constant dense<0.000000e+00> : vector<32x128xf32>
    %184 = tpu.matmul %183, %182, %cst_187 {dimension_numbers = #tpu.dot_dimension_numbers<[1], [0], [0], [1], [0, 0, 1, 1], [], []>} : vector<32x32xf32>, vector<32x128xf32>, vector<32x128xf32> -> vector<32x128xf32>
    %c0_188 = arith.constant 0 : index
    %c0_189 = arith.constant 0 : index
    %185 = vector.load %arg50[%c0_188, %c0_189] : memref<128x128xf32, #tpu.memory_space<vmem>>, vector<128x128xf32>
    %cst_190 = arith.constant dense<0.000000e+00> : vector<32x128xf32>
    %186 = tpu.matmul %184, %185, %cst_190 {dimension_numbers = #tpu.dot_dimension_numbers<[1], [0], [0], [1], [0, 0, 1, 1], [], []>} : vector<32x128xf32>, vector<128x128xf32>, vector<32x128xf32> -> vector<32x128xf32>
    %c0_191 = arith.constant 0 : index
    %c0_192 = arith.constant 0 : index
    %187 = vector.load %arg51[%c0_191, %c0_192] : memref<128x128xf32, #tpu.memory_space<vmem>>, vector<128x128xf32>
    %cst_193 = arith.constant dense<0.000000e+00> : vector<32x128xf32>
    %188 = tpu.matmul %182, %187, %cst_193 {dimension_numbers = #tpu.dot_dimension_numbers<[1], [0], [0], [1], [0, 0, 1, 1], [], []>} : vector<32x128xf32>, vector<128x128xf32>, vector<32x128xf32> -> vector<32x128xf32>
    %189 = arith.addf %186, %188 : vector<32x128xf32>
    %c0_194 = arith.constant 0 : index
    %c0_195 = arith.constant 0 : index
    %190 = vector.load %arg2[%c0_194, %c0_195] : memref<32x32xf32, #tpu.memory_space<vmem>>, vector<32x32xf32>
    %cst_196 = arith.constant dense<0.000000e+00> : vector<32x128xf32>
    %191 = tpu.matmul %190, %182, %cst_196 {dimension_numbers = #tpu.dot_dimension_numbers<[1], [0], [0], [1], [0, 0, 1, 1], [], []>} : vector<32x32xf32>, vector<32x128xf32>, vector<32x128xf32> -> vector<32x128xf32>
    %c0_197 = arith.constant 0 : index
    %c0_198 = arith.constant 0 : index
    %192 = vector.load %arg52[%c0_197, %c0_198] : memref<128x128xf32, #tpu.memory_space<vmem>>, vector<128x128xf32>
    %cst_199 = arith.constant dense<0.000000e+00> : vector<32x128xf32>
    %193 = tpu.matmul %191, %192, %cst_199 {dimension_numbers = #tpu.dot_dimension_numbers<[1], [0], [0], [1], [0, 0, 1, 1], [], []>} : vector<32x128xf32>, vector<128x128xf32>, vector<32x128xf32> -> vector<32x128xf32>
    %194 = arith.addf %189, %193 : vector<32x128xf32>
    %c0_200 = arith.constant 0 : index
    %c0_201 = arith.constant 0 : index
    %195 = vector.load %arg53[%c0_200, %c0_201] : memref<1x128xf32, #tpu.memory_space<vmem>>, vector<1x128xf32>
    %196 = vector.broadcast %195 : vector<1x128xf32> to vector<32x128xf32>
    %197 = arith.addf %194, %196 : vector<32x128xf32>
    %cst_202 = arith.constant 0.000000e+00 : f32
    %198 = vector.broadcast %cst_202 : f32 to vector<32x128xf32>
    %199 = arith.maximumf %197, %198 : vector<32x128xf32>
    %c0_203 = arith.constant 0 : index
    %c0_204 = arith.constant 0 : index
    %200 = vector.load %arg3[%c0_203, %c0_204] : memref<32x32xf32, #tpu.memory_space<vmem>>, vector<32x32xf32>
    %c0_205 = arith.constant 0 : index
    %c0_206 = arith.constant 0 : index
    %201 = vector.load %arg54[%c0_205, %c0_206] : memref<128x128xf32, #tpu.memory_space<vmem>>, vector<128x128xf32>
    %cst_207 = arith.constant dense<0.000000e+00> : vector<32x128xf32>
    %202 = tpu.matmul %200, %199, %cst_207 {dimension_numbers = #tpu.dot_dimension_numbers<[1], [0], [0], [1], [0, 0, 1, 1], [], []>} : vector<32x32xf32>, vector<32x128xf32>, vector<32x128xf32> -> vector<32x128xf32>
    %cst_208 = arith.constant dense<0.000000e+00> : vector<32x128xf32>
    %203 = tpu.matmul %202, %201, %cst_208 {dimension_numbers = #tpu.dot_dimension_numbers<[1], [0], [0], [1], [0, 0, 1, 1], [], []>} : vector<32x128xf32>, vector<128x128xf32>, vector<32x128xf32> -> vector<32x128xf32>
    %204 = arith.subf %199, %203 : vector<32x128xf32>
    %205 = arith.mulf %204, %204 : vector<32x128xf32>
    %cst_209 = arith.constant dense<0.000000e+00> : vector<32x128xf32>
    %206 = tpu.matmul %200, %205, %cst_209 {dimension_numbers = #tpu.dot_dimension_numbers<[1], [0], [0], [1], [0, 0, 1, 1], [], []>} : vector<32x32xf32>, vector<32x128xf32>, vector<32x128xf32> -> vector<32x128xf32>
    %cst_210 = arith.constant dense<0.000000e+00> : vector<32x128xf32>
    %207 = tpu.matmul %206, %201, %cst_210 {dimension_numbers = #tpu.dot_dimension_numbers<[1], [0], [0], [1], [0, 0, 1, 1], [], []>} : vector<32x128xf32>, vector<128x128xf32>, vector<32x128xf32> -> vector<32x128xf32>
    %cst_211 = arith.constant 9.99999974E-6 : f32
    %208 = vector.broadcast %cst_211 : f32 to vector<32x128xf32>
    %209 = arith.addf %207, %208 : vector<32x128xf32>
    %210 = math.rsqrt %209 : vector<32x128xf32>
    %211 = arith.mulf %204, %210 : vector<32x128xf32>
    %c0_212 = arith.constant 0 : index
    %c0_213 = arith.constant 0 : index
    %212 = vector.load %arg55[%c0_212, %c0_213] : memref<1x128xf32, #tpu.memory_space<vmem>>, vector<1x128xf32>
    %213 = vector.broadcast %212 : vector<1x128xf32> to vector<32x128xf32>
    %214 = arith.mulf %211, %213 : vector<32x128xf32>
    %c0_214 = arith.constant 0 : index
    %c0_215 = arith.constant 0 : index
    %215 = vector.load %arg56[%c0_214, %c0_215] : memref<1x128xf32, #tpu.memory_space<vmem>>, vector<1x128xf32>
    %216 = vector.broadcast %215 : vector<1x128xf32> to vector<32x128xf32>
    %217 = arith.addf %214, %216 : vector<32x128xf32>
    %c0_216 = arith.constant 0 : index
    %c0_217 = arith.constant 0 : index
    %218 = vector.load %arg1[%c0_216, %c0_217] : memref<32x32xf32, #tpu.memory_space<vmem>>, vector<32x32xf32>
    %cst_218 = arith.constant dense<0.000000e+00> : vector<32x128xf32>
    %219 = tpu.matmul %218, %217, %cst_218 {dimension_numbers = #tpu.dot_dimension_numbers<[1], [0], [0], [1], [0, 0, 1, 1], [], []>} : vector<32x32xf32>, vector<32x128xf32>, vector<32x128xf32> -> vector<32x128xf32>
    %c0_219 = arith.constant 0 : index
    %c0_220 = arith.constant 0 : index
    %220 = vector.load %arg57[%c0_219, %c0_220] : memref<128x144xf32, #tpu.memory_space<vmem>>, vector<128x144xf32>
    %cst_221 = arith.constant dense<0.000000e+00> : vector<32x144xf32>
    %221 = tpu.matmul %219, %220, %cst_221 {dimension_numbers = #tpu.dot_dimension_numbers<[1], [0], [0], [1], [0, 0, 1, 1], [], []>} : vector<32x128xf32>, vector<128x144xf32>, vector<32x144xf32> -> vector<32x144xf32>
    %c0_222 = arith.constant 0 : index
    %c0_223 = arith.constant 0 : index
    %222 = vector.load %arg58[%c0_222, %c0_223] : memref<128x144xf32, #tpu.memory_space<vmem>>, vector<128x144xf32>
    %cst_224 = arith.constant dense<0.000000e+00> : vector<32x144xf32>
    %223 = tpu.matmul %217, %222, %cst_224 {dimension_numbers = #tpu.dot_dimension_numbers<[1], [0], [0], [1], [0, 0, 1, 1], [], []>} : vector<32x128xf32>, vector<128x144xf32>, vector<32x144xf32> -> vector<32x144xf32>
    %224 = arith.addf %221, %223 : vector<32x144xf32>
    %c0_225 = arith.constant 0 : index
    %c0_226 = arith.constant 0 : index
    %225 = vector.load %arg2[%c0_225, %c0_226] : memref<32x32xf32, #tpu.memory_space<vmem>>, vector<32x32xf32>
    %cst_227 = arith.constant dense<0.000000e+00> : vector<32x128xf32>
    %226 = tpu.matmul %225, %217, %cst_227 {dimension_numbers = #tpu.dot_dimension_numbers<[1], [0], [0], [1], [0, 0, 1, 1], [], []>} : vector<32x32xf32>, vector<32x128xf32>, vector<32x128xf32> -> vector<32x128xf32>
    %c0_228 = arith.constant 0 : index
    %c0_229 = arith.constant 0 : index
    %227 = vector.load %arg59[%c0_228, %c0_229] : memref<128x144xf32, #tpu.memory_space<vmem>>, vector<128x144xf32>
    %cst_230 = arith.constant dense<0.000000e+00> : vector<32x144xf32>
    %228 = tpu.matmul %226, %227, %cst_230 {dimension_numbers = #tpu.dot_dimension_numbers<[1], [0], [0], [1], [0, 0, 1, 1], [], []>} : vector<32x128xf32>, vector<128x144xf32>, vector<32x144xf32> -> vector<32x144xf32>
    %229 = arith.addf %224, %228 : vector<32x144xf32>
    %c0_231 = arith.constant 0 : index
    %c0_232 = arith.constant 0 : index
    %230 = vector.load %arg60[%c0_231, %c0_232] : memref<1x144xf32, #tpu.memory_space<vmem>>, vector<1x144xf32>
    %231 = vector.broadcast %230 : vector<1x144xf32> to vector<32x144xf32>
    %232 = arith.addf %229, %231 : vector<32x144xf32>
    %c0_233 = arith.constant 0 : index
    %c0_234 = arith.constant 0 : index
    %233 = vector.load %arg61[%c0_233, %c0_234] : memref<144x144xf32, #tpu.memory_space<vmem>>, vector<144x144xf32>
    %cst_235 = arith.constant dense<0.000000e+00> : vector<32x144xf32>
    %234 = tpu.matmul %232, %233, %cst_235 {dimension_numbers = #tpu.dot_dimension_numbers<[1], [0], [0], [1], [0, 0, 1, 1], [], []>} : vector<32x144xf32>, vector<144x144xf32>, vector<32x144xf32> -> vector<32x144xf32>
    %cst_236 = arith.constant 0.111111112 : f32
    %235 = vector.broadcast %cst_236 : f32 to vector<32x144xf32>
    %236 = arith.mulf %234, %235 : vector<32x144xf32>
    %237 = arith.subf %232, %236 : vector<32x144xf32>
    %238 = math.exp %237 : vector<32x144xf32>
    %cst_237 = arith.constant dense<0.000000e+00> : vector<32x144xf32>
    %239 = tpu.matmul %238, %233, %cst_237 {dimension_numbers = #tpu.dot_dimension_numbers<[1], [0], [0], [1], [0, 0, 1, 1], [], []>} : vector<32x144xf32>, vector<144x144xf32>, vector<32x144xf32> -> vector<32x144xf32>
    %240 = arith.divf %238, %239 : vector<32x144xf32>
    %c0_238 = arith.constant 0 : index
    %c0_239 = arith.constant 0 : index
    %241 = vector.load %arg62[%c0_238, %c0_239] : memref<32x144xf32, #tpu.memory_space<vmem>>, vector<32x144xf32>
    tpu.vector_store %arg62[%c0_238, %c0_239], %240 {strides = array<i32>} : memref<32x144xf32, #tpu.memory_space<vmem>>, vector<32x144xf32>,
    return
  }
}

</mosaic_0001>

<bundles_post_ra>
// kernel: _lambda_.1
= control target key start
LH: loop header
LB: loop body
LE: loop exit
PB: predicated region body
PF: predicated region fallthrough
CT: control target
= control target key end

     0   :  { %s12706_s6 = smov 1   ;;  %s12707_s10 = smov 2   ;;  %s14489_s0 = inlined_call_operand.smem [shape: u32[63], index: -1, kind: input, shape index: {}] }
   0x1   :  { %s12814_s5 = sld [smem:[%s14489_s0]]   ;;  %s12708_s14 = smov 3  }
   0x2   :  { %s12819_s9 = sld [smem:[%s14489_s0 + %s12706_s6]]   ;;  %s12709_s18 = smov 4  }
   0x3   :  { %s12824_s13 = sld [smem:[%s14489_s0 + %s12707_s10]]   ;;  %s12710_s22 = smov 5  }
   0x4   :  { %s12829_s17 = sld [smem:[%s14489_s0 + %s12708_s14]]   ;;  %s12711_s26 = smov 6  }
   0x5   :  { %s12834_s21 = sld [smem:[%s14489_s0 + %s12709_s18]]   ;;  %s12712_s30 = smov 7  }
   0x6   :  { %s12839_s25 = sld [smem:[%s14489_s0 + %s12710_s22]]   ;;  %s12713_s4 = smov 8  }
   0x7   :  { %14522 = sst [smem:[#allocation73_spill]] %s12814_s5  ;;  %s12714_s10 = smov 9  }
   0x8   :  { %14523 = sst [smem:[#allocation74_spill]] %s12819_s9  ;;  %s12715_s15 = smov 10  }
   0x9   :  { %s12844_s29 = sld [smem:[%s14489_s0 + %s12711_s26]]   ;;  %s12716_s20 = smov 11  }
   0xa   :  { %14524 = sst [smem:[#allocation75_spill]] %s12829_s17  ;;  %s12717_s26 = smov 12  }
   0xb   :  { %s12849_s3 = sld [smem:[%s14489_s0 + %s12712_s30]]   ;;  %s12718_s1 = smov 13  }
   0xc   :  { %14525 = sst [smem:[#allocation76_spill]] %s12839_s25  ;;  %s12719_s7 = smov 14  }
   0xd   :  { %s12854_s8 = sld [smem:[%s14489_s0 + %s12713_s4]]   ;;  %s12721_s22 = smov 16  }
   0xe   :  { %s12859_s14 = sld [smem:[%s14489_s0 + %s12714_s10]]   ;;  %s12722_s28 = smov 17  }
   0xf   :  { %s12864_s19 = sld [smem:[%s14489_s0 + %s12715_s15]]   ;;  %s12720_s15 = smov 15  }
  0x10   :  { %s12869_s24 = sld [smem:[%s14489_s0 + %s12716_s20]]  }
  0x11   :  { %14526 = sst [smem:[#allocation77_spill]] %s12849_s3 }
  0x12   :  { %s12874_s30 = sld [smem:[%s14489_s0 + %s12717_s26]]  }
  0x13   :  { %14527 = sst [smem:[#allocation78_spill]] %s12854_s8 }
  0x14   :  { %s12879_s6 = sld [smem:[%s14489_s0 + %s12718_s1]]  }
  0x15   :  { %14528 = sst [smem:[#allocation79_spill]] %s12864_s19 }
  0x16   :  { %14529 = sst [smem:[#allocation80_spill]] %s12869_s24 }
  0x17   :  { %s12884_s12 = sld [smem:[%s14489_s0 + %s12719_s7]]   ;;  %s12723_s7 = smov 18  }
  0x18   :  { %s12889_s20 = sld [smem:[%s14489_s0 + %s12720_s15]]   ;;  %s12724_s15 = smov 19  }
  0x19   :  { %s12894_s27 = sld [smem:[%s14489_s0 + %s12721_s22]]   ;;  %s12725_s22 = smov 20  }
  0x1a   :  { %14530 = sst [smem:[#allocation81_spill]] %s12879_s6 }
  0x1b   :  { %s12899_s4 = sld [smem:[%s14489_s0 + %s12722_s28]]   ;;  %s12726_s28 = smov 21  }
  0x1c   :  { %s12909_s6 = sld [smem:[%s14489_s0 + %s12724_s15]]   ;;  %s12728_s15 = smov 23  }
  0x1d   :  { %14531 = sst [smem:[#allocation82_spill]] %s12884_s12 }
  0x1e   :  { %14532 = sst [smem:[#allocation83_spill]] %s12889_s20 }
  0x1f   :  { %s12904_s12 = sld [smem:[%s14489_s0 + %s12723_s7]]   ;;  %s12727_s7 = smov 22  }
  0x20   :  { %s12914_s24 = sld [smem:[%s14489_s0 + %s12725_s22]]   ;;  %s12729_s22 = smov 24  }
  0x21   :  { %14533 = sst [smem:[#allocation84_spill]] %s12899_s4 }
  0x22   :  { %s12919_s8 = sld [smem:[%s14489_s0 + %s12726_s28]]   ;;  %s12730_s28 = smov 25  }
  0x23   :  { %s12929_s5 = sld [smem:[%s14489_s0 + %s12728_s15]]   ;;  %s12732_s15 = smov 27  }
  0x24   :  { %s12939_s4 = sld [smem:[%s14489_s0 + %s12730_s28]]   ;;  %s12734_s28 = smov 29  }
  0x25   :  { %14534 = sst [smem:[#allocation85_spill]] %s12904_s12 }
  0x26   :  { %14535 = sst [smem:[#allocation86_spill]] %s12914_s24 }
  0x27   :  { %s12924_s12 = sld [smem:[%s14489_s0 + %s12727_s7]]   ;;  %s12731_s7 = smov 26  }
  0x28   :  { %s12934_s24 = sld [smem:[%s14489_s0 + %s12729_s22]]   ;;  %s12733_s22 = smov 28  }
  0x29   :  { %s12949_s20 = sld [smem:[%s14489_s0 + %s12732_s15]]   ;;  %s12736_s15 = smov 31  }
  0x2a   :  { %14538 = sst [smem:[#allocation89_spill]] %s12939_s4 }
  0x2b   :  { %s12959_s4 = sld [smem:[%s14489_s0 + %s12734_s28]]   ;;  %s12738_s28 = smov 33  }
  0x2d   :  { %14536 = sst [smem:[#allocation87_spill]] %s12924_s12 }
  0x2e   :  { %14537 = sst [smem:[#allocation88_spill]] %s12934_s24 }
  0x2f   :  { %s12944_s12 = sld [smem:[%s14489_s0 + %s12731_s7]]   ;;  %s12735_s7 = smov 30  }
  0x30   :  { %14539 = sst [smem:[#allocation90_spill]] %s12949_s20 }
  0x31   :  { %s12954_s24 = sld [smem:[%s14489_s0 + %s12733_s22]]   ;;  %s12737_s22 = smov 32  }
  0x32   :  { %14540 = sst [smem:[#allocation91_spill]] %s12959_s4 }
  0x33   :  { %s12964_s19 = sld [smem:[%s14489_s0 + %s12735_s7]]   ;;  %s12739_s7 = smov 34  }
  0x34   :  { %s12969_s20 = sld [smem:[%s14489_s0 + %s12736_s15]]   ;;  %s12740_s15 = smov 35  }
  0x35   :  { %s12974_s3 = sld [smem:[%s14489_s0 + %s12737_s22]]   ;;  %s12741_s22 = smov 36  }
  0x36   :  { %s12979_s4 = sld [smem:[%s14489_s0 + %s12738_s28]]   ;;  %s12742_s28 = smov 37  }
  0x39   :  { %14541 = sst [smem:[#allocation92_spill]] %s12964_s19 }
  0x3a   :  { %14542 = sst [smem:[#allocation93_spill]] %s12969_s20 }
  0x3b   :  { %14543 = sst [smem:[#allocation94_spill]] %s12974_s3 }
  0x3c   :  { %14544 = sst [smem:[#allocation95_spill]] %s12979_s4 }
  0x3d   :  { %s12984_s19 = sld [smem:[%s14489_s0 + %s12739_s7]]   ;;  %s12743_s7 = smov 38  }
  0x3e   :  { %s12989_s20 = sld [smem:[%s14489_s0 + %s12740_s15]]   ;;  %s12744_s15 = smov 39  }
  0x3f   :  { %s12994_s3 = sld [smem:[%s14489_s0 + %s12741_s22]]   ;;  %s12745_s22 = smov 40  }
  0x40   :  { %s12999_s4 = sld [smem:[%s14489_s0 + %s12742_s28]]   ;;  %s12746_s28 = smov 41  }
  0x43   :  { %14545 = sst [smem:[#allocation96_spill]] %s12984_s19 }
  0x44   :  { %14546 = sst [smem:[#allocation97_spill]] %s12989_s20 }
  0x45   :  { %14547 = sst [smem:[#allocation98_spill]] %s12994_s3 }
  0x46   :  { %14548 = sst [smem:[#allocation99_spill]] %s12999_s4 }
  0x47   :  { %s13004_s19 = sld [smem:[%s14489_s0 + %s12743_s7]]   ;;  %s12747_s7 = smov 42  }
  0x48   :  { %s13009_s20 = sld [smem:[%s14489_s0 + %s12744_s15]]   ;;  %s12748_s15 = smov 43  }
  0x49   :  { %s13014_s3 = sld [smem:[%s14489_s0 + %s12745_s22]]   ;;  %s12749_s22 = smov 44  }
  0x4a   :  { %s13019_s4 = sld [smem:[%s14489_s0 + %s12746_s28]]   ;;  %s12750_s28 = smov 45  }
  0x4b   :  { %s13029_s25 = sld [smem:[%s14489_s0 + %s12748_s15]]   ;;  %s12752_s15 = smov 47  }
  0x4d   :  { %14549 = sst [smem:[#allocation100_spill]] %s13004_s19 }
  0x4e   :  { %s13024_s19 = sld [smem:[%s14489_s0 + %s12747_s7]]   ;;  %s12751_s7 = smov 46  }
  0x4f   :  { %14550 = sst [smem:[#allocation101_spill]] %s13014_s3 }
  0x50   :  { %14551 = sst [smem:[#allocation102_spill]] %s13019_s4 }
  0x51   :  { %14552 = sst [smem:[#allocation103_spill]] %s13029_s25 }
  0x52   :  { %s13034_s3 = sld [smem:[%s14489_s0 + %s12749_s22]]   ;;  %s12753_s22 = smov 48  }
  0x53   :  { %s13039_s4 = sld [smem:[%s14489_s0 + %s12750_s28]]   ;;  %s12754_s28 = smov 49  }
  0x54   :  { %s13044_s17 = sld [smem:[%s14489_s0 + %s12751_s7]]   ;;  %s12755_s7 = smov 50  }
  0x55   :  { %s13049_s25 = sld [smem:[%s14489_s0 + %s12752_s15]]   ;;  %s12756_s15 = smov 51  }
  0x56   :  { %s13054_s9 = sld [smem:[%s14489_s0 + %s12753_s22]]   ;;  %s12757_s22 = smov 52  }
  0x59   :  { %14553 = sst [smem:[#allocation104_spill]] %s13039_s4 }
  0x5a   :  { %14554 = sst [smem:[#allocation105_spill]] %s13044_s17 }
  0x5b   :  { %14555 = sst [smem:[#allocation106_spill]] %s13049_s25 }
  0x5c   :  { %14556 = sst [smem:[#allocation107_spill]] %s13054_s9 }
  0x5d   :  { %s13059_s4 = sld [smem:[%s14489_s0 + %s12754_s28]]   ;;  %s12758_s28 = smov 53  }
  0x5e   :  { %s13064_s17 = sld [smem:[%s14489_s0 + %s12755_s7]]   ;;  %s12759_s7 = smov 54  }
  0x5f   :  { %s13069_s25 = sld [smem:[%s14489_s0 + %s12756_s15]]   ;;  %s12760_s15 = smov 55  }
  0x60   :  { %s13074_s9 = sld [smem:[%s14489_s0 + %s12757_s22]]   ;;  %s12761_s22 = smov 56  }
  0x63   :  { %14557 = sst [smem:[#allocation108_spill]] %s13059_s4 }
  0x64   :  { %14558 = sst [smem:[#allocation109_spill]] %s13064_s17 }
  0x65   :  { %14559 = sst [smem:[#allocation110_spill]] %s13069_s25 }
  0x66   :  { %14560 = sst [smem:[#allocation111_spill]] %s13074_s9 }
  0x67   :  { %s13079_s4 = sld [smem:[%s14489_s0 + %s12758_s28]]   ;;  %s12762_s28 = smov 57  }
  0x68   :  { %s13084_s17 = sld [smem:[%s14489_s0 + %s12759_s7]]   ;;  %s12763_s7 = smov 58  }
  0x69   :  { %s13089_s25 = sld [smem:[%s14489_s0 + %s12760_s15]]   ;;  %s12764_s15 = smov 59  }
  0x6a   :  { %s13094_s9 = sld [smem:[%s14489_s0 + %s12761_s22]]   ;;  %s12765_s22 = smov 60  }
  0x6d   :  { %14561 = sst [smem:[#allocation112_spill]] %s13079_s4 }
  0x6e   :  { %14562 = sst [smem:[#allocation113_spill]] %s13084_s17 }
  0x6f   :  { %14563 = sst [smem:[#allocation114_spill]] %s13089_s25 }
  0x70   :  { %14564 = sst [smem:[#allocation115_spill]] %s13094_s9 }
  0x71   :  { %s13099_s4 = sld [smem:[%s14489_s0 + %s12762_s28]]   ;;  %s12766_s28 = smov 61  }
  0x72   :  { %s13104_s17 = sld [smem:[%s14489_s0 + %s12763_s7]]   ;;  %s12767_s7 = smov 62  }
  0x73   :  { %s13109_s25 = sld [smem:[%s14489_s0 + %s12764_s15]]  }
  0x74   :  { %s13114_s9 = sld [smem:[%s14489_s0 + %s12765_s22]]  }
  0x77   :  { %14565 = sst [smem:[#allocation116_spill]] %s13099_s4 }
  0x78   :  { %14566 = sst [smem:[#allocation117_spill]] %s13104_s17 }
  0x79   :  { %s13119_s4 = sld [smem:[%s14489_s0 + %s12766_s28]]  }
  0x7a   :  { %s13124_s17 = sld [smem:[%s14489_s0 + %s12767_s7]]  }
  0x7b   :  { %130 = vsyncpa [#allocation3], 0 }
  0x7c   :  { %131 = vsyncpa [#allocation5], 0 }
  0x7d   :  { %132 = vsyncpa [#allocation8], 0 }
  0x7e   :  { %133 = vsyncpa [#allocation11], 0 }
  0x7f   :  { %134 = vsyncpa [#allocation14], 0 }
  0x80   :  { %135 = vsyncpa [#allocation17], 0 }
  0x81   :  { %136 = vsyncpa [#allocation20], 0 }
  0x82   :  { %137 = vsyncpa [#allocation23], 0 }
  0x83   :  { %138 = vsyncpa [#allocation26], 0 }
  0x84   :  { %139 = vsyncpa [#allocation29], 0 }
  0x85   :  { %140 = vsyncpa [#allocation32], 0 }
  0x86   :  { %141 = vsyncpa [#allocation35], 0 }
  0x87   :  { %142 = vsyncpa [#allocation38], 0 }
  0x88   :  { %143 = vsyncpa [#allocation41], 0 }
  0x89   :  { %144 = vsyncpa [#allocation44], 0 }
  0x8a   :  { %145 = vsyncpa [#allocation47], 0 }
  0x8b   :  { %146 = vsyncpa [#allocation50], 0 }
  0x8c   :  { %147 = vsyncpa [#allocation53], 0  ;;  %s12768_s0 = smov [#allocation4]   ;;  %s12769_s16 = smov [#allocation7]  }
  0x8d   :  { %s167_s15 = sshll.u32 %s12768_s0, 4  ;;  %s191_s18 = sshll.u32 %s12769_s16, 4  ;;  %s168_s15 = int_to_ptr.vmem [resolvable:$true] %s167_s15  ;;  %s13126_s18 = int_to_ptr.vmem [resolvable:$true] %s191_s18 }
  0x8e   :  { %s11900_s22 = scalar_lea.hbm %s12824_s13, 512 }
  0x8f   :  { %p11901_p0 = scmp.ne.s32.totalorder %s12824_s13, %s11900_s22  ;;  %p11904_p1 = scmp.lt.u32.totalorder %s11900_s22, %s12824_s13 }
  0x91   :  { %p11906_p2 = pnand %p11904_p1, %p11901_p0 }
  0x93   :  { %11909 = shalt.err (!%p11906_p2)
}
  0x94   :  { %s11910_s23 = scalar_lea.vmem %s168_s15, 512  ;;  %p11915_p4 = scmp.lt.s32.totalorder %s168_s15, %s168_s15 }
  0x95   :  { %p11911_p3 = scmp.ne.s32.totalorder %s168_s15, %s11910_s23  ;;  %p11916_p5 = scmp.lt.s32.totalorder %s11910_s23, %s11910_s23 }
  0x97   :  { %p11917_p6 = por %p11916_p5, %p11915_p4 }
  0x99   :  { %p11918_p7 = pnand %p11917_p6, %p11911_p3 }
  0x9b   :  { %11921 = shalt.err (!%p11918_p7)
}
  0x9c   :  { %s12770_s26 = smov 128   ;;  %s12771_s28 = smov 8  }
  0x9d   :  { %173 = dma.hbm_to_vmem [thread:$0]  %s12824_s13, 512, %s168_s15, [#allocation5], %s12770_s26, %s12770_s26, %s12771_s28  }
  0x9e   :  { %s11922_s1 = scalar_lea.hbm %s12834_s21, 768 }
  0x9f   :  { %p11923_p8 = scmp.ne.s32.totalorder %s12834_s21, %s11922_s1  ;;  %p11926_p9 = scmp.lt.u32.totalorder %s11922_s1, %s12834_s21 }
  0xa1   :  { %p11928_p10 = pnand %p11926_p9, %p11923_p8 }
  0xa3   :  { %11931 = shalt.err (!%p11928_p10)
}
  0xa4   :  { %s11932_s2 = scalar_lea.vmem %s13126_s18, 768  ;;  %p11937_p12 = scmp.lt.s32.totalorder %s13126_s18, %s13126_s18 }
  0xa5   :  { %p11933_p11 = scmp.ne.s32.totalorder %s13126_s18, %s11932_s2  ;;  %p11938_p13 = scmp.lt.s32.totalorder %s11932_s2, %s11932_s2 }
  0xa7   :  { %p11939_p0 = por %p11938_p13, %p11937_p12 }
  0xa9   :  { %p11940_p1 = pnand %p11939_p0, %p11933_p11 }
  0xab   :  { %11943 = shalt.err (!%p11940_p1)
}
  0xac   :  { %197 = dma.hbm_to_vmem [thread:$0]  %s12834_s21, 768, %s13126_s18, [#allocation8], %s12770_s26, %s12770_s26, %s12771_s28  }
  0xad   :  { %s12772_s13 = smov [#allocation10]   ;;  %s12773_s10 = smov [#allocation13]  }
  0xae   :  { %s215_s7 = sshll.u32 %s12772_s13, 4  ;;  %s239_s11 = sshll.u32 %s12773_s10, 4  ;;  %s216_s7 = int_to_ptr.vmem [resolvable:$true] %s215_s7  ;;  %s13147_s11 = int_to_ptr.vmem [resolvable:$true] %s239_s11 }
  0xaf   :  { %s11944_s0 = scalar_lea.hbm %s12844_s29, 768 }
  0xb0   :  { %p11945_p2 = scmp.ne.s32.totalorder %s12844_s29, %s11944_s0  ;;  %p11948_p3 = scmp.lt.u32.totalorder %s11944_s0, %s12844_s29 }
  0xb2   :  { %p11950_p4 = pnand %p11948_p3, %p11945_p2 }
  0xb4   :  { %11953 = shalt.err (!%p11950_p4)
}
  0xb5   :  { %s11954_s15 = scalar_lea.vmem %s216_s7, 768  ;;  %p11959_p6 = scmp.lt.s32.totalorder %s216_s7, %s216_s7 }
  0xb6   :  { %p11955_p5 = scmp.ne.s32.totalorder %s216_s7, %s11954_s15  ;;  %p11960_p7 = scmp.lt.s32.totalorder %s11954_s15, %s11954_s15 }
  0xb8   :  { %p11961_p8 = por %p11960_p7, %p11959_p6 }
  0xba   :  { %p11962_p9 = pnand %p11961_p8, %p11955_p5 }
  0xbc   :  { %11965 = shalt.err (!%p11962_p9)
}
  0xbd   :  { %221 = dma.hbm_to_vmem [thread:$0]  %s12844_s29, 768, %s216_s7, [#allocation11], %s12770_s26, %s12770_s26, %s12771_s28  }
  0xbe   :  { %s11966_s21 = scalar_lea.hbm %s12859_s14, 2048 }
  0xbf   :  { %p11967_p10 = scmp.ne.s32.totalorder %s12859_s14, %s11966_s21  ;;  %p11970_p11 = scmp.lt.u32.totalorder %s11966_s21, %s12859_s14 }
  0xc1   :  { %p11972_p12 = pnand %p11970_p11, %p11967_p10 }
  0xc3   :  { %11975 = shalt.err (!%p11972_p12)
}
  0xc4   :  { %s11976_s16 = scalar_lea.vmem %s13147_s11, 2048  ;;  %p11981_p0 = scmp.lt.s32.totalorder %s13147_s11, %s13147_s11 }
  0xc5   :  { %p11977_p13 = scmp.ne.s32.totalorder %s13147_s11, %s11976_s16  ;;  %p11982_p1 = scmp.lt.s32.totalorder %s11976_s16, %s11976_s16 }
  0xc7   :  { %p11983_p2 = por %p11982_p1, %p11981_p0 }
  0xc9   :  { %p11984_p3 = pnand %p11983_p2, %p11977_p13 }
  0xcb   :  { %11987 = shalt.err (!%p11984_p3)
}
  0xcc   :  { %245 = dma.hbm_to_vmem [thread:$0]  %s12859_s14, 2048, %s13147_s11, [#allocation14], %s12770_s26, %s12770_s26, %s12771_s28  }
  0xcd   :  { %s12774_s29 = smov [#allocation16]   ;;  %s12775_s22 = smov [#allocation19]  }
  0xce   :  { %s265_s18 = sshll.u32 %s12774_s29, 4  ;;  %s293_s23 = sshll.u32 %s12775_s22, 4  ;;  %s266_s18 = int_to_ptr.vmem [resolvable:$true] %s265_s18  ;;  %s13168_s23 = int_to_ptr.vmem [resolvable:$true] %s293_s23 }
  0xcf   :  { %s11988_s1 = scalar_lea.hbm %s12874_s30, 2048 }
  0xd0   :  { %p11989_p4 = scmp.ne.s32.totalorder %s12874_s30, %s11988_s1  ;;  %p11992_p5 = scmp.lt.u32.totalorder %s11988_s1, %s12874_s30 }
  0xd2   :  { %p11994_p6 = pnand %p11992_p5, %p11989_p4 }
  0xd4   :  { %11997 = shalt.err (!%p11994_p6)
}
  0xd5   :  { %s11998_s2 = scalar_lea.vmem %s266_s18, 2048  ;;  %p12003_p8 = scmp.lt.s32.totalorder %s266_s18, %s266_s18 }
  0xd6   :  { %p11999_p7 = scmp.ne.s32.totalorder %s266_s18, %s11998_s2  ;;  %p12004_p9 = scmp.lt.s32.totalorder %s11998_s2, %s11998_s2 }
  0xd8   :  { %p12005_p10 = por %p12004_p9, %p12003_p8 }
  0xda   :  { %p12006_p11 = pnand %p12005_p10, %p11999_p7 }
  0xdc   :  { %12009 = shalt.err (!%p12006_p11)
}
  0xdd   :  { %271 = dma.hbm_to_vmem [thread:$0]  %s12874_s30, 2048, %s266_s18, [#allocation17], %s12770_s26, %s12770_s26, %s12771_s28  }
  0xde   :  { %s12010_s14 = scalar_lea.hbm %s12894_s27, 256 }
  0xdf   :  { %p12011_p12 = scmp.ne.s32.totalorder %s12894_s27, %s12010_s14  ;;  %p12014_p13 = scmp.lt.u32.totalorder %s12010_s14, %s12894_s27 }
  0xe1   :  { %p12016_p0 = pnand %p12014_p13, %p12011_p12 }
  0xe3   :  { %12019 = shalt.err (!%p12016_p0)
}
  0xe4   :  { %s12020_s13 = scalar_lea.vmem %s13168_s23, 256  ;;  %p12025_p2 = scmp.lt.s32.totalorder %s13168_s23, %s13168_s23 }
  0xe5   :  { %p12021_p1 = scmp.ne.s32.totalorder %s13168_s23, %s12020_s13  ;;  %p12026_p3 = scmp.lt.s32.totalorder %s12020_s13, %s12020_s13 }
  0xe7   :  { %p12027_p4 = por %p12026_p3, %p12025_p2 }
  0xe9   :  { %p12028_p5 = pnand %p12027_p4, %p12021_p1 }
  0xeb   :  { %12031 = shalt.err (!%p12028_p5)
}
  0xec   :  { %299 = dma.hbm_to_vmem [thread:$0]  %s12894_s27, 256, %s13168_s23, [#allocation20], %s12770_s26, %s12770_s26, %s12771_s28  }
  0xed   :  { %s12776_s30 = smov [#allocation22]   ;;  %s12777_s10 = smov [#allocation25]  }
  0xee   :  { %s319_s7 = sshll.u32 %s12776_s30, 4  ;;  %s343_s11 = sshll.u32 %s12777_s10, 4  ;;  %s320_s7 = int_to_ptr.vmem [resolvable:$true] %s319_s7  ;;  %s13189_s11 = int_to_ptr.vmem [resolvable:$true] %s343_s11 }
  0xef   :  { %s12032_s0 = scalar_lea.hbm %s12909_s6, 256 }
  0xf0   :  { %p12033_p6 = scmp.ne.s32.totalorder %s12909_s6, %s12032_s0  ;;  %p12036_p7 = scmp.lt.u32.totalorder %s12032_s0, %s12909_s6 }
  0xf2   :  { %p12038_p8 = pnand %p12036_p7, %p12033_p6 }
  0xf4   :  { %12041 = shalt.err (!%p12038_p8)
}
  0xf5   :  { %s12042_s15 = scalar_lea.vmem %s320_s7, 256  ;;  %p12047_p10 = scmp.lt.s32.totalorder %s320_s7, %s320_s7 }
  0xf6   :  { %p12043_p9 = scmp.ne.s32.totalorder %s320_s7, %s12042_s15  ;;  %p12048_p11 = scmp.lt.s32.totalorder %s12042_s15, %s12042_s15 }
  0xf8   :  { %p12049_p12 = por %p12048_p11, %p12047_p10 }
  0xfa   :  { %p12050_p13 = pnand %p12049_p12, %p12043_p9 }
  0xfc   :  { %12053 = shalt.err (!%p12050_p13)
}
  0xfd   :  { %325 = dma.hbm_to_vmem [thread:$0]  %s12909_s6, 256, %s320_s7, [#allocation23], %s12770_s26, %s12770_s26, %s12771_s28  }
  0xfe   :  { %s12054_s27 = scalar_lea.hbm %s12919_s8, 256 }
  0xff   :  { %p12055_p0 = scmp.ne.s32.totalorder %s12919_s8, %s12054_s27  ;;  %p12058_p1 = scmp.lt.u32.totalorder %s12054_s27, %s12919_s8 }
 0x101   :  { %p12060_p2 = pnand %p12058_p1, %p12055_p0 }
 0x103   :  { %12063 = shalt.err (!%p12060_p2)
}
 0x104   :  { %s12064_s21 = scalar_lea.vmem %s13189_s11, 256  ;;  %p12069_p4 = scmp.lt.s32.totalorder %s13189_s11, %s13189_s11 }
 0x105   :  { %p12065_p3 = scmp.ne.s32.totalorder %s13189_s11, %s12064_s21  ;;  %p12070_p5 = scmp.lt.s32.totalorder %s12064_s21, %s12064_s21 }
 0x107   :  { %p12071_p6 = por %p12070_p5, %p12069_p4 }
 0x109   :  { %p12072_p7 = pnand %p12071_p6, %p12065_p3 }
 0x10b   :  { %12075 = shalt.err (!%p12072_p7)
}
 0x10c   :  { %349 = dma.hbm_to_vmem [thread:$0]  %s12919_s8, 256, %s13189_s11, [#allocation26], %s12770_s26, %s12770_s26, %s12771_s28  }
 0x10d   :  { %s12778_s6 = smov [#allocation28]   ;;  %s12779_s29 = smov [#allocation31]  }
 0x10e   :  { %s367_s16 = sshll.u32 %s12778_s6, 4  ;;  %s393_s18 = sshll.u32 %s12779_s29, 4  ;;  %s368_s16 = int_to_ptr.vmem [resolvable:$true] %s367_s16  ;;  %s13210_s18 = int_to_ptr.vmem [resolvable:$true] %s393_s18 }
 0x10f   :  { %s12076_s22 = scalar_lea.hbm %s12929_s5, 1024 }
 0x110   :  { %p12077_p8 = scmp.ne.s32.totalorder %s12929_s5, %s12076_s22  ;;  %p12080_p9 = scmp.lt.u32.totalorder %s12076_s22, %s12929_s5 }
 0x112   :  { %p12082_p10 = pnand %p12080_p9, %p12077_p8 }
 0x114   :  { %12085 = shalt.err (!%p12082_p10)
}
 0x115   :  { %s12086_s23 = scalar_lea.vmem %s368_s16, 1024  ;;  %p12091_p12 = scmp.lt.s32.totalorder %s368_s16, %s368_s16 }
 0x116   :  { %p12087_p11 = scmp.ne.s32.totalorder %s368_s16, %s12086_s23  ;;  %p12092_p13 = scmp.lt.s32.totalorder %s12086_s23, %s12086_s23 }
 0x118   :  { %p12093_p0 = por %p12092_p13, %p12091_p12 }
 0x11a   :  { %p12094_p1 = pnand %p12093_p0, %p12087_p11 }
 0x11c   :  { %12097 = shalt.err (!%p12094_p1)
}
 0x11d   :  { %373 = dma.hbm_to_vmem [thread:$0]  %s12929_s5, 1024, %s368_s16, [#allocation29], %s12770_s26, %s12770_s26, %s12771_s28  }
 0x11e   :  { %s12098_s8 = scalar_lea.hbm %s12944_s12, 2048 }
 0x11f   :  { %p12099_p2 = scmp.ne.s32.totalorder %s12944_s12, %s12098_s8  ;;  %p12102_p3 = scmp.lt.u32.totalorder %s12098_s8, %s12944_s12 }
 0x121   :  { %p12104_p4 = pnand %p12102_p3, %p12099_p2 }
 0x123   :  { %12107 = shalt.err (!%p12104_p4)
}
 0x124   :  { %s12108_s1 = scalar_lea.vmem %s13210_s18, 2048  ;;  %p12113_p6 = scmp.lt.s32.totalorder %s13210_s18, %s13210_s18 }
 0x125   :  { %p12109_p5 = scmp.ne.s32.totalorder %s13210_s18, %s12108_s1  ;;  %p12114_p7 = scmp.lt.s32.totalorder %s12108_s1, %s12108_s1 }
 0x127   :  { %p12115_p8 = por %p12114_p7, %p12113_p6 }
 0x129   :  { %p12116_p9 = pnand %p12115_p8, %p12109_p5 }
 0x12b   :  { %12119 = shalt.err (!%p12116_p9)
}
 0x12c   :  { %399 = dma.hbm_to_vmem [thread:$0]  %s12944_s12, 2048, %s13210_s18, [#allocation32], %s12770_s26, %s12770_s26, %s12771_s28  }
 0x12d   :  { %s12780_s5 = smov [#allocation34]   ;;  %s12781_s14 = smov [#allocation37]  }
 0x12e   :  { %s417_s2 = sshll.u32 %s12780_s5, 4  ;;  %s459_s13 = sshll.u32 %s12781_s14, 4  ;;  %s418_s2 = int_to_ptr.vmem [resolvable:$true] %s417_s2  ;;  %s13231_s13 = int_to_ptr.vmem [resolvable:$true] %s459_s13 }
 0x12f   :  { %s12120_s30 = scalar_lea.hbm %s12954_s24, 2048 }
 0x130   :  { %p12121_p10 = scmp.ne.s32.totalorder %s12954_s24, %s12120_s30  ;;  %p12124_p11 = scmp.lt.u32.totalorder %s12120_s30, %s12954_s24 }
 0x132   :  { %p12126_p12 = pnand %p12124_p11, %p12121_p10 }
 0x134   :  { %12129 = shalt.err (!%p12126_p12)
}
 0x135   :  { %s12130_s7 = scalar_lea.vmem %s418_s2, 2048  ;;  %p12135_p0 = scmp.lt.s32.totalorder %s418_s2, %s418_s2 }
 0x136   :  { %p12131_p13 = scmp.ne.s32.totalorder %s418_s2, %s12130_s7  ;;  %p12136_p1 = scmp.lt.s32.totalorder %s12130_s7, %s12130_s7 }
 0x138   :  { %p12137_p2 = por %p12136_p1, %p12135_p0 }
 0x13a   :  { %p12138_p3 = pnand %p12137_p2, %p12131_p13 }
 0x13c   :  { %12141 = shalt.err (!%p12138_p3)
}
 0x13d   :  { %423 = dma.hbm_to_vmem [thread:$0]  %s12954_s24, 2048, %s418_s2, [#allocation35], %s12770_s26, %s12770_s26, %s12771_s28  }
 0x13e   :  { %s12142_s12 = scalar_lea.hbm %s13009_s20, 2048 }
 0x13f   :  { %p12143_p4 = scmp.ne.s32.totalorder %s13009_s20, %s12142_s12  ;;  %p12146_p5 = scmp.lt.u32.totalorder %s12142_s12, %s13009_s20 }
 0x141   :  { %p12148_p6 = pnand %p12146_p5, %p12143_p4 }
 0x143   :  { %12151 = shalt.err (!%p12148_p6)
}
 0x144   :  { %s12152_s10 = scalar_lea.vmem %s13231_s13, 2048  ;;  %p12157_p8 = scmp.lt.s32.totalorder %s13231_s13, %s13231_s13 }
 0x145   :  { %p12153_p7 = scmp.ne.s32.totalorder %s13231_s13, %s12152_s10  ;;  %p12158_p9 = scmp.lt.s32.totalorder %s12152_s10, %s12152_s10 }
 0x147   :  { %p12159_p10 = por %p12158_p9, %p12157_p8 }
 0x149   :  { %p12160_p11 = pnand %p12159_p10, %p12153_p7 }
 0x14b   :  { %12163 = shalt.err (!%p12160_p11)
}
 0x14c   :  { %465 = dma.hbm_to_vmem [thread:$0]  %s13009_s20, 2048, %s13231_s13, [#allocation38], %s12770_s26, %s12770_s26, %s12771_s28  }
 0x14d   :  { %s12782_s24 = smov [#allocation40]   ;;  %s12783_s0 = smov [#allocation43]  }
 0x14e   :  { %s485_s11 = sshll.u32 %s12782_s24, 4  ;;  %s509_s15 = sshll.u32 %s12783_s0, 4  ;;  %s486_s11 = int_to_ptr.vmem [resolvable:$true] %s485_s11  ;;  %s13252_s15 = int_to_ptr.vmem [resolvable:$true] %s509_s15 }
 0x14f   :  { %s12164_s27 = scalar_lea.hbm %s13024_s19, 2048 }
 0x150   :  { %p12165_p12 = scmp.ne.s32.totalorder %s13024_s19, %s12164_s27  ;;  %p12168_p13 = scmp.lt.u32.totalorder %s12164_s27, %s13024_s19 }
 0x152   :  { %p12170_p0 = pnand %p12168_p13, %p12165_p12 }
 0x154   :  { %12173 = shalt.err (!%p12170_p0)
}
 0x155   :  { %s12174_s21 = scalar_lea.vmem %s486_s11, 2048  ;;  %p12179_p2 = scmp.lt.s32.totalorder %s486_s11, %s486_s11 }
 0x156   :  { %p12175_p1 = scmp.ne.s32.totalorder %s486_s11, %s12174_s21  ;;  %p12180_p3 = scmp.lt.s32.totalorder %s12174_s21, %s12174_s21 }
 0x158   :  { %p12181_p4 = por %p12180_p3, %p12179_p2 }
 0x15a   :  { %p12182_p5 = pnand %p12181_p4, %p12175_p1 }
 0x15c   :  { %12185 = shalt.err (!%p12182_p5)
}
 0x15d   :  { %491 = dma.hbm_to_vmem [thread:$0]  %s13024_s19, 2048, %s486_s11, [#allocation41], %s12770_s26, %s12770_s26, %s12771_s28  }
 0x15e   :  { %s12186_s20 = scalar_lea.hbm %s13034_s3, 2048 }
 0x15f   :  { %p12187_p6 = scmp.ne.s32.totalorder %s13034_s3, %s12186_s20  ;;  %p12190_p7 = scmp.lt.u32.totalorder %s12186_s20, %s13034_s3 }
 0x161   :  { %p12192_p8 = pnand %p12190_p7, %p12187_p6 }
 0x163   :  { %12195 = shalt.err (!%p12192_p8)
}
 0x164   :  { %s12196_s6 = scalar_lea.vmem %s13252_s15, 2048  ;;  %p12201_p10 = scmp.lt.s32.totalorder %s13252_s15, %s13252_s15 }
 0x165   :  { %p12197_p9 = scmp.ne.s32.totalorder %s13252_s15, %s12196_s6  ;;  %p12202_p11 = scmp.lt.s32.totalorder %s12196_s6, %s12196_s6 }
 0x167   :  { %p12203_p12 = por %p12202_p11, %p12201_p10 }
 0x169   :  { %p12204_p13 = pnand %p12203_p12, %p12197_p9 }
 0x16b   :  { %12207 = shalt.err (!%p12204_p13)
}
 0x16c   :  { %s14567_s19 = sld [smem:[#allocation106_spill]]  ;;  %s12784_s16 = smov [#allocation46]  }
 0x16d   :  { %515 = dma.hbm_to_vmem [thread:$0]  %s13034_s3, 2048, %s13252_s15, [#allocation44], %s12770_s26, %s12770_s26, %s12771_s28  }
 0x16e   :  { %s535_s29 = sshll.u32 %s12784_s16, 4  ;;  %s12785_s18 = smov [#allocation49]   ;;  %s536_s29 = int_to_ptr.vmem [resolvable:$true] %s535_s29 }
 0x16f   :  { %s561_s22 = sshll.u32 %s12785_s18, 4  ;;  %s13273_s22 = int_to_ptr.vmem [resolvable:$true] %s561_s22 }
 0x172   :  { %s12208_s23 = scalar_lea.hbm %s14567_s19, 2048 }
 0x173   :  { %p12209_p0 = scmp.ne.s32.totalorder %s14567_s19, %s12208_s23  ;;  %p12212_p1 = scmp.lt.u32.totalorder %s12208_s23, %s14567_s19 }
 0x175   :  { %p12214_p2 = pnand %p12212_p1, %p12209_p0 }
 0x177   :  { %12217 = shalt.err (!%p12214_p2)
}
 0x178   :  { %s12218_s8 = scalar_lea.vmem %s536_s29, 2048  ;;  %p12223_p4 = scmp.lt.s32.totalorder %s536_s29, %s536_s29 }
 0x179   :  { %p12219_p3 = scmp.ne.s32.totalorder %s536_s29, %s12218_s8  ;;  %p12224_p5 = scmp.lt.s32.totalorder %s12218_s8, %s12218_s8 }
 0x17b   :  { %p12225_p6 = por %p12224_p5, %p12223_p4 }
 0x17d   :  { %p12226_p7 = pnand %p12225_p6, %p12219_p3 }
 0x17f   :  { %12229 = shalt.err (!%p12226_p7)
}
 0x180   :  { %s14568_s3 = sld [smem:[#allocation109_spill]] }
 0x181   :  { %541 = dma.hbm_to_vmem [thread:$0]  %s14567_s19, 2048, %s536_s29, [#allocation47], %s12770_s26, %s12770_s26, %s12771_s28  }
 0x186   :  { %s12230_s1 = scalar_lea.hbm %s14568_s3, 2048 }
 0x187   :  { %p12231_p8 = scmp.ne.s32.totalorder %s14568_s3, %s12230_s1  ;;  %p12234_p9 = scmp.lt.u32.totalorder %s12230_s1, %s14568_s3 }
 0x189   :  { %p12236_p10 = pnand %p12234_p9, %p12231_p8 }
 0x18b   :  { %12239 = shalt.err (!%p12236_p10)
}
 0x18c   :  { %s12240_s5 = scalar_lea.vmem %s13273_s22, 2048  ;;  %p12245_p12 = scmp.lt.s32.totalorder %s13273_s22, %s13273_s22 }
 0x18d   :  { %p12241_p11 = scmp.ne.s32.totalorder %s13273_s22, %s12240_s5  ;;  %p12246_p13 = scmp.lt.s32.totalorder %s12240_s5, %s12240_s5 }
 0x18f   :  { %p12247_p0 = por %p12246_p13, %p12245_p12 }
 0x191   :  { %p12248_p1 = pnand %p12247_p0, %p12241_p11 }
 0x193   :  { %12251 = shalt.err (!%p12248_p1)
}
 0x194   :  { %s14569_s2 = sld [smem:[#allocation111_spill]]  ;;  %s12786_s14 = smov [#allocation52]  }
 0x195   :  { %567 = dma.hbm_to_vmem [thread:$0]  %s14568_s3, 2048, %s13273_s22, [#allocation50], %s12770_s26, %s12770_s26, %s12771_s28  }
 0x196   :  { %s585_s13 = sshll.u32 %s12786_s14, 4  ;;  %s12787_s30 = smov [#allocation2]   ;;  %s586_s13 = int_to_ptr.vmem [resolvable:$true] %s585_s13 }
 0x197   :  { %s155_s7 = sshll.u32 %s12787_s30, 4  ;;  %s13294_s7 = int_to_ptr.vmem [resolvable:$true] %s155_s7 }
 0x19a   :  { %s12252_s12 = scalar_lea.hbm %s14569_s2, 2048 }
 0x19b   :  { %p12253_p2 = scmp.ne.s32.totalorder %s14569_s2, %s12252_s12  ;;  %p12256_p3 = scmp.lt.u32.totalorder %s12252_s12, %s14569_s2 }
 0x19d   :  { %p12258_p4 = pnand %p12256_p3, %p12253_p2 }
 0x19f   :  { %12261 = shalt.err (!%p12258_p4)
}
 0x1a0   :  { %s12262_s10 = scalar_lea.vmem %s586_s13, 2048  ;;  %p12267_p6 = scmp.lt.s32.totalorder %s586_s13, %s586_s13 }
 0x1a1   :  { %p12263_p5 = scmp.ne.s32.totalorder %s586_s13, %s12262_s10  ;;  %p12268_p7 = scmp.lt.s32.totalorder %s12262_s10, %s12262_s10 }
 0x1a3   :  { %p12269_p8 = por %p12268_p7, %p12267_p6 }
 0x1a5   :  { %p12270_p9 = pnand %p12269_p8, %p12263_p5 }
 0x1a7   :  { %12273 = shalt.err (!%p12270_p9)
}
 0x1a8   :  { %s14570_s24 = sld [smem:[#allocation74_spill]] }
 0x1a9   :  { %591 = dma.hbm_to_vmem [thread:$0]  %s14569_s2, 2048, %s586_s13, [#allocation53], %s12770_s26, %s12770_s26, %s12771_s28  }
 0x1ae   :  { %s12274_s11 = scalar_lea.hbm %s14570_s24, 512 }
 0x1af   :  { %p12275_p10 = scmp.ne.s32.totalorder %s14570_s24, %s12274_s11  ;;  %p12278_p11 = scmp.lt.u32.totalorder %s12274_s11, %s14570_s24 }
 0x1b1   :  { %p12280_p12 = pnand %p12278_p11, %p12275_p10 }
 0x1b3   :  { %12283 = shalt.err (!%p12280_p12)
}
 0x1b4   :  { %s12284_s0 = scalar_lea.vmem %s13294_s7, 512  ;;  %p12289_p0 = scmp.lt.s32.totalorder %s13294_s7, %s13294_s7 }
 0x1b5   :  { %p12285_p13 = scmp.ne.s32.totalorder %s13294_s7, %s12284_s0  ;;  %p12290_p1 = scmp.lt.s32.totalorder %s12284_s0, %s12284_s0 }
 0x1b7   :  { %p12291_p2 = por %p12290_p1, %p12289_p0 }
 0x1b9   :  { %p12292_p3 = pnand %p12291_p2, %p12285_p13 }
 0x1bb   :  { %12295 = shalt.err (!%p12292_p3)
}
 0x1bc   :  { %s14571_s15 = sld [smem:[#allocation75_spill]]  ;;  %s12788_s27 = smov [#allocation6]  }
 0x1bd   :  { %161 = dma.hbm_to_vmem [thread:$0]  %s14570_s24, 512, %s13294_s7, [#allocation3], %s12770_s26, %s12770_s26, %s12771_s28  }
 0x1be   :  { %s179_s21 = sshll.u32 %s12788_s27, 4  ;;  %s12789_s20 = smov [#allocation9]   ;;  %s180_s21 = int_to_ptr.vmem [resolvable:$true] %s179_s21 }
 0x1bf   :  { %s203_s6 = sshll.u32 %s12789_s20, 4  ;;  %s13315_s6 = int_to_ptr.vmem [resolvable:$true] %s203_s6 }
 0x1c2   :  { %s12296_s19 = scalar_lea.hbm %s14571_s15, 512 }
 0x1c3   :  { %p12297_p4 = scmp.ne.s32.totalorder %s14571_s15, %s12296_s19  ;;  %p12300_p5 = scmp.lt.u32.totalorder %s12296_s19, %s14571_s15 }
 0x1c5   :  { %p12302_p6 = pnand %p12300_p5, %p12297_p4 }
 0x1c7   :  { %12305 = shalt.err (!%p12302_p6)
}
 0x1c8   :  { %s12306_s16 = scalar_lea.vmem %s180_s21, 512  ;;  %p12311_p8 = scmp.lt.s32.totalorder %s180_s21, %s180_s21 }
 0x1c9   :  { %p12307_p7 = scmp.ne.s32.totalorder %s180_s21, %s12306_s16  ;;  %p12312_p9 = scmp.lt.s32.totalorder %s12306_s16, %s12306_s16 }
 0x1cb   :  { %p12313_p10 = por %p12312_p9, %p12311_p8 }
 0x1cd   :  { %p12314_p11 = pnand %p12313_p10, %p12307_p7 }
 0x1cf   :  { %12317 = shalt.err (!%p12314_p11)
}
 0x1d0   :  { %s14572_s29 = sld [smem:[#allocation76_spill]] }
 0x1d1   :  { %185 = dma.hbm_to_vmem [thread:$0]  %s14571_s15, 512, %s180_s21, [#allocation5], %s12770_s26, %s12770_s26, %s12771_s28  }
 0x1d6   :  { %s12318_s18 = scalar_lea.hbm %s14572_s29, 768 }
 0x1d7   :  { %p12319_p12 = scmp.ne.s32.totalorder %s14572_s29, %s12318_s18  ;;  %p12322_p13 = scmp.lt.u32.totalorder %s12318_s18, %s14572_s29 }
 0x1d9   :  { %p12324_p0 = pnand %p12322_p13, %p12319_p12 }
 0x1db   :  { %12327 = shalt.err (!%p12324_p0)
}
 0x1dc   :  { %s12328_s22 = scalar_lea.vmem %s13315_s6, 768  ;;  %p12333_p2 = scmp.lt.s32.totalorder %s13315_s6, %s13315_s6 }
 0x1dd   :  { %p12329_p1 = scmp.ne.s32.totalorder %s13315_s6, %s12328_s22  ;;  %p12334_p3 = scmp.lt.s32.totalorder %s12328_s22, %s12328_s22 }
 0x1df   :  { %p12335_p4 = por %p12334_p3, %p12333_p2 }
 0x1e1   :  { %p12336_p5 = pnand %p12335_p4, %p12329_p1 }
 0x1e3   :  { %12339 = shalt.err (!%p12336_p5)
}
 0x1e4   :  { %s14573_s23 = sld [smem:[#allocation77_spill]]  ;;  %s12790_s8 = smov [#allocation12]  }
 0x1e5   :  { %209 = dma.hbm_to_vmem [thread:$0]  %s14572_s29, 768, %s13315_s6, [#allocation8], %s12770_s26, %s12770_s26, %s12771_s28  }
 0x1e6   :  { %s228_s3 = sshll.u32 %s12790_s8, 4  ;;  %s12791_s1 = smov [#allocation15]   ;;  %s229_s3 = int_to_ptr.vmem [resolvable:$true] %s228_s3 }
 0x1e7   :  { %s251_s5 = sshll.u32 %s12791_s1, 4  ;;  %s13336_s5 = int_to_ptr.vmem [resolvable:$true] %s251_s5 }
 0x1ea   :  { %s12340_s2 = scalar_lea.hbm %s14573_s23, 16 }
 0x1eb   :  { %p12341_p6 = scmp.ne.s32.totalorder %s14573_s23, %s12340_s2  ;;  %p12344_p7 = scmp.lt.u32.totalorder %s12340_s2, %s14573_s23 }
 0x1ed   :  { %p12346_p8 = pnand %p12344_p7, %p12341_p6 }
 0x1ef   :  { %12349 = shalt.err (!%p12346_p8)
}
 0x1f0   :  { %s12350_s14 = scalar_lea.vmem %s229_s3, 16  ;;  %s12354_s13 = scalar_lea.vmem %s229_s3, 32 }
 0x1f1   :  { %p12351_p9 = scmp.ne.s32.totalorder %s229_s3, %s12350_s14  ;;  %p12355_p10 = scmp.lt.s32.totalorder %s229_s3, %s229_s3 }
 0x1f2   :  { %p12356_p11 = scmp.lt.s32.totalorder %s12354_s13, %s12350_s14 }
 0x1f4   :  { %p12357_p12 = por %p12356_p11, %p12355_p10 }
 0x1f6   :  { %p12358_p13 = pnand %p12357_p12, %p12351_p9 }
 0x1f8   :  { %12361 = shalt.err (!%p12358_p13)
}
 0x1f9   :  { %s14574_s30 = sld [smem:[#allocation79_spill]] }
 0x1fa   :  { %231 = dma.hbm_to_vmem [thread:$0]  %s14573_s23, 16, %s229_s3, [#allocation11]  }
 0x1ff   :  { %s12362_s7 = scalar_lea.hbm %s14574_s30, 2048 }
 0x200   :  { %p12363_p0 = scmp.ne.s32.totalorder %s14574_s30, %s12362_s7  ;;  %p12366_p1 = scmp.lt.u32.totalorder %s12362_s7, %s14574_s30 }
 0x202   :  { %p12368_p2 = pnand %p12366_p1, %p12363_p0 }
 0x204   :  { %12371 = shalt.err (!%p12368_p2)
}
 0x205   :  { %s12372_s12 = scalar_lea.vmem %s13336_s5, 2048  ;;  %p12377_p4 = scmp.lt.s32.totalorder %s13336_s5, %s13336_s5 }
 0x206   :  { %p12373_p3 = scmp.ne.s32.totalorder %s13336_s5, %s12372_s12  ;;  %p12378_p5 = scmp.lt.s32.totalorder %s12372_s12, %s12372_s12 }
 0x208   :  { %p12379_p6 = por %p12378_p5, %p12377_p4 }
 0x20a   :  { %p12380_p7 = pnand %p12379_p6, %p12373_p3 }
 0x20c   :  { %12383 = shalt.err (!%p12380_p7)
}
 0x20d   :  { %s14575_s10 = sld [smem:[#allocation83_spill]]  ;;  %s12792_s24 = smov [#allocation18]  }
 0x20e   :  { %257 = dma.hbm_to_vmem [thread:$0]  %s14574_s30, 2048, %s13336_s5, [#allocation14], %s12770_s26, %s12770_s26, %s12771_s28  }
 0x20f   :  { %s281_s11 = sshll.u32 %s12792_s24, 4  ;;  %s12793_s0 = smov [#allocation21]   ;;  %s282_s11 = int_to_ptr.vmem [resolvable:$true] %s281_s11 }
 0x210   :  { %s305_s15 = sshll.u32 %s12793_s0, 4  ;;  %s13354_s15 = int_to_ptr.vmem [resolvable:$true] %s305_s15 }
 0x213   :  { %s12384_s27 = scalar_lea.hbm %s14575_s10, 512 }
 0x214   :  { %p12385_p8 = scmp.ne.s32.totalorder %s14575_s10, %s12384_s27  ;;  %p12388_p9 = scmp.lt.u32.totalorder %s12384_s27, %s14575_s10 }
 0x216   :  { %p12390_p10 = pnand %p12388_p9, %p12385_p8 }
 0x218   :  { %12393 = shalt.err (!%p12390_p10)
}
 0x219   :  { %s12394_s21 = scalar_lea.vmem %s282_s11, 512  ;;  %p12399_p12 = scmp.lt.s32.totalorder %s282_s11, %s282_s11 }
 0x21a   :  { %p12395_p11 = scmp.ne.s32.totalorder %s282_s11, %s12394_s21  ;;  %p12400_p13 = scmp.lt.s32.totalorder %s12394_s21, %s12394_s21 }
 0x21c   :  { %p12401_p0 = por %p12400_p13, %p12399_p12 }
 0x21e   :  { %p12402_p1 = pnand %p12401_p0, %p12395_p11 }
 0x220   :  { %12405 = shalt.err (!%p12402_p1)
}
 0x221   :  { %s14576_s20 = sld [smem:[#allocation84_spill]] }
 0x222   :  { %287 = dma.hbm_to_vmem [thread:$0]  %s14575_s10, 512, %s282_s11, [#allocation17], %s12770_s26, %s12770_s26, %s12771_s28  }
 0x227   :  { %s12406_s6 = scalar_lea.hbm %s14576_s20, 2048 }
 0x228   :  { %p12407_p2 = scmp.ne.s32.totalorder %s14576_s20, %s12406_s6  ;;  %p12410_p3 = scmp.lt.u32.totalorder %s12406_s6, %s14576_s20 }
 0x22a   :  { %p12412_p4 = pnand %p12410_p3, %p12407_p2 }
 0x22c   :  { %12415 = shalt.err (!%p12412_p4)
}
 0x22d   :  { %s12416_s19 = scalar_lea.vmem %s13354_s15, 2048  ;;  %p12421_p6 = scmp.lt.s32.totalorder %s13354_s15, %s13354_s15 }
 0x22e   :  { %p12417_p5 = scmp.ne.s32.totalorder %s13354_s15, %s12416_s19  ;;  %p12422_p7 = scmp.lt.s32.totalorder %s12416_s19, %s12416_s19 }
 0x230   :  { %p12423_p8 = por %p12422_p7, %p12421_p6 }
 0x232   :  { %p12424_p9 = pnand %p12423_p8, %p12417_p5 }
 0x234   :  { %12427 = shalt.err (!%p12424_p9)
}
 0x235   :  { %s14577_s16 = sld [smem:[#allocation86_spill]]  ;;  %s12794_s29 = smov [#allocation24]  }
 0x236   :  { %311 = dma.hbm_to_vmem [thread:$0]  %s14576_s20, 2048, %s13354_s15, [#allocation20], %s12770_s26, %s12770_s26, %s12771_s28  }
 0x237   :  { %s331_s18 = sshll.u32 %s12794_s29, 4  ;;  %s12795_s22 = smov [#allocation27]   ;;  %s332_s18 = int_to_ptr.vmem [resolvable:$true] %s331_s18 }
 0x238   :  { %s355_s23 = sshll.u32 %s12795_s22, 4  ;;  %s13375_s23 = int_to_ptr.vmem [resolvable:$true] %s355_s23 }
 0x23b   :  { %s12428_s8 = scalar_lea.hbm %s14577_s16, 256 }
 0x23c   :  { %p12429_p10 = scmp.ne.s32.totalorder %s14577_s16, %s12428_s8  ;;  %p12432_p11 = scmp.lt.u32.totalorder %s12428_s8, %s14577_s16 }
 0x23e   :  { %p12434_p12 = pnand %p12432_p11, %p12429_p10 }
 0x240   :  { %12437 = shalt.err (!%p12434_p12)
}
 0x241   :  { %s12438_s3 = scalar_lea.vmem %s332_s18, 256  ;;  %p12443_p0 = scmp.lt.s32.totalorder %s332_s18, %s332_s18 }
 0x242   :  { %p12439_p13 = scmp.ne.s32.totalorder %s332_s18, %s12438_s3  ;;  %p12444_p1 = scmp.lt.s32.totalorder %s12438_s3, %s12438_s3 }
 0x244   :  { %p12445_p2 = por %p12444_p1, %p12443_p0 }
 0x246   :  { %p12446_p3 = pnand %p12445_p2, %p12439_p13 }
 0x248   :  { %12449 = shalt.err (!%p12446_p3)
}
 0x249   :  { %s14578_s1 = sld [smem:[#allocation87_spill]] }
 0x24a   :  { %337 = dma.hbm_to_vmem [thread:$0]  %s14577_s16, 256, %s332_s18, [#allocation23], %s12770_s26, %s12770_s26, %s12771_s28  }
 0x24f   :  { %s12450_s5 = scalar_lea.hbm %s14578_s1, 1024 }
 0x250   :  { %p12451_p4 = scmp.ne.s32.totalorder %s14578_s1, %s12450_s5  ;;  %p12454_p5 = scmp.lt.u32.totalorder %s12450_s5, %s14578_s1 }
 0x252   :  { %p12456_p6 = pnand %p12454_p5, %p12451_p4 }
 0x254   :  { %12459 = shalt.err (!%p12456_p6)
}
 0x255   :  { %s12460_s2 = scalar_lea.vmem %s13375_s23, 1024  ;;  %p12465_p8 = scmp.lt.s32.totalorder %s13375_s23, %s13375_s23 }
 0x256   :  { %p12461_p7 = scmp.ne.s32.totalorder %s13375_s23, %s12460_s2  ;;  %p12466_p9 = scmp.lt.s32.totalorder %s12460_s2, %s12460_s2 }
 0x258   :  { %p12467_p10 = por %p12466_p9, %p12465_p8 }
 0x25a   :  { %p12468_p11 = pnand %p12467_p10, %p12461_p7 }
 0x25c   :  { %12471 = shalt.err (!%p12468_p11)
}
 0x25d   :  { %s14579_s14 = sld [smem:[#allocation88_spill]]  ;;  %s12796_s13 = smov [#allocation30]  }
 0x25e   :  { %361 = dma.hbm_to_vmem [thread:$0]  %s14578_s1, 1024, %s13375_s23, [#allocation26], %s12770_s26, %s12770_s26, %s12771_s28  }
 0x25f   :  { %s379_s30 = sshll.u32 %s12796_s13, 4  ;;  %s12797_s7 = smov [#allocation33]   ;;  %s380_s30 = int_to_ptr.vmem [resolvable:$true] %s379_s30 }
 0x260   :  { %s405_s12 = sshll.u32 %s12797_s7, 4  ;;  %s13396_s12 = int_to_ptr.vmem [resolvable:$true] %s405_s12 }
 0x263   :  { %s12472_s10 = scalar_lea.hbm %s14579_s14, 1024 }
 0x264   :  { %p12473_p12 = scmp.ne.s32.totalorder %s14579_s14, %s12472_s10  ;;  %p12476_p13 = scmp.lt.u32.totalorder %s12472_s10, %s14579_s14 }
 0x266   :  { %p12478_p0 = pnand %p12476_p13, %p12473_p12 }
 0x268   :  { %12481 = shalt.err (!%p12478_p0)
}
 0x269   :  { %s12482_s24 = scalar_lea.vmem %s380_s30, 1024  ;;  %p12487_p2 = scmp.lt.s32.totalorder %s380_s30, %s380_s30 }
 0x26a   :  { %p12483_p1 = scmp.ne.s32.totalorder %s380_s30, %s12482_s24  ;;  %p12488_p3 = scmp.lt.s32.totalorder %s12482_s24, %s12482_s24 }
 0x26c   :  { %p12489_p4 = por %p12488_p3, %p12487_p2 }
 0x26e   :  { %p12490_p5 = pnand %p12489_p4, %p12483_p1 }
 0x270   :  { %12493 = shalt.err (!%p12490_p5)
}
 0x271   :  { %s14580_s11 = sld [smem:[#allocation90_spill]] }
 0x272   :  { %385 = dma.hbm_to_vmem [thread:$0]  %s14579_s14, 1024, %s380_s30, [#allocation29], %s12770_s26, %s12770_s26, %s12771_s28  }
 0x277   :  { %s12494_s0 = scalar_lea.hbm %s14580_s11, 2048 }
 0x278   :  { %p12495_p6 = scmp.ne.s32.totalorder %s14580_s11, %s12494_s0  ;;  %p12498_p7 = scmp.lt.u32.totalorder %s12494_s0, %s14580_s11 }
 0x27a   :  { %p12500_p8 = pnand %p12498_p7, %p12495_p6 }
 0x27c   :  { %12503 = shalt.err (!%p12500_p8)
}
 0x27d   :  { %s12504_s15 = scalar_lea.vmem %s13396_s12, 2048  ;;  %p12509_p10 = scmp.lt.s32.totalorder %s13396_s12, %s13396_s12 }
 0x27e   :  { %p12505_p9 = scmp.ne.s32.totalorder %s13396_s12, %s12504_s15  ;;  %p12510_p11 = scmp.lt.s32.totalorder %s12504_s15, %s12504_s15 }
 0x280   :  { %p12511_p12 = por %p12510_p11, %p12509_p10 }
 0x282   :  { %p12512_p13 = pnand %p12511_p12, %p12505_p9 }
 0x284   :  { %12515 = shalt.err (!%p12512_p13)
}
 0x285   :  { %s14581_s27 = sld [smem:[#allocation92_spill]]  ;;  %s12798_s21 = smov [#allocation36]  }
 0x286   :  { %411 = dma.hbm_to_vmem [thread:$0]  %s14580_s11, 2048, %s13396_s12, [#allocation32], %s12770_s26, %s12770_s26, %s12771_s28  }
 0x287   :  { %s431_s20 = sshll.u32 %s12798_s21, 4  ;;  %s12799_s6 = smov [#allocation39]   ;;  %s432_s20 = int_to_ptr.vmem [resolvable:$true] %s431_s20 }
 0x288   :  { %s471_s19 = sshll.u32 %s12799_s6, 4  ;;  %s13417_s19 = int_to_ptr.vmem [resolvable:$true] %s471_s19 }
 0x28b   :  { %s12516_s16 = scalar_lea.hbm %s14581_s27, 2048 }
 0x28c   :  { %p12517_p0 = scmp.ne.s32.totalorder %s14581_s27, %s12516_s16  ;;  %p12520_p1 = scmp.lt.u32.totalorder %s12516_s16, %s14581_s27 }
 0x28e   :  { %p12522_p2 = pnand %p12520_p1, %p12517_p0 }
 0x290   :  { %12525 = shalt.err (!%p12522_p2)
}
 0x291   :  { %s12526_s29 = scalar_lea.vmem %s432_s20, 2048  ;;  %p12531_p4 = scmp.lt.s32.totalorder %s432_s20, %s432_s20 }
 0x292   :  { %p12527_p3 = scmp.ne.s32.totalorder %s432_s20, %s12526_s29  ;;  %p12532_p5 = scmp.lt.s32.totalorder %s12526_s29, %s12526_s29 }
 0x294   :  { %p12533_p6 = por %p12532_p5, %p12531_p4 }
 0x296   :  { %p12534_p7 = pnand %p12533_p6, %p12527_p3 }
 0x298   :  { %12537 = shalt.err (!%p12534_p7)
}
 0x299   :  { %s14582_s18 = sld [smem:[#allocation101_spill]] }
 0x29a   :  { %437 = dma.hbm_to_vmem [thread:$0]  %s14581_s27, 2048, %s432_s20, [#allocation35], %s12770_s26, %s12770_s26, %s12771_s28  }
 0x29f   :  { %s12538_s22 = scalar_lea.hbm %s14582_s18, 2048 }
 0x2a0   :  { %p12539_p8 = scmp.ne.s32.totalorder %s14582_s18, %s12538_s22  ;;  %p12542_p9 = scmp.lt.u32.totalorder %s12538_s22, %s14582_s18 }
 0x2a2   :  { %p12544_p10 = pnand %p12542_p9, %p12539_p8 }
 0x2a4   :  { %12547 = shalt.err (!%p12544_p10)
}
 0x2a5   :  { %s12548_s23 = scalar_lea.vmem %s13417_s19, 2048  ;;  %p12553_p12 = scmp.lt.s32.totalorder %s13417_s19, %s13417_s19 }
 0x2a6   :  { %p12549_p11 = scmp.ne.s32.totalorder %s13417_s19, %s12548_s23  ;;  %p12554_p13 = scmp.lt.s32.totalorder %s12548_s23, %s12548_s23 }
 0x2a8   :  { %p12555_p0 = por %p12554_p13, %p12553_p12 }
 0x2aa   :  { %p12556_p1 = pnand %p12555_p0, %p12549_p11 }
 0x2ac   :  { %12559 = shalt.err (!%p12556_p1)
}
 0x2ad   :  { %s14583_s8 = sld [smem:[#allocation103_spill]]  ;;  %s12800_s3 = smov [#allocation42]  }
 0x2ae   :  { %477 = dma.hbm_to_vmem [thread:$0]  %s14582_s18, 2048, %s13417_s19, [#allocation38], %s12770_s26, %s12770_s26, %s12771_s28  }
 0x2af   :  { %s497_s1 = sshll.u32 %s12800_s3, 4  ;;  %s12801_s5 = smov [#allocation45]   ;;  %s498_s1 = int_to_ptr.vmem [resolvable:$true] %s497_s1 }
 0x2b0   :  { %s523_s2 = sshll.u32 %s12801_s5, 4  ;;  %s13438_s2 = int_to_ptr.vmem [resolvable:$true] %s523_s2 }
 0x2b3   :  { %s12560_s14 = scalar_lea.hbm %s14583_s8, 2048 }
 0x2b4   :  { %p12561_p2 = scmp.ne.s32.totalorder %s14583_s8, %s12560_s14  ;;  %p12564_p3 = scmp.lt.u32.totalorder %s12560_s14, %s14583_s8 }
 0x2b6   :  { %p12566_p4 = pnand %p12564_p3, %p12561_p2 }
 0x2b8   :  { %12569 = shalt.err (!%p12566_p4)
}
 0x2b9   :  { %s12570_s13 = scalar_lea.vmem %s498_s1, 2048  ;;  %p12575_p6 = scmp.lt.s32.totalorder %s498_s1, %s498_s1 }
 0x2ba   :  { %p12571_p5 = scmp.ne.s32.totalorder %s498_s1, %s12570_s13  ;;  %p12576_p7 = scmp.lt.s32.totalorder %s12570_s13, %s12570_s13 }
 0x2bc   :  { %p12577_p8 = por %p12576_p7, %p12575_p6 }
 0x2be   :  { %p12578_p9 = pnand %p12577_p8, %p12571_p5 }
 0x2c0   :  { %12581 = shalt.err (!%p12578_p9)
}
 0x2c1   :  { %s14584_s30 = sld [smem:[#allocation105_spill]] }
 0x2c2   :  { %503 = dma.hbm_to_vmem [thread:$0]  %s14583_s8, 2048, %s498_s1, [#allocation41], %s12770_s26, %s12770_s26, %s12771_s28  }
 0x2c7   :  { %s12582_s7 = scalar_lea.hbm %s14584_s30, 2048 }
 0x2c8   :  { %p12583_p10 = scmp.ne.s32.totalorder %s14584_s30, %s12582_s7  ;;  %p12586_p11 = scmp.lt.u32.totalorder %s12582_s7, %s14584_s30 }
 0x2ca   :  { %p12588_p12 = pnand %p12586_p11, %p12583_p10 }
 0x2cc   :  { %12591 = shalt.err (!%p12588_p12)
}
 0x2cd   :  { %s12592_s12 = scalar_lea.vmem %s13438_s2, 2048  ;;  %p12597_p0 = scmp.lt.s32.totalorder %s13438_s2, %s13438_s2 }
 0x2ce   :  { %p12593_p13 = scmp.ne.s32.totalorder %s13438_s2, %s12592_s12  ;;  %p12598_p1 = scmp.lt.s32.totalorder %s12592_s12, %s12592_s12 }
 0x2d0   :  { %p12599_p2 = por %p12598_p1, %p12597_p0 }
 0x2d2   :  { %p12600_p3 = pnand %p12599_p2, %p12593_p13 }
 0x2d4   :  { %12603 = shalt.err (!%p12600_p3)
}
 0x2d5   :  { %s14585_s10 = sld [smem:[#allocation107_spill]]  ;;  %s12802_s24 = smov [#allocation48]  }
 0x2d6   :  { %529 = dma.hbm_to_vmem [thread:$0]  %s14584_s30, 2048, %s13438_s2, [#allocation44], %s12770_s26, %s12770_s26, %s12771_s28  }
 0x2d7   :  { %s547_s11 = sshll.u32 %s12802_s24, 4  ;;  %s12803_s0 = smov [#allocation51]   ;;  %s548_s11 = int_to_ptr.vmem [resolvable:$true] %s547_s11 }
 0x2d8   :  { %s573_s15 = sshll.u32 %s12803_s0, 4  ;;  %s13459_s15 = int_to_ptr.vmem [resolvable:$true] %s573_s15 }
 0x2db   :  { %s12604_s27 = scalar_lea.hbm %s14585_s10, 2048 }
 0x2dc   :  { %p12605_p4 = scmp.ne.s32.totalorder %s14585_s10, %s12604_s27  ;;  %p12608_p5 = scmp.lt.u32.totalorder %s12604_s27, %s14585_s10 }
 0x2de   :  { %p12610_p6 = pnand %p12608_p5, %p12605_p4 }
 0x2e0   :  { %12613 = shalt.err (!%p12610_p6)
}
 0x2e1   :  { %s12614_s21 = scalar_lea.vmem %s548_s11, 2048  ;;  %p12619_p8 = scmp.lt.s32.totalorder %s548_s11, %s548_s11 }
 0x2e2   :  { %p12615_p7 = scmp.ne.s32.totalorder %s548_s11, %s12614_s21  ;;  %p12620_p9 = scmp.lt.s32.totalorder %s12614_s21, %s12614_s21 }
 0x2e4   :  { %p12621_p10 = por %p12620_p9, %p12619_p8 }
 0x2e6   :  { %p12622_p11 = pnand %p12621_p10, %p12615_p7 }
 0x2e8   :  { %12625 = shalt.err (!%p12622_p11)
}
 0x2e9   :  { %s14586_s20 = sld [smem:[#allocation110_spill]] }
 0x2ea   :  { %553 = dma.hbm_to_vmem [thread:$0]  %s14585_s10, 2048, %s548_s11, [#allocation47], %s12770_s26, %s12770_s26, %s12771_s28  }
 0x2ef   :  { %s12626_s6 = scalar_lea.hbm %s14586_s20, 2048 }
 0x2f0   :  { %p12627_p12 = scmp.ne.s32.totalorder %s14586_s20, %s12626_s6  ;;  %p12630_p13 = scmp.lt.u32.totalorder %s12626_s6, %s14586_s20 }
 0x2f2   :  { %p12632_p0 = pnand %p12630_p13, %p12627_p12 }
 0x2f4   :  { %12635 = shalt.err (!%p12632_p0)
}
 0x2f5   :  { %s12636_s19 = scalar_lea.vmem %s13459_s15, 2048  ;;  %p12641_p2 = scmp.lt.s32.totalorder %s13459_s15, %s13459_s15 }
 0x2f6   :  { %p12637_p1 = scmp.ne.s32.totalorder %s13459_s15, %s12636_s19  ;;  %p12642_p3 = scmp.lt.s32.totalorder %s12636_s19, %s12636_s19 }
 0x2f8   :  { %p12643_p4 = por %p12642_p3, %p12641_p2 }
 0x2fa   :  { %p12644_p5 = pnand %p12643_p4, %p12637_p1 }
 0x2fc   :  { %12647 = shalt.err (!%p12644_p5)
}
 0x2fd   :  { %s14587_s16 = sld [smem:[#allocation113_spill]]  ;;  %s12804_s29 = smov [#allocation54]  }
 0x2fe   :  { %579 = dma.hbm_to_vmem [thread:$0]  %s14586_s20, 2048, %s13459_s15, [#allocation50], %s12770_s26, %s12770_s26, %s12771_s28  }
 0x2ff   :  { %s599_s18 = sshll.u32 %s12804_s29, 4  ;;  %s600_s18 = int_to_ptr.vmem [resolvable:$true] %s599_s18 }
 0x303   :  { %s12648_s22 = scalar_lea.hbm %s14587_s16, 2048 }
 0x304   :  { %p12649_p6 = scmp.ne.s32.totalorder %s14587_s16, %s12648_s22  ;;  %p12652_p7 = scmp.lt.u32.totalorder %s12648_s22, %s14587_s16 }
 0x306   :  { %p12654_p8 = pnand %p12652_p7, %p12649_p6 }
 0x308   :  { %12657 = shalt.err (!%p12654_p8)
}
 0x309   :  { %s12658_s23 = scalar_lea.vmem %s600_s18, 2048  ;;  %p12663_p10 = scmp.lt.s32.totalorder %s600_s18, %s600_s18 }
 0x30a   :  { %p12659_p9 = scmp.ne.s32.totalorder %s600_s18, %s12658_s23  ;;  %p12664_p11 = scmp.lt.s32.totalorder %s12658_s23, %s12658_s23 }
 0x30c   :  { %p12665_p12 = por %p12664_p11, %p12663_p10 }
 0x30e   :  { %p12666_p13 = pnand %p12665_p12, %p12659_p9 }
 0x310   :  { %12669 = shalt.err (!%p12666_p13)
}
 0x311   :  { %605 = dma.hbm_to_vmem [thread:$0]  %s14587_s16, 2048, %s600_s18, [#allocation53], %s12770_s26, %s12770_s26, %s12771_s28  }
 0x312   :  { %12670 = dma.done.wait [#allocation3], 512  }
 0x313   :  { %12671 = vsyncadd [#allocation3], 4294966784 }
 0x314   :  { %12672 = dma.done.wait [#allocation5], 1024  }
 0x315   :  { %12673 = vsyncadd [#allocation5], 4294966272 }
 0x316   :  { %12674 = dma.done.wait [#allocation8], 1536  }
 0x317   :  { %12675 = vsyncadd [#allocation8], 4294965760 }
 0x318   :  { %12676 = dma.done.wait [#allocation11], 784  }
 0x319   :  { %12677 = vsyncadd [#allocation11], 4294966512 }
 0x31a   :  { %12678 = dma.done.wait [#allocation14], 4096  }
 0x31b   :  { %12679 = vsyncadd [#allocation14], 4294963200 }
 0x31c   :  { %12680 = dma.done.wait [#allocation17], 2560  }
 0x31d   :  { %12681 = vsyncadd [#allocation17], 4294964736 }
 0x31e   :  { %12682 = dma.done.wait [#allocation20], 2304  }
 0x31f   :  { %12683 = vsyncadd [#allocation20], 4294964992 }
 0x320   :  { %12684 = dma.done.wait [#allocation23], 512  }
 0x321   :  { %12685 = vsyncadd [#allocation23], 4294966784 }
 0x322   :  { %12686 = dma.done.wait [#allocation26], 1280  }
 0x323   :  { %12687 = vsyncadd [#allocation26], 4294966016 }
 0x324   :  { %12688 = dma.done.wait [#allocation29], 2048  }
 0x325   :  { %12689 = vsyncadd [#allocation29], 4294965248 }
 0x326   :  { %12690 = dma.done.wait [#allocation32], 4096  }
 0x327   :  { %12691 = vsyncadd [#allocation32], 4294963200 }
 0x328   :  { %12692 = dma.done.wait [#allocation35], 4096  }
 0x329   :  { %12693 = vsyncadd [#allocation35], 4294963200 }
 0x32a   :  { %12694 = dma.done.wait [#allocation38], 4096  }
 0x32b   :  { %12695 = vsyncadd [#allocation38], 4294963200 }
 0x32c   :  { %12696 = dma.done.wait [#allocation41], 4096  }
 0x32d   :  { %12697 = vsyncadd [#allocation41], 4294963200 }
 0x32e   :  { %12698 = dma.done.wait [#allocation44], 4096  }
 0x32f   :  { %12699 = vsyncadd [#allocation44], 4294963200 }
 0x330   :  { %12700 = dma.done.wait [#allocation47], 4096  }
 0x331   :  { %12701 = vsyncadd [#allocation47], 4294963200 }
 0x332   :  { %12702 = dma.done.wait [#allocation50], 4096  }
 0x333   :  { %12703 = vsyncadd [#allocation50], 4294963200 }
 0x334   :  { %12704 = dma.done.wait [#allocation53], 4096  }
 0x335   :  { %12705 = vsyncadd [#allocation53], 4294963200  ;;  %s14588_s26 = sld [smem:[#allocation73_spill]]  ;;  %vm843_vm0 = vcmask 392192   ;;  %vm733_vm1 = vcmask 261120   ;;  %v729_v5 = vld [vmem:[#allocation2] sm:$0xff] }
 0x336   :  { %8847 = vmatprep.mubr.msk.f32.mxu0 %vm733_vm1, %v729_v5  ;;  %v837_v7 = vld [vmem:[#allocation9] sm:$0xff]  ;;  %v838_v8 = vld [vmem:[#allocation9 + $0x8] sm:$0xff]  ;;  %v839_v9 = vld [vmem:[#allocation9 + $0x10] sm:$0xff]  ;;  %s14589_s28 = sld [smem:[#allocation78_spill]]  ;;  %s14590_s8 = sld [smem:[#allocation80_spill]]  ;;  %vm2537_vm2 = vcmask 130048  }
 0x337   :  { %v10244_v10 = vpack.c.bf16 %v838_v8, %v837_v7  ;;  %v840_v11 = vld [vmem:[#allocation9 + $0x18] sm:$0xff]  ;;  %v841_v13 = vld [vmem:[#allocation9 + $0x20] sm:$0xff]  ;;  %v842_v14 = vld [vmem:[#allocation9 + $0x28] sm:$0xff]  ;;  %s14591_s3 = sld [smem:[#allocation81_spill]]  ;;  %s14592_s1 = sld [smem:[#allocation82_spill]]  ;;  %vm2635_vm3 = vcmask 523264  }
 0x338   :  { %v10248_v12 = vpack.c.bf16 %v840_v11, %v839_v9  ;;  %v13493_v15 = vld [vmem:[#allocation2 + $0x8] sm:$0xff]  ;;  %v13495_v16 = vld [vmem:[#allocation2 + $0x10] sm:$0xff]  ;;  %v10252_v17 = vpack.c.bf16 %v842_v14, %v841_v13  ;;  %v831_v18 = vld [vmem:[#allocation7] sm:$0xff]  ;;  %s14593_s5 = sld [smem:[#allocation85_spill]]  ;;  %s14594_s2 = sld [smem:[#allocation89_spill]] }
 0x339   :  { %10245 = vmatprep.subr.bf16.mxu1 %v10244_v10  ;;  %v832_v19 = vld [vmem:[#allocation7 + $0x8] sm:$0xff]  ;;  %v13501_v20 = vld [vmem:[#allocation2 + $0x18] sm:$0xff]  ;;  %v1038_v21 = vld [vmem:[#allocation4] sm:$0xff]  ;;  %s14595_s14 = sld [smem:[#allocation91_spill]]  ;;  %s14596_s13 = sld [smem:[#allocation96_spill]] }
 0x33a   :  { %10247 = vmatpush3.bf16.msra.mxu1 %v10244_v10  ;;  %v10256_v22 = vpack.c.bf16 %v832_v19, %v831_v18  ;;  %v833_v23 = vld [vmem:[#allocation7 + $0x10] sm:$0xff]  ;;  %v834_v24 = vld [vmem:[#allocation7 + $0x18] sm:$0xff]  ;;  %v13506_v25 = vld [vmem:[#allocation4 + $0x8] sm:$0xff]  ;;  %s14597_s30 = sld [smem:[#allocation93_spill]]  ;;  %s14598_s7 = sld [smem:[#allocation94_spill]] }
 0x33b   :  { %v725_v0 = vld [vmem:[%s14588_s26] sm:$0xff]  ;;  %v726_v1 = vld [vmem:[%s14588_s26 + $0x8] sm:$0xff]  ;;  %v727_v2 = vld [vmem:[%s14588_s26 + $0x10] sm:$0xff]  ;;  %10249 = vmatprep.subr.bf16.mxu1 %v10248_v12  ;;  %v10260_v27 = vpack.c.bf16 %v834_v24, %v833_v23  ;;  %s14599_s12 = sld [smem:[#allocation98_spill]]  ;;  %s14600_s10 = sld [smem:[#allocation95_spill]] }
 0x33c   :  { %v10236_v3 = vpack.c.bf16 %v726_v1, %v725_v0  ;;  %v728_v4 = vld [vmem:[%s14588_s26 + $0x18] sm:$0xff]  ;;  %8865 = vmatprep.mubr.msk.f32.mxu1 %vm843_vm0, %v725_v0  ;;  %v13508_v26 = vld [vmem:[#allocation4 + $0x10] sm:$0xff]  ;;  %v835_v28 = vld [vmem:[#allocation7 + $0x20] sm:$0xff]  ;;  %s14601_s24 = sld [smem:[#allocation97_spill]]  ;;  %s14602_s11 = sld [smem:[#allocation99_spill]] }
 0x33d   :  { %v10240_v6 = vpack.c.bf16 %v728_v4, %v727_v2  ;;  %v836_v29 = vld [vmem:[#allocation7 + $0x28] sm:$0xff]  ;;  %v13514_v30 = vld [vmem:[#allocation4 + $0x18] sm:$0xff]  ;;  %v1139_v32 = vld [vmem:[#allocation10] sm:$0xff]  ;;  %s14603_s0 = sld [smem:[#allocation100_spill]]  ;;  %s14604_s15 = sld [smem:[#allocation102_spill]] }
 0x33e   :  { %10237 = vmatprep.subr.bf16.mxu0 %v10236_v3  ;;  %10251 = vmatpush3.bf16.msra.mxu1 %v10248_v12  ;;  %v10264_v31 = vpack.c.bf16 %v836_v29, %v835_v28  ;;  %v1140_v33 = vld [vmem:[#allocation10 + $0x8] sm:$0xff]  ;;  %v1141_v35 = vld [vmem:[#allocation10 + $0x10] sm:$0xff]  ;;  %v1142_v36 = vld [vmem:[#allocation10 + $0x18] sm:$0xff]  ;;  %s14605_s27 = sld [smem:[#allocation104_spill]]  ;;  %s14606_s21 = sld [smem:[#allocation108_spill]] }
 0x33f   :  { %10239 = vmatpush3.bf16.msra.mxu0 %v10236_v3  ;;  %10253 = vmatprep.subr.bf16.mxu1 %v10252_v17  ;;  %v10276_v34 = vpack.c.bf16 %v1140_v33, %v1139_v32  ;;  %v10280_v39 = vpack.c.bf16 %v1142_v36, %v1141_v35  ;;  %v1143_v40 = vld [vmem:[#allocation10 + $0x20] sm:$0xff]  ;;  %v1144_v41 = vld [vmem:[#allocation10 + $0x28] sm:$0xff]  ;;  %v7837_v49 = vld [vmem:[#allocation12] ss:$0 sm:$0xff]  ;;  %s14607_s20 = sld [smem:[#allocation112_spill]]  ;;  %s14608_s6 = sld [smem:[#allocation114_spill]] }
 0x340   :  { %10241 = vmatprep.subr.bf16.mxu0 %v10240_v6  ;;  %v10284_v44 = vpack.c.bf16 %v1144_v41, %v1143_v40  ;;  %v1362_v62 = vld [vmem:[#allocation13] sm:$0xff]  ;;  %v1363_v63 = vld [vmem:[#allocation13 + $0x8] sm:$0xff]  ;;  %v1368_v9 = vld [vmem:[#allocation13 + $0x30] sm:$0xff]  ;;  %s14609_s19 = sld [smem:[#allocation115_spill]]  ;;  %s14610_s16 = sld [smem:[#allocation117_spill]] }
 0x341   :  { %v1367_v7 = vld [vmem:[#allocation13 + $0x28] sm:$0xff]  ;;  %v1369_v10 = vld [vmem:[#allocation13 + $0x38] sm:$0xff]  ;;  %v1370_v12 = vld [vmem:[#allocation13 + $0x40] sm:$0xff]  ;;  %s14611_s29 = sld [smem:[#allocation116_spill]] }
 0x342   :  { %10255 = vmatpush3.bf16.msra.mxu1 %v10252_v17  ;;  %v10308_v11 = vpack.c.bf16 %v1369_v10, %v1368_v9  ;;  %v1371_v13 = vld [vmem:[#allocation13 + $0x48] sm:$0xff]  ;;  %v1374_v18 = vld [vmem:[#allocation13 + $0x60] sm:$0xff] }
 0x343   :  { %10243 = vmatpush3.bf16.msra.mxu0 %v10240_v6  ;;  %10257 = vmatprep.subr.bf16.mxu1 %v10256_v22  ;;  %v10312_v14 = vpack.c.bf16 %v1371_v13, %v1370_v12  ;;  %v1375_v19 = vld [vmem:[#allocation13 + $0x68] sm:$0xff]  ;;  %v1352_v33 = vld [vmem:[%s14589_s28 + $0x30] sm:$0xff]  ;;  %v1647_v13 = vld [vmem:[#allocation15 + $0x70] sm:$0xff] }
 0x344   :  { %10269 = vmatprep.subr.bf16.mxu0 %v10236_v3  ;;  %v1346_v24 = vld [vmem:[%s14589_s28] sm:$0xff]  ;;  %v1349_v28 = vld [vmem:[%s14589_s28 + $0x18] sm:$0xff] }
 0x345   :  { %8866 = vmatmul.mubr.msk.f32.vlgmr.msra.gmra.mrb[0].mxu1 %vm843_vm0, %v726_v1  ;;  %v1354_v36 = vld [vmem:[%s14589_s28 + $0x40] sm:$0xff]  ;;  %v1357_v40 = vld [vmem:[%s14589_s28 + $0x58] sm:$0xff] }
 0x346   :  { %8848 = vmatmul.mubr.msk.f32.vlgmr.msra.gmra.mrb[0].mxu0 %vm733_vm1, %v13493_v15  ;;  %10259 = vmatpush3.bf16.msra.mxu1 %v10256_v22  ;;  %v1377_v22 = vld [vmem:[#allocation13 + $0x78] sm:$0xff]  ;;  %v1645_v10 = vld [vmem:[#allocation15 + $0x60] sm:$0xff] }
 0x347   :  { %10271 = vmatpush3.bf16.msra.mxu0 %v10236_v3  ;;  %8850 = vmatprep.mubr.msk.f32.mxu0 %vm733_vm1, %v13495_v16  ;;  %v1364_v3 = vld [vmem:[#allocation13 + $0x10] sm:$0xff] }
 0x348   :  { %10273 = vmatprep.subr.bf16.mxu0 %v10240_v6  ;;  %8868 = vmatprep.mubr.msk.f32.mxu1 %vm843_vm0, %v727_v2  ;;  %v10296_v2 = vpack.c.bf16 %v1363_v63, %v1362_v62 }
 0x349   :  { %10261 = vmatprep.subr.bf16.mxu1 %v10260_v27  ;;  %8869 = vmatmul.mubr.msk.f32.gmra.mrb[2].mxu1 %vm843_vm0, %v728_v4  ;;  %v1365_v4 = vld [vmem:[#allocation13 + $0x18] sm:$0xff] }
 0x34a   :  { %8851 = vmatmul.mubr.msk.f32.gmra.mrb[2].mxu0 %vm733_vm1, %v13501_v20  ;;  %10263 = vmatpush3.bf16.msra.mxu1 %v10260_v27  ;;  %v1348_v27 = vld [vmem:[%s14589_s28 + $0x10] sm:$0xff] }
 0x34b   :  { %10275 = vmatpush3.bf16.msra.mxu0 %v10240_v6  ;;  %8897 = vmatprep.mubr.msk.f32.mxu0 %vm733_vm1, %v1038_v21  ;;  %v1366_v6 = vld [vmem:[#allocation13 + $0x20] sm:$0xff]  ;;  %v10332_v29 = vpack.c.bf16 %v1349_v28, %v1348_v27 }
 0x34c   :  { %10265 = vmatprep.subr.bf16.mxu1 %v10264_v31  ;;  %v10304_v8 = vpack.c.bf16 %v1367_v7, %v1366_v6  ;;  %v1643_v7 = vld [vmem:[#allocation15 + $0x50] sm:$0xff] }
 0x34e   :  { %8898 = vmatmul.mubr.msk.f32.vlgmr.msra.gmra.mrb[4].mxu0 %vm733_vm1, %v13506_v25  ;;  %10267 = vmatpush3.bf16.msra.mxu1 %v10264_v31  ;;  %v1351_v31 = vld [vmem:[%s14589_s28 + $0x28] sm:$0xff] }
 0x34f   :  { %8900 = vmatprep.mubr.msk.f32.mxu0 %vm733_vm1, %v13508_v26  ;;  %10277 = vmatprep.subr.bf16.mxu1 %v10276_v34 }
 0x352   :  { %8901 = vmatmul.mubr.msk.f32.gmra.mrb[6].mxu0 %vm733_vm1, %v13514_v30 }
 0x353   :  { %8929 = vmatprep.mubr.msk.f32.mxu0 %vm733_vm1, %v729_v5  ;;  %v10300_v5 = vpack.c.bf16 %v1365_v4, %v1364_v3  ;;  %v1641_v4 = vld [vmem:[#allocation15 + $0x40] sm:$0xff] }
 0x419   :  { %v8849_v37 = vpop.f32.mrb[0].mxu0 }
 0x41a   :  { %v812_v38 = vpop.f32.mrb[1].mxu0 }
 0x41b   :  { %8883 = vmatprep.mubr.msk.f32.mxu1 %vm843_vm0, %v812_v38 }
 0x41c   :  { %8884 = vmatmul.mubr.msk.f32.vlgmr.msra.gmra.mrb[0].mxu1 %vm843_vm0, %v8849_v37  ;;  %v1355_v37 = vld [vmem:[%s14589_s28 + $0x48] sm:$0xff] }
 0x41d   :  { %10279 = vmatpush3.bf16.msra.mxu1 %v10276_v34  ;;  %v8852_v42 = vpop.f32.mrb[2].mxu0  ;;  %v1353_v34 = vld [vmem:[%s14589_s28 + $0x38] sm:$0xff]  ;;  %v10344_v38 = vpack.c.bf16 %v1355_v37, %v1354_v36  ;;  %v1760_v36 = vld [vmem:[#allocation16 + $0x18] sm:$0xff] }
 0x41e   :  { %v822_v43 = vpop.f32.mrb[3].mxu0  ;;  %10281 = vmatprep.subr.bf16.mxu1 %v10280_v39  ;;  %v10340_v35 = vpack.c.bf16 %v1353_v34, %v1352_v33  ;;  %v13607_v37 = vld [vmem:[#allocation6 + $0x8] sm:$0xff] }
 0x41f   :  { %8886 = vmatprep.mubr.msk.f32.mxu1 %vm843_vm0, %v822_v43  ;;  %v1359_v43 = vld [vmem:[%s14589_s28 + $0x68] sm:$0xff] }
 0x420   :  { %8887 = vmatmul.mubr.msk.f32.gmra.mrb[2].mxu1 %vm843_vm0, %v8852_v42  ;;  %v1358_v42 = vld [vmem:[%s14589_s28 + $0x60] sm:$0xff] }
 0x421   :  { %10283 = vmatpush3.bf16.msra.mxu1 %v10280_v39  ;;  %v8899_v45 = vpop.f32.mrb[4].mxu0  ;;  %v1356_v39 = vld [vmem:[%s14589_s28 + $0x50] sm:$0xff] }
 0x422   :  { %10285 = vmatprep.subr.bf16.mxu1 %v10284_v44  ;;  %v1120_v46 = vpop.f32.mrb[5].mxu0  ;;  %v10348_v41 = vpack.c.bf16 %v1357_v40, %v1356_v39  ;;  %v1761_v40 = vld [vmem:[#allocation16 + $0x20] sm:$0xff] }
 0x423   :  { %8915 = vmatprep.mubr.msk.f32.mxu1 %vm843_vm0, %v1120_v46  ;;  %v1361_v46 = vld [vmem:[%s14589_s28 + $0x78] sm:$0xff] }
 0x425   :  { %10287 = vmatpush3.bf16.msra.mxu1 %v10284_v44  ;;  %v8902_v47 = vpop.f32.mrb[6].mxu0  ;;  %v10352_v44 = vpack.c.bf16 %v1359_v43, %v1358_v42  ;;  %v13618_v42 = vld [vmem:[#allocation6 + $0x18] sm:$0xff] }
 0x426   :  { %v1130_v48 = vpop.f32.mrb[7].mxu0 }
 0x428   :  { %8916 = vmatmul.mubr.msk.f32.vlgmr.msra.gmra.mrb[0].mxu1 %vm843_vm0, %v8899_v45  ;;  %v1360_v45 = vld [vmem:[%s14589_s28 + $0x70] sm:$0xff] }
 0x429   :  { %8918 = vmatprep.mubr.msk.f32.mxu1 %vm843_vm0, %v1130_v48  ;;  %v1633_v48 = vld [vmem:[#allocation15] sm:$0xff] }
 0x42c   :  { %8919 = vmatmul.mubr.msk.f32.gmra.mrb[2].mxu1 %vm843_vm0, %v8902_v47  ;;  %v10356_v47 = vpack.c.bf16 %v1361_v46, %v1360_v45  ;;  %v1764_v45 = vld [vmem:[#allocation16 + $0x38] sm:$0xff] }
 0x42d   :  { %9019 = vmatprep.mubr.msk.f32.mxu1 %vm733_vm1, %v1038_v21  ;;  %v1376_v21 = vld [vmem:[#allocation13 + $0x70] sm:$0xff] }
 0x42e   :  { %v10324_v23 = vpack.c.bf16 %v1377_v22, %v1376_v21 }
 0x4fb   :  { %v8917_v50 = vpop.f32.mrb[0].mxu1 }
 0x4fc   :  { %v13531_v51 = vadd.f32 %v8917_v50, %v7837_v49  ;;  %v1223_v52 = vpop.f32.mrb[1].mxu1 }
 0x4fd   :  { %v1253_v53 = vadd.f32 %v7837_v49, %v1223_v52  ;;  %v1636_v52 = vld [vmem:[#allocation15 + $0x18] sm:$0xff] }
 0x4fe   :  { %v1258_v54 = vmax.f32 %v13531_v51, 0.0  ;;  %v1635_v51 = vld [vmem:[#allocation15 + $0x10] sm:$0xff] }
 0x4ff   :  { %v1257_v55 = vmax.f32 %v1253_v53, 0.0  ;;  %v8920_v56 = vpop.f32.mrb[2].mxu1 }
 0x500   :  { %v13534_v57 = vadd.f32 %v8920_v56, %v7837_v49  ;;  %v1233_v58 = vpop.f32.mrb[3].mxu1  ;;  %v10372_v56 = vpack.c.bf16 %v1636_v52, %v1635_v51  ;;  %v1768_v51 = vld [vmem:[#allocation16 + $0x58] sm:$0xff] }
 0x501   :  { %v10288_v59 = vpack.c.bf16 %v1258_v54, %v1257_v55  ;;  %v13538_v60 = vadd.f32 %v7837_v49, %v1233_v58  ;;  %v1634_v49 = vld [vmem:[#allocation15 + $0x8] sm:$0xff]  ;;  %v1637_v58 = vld [vmem:[#allocation15 + $0x20] sm:$0xff] }
 0x502   :  { %v1260_v61 = vmax.f32 %v13534_v57, 0.0  ;;  %v10368_v50 = vpack.c.bf16 %v1634_v49, %v1633_v48  ;;  %v1766_v48 = vld [vmem:[#allocation16 + $0x48] sm:$0xff] }
 0x503   :  { %v1259_v0 = vmax.f32 %v13538_v60, 0.0  ;;  %10289 = vmatprep.subr.bf16.mxu0 %v10288_v59  ;;  %10361 = vmatprep.subr.bf16.mxu1 %v10288_v59 }
 0x504   :  { %10291 = vmatpush3.bf16.msra.mxu0 %v10288_v59  ;;  %10363 = vmatpush3.bf16.msra.mxu1 %v10288_v59  ;;  %v1638_v59 = vld [vmem:[#allocation15 + $0x28] sm:$0xff] }
 0x505   :  { %v10292_v1 = vpack.c.bf16 %v1260_v61, %v1259_v0  ;;  %v10376_v62 = vpack.c.bf16 %v1638_v59, %v1637_v58 }
 0x507   :  { %10293 = vmatprep.subr.bf16.mxu0 %v10292_v1  ;;  %10365 = vmatprep.subr.bf16.mxu1 %v10292_v1 }
 0x508   :  { %10295 = vmatpush3.bf16.msra.mxu0 %v10292_v1  ;;  %10367 = vmatpush3.bf16.msra.mxu1 %v10292_v1  ;;  %v1639_v1 = vld [vmem:[#allocation15 + $0x30] sm:$0xff] }
 0x509   :  { %10297 = vmatprep.subr.bf16.mxu0 %v10296_v2 }
 0x50b   :  { %8930 = vmatmul.mubr.msk.f32.vlgmr.msra.gmra.mrb[8].mxu0 %vm733_vm1, %v13493_v15  ;;  %9020 = vmatmul.mubr.msk.f32.vlgmr.msra.gmra.mrb[4].mxu1 %vm733_vm1, %v13506_v25  ;;  %v1372_v15 = vld [vmem:[#allocation13 + $0x50] sm:$0xff] }
 0x50c   :  { %10299 = vmatpush3.bf16.msra.mxu0 %v10296_v2  ;;  %8932 = vmatprep.mubr.msk.f32.mxu0 %vm733_vm1, %v13495_v16  ;;  %v1373_v16 = vld [vmem:[#allocation13 + $0x58] sm:$0xff] }
 0x50d   :  { %10301 = vmatprep.subr.bf16.mxu0 %v10300_v5  ;;  %9022 = vmatprep.mubr.msk.f32.mxu1 %vm733_vm1, %v13508_v26  ;;  %v10316_v17 = vpack.c.bf16 %v1373_v16, %v1372_v15  ;;  %v1347_v25 = vld [vmem:[%s14589_s28 + $0x8] sm:$0xff]  ;;  %v13580_v16 = vld [vmem:[#allocation6] sm:$0xff] }
 0x50e   :  { %v10328_v26 = vpack.c.bf16 %v1347_v25, %v1346_v24  ;;  %v1640_v2 = vld [vmem:[#allocation15 + $0x38] sm:$0xff] }
 0x50f   :  { %8933 = vmatmul.mubr.msk.f32.gmra.mrb[10].mxu0 %vm733_vm1, %v13501_v20  ;;  %9023 = vmatmul.mubr.msk.f32.gmra.mrb[6].mxu1 %vm733_vm1, %v13514_v30  ;;  %v10320_v20 = vpack.c.bf16 %v1375_v19, %v1374_v18  ;;  %v1350_v30 = vld [vmem:[%s14589_s28 + $0x20] sm:$0xff]  ;;  %v10380_v3 = vpack.c.bf16 %v1640_v2, %v1639_v1 }
 0x510   :  { %10303 = vmatpush3.bf16.msra.mxu0 %v10300_v5  ;;  %8967 = vmatprep.mubr.f32.mxu0 %v1257_v55  ;;  %v10336_v32 = vpack.c.bf16 %v1351_v31, %v1350_v30  ;;  %v1642_v5 = vld [vmem:[#allocation15 + $0x48] sm:$0xff]  ;;  %v1757_v30 = vld [vmem:[#allocation16] sm:$0xff] }
 0x511   :  { %10305 = vmatprep.subr.bf16.mxu0 %v10304_v8  ;;  %v10384_v6 = vpack.c.bf16 %v1642_v5, %v1641_v4  ;;  %9071 = vmatprep.mubr.msk.f32.mxu1 %vm733_vm1, %v13580_v16  ;;  %v1758_v31 = vld [vmem:[#allocation16 + $0x8] sm:$0xff] }
 0x512   :  { %v13605_v34 = vpack.c.bf16 %v1758_v31, %v1757_v30  ;;  %v7856_v30 = vld [vmem:[%s14592_s1] ss:$0 sm:$0xff] }
 0x514   :  { %10307 = vmatpush3.bf16.msra.mxu0 %v10304_v8  ;;  %v1644_v8 = vld [vmem:[#allocation15 + $0x58] sm:$0xff] }
 0x515   :  { %10309 = vmatprep.subr.bf16.mxu0 %v10308_v11  ;;  %v10388_v9 = vpack.c.bf16 %v1644_v8, %v1643_v7 }
 0x518   :  { %10311 = vmatpush3.bf16.msra.mxu0 %v10308_v11  ;;  %v1646_v11 = vld [vmem:[#allocation15 + $0x68] sm:$0xff] }
 0x519   :  { %10313 = vmatprep.subr.bf16.mxu0 %v10312_v14  ;;  %v10392_v12 = vpack.c.bf16 %v1646_v11, %v1645_v10 }
 0x51c   :  { %10315 = vmatpush3.bf16.msra.mxu0 %v10312_v14  ;;  %v1648_v14 = vld [vmem:[#allocation15 + $0x78] sm:$0xff] }
 0x51d   :  { %10317 = vmatprep.subr.bf16.mxu0 %v10316_v17  ;;  %v10396_v15 = vpack.c.bf16 %v1648_v14, %v1647_v13 }
 0x520   :  { %10319 = vmatpush3.bf16.msra.mxu0 %v10316_v17  ;;  %v7846_v17 = vld [vmem:[%s14590_s8] ss:$0 sm:$0xff] }
 0x521   :  { %10321 = vmatprep.subr.bf16.mxu0 %v10320_v20 }
 0x524   :  { %10323 = vmatpush3.bf16.msra.mxu0 %v10320_v20 }
 0x525   :  { %10325 = vmatprep.subr.bf16.mxu0 %v10324_v23 }
 0x528   :  { %10327 = vmatpush3.bf16.msra.mxu0 %v10324_v23 }
 0x529   :  { %10329 = vmatprep.subr.bf16.mxu0 %v10328_v26 }
 0x52b   :  { %8968 = vmatmul.mubr.f32.vlgmr.msra.gmra.mrb[12].mxu0 %v1258_v54 }
 0x52c   :  { %8970 = vmatprep.mubr.f32.mxu0 %v1259_v0  ;;  %10331 = vmatpush3.bf16.msra.mxu0 %v10328_v26 }
 0x52d   :  { %10333 = vmatprep.subr.bf16.mxu0 %v10332_v29 }
 0x52f   :  { %8971 = vmatmul.mubr.f32.gmra.mrb[14].mxu0 %v1260_v61 }
 0x530   :  { %10335 = vmatpush3.bf16.msra.mxu0 %v10332_v29 }
 0x531   :  { %10337 = vmatprep.subr.bf16.mxu0 %v10336_v32 }
 0x534   :  { %10339 = vmatpush3.bf16.msra.mxu0 %v10336_v32 }
 0x535   :  { %10341 = vmatprep.subr.bf16.mxu0 %v10340_v35 }
 0x538   :  { %10343 = vmatpush3.bf16.msra.mxu0 %v10340_v35  ;;  %v1759_v35 = vld [vmem:[#allocation16 + $0x10] sm:$0xff] }
 0x539   :  { %10345 = vmatprep.subr.bf16.mxu0 %v10344_v38  ;;  %v13612_v39 = vpack.c.bf16 %v1760_v36, %v1759_v35 }
 0x53c   :  { %10347 = vmatpush3.bf16.msra.mxu0 %v10344_v38  ;;  %v13609_v38 = vld [vmem:[#allocation6 + $0x10] sm:$0xff] }
 0x53d   :  { %10349 = vmatprep.subr.bf16.mxu0 %v10348_v41 }
 0x540   :  { %10351 = vmatpush3.bf16.msra.mxu0 %v10348_v41  ;;  %v1762_v41 = vld [vmem:[#allocation16 + $0x28] sm:$0xff] }
 0x541   :  { %10353 = vmatprep.subr.bf16.mxu0 %v10352_v44  ;;  %v13622_v43 = vpack.c.bf16 %v1762_v41, %v1761_v40 }
 0x544   :  { %10355 = vmatpush3.bf16.msra.mxu0 %v10352_v44  ;;  %v1763_v44 = vld [vmem:[#allocation16 + $0x30] sm:$0xff] }
 0x545   :  { %10357 = vmatprep.subr.bf16.mxu0 %v10356_v47  ;;  %v10420_v46 = vpack.c.bf16 %v1764_v45, %v1763_v44 }
 0x548   :  { %10359 = vmatpush3.bf16.msra.mxu0 %v10356_v47  ;;  %v1765_v47 = vld [vmem:[#allocation16 + $0x40] sm:$0xff] }
 0x549   :  { %10369 = vmatprep.subr.bf16.mxu0 %v10368_v50  ;;  %v10424_v49 = vpack.c.bf16 %v1766_v48, %v1765_v47  ;;  %v2165_v47 = vld [vmem:[#allocation18 + $0x10] sm:$0xff]  ;;  %v2166_v48 = vld [vmem:[#allocation18 + $0x18] sm:$0xff] }
 0x5de   :  { %v8931_v53 = vpop.f32.mrb[8].mxu0  ;;  %v9021_v54 = vpop.f32.mrb[4].mxu1 }
 0x5df   :  { %v1327_v55 = vpop.f32.mrb[9].mxu0  ;;  %v1614_v57 = vpop.f32.mrb[5].mxu1 }
 0x5e0   :  { %9005 = vmatprep.mubr.f32.mxu0 %v1327_v55 }
 0x5e1   :  { %9006 = vmatmul.mubr.f32.vlgmr.msra.gmra.mrb[12].mxu0 %v8931_v53  ;;  %v1769_v53 = vld [vmem:[#allocation16 + $0x60] sm:$0xff] }
 0x5e2   :  { %10371 = vmatpush3.bf16.msra.mxu0 %v10368_v50  ;;  %v8934_v60 = vpop.f32.mrb[10].mxu0  ;;  %v9024_v61 = vpop.f32.mrb[6].mxu1  ;;  %v1767_v50 = vld [vmem:[#allocation16 + $0x50] sm:$0xff] }
 0x5e3   :  { %10373 = vmatprep.subr.bf16.mxu0 %v10372_v56  ;;  %v1337_v63 = vpop.f32.mrb[11].mxu0  ;;  %v1624_v0 = vpop.f32.mrb[7].mxu1  ;;  %v10428_v52 = vpack.c.bf16 %v1768_v51, %v1767_v50  ;;  %v2351_v50 = vld [vmem:[#allocation21] sm:$0xff]  ;;  %v2352_v51 = vld [vmem:[#allocation21 + $0x8] sm:$0xff] }
 0x5e4   :  { %9008 = vmatprep.mubr.f32.mxu0 %v1337_v63 }
 0x5e5   :  { %9009 = vmatmul.mubr.f32.gmra.mrb[14].mxu0 %v8934_v60 }
 0x5e6   :  { %10375 = vmatpush3.bf16.msra.mxu0 %v10372_v56  ;;  %9057 = vmatprep.mubr.f32.mxu0 %v1614_v57  ;;  %v1771_v56 = vld [vmem:[#allocation16 + $0x70] sm:$0xff]  ;;  %v1772_v57 = vld [vmem:[#allocation16 + $0x78] sm:$0xff] }
 0x5e7   :  { %10377 = vmatprep.subr.bf16.mxu0 %v10376_v62  ;;  %v10436_v58 = vpack.c.bf16 %v1772_v57, %v1771_v56  ;;  %v2355_v56 = vld [vmem:[#allocation21 + $0x20] sm:$0xff]  ;;  %v2356_v57 = vld [vmem:[#allocation21 + $0x28] sm:$0xff] }
 0x5ea   :  { %10379 = vmatpush3.bf16.msra.mxu0 %v10376_v62 }
 0x5eb   :  { %10381 = vmatprep.subr.bf16.mxu0 %v10380_v3 }
 0x5ee   :  { %10383 = vmatpush3.bf16.msra.mxu0 %v10380_v3 }
 0x5ef   :  { %10385 = vmatprep.subr.bf16.mxu0 %v10384_v6 }
 0x5f2   :  { %10387 = vmatpush3.bf16.msra.mxu0 %v10384_v6 }
 0x5f3   :  { %10389 = vmatprep.subr.bf16.mxu0 %v10388_v9 }
 0x5f6   :  { %10391 = vmatpush3.bf16.msra.mxu0 %v10388_v9 }
 0x5f7   :  { %10393 = vmatprep.subr.bf16.mxu0 %v10392_v12 }
 0x5fa   :  { %10395 = vmatpush3.bf16.msra.mxu0 %v10392_v12 }
 0x5fb   :  { %10397 = vmatprep.subr.bf16.mxu0 %v10396_v15 }
 0x5fe   :  { %10399 = vmatpush3.bf16.msra.mxu0 %v10396_v15 }
 0x601   :  { %9058 = vmatmul.mubr.f32.vlgmr.msra.gmra.mrb[12].mxu0 %v9021_v54  ;;  %v1770_v54 = vld [vmem:[#allocation16 + $0x68] sm:$0xff] }
 0x602   :  { %9060 = vmatprep.mubr.f32.mxu0 %v1624_v0  ;;  %v10432_v55 = vpack.c.bf16 %v1770_v54, %v1769_v53  ;;  %v10496_v53 = vpack.c.bf16 %v2352_v51, %v2351_v50  ;;  %v2354_v54 = vld [vmem:[#allocation21 + $0x18] sm:$0xff]  ;;  %v2458_v50 = vld [vmem:[%s14593_s5 + $0x70] sm:$0xff] }
 0x603   :  { %v2459_v51 = vld [vmem:[%s14593_s5 + $0x78] sm:$0xff] }
 0x605   :  { %9061 = vmatmul.mubr.f32.gmra.mrb[14].mxu0 %v9024_v61 }
 0x6d4   :  { %v9059_v18 = vpop.f32.mrb[12].mxu0 }
 0x6d5   :  { %v13585_v19 = vadd.f32 %v9059_v18, %v7846_v17  ;;  %v1715_v20 = vpop.f32.mrb[13].mxu0 }
 0x6d6   :  { %v13587_v21 = vadd.f32 %v7846_v17, %v1715_v20 }
 0x6d7   :  { %v1750_v22 = vmax.f32 %v13585_v19, 0.0 }
 0x6d8   :  { %v1749_v23 = vmax.f32 %v13587_v21, 0.0  ;;  %v9062_v24 = vpop.f32.mrb[14].mxu0 }
 0x6d9   :  { %v13591_v25 = vadd.f32 %v9062_v24, %v7846_v17  ;;  %v1725_v26 = vpop.f32.mrb[15].mxu0 }
 0x6da   :  { %v10400_v27 = vpack.c.bf16 %v1750_v22, %v1749_v23  ;;  %v13597_v28 = vadd.f32 %v7846_v17, %v1725_v26  ;;  %v2163_v17 = vld [vmem:[#allocation18] sm:$0xff] }
 0x6db   :  { %v1752_v29 = vmax.f32 %v13591_v25, 0.0  ;;  %9175 = vmatprep.mubr.msk.f32.mxu0 %vm733_vm1, %v2163_v17 }
 0x6dc   :  { %v1751_v32 = vmax.f32 %v13597_v28, 0.0  ;;  %10401 = vmatprep.subr.bf16.mxu1 %v10400_v27 }
 0x6dd   :  { %10403 = vmatpush3.bf16.msra.mxu1 %v10400_v27  ;;  %v7855_v27 = vld [vmem:[%s14591_s3] ss:$0 sm:$0xff] }
 0x6de   :  { %v10404_v33 = vpack.c.bf16 %v1752_v29, %v1751_v32 }
 0x6e0   :  { %10405 = vmatprep.subr.bf16.mxu1 %v10404_v33 }
 0x6e1   :  { %10407 = vmatpush3.bf16.msra.mxu1 %v10404_v33 }
 0x6e2   :  { %10409 = vmatprep.subr.bf16.mxu1 %v13605_v34 }
 0x6e4   :  { %9072 = vmatmul.mubr.msk.f32.vlgmr.msra.gmra.mrb[8].mxu1 %vm733_vm1, %v13607_v37 }
 0x6e5   :  { %9074 = vmatprep.mubr.msk.f32.mxu1 %vm733_vm1, %v13609_v38  ;;  %10411 = vmatpush3.bf16.msra.mxu1 %v13605_v34 }
 0x6e6   :  { %10413 = vmatprep.subr.bf16.mxu1 %v13612_v39 }
 0x6e8   :  { %9075 = vmatmul.mubr.msk.f32.gmra.mrb[10].mxu1 %vm733_vm1, %v13618_v42 }
 0x6e9   :  { %10415 = vmatpush3.bf16.msra.mxu1 %v13612_v39 }
 0x6ea   :  { %10417 = vmatprep.subr.bf16.mxu1 %v13622_v43 }
 0x6ed   :  { %10419 = vmatpush3.bf16.msra.mxu1 %v13622_v43 }
 0x6ee   :  { %10421 = vmatprep.subr.bf16.mxu1 %v10420_v46 }
 0x6f1   :  { %10423 = vmatpush3.bf16.msra.mxu1 %v10420_v46 }
 0x6f2   :  { %10425 = vmatprep.subr.bf16.mxu1 %v10424_v49 }
 0x6f5   :  { %10427 = vmatpush3.bf16.msra.mxu1 %v10424_v49 }
 0x6f6   :  { %10429 = vmatprep.subr.bf16.mxu1 %v10428_v52 }
 0x6f9   :  { %10431 = vmatpush3.bf16.msra.mxu1 %v10428_v52 }
 0x6fa   :  { %10433 = vmatprep.subr.bf16.mxu1 %v10432_v55 }
 0x6fd   :  { %10435 = vmatpush3.bf16.msra.mxu1 %v10432_v55 }
 0x6fe   :  { %10437 = vmatprep.subr.bf16.mxu1 %v10436_v58 }
 0x701   :  { %10439 = vmatpush3.bf16.msra.mxu1 %v10436_v58 }
 0x7b7   :  { %v9073_v59 = vpop.f32.mrb[8].mxu1 }
 0x7b8   :  { %v1851_v60 = vpop.f32.mrb[9].mxu1 }
 0x7b9   :  { %9109 = vmatprep.mubr.f32.mxu1 %v1851_v60  ;;  %v2358_v60 = vld [vmem:[#allocation21 + $0x38] sm:$0xff] }
 0x7ba   :  { %9110 = vmatmul.mubr.f32.vlgmr.msra.gmra.mrb[12].mxu1 %v9073_v59  ;;  %v2357_v59 = vld [vmem:[#allocation21 + $0x30] sm:$0xff] }
 0x7bb   :  { %v9076_v61 = vpop.f32.mrb[10].mxu1 }
 0x7bc   :  { %v1861_v62 = vpop.f32.mrb[11].mxu1 }
 0x7bd   :  { %9112 = vmatprep.mubr.f32.mxu1 %v1861_v62  ;;  %v2359_v62 = vld [vmem:[#allocation21 + $0x40] sm:$0xff] }
 0x7be   :  { %9113 = vmatmul.mubr.f32.gmra.mrb[14].mxu1 %v9076_v61  ;;  %v10508_v61 = vpack.c.bf16 %v2358_v60, %v2357_v59  ;;  %v2631_v59 = vld [vmem:[#allocation28 + $0x20] sm:$0xff]  ;;  %v2632_v60 = vld [vmem:[#allocation28 + $0x28] sm:$0xff] }
 0x7bf   :  { %9123 = vmatprep.mubr.msk.f32.mxu1 %vm733_vm1, %v13580_v16 }
 0x88d   :  { %v9111_v63 = vpop.f32.mrb[12].mxu1 }
 0x88e   :  { %v1956_v0 = vsub.f32 %v1750_v22, %v9111_v63  ;;  %v1936_v1 = vpop.f32.mrb[13].mxu1  ;;  %v2360_v63 = vld [vmem:[#allocation21 + $0x48] sm:$0xff] }
 0x88f   :  { %v1955_v2 = vsub.f32 %v1749_v23, %v1936_v1  ;;  %v2361_v1 = vld [vmem:[#allocation21 + $0x50] sm:$0xff] }
 0x890   :  { %v1960_v3 = vmul.f32 %v1956_v0, %v1956_v0 }
 0x891   :  { %v1959_v4 = vmul.f32 %v1955_v2, %v1955_v2  ;;  %v9114_v5 = vpop.f32.mrb[14].mxu1 }
 0x892   :  { %v13637_v6 = vsub.f32 %v1752_v29, %v9114_v5  ;;  %v1946_v7 = vpop.f32.mrb[15].mxu1  ;;  %v2364_v5 = vld [vmem:[#allocation21 + $0x68] sm:$0xff] }
 0x893   :  { %v13641_v8 = vsub.f32 %v1751_v32, %v1946_v7  ;;  %v10440_v9 = vpack.c.bf16 %v1960_v3, %v1959_v4  ;;  %v2363_v4 = vld [vmem:[#allocation21 + $0x60] sm:$0xff]  ;;  %v2365_v7 = vld [vmem:[#allocation21 + $0x70] sm:$0xff] }
 0x894   :  { %v1962_v10 = vmul.f32 %v13637_v6, %v13637_v6 }
 0x895   :  { %v1961_v11 = vmul.f32 %v13641_v8, %v13641_v8  ;;  %10441 = vmatprep.subr.bf16.mxu1 %v10440_v9 }
 0x896   :  { %10443 = vmatpush3.bf16.msra.mxu1 %v10440_v9 }
 0x897   :  { %v10444_v12 = vpack.c.bf16 %v1962_v10, %v1961_v11 }
 0x899   :  { %10445 = vmatprep.subr.bf16.mxu1 %v10444_v12 }
 0x89a   :  { %10447 = vmatpush3.bf16.msra.mxu1 %v10444_v12 }
 0x89b   :  { %10449 = vmatprep.subr.bf16.mxu1 %v13605_v34 }
 0x89d   :  { %9124 = vmatmul.mubr.msk.f32.vlgmr.msra.gmra.mrb[16].mxu1 %vm733_vm1, %v13607_v37 }
 0x89e   :  { %9126 = vmatprep.mubr.msk.f32.mxu1 %vm733_vm1, %v13609_v38  ;;  %10451 = vmatpush3.bf16.msra.mxu1 %v13605_v34 }
 0x89f   :  { %10453 = vmatprep.subr.bf16.mxu1 %v13612_v39 }
 0x8a1   :  { %9127 = vmatmul.mubr.msk.f32.gmra.mrb[18].mxu1 %vm733_vm1, %v13618_v42 }
 0x8a2   :  { %10455 = vmatpush3.bf16.msra.mxu1 %v13612_v39 }
 0x8a3   :  { %10457 = vmatprep.subr.bf16.mxu1 %v13622_v43 }
 0x8a6   :  { %10459 = vmatpush3.bf16.msra.mxu1 %v13622_v43 }
 0x8a7   :  { %10461 = vmatprep.subr.bf16.mxu1 %v10420_v46 }
 0x8aa   :  { %10463 = vmatpush3.bf16.msra.mxu1 %v10420_v46  ;;  %v2164_v46 = vld [vmem:[#allocation18 + $0x8] sm:$0xff] }
 0x8ab   :  { %10465 = vmatprep.subr.bf16.mxu1 %v10424_v49 }
 0x8ae   :  { %10467 = vmatpush3.bf16.msra.mxu1 %v10424_v49  ;;  %v2268_v49 = vld [vmem:[#allocation19] sm:$0xff] }
 0x8af   :  { %10469 = vmatprep.subr.bf16.mxu1 %v10428_v52 }
 0x8b2   :  { %10471 = vmatpush3.bf16.msra.mxu1 %v10428_v52  ;;  %v2353_v52 = vld [vmem:[#allocation21 + $0x10] sm:$0xff] }
 0x8b3   :  { %10473 = vmatprep.subr.bf16.mxu1 %v10432_v55 }
 0x8b6   :  { %10475 = vmatpush3.bf16.msra.mxu1 %v10432_v55  ;;  %v10500_v55 = vpack.c.bf16 %v2354_v54, %v2353_v52  ;;  %v10556_v52 = vpack.c.bf16 %v2459_v51, %v2458_v50  ;;  %v2628_v54 = vld [vmem:[#allocation28 + $0x8] sm:$0xff] }
 0x8b7   :  { %10477 = vmatprep.subr.bf16.mxu1 %v10436_v58 }
 0x8ba   :  { %10479 = vmatpush3.bf16.msra.mxu1 %v10436_v58  ;;  %v10504_v58 = vpack.c.bf16 %v2356_v57, %v2355_v56  ;;  %v2630_v57 = vld [vmem:[#allocation28 + $0x18] sm:$0xff] }
 0x970   :  { %v9125_v13 = vpop.f32.mrb[16].mxu1 }
 0x971   :  { %v2029_v14 = vpop.f32.mrb[17].mxu1 }
 0x972   :  { %9161 = vmatprep.mubr.f32.mxu1 %v2029_v14 }
 0x973   :  { %9162 = vmatmul.mubr.f32.vlgmr.msra.gmra.mrb[20].mxu1 %v9125_v13 }
 0x974   :  { %v9128_v15 = vpop.f32.mrb[18].mxu1 }
 0x975   :  { %v2039_v16 = vpop.f32.mrb[19].mxu1 }
 0x976   :  { %9164 = vmatprep.mubr.f32.mxu1 %v2039_v16 }
 0x977   :  { %9165 = vmatmul.mubr.f32.gmra.mrb[22].mxu1 %v9128_v15 }
 0x978   :  { %9189 = vmatprep.mubr.msk.f32.mxu1 %vm733_vm1, %v2268_v49 }
 0xa46   :  { %v9163_v18 = vpop.f32.mrb[20].mxu1 }
 0xa47   :  { %v2120_v19 = vadd.f32 1e-05, %v9163_v18  ;;  %v2114_v20 = vpop.f32.mrb[21].mxu1 }
 0xa48   :  { %v2115_v21 = vadd.f32 1e-05, %v2114_v20  ;;  %v2269_v20 = vld [vmem:[#allocation19 + $0x8] sm:$0xff] }
 0xa49   :  { %11828 = vrsqrt.f32 %v2120_v19 }
 0xa4a   :  { %11830 = vrsqrt.f32 %v2115_v21  ;;  %v9166_v22 = vpop.f32.mrb[22].mxu1  ;;  %v2444_v21 = vld [vmem:[%s14593_s5] sm:$0xff] }
 0xa4b   :  { %v2130_v23 = vadd.f32 1e-05, %v9166_v22  ;;  %v2124_v24 = vpop.f32.mrb[23].mxu1  ;;  %v2445_v22 = vld [vmem:[%s14593_s5 + $0x8] sm:$0xff] }
 0xa4c   :  { %v2125_v25 = vadd.f32 1e-05, %v2124_v24  ;;  %v10528_v24 = vpack.c.bf16 %v2445_v22, %v2444_v21  ;;  %v2626_v21 = vld [vmem:[#allocation27 + $0x38] sm:$0xff]  ;;  %v2799_v22 = vld [vmem:[#allocation24 + $0x8] sm:$0xff] }
 0xa4d   :  { %11832 = vrsqrt.f32 %v2130_v23  ;;  %v2446_v23 = vld [vmem:[%s14593_s5 + $0x10] sm:$0xff] }
 0xa4e   :  { %11834 = vrsqrt.f32 %v2125_v25  ;;  %v2447_v25 = vld [vmem:[%s14593_s5 + $0x18] sm:$0xff] }
 0xa53   :  { %v11829_v26 = vpop.eup %11828 }
 0xa54   :  { %v11831_v28 = vpop.eup %11830  ;;  %v2138_v29 = vmul.f32 %v11829_v26, %v1956_v0  ;;  %v10512_v0 = vpack.c.bf16 %v2360_v63, %v2359_v62  ;;  %v10532_v26 = vpack.c.bf16 %v2447_v25, %v2446_v23  ;;  %v2633_v62 = vld [vmem:[#allocation28 + $0x30] sm:$0xff]  ;;  %v2634_v63 = vld [vmem:[#allocation28 + $0x38] sm:$0xff]  ;;  %v2882_v25 = vld [vmem:[#allocation30 + $0x8] sm:$0xff] }
 0xa55   :  { %v2137_v31 = vmul.f32 %v11831_v28, %v1955_v2  ;;  %v2362_v2 = vld [vmem:[#allocation21 + $0x58] sm:$0xff]  ;;  %v2449_v28 = vld [vmem:[%s14593_s5 + $0x28] sm:$0xff] }
 0xa56   :  { %v2149_v32 = vmul.f32 %v7855_v27, %v2138_v29  ;;  %v10516_v3 = vpack.c.bf16 %v2362_v2, %v2361_v1 }
 0xa57   :  { %v11833_v33 = vpop.eup %11832  ;;  %v2148_v34 = vmul.f32 %v7855_v27, %v2137_v31  ;;  %v2451_v31 = vld [vmem:[%s14593_s5 + $0x38] sm:$0xff] }
 0xa58   :  { %v11835_v35 = vpop.eup %11834  ;;  %v13662_v36 = vadd.f32 %v7856_v30, %v2149_v32  ;;  %v2140_v37 = vmul.f32 %v11833_v33, %v13637_v6  ;;  %v10520_v6 = vpack.c.bf16 %v2364_v5, %v2363_v4  ;;  %v2452_v33 = vld [vmem:[%s14593_s5 + $0x40] sm:$0xff] }
 0xa59   :  { %v13665_v38 = vadd.f32 %v7856_v30, %v2148_v34  ;;  %v2139_v39 = vmul.f32 %v11835_v35, %v13641_v8  ;;  %v2366_v8 = vld [vmem:[#allocation21 + $0x78] sm:$0xff]  ;;  %v2453_v34 = vld [vmem:[%s14593_s5 + $0x48] sm:$0xff] }
 0xa5a   :  { %v2151_v40 = vmul.f32 %v7855_v27, %v2140_v37  ;;  %v10524_v9 = vpack.c.bf16 %v2366_v8, %v2365_v7  ;;  %v10544_v35 = vpack.c.bf16 %v2453_v34, %v2452_v33  ;;  %v2454_v37 = vld [vmem:[%s14593_s5 + $0x50] sm:$0xff]  ;;  %v2535_v5 = vld [vmem:[#allocation22] sm:$0xff]  ;;  %v2620_v7 = vld [vmem:[#allocation27 + $0x8] sm:$0xff] }
 0xa5b   :  { %v2150_v41 = vmul.f32 %v7855_v27, %v2139_v39  ;;  %v13670_v42 = vpack.c.bf16 %v13662_v36, %v13665_v38  ;;  %v2448_v27 = vld [vmem:[%s14593_s5 + $0x20] sm:$0xff]  ;;  %v2455_v39 = vld [vmem:[%s14593_s5 + $0x58] sm:$0xff] }
 0xa5c   :  { %v13672_v43 = vadd.f32 %v7856_v30, %v2151_v40  ;;  %v10536_v29 = vpack.c.bf16 %v2449_v28, %v2448_v27  ;;  %v10548_v40 = vpack.c.bf16 %v2455_v39, %v2454_v37  ;;  %v2883_v27 = vld [vmem:[#allocation30 + $0x10] sm:$0xff]  ;;  %v2884_v28 = vld [vmem:[#allocation30 + $0x18] sm:$0xff]  ;;  %v2886_v33 = vld [vmem:[#allocation30 + $0x28] sm:$0xff] }
 0xa5d   :  { %v13674_v44 = vadd.f32 %v7856_v30, %v2150_v41  ;;  %10481 = vmatprep.subr.bf16.mxu0 %v13670_v42  ;;  %v2450_v30 = vld [vmem:[%s14593_s5 + $0x30] sm:$0xff]  ;;  %v2456_v41 = vld [vmem:[%s14593_s5 + $0x60] sm:$0xff] }
 0xa5e   :  { %10483 = vmatpush3.bf16.msra.mxu0 %v13670_v42  ;;  %v10540_v32 = vpack.c.bf16 %v2451_v31, %v2450_v30  ;;  %v10604_v31 = vpack.c.bf16 %v2884_v28, %v2883_v27  ;;  %v2887_v39 = vld [vmem:[#allocation30 + $0x30] sm:$0xff]  ;;  %v3067_v27 = vld [vmem:[#allocation31 + $0x48] sm:$0xff] }
 0xa5f   :  { %v13680_v45 = vpack.c.bf16 %v13672_v43, %v13674_v44 }
 0xa61   :  { %10485 = vmatprep.subr.bf16.mxu0 %v13680_v45 }
 0xa62   :  { %10487 = vmatpush3.bf16.msra.mxu0 %v13680_v45 }
 0xa63   :  { %10497 = vmatprep.subr.bf16.mxu0 %v10496_v53 }
 0xa65   :  { %9176 = vmatmul.mubr.msk.f32.vlgmr.msra.gmra.mrb[16].mxu0 %vm733_vm1, %v2164_v46  ;;  %v2457_v46 = vld [vmem:[%s14593_s5 + $0x68] sm:$0xff] }
 0xa66   :  { %9178 = vmatprep.mubr.msk.f32.mxu0 %vm733_vm1, %v2165_v47  ;;  %10499 = vmatpush3.bf16.msra.mxu0 %v10496_v53  ;;  %v10552_v47 = vpack.c.bf16 %v2457_v46, %v2456_v41  ;;  %v2627_v53 = vld [vmem:[#allocation28] sm:$0xff]  ;;  %v7873_v46 = vld [vmem:[%s14594_s2] ss:$0 sm:$0xff] }
 0xa67   :  { %10501 = vmatprep.subr.bf16.mxu0 %v10500_v55  ;;  %v10564_v56 = vpack.c.bf16 %v2628_v54, %v2627_v53  ;;  %v3075_v53 = vld [vmem:[#allocation33 + $0x8] sm:$0xff] }
 0xa69   :  { %9179 = vmatmul.mubr.msk.f32.gmra.mrb[18].mxu0 %vm733_vm1, %v2166_v48 }
 0xa6a   :  { %10503 = vmatpush3.bf16.msra.mxu0 %v10500_v55  ;;  %v2629_v55 = vld [vmem:[#allocation28 + $0x10] sm:$0xff] }
 0xa6b   :  { %10505 = vmatprep.subr.bf16.mxu0 %v10504_v58 }
 0xa6e   :  { %10507 = vmatpush3.bf16.msra.mxu0 %v10504_v58  ;;  %v10568_v58 = vpack.c.bf16 %v2630_v57, %v2629_v55  ;;  %v3076_v57 = vld [vmem:[#allocation33 + $0x10] sm:$0xff] }
 0xa6f   :  { %10509 = vmatprep.subr.bf16.mxu0 %v10508_v61 }
 0xa72   :  { %10511 = vmatpush3.bf16.msra.mxu0 %v10508_v61  ;;  %v10572_v61 = vpack.c.bf16 %v2632_v60, %v2631_v59  ;;  %v3078_v60 = vld [vmem:[#allocation33 + $0x20] sm:$0xff] }
 0xa73   :  { %10513 = vmatprep.subr.bf16.mxu0 %v10512_v0 }
 0xa76   :  { %10515 = vmatpush3.bf16.msra.mxu0 %v10512_v0  ;;  %v10576_v0 = vpack.c.bf16 %v2634_v63, %v2633_v62  ;;  %v3080_v63 = vld [vmem:[#allocation33 + $0x30] sm:$0xff] }
 0xa77   :  { %10517 = vmatprep.subr.bf16.mxu0 %v10516_v3 }
 0xa7a   :  { %10519 = vmatpush3.bf16.msra.mxu0 %v10516_v3 }
 0xa7b   :  { %10521 = vmatprep.subr.bf16.mxu0 %v10520_v6 }
 0xa7e   :  { %10523 = vmatpush3.bf16.msra.mxu0 %v10520_v6  ;;  %v2619_v6 = vld [vmem:[#allocation27] sm:$0xff] }
 0xa7f   :  { %10525 = vmatprep.subr.bf16.mxu0 %v10524_v9  ;;  %v10580_v8 = vpack.c.bf16 %v2620_v7, %v2619_v6  ;;  %v3085_v6 = vld [vmem:[#allocation33 + $0x58] sm:$0xff] }
 0xa82   :  { %10527 = vmatpush3.bf16.msra.mxu0 %v10524_v9  ;;  %v2621_v9 = vld [vmem:[#allocation27 + $0x10] sm:$0xff] }
 0xa83   :  { %10565 = vmatprep.subr.bf16.mxu0 %v10564_v56 }
 0xb38   :  { %v9177_v10 = vpop.f32.mrb[16].mxu0 }
 0xb39   :  { %v2265_v11 = vmax.f32 %v13662_v36, %v9177_v10  ;;  %v2245_v12 = vpop.f32.mrb[17].mxu0  ;;  %v2622_v10 = vld [vmem:[#allocation27 + $0x18] sm:$0xff] }
 0xb3a   :  { %v2264_v13 = vmax.f32 %v13665_v38, %v2245_v12 }
 0xb3c   :  { %v10488_v14 = vpack.c.bf16 %v2265_v11, %v2264_v13  ;;  %v9180_v15 = vpop.f32.mrb[18].mxu0  ;;  %v10584_v13 = vpack.c.bf16 %v2622_v10, %v2621_v9  ;;  %v3087_v9 = vld [vmem:[#allocation33 + $0x68] sm:$0xff] }
 0xb3d   :  { %v2267_v16 = vmax.f32 %v13672_v43, %v9180_v15  ;;  %v2255_v17 = vpop.f32.mrb[19].mxu0  ;;  %v2623_v15 = vld [vmem:[#allocation27 + $0x20] sm:$0xff] }
 0xb3e   :  { %v2266_v18 = vmax.f32 %v13674_v44, %v2255_v17  ;;  %10489 = vmatprep.subr.bf16.mxu1 %v10488_v14  ;;  %v13712_v17 = vld [vmem:[#allocation22 + $0x8] sm:$0xff] }
 0xb3f   :  { %10491 = vmatpush3.bf16.msra.mxu1 %v10488_v14 }
 0xb40   :  { %v10492_v19 = vpack.c.bf16 %v2267_v16, %v2266_v18  ;;  %v2624_v16 = vld [vmem:[#allocation27 + $0x28] sm:$0xff]  ;;  %v2798_v18 = vld [vmem:[#allocation24] sm:$0xff] }
 0xb42   :  { %10493 = vmatprep.subr.bf16.mxu1 %v10492_v19 }
 0xb43   :  { %10495 = vmatpush3.bf16.msra.mxu1 %v10492_v19  ;;  %v10588_v19 = vpack.c.bf16 %v2624_v16, %v2623_v15  ;;  %v3059_v15 = vld [vmem:[#allocation31 + $0x8] sm:$0xff] }
 0xb44   :  { %10529 = vmatprep.subr.bf16.mxu1 %v10528_v24 }
 0xb46   :  { %9190 = vmatmul.mubr.msk.f32.vlgmr.msra.gmra.mrb[24].mxu1 %vm733_vm1, %v2269_v20  ;;  %v2625_v20 = vld [vmem:[#allocation27 + $0x30] sm:$0xff] }
 0xb47   :  { %10531 = vmatpush3.bf16.msra.mxu1 %v10528_v24  ;;  %v10592_v23 = vpack.c.bf16 %v2626_v21, %v2625_v20  ;;  %v2881_v24 = vld [vmem:[#allocation30] sm:$0xff]  ;;  %v3063_v21 = vld [vmem:[#allocation31 + $0x28] sm:$0xff] }
 0xb48   :  { %10533 = vmatprep.subr.bf16.mxu1 %v10532_v26  ;;  %v3062_v20 = vld [vmem:[#allocation31 + $0x20] sm:$0xff] }
 0xb4b   :  { %10535 = vmatpush3.bf16.msra.mxu1 %v10532_v26  ;;  %v10600_v26 = vpack.c.bf16 %v2882_v25, %v2881_v24  ;;  %v3065_v24 = vld [vmem:[#allocation31 + $0x38] sm:$0xff] }
 0xb4c   :  { %10537 = vmatprep.subr.bf16.mxu1 %v10536_v29 }
 0xb4f   :  { %10539 = vmatpush3.bf16.msra.mxu1 %v10536_v29 }
 0xb50   :  { %10541 = vmatprep.subr.bf16.mxu1 %v10540_v32 }
 0xb53   :  { %10543 = vmatpush3.bf16.msra.mxu1 %v10540_v32  ;;  %v2885_v32 = vld [vmem:[#allocation30 + $0x20] sm:$0xff] }
 0xb54   :  { %10545 = vmatprep.subr.bf16.mxu1 %v10544_v35 }
 0xb57   :  { %10547 = vmatpush3.bf16.msra.mxu1 %v10544_v35  ;;  %v10608_v35 = vpack.c.bf16 %v2886_v33, %v2885_v32  ;;  %v3070_v32 = vld [vmem:[#allocation31 + $0x60] sm:$0xff]  ;;  %v3071_v33 = vld [vmem:[#allocation31 + $0x68] sm:$0xff] }
 0xb58   :  { %10549 = vmatprep.subr.bf16.mxu1 %v10548_v40 }
 0xb5b   :  { %10551 = vmatpush3.bf16.msra.mxu1 %v10548_v40  ;;  %v2888_v40 = vld [vmem:[#allocation30 + $0x38] sm:$0xff] }
 0xb5c   :  { %10553 = vmatprep.subr.bf16.mxu1 %v10552_v47  ;;  %v10612_v41 = vpack.c.bf16 %v2888_v40, %v2887_v39  ;;  %v3315_v40 = vld [vmem:[#allocation34] sm:$0xff] }
 0xb5f   :  { %10555 = vmatpush3.bf16.msra.mxu1 %v10552_v47 }
 0xb60   :  { %10557 = vmatprep.subr.bf16.mxu1 %v10556_v52 }
 0xb63   :  { %10559 = vmatpush3.bf16.msra.mxu1 %v10556_v52  ;;  %v3074_v52 = vld [vmem:[#allocation33] sm:$0xff] }
 0xc19   :  { %v9191_v48 = vpop.f32.mrb[24].mxu1 }
 0xc1a   :  { %v2342_v49 = vpop.f32.mrb[25].mxu1 }
 0xc1b   :  { %9224 = vmatprep.mubr.f32.mxu0 %v2342_v49 }
 0xc1c   :  { %9225 = vmatmul.mubr.f32.vlgmr.msra.gmra.mrb[20].mxu0 %v9191_v48 }
 0xc1d   :  { %10567 = vmatpush3.bf16.msra.mxu0 %v10564_v56  ;;  %v10620_v56 = vpack.c.bf16 %v3075_v53, %v3074_v52 }
 0xc1e   :  { %10569 = vmatprep.subr.bf16.mxu0 %v10568_v58 }
 0xc21   :  { %10571 = vmatpush3.bf16.msra.mxu0 %v10568_v58  ;;  %v3077_v58 = vld [vmem:[#allocation33 + $0x18] sm:$0xff] }
 0xc22   :  { %10573 = vmatprep.subr.bf16.mxu0 %v10572_v61  ;;  %v10624_v59 = vpack.c.bf16 %v3077_v58, %v3076_v57  ;;  %v3321_v57 = vld [vmem:[#allocation34 + $0x30] sm:$0xff]  ;;  %v3322_v58 = vld [vmem:[#allocation34 + $0x38] sm:$0xff] }
 0xc25   :  { %10575 = vmatpush3.bf16.msra.mxu0 %v10572_v61  ;;  %v3079_v61 = vld [vmem:[#allocation33 + $0x28] sm:$0xff] }
 0xc26   :  { %10577 = vmatprep.subr.bf16.mxu0 %v10576_v0  ;;  %v10628_v62 = vpack.c.bf16 %v3079_v61, %v3078_v60  ;;  %v3323_v60 = vld [vmem:[#allocation34 + $0x40] sm:$0xff]  ;;  %v3324_v61 = vld [vmem:[#allocation34 + $0x48] sm:$0xff] }
 0xc29   :  { %10579 = vmatpush3.bf16.msra.mxu0 %v10576_v0  ;;  %v3081_v0 = vld [vmem:[#allocation33 + $0x38] sm:$0xff] }
 0xc2a   :  { %10581 = vmatprep.subr.bf16.mxu0 %v10580_v8 }
 0xcef   :  { %v9226_v1 = vpop.f32.mrb[20].mxu0 }
 0xcf0   :  { %v2443_v2 = vmax.f32 %v9191_v48, %v9226_v1  ;;  %v2433_v3 = vpop.f32.mrb[21].mxu0  ;;  %v10632_v1 = vpack.c.bf16 %v3081_v0, %v3080_v63  ;;  %v3325_v63 = vld [vmem:[#allocation34 + $0x50] sm:$0xff]  ;;  %v3326_v0 = vld [vmem:[#allocation34 + $0x58] sm:$0xff] }
 0xcf1   :  { %v2442_v4 = vmax.f32 %v2342_v49, %v2433_v3  ;;  %v3083_v3 = vld [vmem:[#allocation33 + $0x48] sm:$0xff] }
 0xcf3   :  { %9259 = vmatprep.mubr.f32.mxu1 %v2442_v4 }
 0xcf4   :  { %9260 = vmatmul.mubr.f32.vlgmr.msra.gmra.mrb[26].mxu1 %v2443_v2  ;;  %v3082_v2 = vld [vmem:[#allocation33 + $0x40] sm:$0xff] }
 0xcf5   :  { %9266 = vmatprep.mubr.msk.f32.mxu1 %vm2537_vm2, %v2535_v5  ;;  %v10636_v4 = vpack.c.bf16 %v3083_v3, %v3082_v2  ;;  %v3327_v2 = vld [vmem:[#allocation34 + $0x60] sm:$0xff]  ;;  %v3328_v3 = vld [vmem:[#allocation34 + $0x68] sm:$0xff] }
 0xdc7   :  { %v9261_v11 = vpop.f32.mrb[26].mxu1 }
 0xdc8   :  { %v2526_v12 = vpop.f32.mrb[27].mxu1 }
 0xdc9   :  { %v10560_v14 = vpack.c.bf16 %v9261_v11, %v2526_v12  ;;  %9285 = vmatprep.mubr.msk.f32.mxu0 %vm2635_vm3, %v2526_v12  ;;  %v3089_v12 = vld [vmem:[#allocation33 + $0x78] sm:$0xff] }
 0xdca   :  { %9286 = vmatmul.mubr.msk.f32.vlgmr.msra.gmra.mrb[22].mxu0 %vm2635_vm3, %v9261_v11  ;;  %v3088_v11 = vld [vmem:[#allocation33 + $0x70] sm:$0xff] }
 0xdcb   :  { %10561 = vmatprep.subr.bf16.mxu1 %v10560_v14  ;;  %10583 = vmatpush3.bf16.msra.mxu0 %v10580_v8  ;;  %v3086_v8 = vld [vmem:[#allocation33 + $0x60] sm:$0xff] }
 0xdcc   :  { %10563 = vmatpush3.bf16.msra.mxu1 %v10560_v14  ;;  %10585 = vmatprep.subr.bf16.mxu0 %v10584_v13  ;;  %v10644_v10 = vpack.c.bf16 %v3087_v9, %v3086_v8  ;;  %v3419_v8 = vld [vmem:[#allocation25] sm:$0xff]  ;;  %v7878_v9 = vld [vmem:[%s14595_s14] ss:$0 sm:$0xff] }
 0xdcd   :  { %10597 = vmatprep.subr.bf16.mxu1 %v10560_v14 }
 0xdcf   :  { %9267 = vmatmul.mubr.msk.f32.vlgmr.msra.gmra.mrb[28].mxu1 %vm2537_vm2, %v13712_v17  ;;  %10587 = vmatpush3.bf16.msra.mxu0 %v10584_v13  ;;  %v10648_v13 = vpack.c.bf16 %v3089_v12, %v3088_v11 }
 0xdd0   :  { %10599 = vmatpush3.bf16.msra.mxu1 %v10560_v14  ;;  %9311 = vmatprep.mubr.msk.f32.mxu1 %vm2537_vm2, %v2798_v18  ;;  %v3058_v14 = vld [vmem:[#allocation31] sm:$0xff] }
 0xdd1   :  { %10589 = vmatprep.subr.bf16.mxu0 %v10588_v19  ;;  %v10652_v16 = vpack.c.bf16 %v3059_v15, %v3058_v14  ;;  %v3421_v15 = vld [vmem:[#allocation36] sm:$0xff] }
 0xdd3   :  { %9312 = vmatmul.mubr.msk.f32.vlgmr.msra.gmra.mrb[30].mxu1 %vm2537_vm2, %v2799_v22  ;;  %10591 = vmatpush3.bf16.msra.mxu0 %v10588_v19 }
 0xdd4   :  { %10593 = vmatprep.subr.bf16.mxu0 %v10592_v23  ;;  %9337 = vmatprep.mubr.msk.f32.mxu1 %vm2537_vm2, %v2535_v5  ;;  %v3084_v5 = vld [vmem:[#allocation33 + $0x50] sm:$0xff] }
 0xdd5   :  { %v10640_v7 = vpack.c.bf16 %v3085_v6, %v3084_v5  ;;  %v3329_v5 = vld [vmem:[#allocation34 + $0x70] sm:$0xff]  ;;  %v3330_v6 = vld [vmem:[#allocation34 + $0x78] sm:$0xff] }
 0xdd7   :  { %10595 = vmatpush3.bf16.msra.mxu0 %v10592_v23  ;;  %v3064_v23 = vld [vmem:[#allocation31 + $0x30] sm:$0xff] }
 0xdd8   :  { %10601 = vmatprep.subr.bf16.mxu0 %v10600_v26  ;;  %v10664_v25 = vpack.c.bf16 %v3065_v24, %v3064_v23  ;;  %v3425_v24 = vld [vmem:[#allocation36 + $0x20] sm:$0xff] }
 0xea2   :  { %v9268_v29 = vpop.f32.mrb[28].mxu1 }
 0xea3   :  { %v2610_v30 = vpop.f32.mrb[29].mxu1 }
 0xea4   :  { %9304 = vmatprep.mubr.msk.f32.mxu0 %vm2635_vm3, %v2610_v30  ;;  %v3069_v30 = vld [vmem:[#allocation31 + $0x58] sm:$0xff] }
 0xea5   :  { %9305 = vmatmul.mubr.msk.f32.vlgmr.msra.gmra.mrb[22].mxu0 %vm2635_vm3, %v9268_v29  ;;  %v3068_v29 = vld [vmem:[#allocation31 + $0x50] sm:$0xff] }
 0xea6   :  { %10603 = vmatpush3.bf16.msra.mxu0 %v10600_v26  ;;  %v9313_v34 = vpop.f32.mrb[30].mxu1  ;;  %v3066_v26 = vld [vmem:[#allocation31 + $0x40] sm:$0xff] }
 0xea7   :  { %10605 = vmatprep.subr.bf16.mxu0 %v10604_v31  ;;  %v2872_v37 = vpop.f32.mrb[31].mxu1  ;;  %v10668_v28 = vpack.c.bf16 %v3067_v27, %v3066_v26  ;;  %v3427_v27 = vld [vmem:[#allocation36 + $0x30] sm:$0xff] }
 0xea8   :  { %9330 = vmatprep.mubr.msk.f32.mxu0 %vm2635_vm3, %v2872_v37  ;;  %v3073_v37 = vld [vmem:[#allocation31 + $0x78] sm:$0xff] }
 0xeaa   :  { %10607 = vmatpush3.bf16.msra.mxu0 %v10604_v31  ;;  %v10672_v31 = vpack.c.bf16 %v3069_v30, %v3068_v29  ;;  %v3429_v30 = vld [vmem:[#allocation36 + $0x40] sm:$0xff] }
 0xeab   :  { %10609 = vmatprep.subr.bf16.mxu0 %v10608_v35 }
 0xeae   :  { %10611 = vmatpush3.bf16.msra.mxu0 %v10608_v35  ;;  %v3072_v35 = vld [vmem:[#allocation31 + $0x70] sm:$0xff] }
 0xeaf   :  { %10613 = vmatprep.subr.bf16.mxu0 %v10612_v41  ;;  %v10680_v39 = vpack.c.bf16 %v3073_v37, %v3072_v35  ;;  %v3433_v37 = vld [vmem:[#allocation36 + $0x60] sm:$0xff] }
 0xeb2   :  { %10615 = vmatpush3.bf16.msra.mxu0 %v10612_v41  ;;  %v3316_v41 = vld [vmem:[#allocation34 + $0x8] sm:$0xff] }
 0xeb5   :  { %9331 = vmatmul.mubr.msk.f32.vlgmr.msra.gmra.mrb[22].mxu0 %vm2635_vm3, %v9313_v34  ;;  %v10676_v34 = vpack.c.bf16 %v3071_v33, %v3070_v32  ;;  %v3431_v33 = vld [vmem:[#allocation36 + $0x50] sm:$0xff] }
 0xeb6   :  { %9414 = vmatprep.mubr.msk.f32.mxu0 %vm2537_vm2, %v2798_v18  ;;  %v3061_v18 = vld [vmem:[#allocation31 + $0x18] sm:$0xff] }
 0xf88   :  { %v9332_v47 = vpop.f32.mrb[22].mxu0 }
 0xf89   :  { %v2980_v48 = vadd.f32 %v9332_v47, %v7873_v46  ;;  %v2961_v49 = vpop.f32.mrb[23].mxu0  ;;  %v3317_v47 = vld [vmem:[#allocation34 + $0x10] sm:$0xff] }
 0xf8a   :  { %v2979_v50 = vadd.f32 %v7873_v46, %v2961_v49  ;;  %v10688_v46 = vpack.c.bf16 %v3316_v41, %v3315_v40  ;;  %v3435_v41 = vld [vmem:[#allocation36 + $0x70] sm:$0xff] }
 0xf8b   :  { %v2982_v51 = vmax.f32 %v2980_v48, 0.0  ;;  %v3318_v48 = vld [vmem:[#allocation34 + $0x18] sm:$0xff] }
 0xf8c   :  { %v2981_v54 = vmax.f32 %v2979_v50, 0.0  ;;  %v10692_v52 = vpack.c.bf16 %v3318_v48, %v3317_v47 }
 0xf8e   :  { %v10616_v55 = vpack.c.bf16 %v2982_v51, %v2981_v54 }
 0xf90   :  { %10617 = vmatprep.subr.bf16.mxu1 %v10616_v55  ;;  %10685 = vmatprep.subr.bf16.mxu0 %v10616_v55 }
 0xf91   :  { %10619 = vmatpush3.bf16.msra.mxu1 %v10616_v55  ;;  %10687 = vmatpush3.bf16.msra.mxu0 %v10616_v55  ;;  %v3320_v55 = vld [vmem:[#allocation34 + $0x28] sm:$0xff] }
 0xf92   :  { %10621 = vmatprep.subr.bf16.mxu1 %v10620_v56 }
 0xf94   :  { %9338 = vmatmul.mubr.msk.f32.vlgmr.msra.gmra.mrb[32].mxu1 %vm2537_vm2, %v13712_v17  ;;  %9415 = vmatmul.mubr.msk.f32.vlgmr.msra.gmra.mrb[24].mxu0 %vm2537_vm2, %v2799_v22  ;;  %v3060_v17 = vld [vmem:[#allocation31 + $0x10] sm:$0xff]  ;;  %v10660_v22 = vpack.c.bf16 %v3063_v21, %v3062_v20  ;;  %v3424_v21 = vld [vmem:[#allocation36 + $0x18] sm:$0xff] }
 0xf95   :  { %10623 = vmatpush3.bf16.msra.mxu1 %v10620_v56  ;;  %9372 = vmatprep.mubr.f32.mxu1 %v2981_v54  ;;  %v10656_v19 = vpack.c.bf16 %v3061_v18, %v3060_v17  ;;  %v3319_v54 = vld [vmem:[#allocation34 + $0x20] sm:$0xff]  ;;  %v3423_v20 = vld [vmem:[#allocation36 + $0x10] sm:$0xff] }
 0xf96   :  { %10625 = vmatprep.subr.bf16.mxu1 %v10624_v59  ;;  %v10696_v56 = vpack.c.bf16 %v3320_v55, %v3319_v54  ;;  %9456 = vmatprep.mubr.msk.f32.mxu0 %vm2537_vm2, %v3419_v8  ;;  %v10728_v23 = vpack.c.bf16 %v3424_v21, %v3423_v20  ;;  %v3792_v20 = vld [vmem:[%s14596_s13 + $0x98] sm:$0xff] }
 0xf99   :  { %10627 = vmatpush3.bf16.msra.mxu1 %v10624_v59  ;;  %v10700_v59 = vpack.c.bf16 %v3322_v58, %v3321_v57  ;;  %v3774_v57 = vld [vmem:[%s14596_s13 + $0x8] sm:$0xff]  ;;  %v3776_v58 = vld [vmem:[%s14596_s13 + $0x18] sm:$0xff] }
 0xf9a   :  { %10629 = vmatprep.subr.bf16.mxu1 %v10628_v62 }
 0xf9d   :  { %10631 = vmatpush3.bf16.msra.mxu1 %v10628_v62  ;;  %v10704_v62 = vpack.c.bf16 %v3324_v61, %v3323_v60  ;;  %v10792_v60 = vpack.c.bf16 %v3776_v58, %v3774_v57  ;;  %v3775_v61 = vld [vmem:[%s14596_s13 + $0x10] sm:$0xff]  ;;  %v7883_v58 = vld [vmem:[%s14597_s30] ss:$0 sm:$0xff] }
 0xf9e   :  { %10633 = vmatprep.subr.bf16.mxu1 %v10632_v1 }
 0xfa1   :  { %10635 = vmatpush3.bf16.msra.mxu1 %v10632_v1  ;;  %v10708_v1 = vpack.c.bf16 %v3326_v0, %v3325_v63  ;;  %v3780_v63 = vld [vmem:[%s14596_s13 + $0x38] sm:$0xff] }
 0xfa2   :  { %10637 = vmatprep.subr.bf16.mxu1 %v10636_v4 }
 0xfa5   :  { %10639 = vmatpush3.bf16.msra.mxu1 %v10636_v4  ;;  %v10712_v4 = vpack.c.bf16 %v3328_v3, %v3327_v2  ;;  %v3777_v2 = vld [vmem:[%s14596_s13 + $0x20] sm:$0xff]  ;;  %v3779_v3 = vld [vmem:[%s14596_s13 + $0x30] sm:$0xff] }
 0xfa6   :  { %10641 = vmatprep.subr.bf16.mxu1 %v10640_v7 }
 0xfa9   :  { %10643 = vmatpush3.bf16.msra.mxu1 %v10640_v7  ;;  %v10716_v7 = vpack.c.bf16 %v3330_v6, %v3329_v5  ;;  %v3784_v5 = vld [vmem:[%s14596_s13 + $0x58] sm:$0xff]  ;;  %v10798_v6 = vpack.c.bf16 %v3779_v3, %v3777_v2  ;;  %v4120_v2 = vld [vmem:[%s14599_s12 + $0x80] sm:$0xff]  ;;  %v4121_v3 = vld [vmem:[%s14599_s12 + $0x88] sm:$0xff] }
 0xfaa   :  { %10645 = vmatprep.subr.bf16.mxu1 %v10644_v10 }
 0xfad   :  { %10647 = vmatpush3.bf16.msra.mxu1 %v10644_v10 }
 0xfae   :  { %10649 = vmatprep.subr.bf16.mxu1 %v10648_v13 }
 0xfb1   :  { %10651 = vmatpush3.bf16.msra.mxu1 %v10648_v13 }
 0xfb2   :  { %10653 = vmatprep.subr.bf16.mxu1 %v10652_v16 }
 0xfb4   :  { %9373 = vmatmul.mubr.f32.vlgmr.msra.gmra.mrb[34].mxu1 %v2982_v51 }
 0xfb5   :  { %10655 = vmatpush3.bf16.msra.mxu1 %v10652_v16  ;;  %v3422_v16 = vld [vmem:[#allocation36 + $0x8] sm:$0xff] }
 0xfb6   :  { %10657 = vmatprep.subr.bf16.mxu1 %v10656_v19 }
 0xfb9   :  { %10659 = vmatpush3.bf16.msra.mxu1 %v10656_v19  ;;  %v10724_v19 = vpack.c.bf16 %v3422_v16, %v3421_v15  ;;  %v3785_v16 = vld [vmem:[%s14596_s13 + $0x60] sm:$0xff] }
 0xfba   :  { %10661 = vmatprep.subr.bf16.mxu1 %v10660_v22 }
 0xfbd   :  { %10663 = vmatpush3.bf16.msra.mxu1 %v10660_v22  ;;  %v3420_v22 = vld [vmem:[#allocation25 + $0x8] sm:$0xff] }
 0xfbe   :  { %10665 = vmatprep.subr.bf16.mxu1 %v10664_v25 }
 0xfc1   :  { %10667 = vmatpush3.bf16.msra.mxu1 %v10664_v25  ;;  %v3426_v25 = vld [vmem:[#allocation36 + $0x28] sm:$0xff] }
 0xfc2   :  { %10669 = vmatprep.subr.bf16.mxu1 %v10668_v28  ;;  %v10732_v26 = vpack.c.bf16 %v3426_v25, %v3425_v24  ;;  %v3794_v25 = vld [vmem:[%s14596_s13 + $0xa8] sm:$0xff] }
 0xfc5   :  { %10671 = vmatpush3.bf16.msra.mxu1 %v10668_v28  ;;  %v3428_v28 = vld [vmem:[#allocation36 + $0x38] sm:$0xff] }
 0xfc6   :  { %10673 = vmatprep.subr.bf16.mxu1 %v10672_v31  ;;  %v10736_v29 = vpack.c.bf16 %v3428_v28, %v3427_v27  ;;  %v3793_v27 = vld [vmem:[%s14596_s13 + $0xa0] sm:$0xff] }
 0xfc9   :  { %10675 = vmatpush3.bf16.msra.mxu1 %v10672_v31  ;;  %v3430_v31 = vld [vmem:[#allocation36 + $0x48] sm:$0xff] }
 0xfca   :  { %10677 = vmatprep.subr.bf16.mxu1 %v10676_v34  ;;  %v10740_v32 = vpack.c.bf16 %v3430_v31, %v3429_v30  ;;  %v3798_v30 = vld [vmem:[%s14596_s13 + $0xc8] sm:$0xff]  ;;  %v3800_v31 = vld [vmem:[%s14596_s13 + $0xd8] sm:$0xff] }
 0xfcd   :  { %10679 = vmatpush3.bf16.msra.mxu1 %v10676_v34  ;;  %v3432_v34 = vld [vmem:[#allocation36 + $0x58] sm:$0xff] }
 0xfce   :  { %10681 = vmatprep.subr.bf16.mxu1 %v10680_v39  ;;  %v10744_v35 = vpack.c.bf16 %v3432_v34, %v3431_v33  ;;  %v10816_v34 = vpack.c.bf16 %v3800_v31, %v3798_v30  ;;  %v4131_v30 = vld [vmem:[%s14599_s12 + $0xd8] sm:$0xff] }
 0xfd1   :  { %10683 = vmatpush3.bf16.msra.mxu1 %v10680_v39  ;;  %v3434_v39 = vld [vmem:[#allocation36 + $0x68] sm:$0xff] }
 0xfd2   :  { %10689 = vmatprep.subr.bf16.mxu1 %v10688_v46  ;;  %v10748_v40 = vpack.c.bf16 %v3434_v39, %v3433_v37  ;;  %v3799_v37 = vld [vmem:[%s14596_s13 + $0xd0] sm:$0xff]  ;;  %v3802_v39 = vld [vmem:[%s14596_s13 + $0xe8] sm:$0xff] }
0x1067   :  { %v9339_v49 = vpop.f32.mrb[32].mxu1  ;;  %v9416_v50 = vpop.f32.mrb[24].mxu0 }
0x1068   :  { %v3049_v51 = vpop.f32.mrb[33].mxu1  ;;  %v3306_v53 = vpop.f32.mrb[25].mxu0 }
0x1069   :  { %9407 = vmatprep.mubr.f32.mxu1 %v3049_v51 }
0x106a   :  { %9408 = vmatmul.mubr.f32.vlgmr.msra.gmra.mrb[34].mxu1 %v9339_v49 }
0x106b   :  { %10691 = vmatpush3.bf16.msra.mxu1 %v10688_v46  ;;  %9449 = vmatprep.mubr.f32.mxu1 %v3306_v53  ;;  %v3436_v46 = vld [vmem:[#allocation36 + $0x78] sm:$0xff] }
0x106c   :  { %10693 = vmatprep.subr.bf16.mxu1 %v10692_v52  ;;  %v10752_v47 = vpack.c.bf16 %v3436_v46, %v3435_v41 }
0x106f   :  { %10695 = vmatpush3.bf16.msra.mxu1 %v10692_v52 }
0x1070   :  { %10697 = vmatprep.subr.bf16.mxu1 %v10696_v56 }
0x1073   :  { %10699 = vmatpush3.bf16.msra.mxu1 %v10696_v56 }
0x1074   :  { %10701 = vmatprep.subr.bf16.mxu1 %v10700_v59 }
0x1077   :  { %10703 = vmatpush3.bf16.msra.mxu1 %v10700_v59  ;;  %v3773_v59 = vld [vmem:[%s14596_s13] sm:$0xff] }
0x1078   :  { %10705 = vmatprep.subr.bf16.mxu1 %v10704_v62  ;;  %v10794_v0 = vpack.c.bf16 %v3775_v61, %v3773_v59  ;;  %v7884_v61 = vld [vmem:[%s14598_s7] ss:$0 sm:$0xff] }
0x107b   :  { %10707 = vmatpush3.bf16.msra.mxu1 %v10704_v62  ;;  %v3778_v62 = vld [vmem:[%s14596_s13 + $0x28] sm:$0xff] }
0x107c   :  { %10709 = vmatprep.subr.bf16.mxu1 %v10708_v1 }
0x107f   :  { %10711 = vmatpush3.bf16.msra.mxu1 %v10708_v1  ;;  %v10796_v1 = vpack.c.bf16 %v3780_v63, %v3778_v62 }
0x1080   :  { %10713 = vmatprep.subr.bf16.mxu1 %v10712_v4 }
0x1083   :  { %10715 = vmatpush3.bf16.msra.mxu1 %v10712_v4  ;;  %v3782_v4 = vld [vmem:[%s14596_s13 + $0x48] sm:$0xff] }
0x1084   :  { %10717 = vmatprep.subr.bf16.mxu1 %v10716_v7 }
0x1087   :  { %10719 = vmatpush3.bf16.msra.mxu1 %v10716_v7  ;;  %v10800_v7 = vpack.c.bf16 %v3784_v5, %v3782_v4  ;;  %v4104_v4 = vld [vmem:[%s14599_s12] sm:$0xff]  ;;  %v4122_v5 = vld [vmem:[%s14599_s12 + $0x90] sm:$0xff] }
0x1088   :  { %10793 = vmatprep.subr.bf16.mxu1 %v10792_v60 }
0x108a   :  { %9450 = vmatmul.mubr.f32.vlgmr.msra.gmra.mrb[34].mxu1 %v9416_v50 }
0x108b   :  { %10795 = vmatpush1.bf16.msra.mxu1 %v10794_v0 }
0x108c   :  { %10797 = vmatprep.subr.bf16.mxu1 %v10796_v1 }
0x108f   :  { %10799 = vmatpush1.bf16.msra.mxu1 %v10798_v6  ;;  %v4123_v6 = vld [vmem:[%s14599_s12 + $0x98] sm:$0xff] }
0x1090   :  { %10801 = vmatprep.subr.bf16.mxu1 %v10800_v7 }
0x115d   :  { %v9451_v10 = vpop.f32.mrb[34].mxu1 }
0x115e   :  { %v3416_v11 = vadd.f32 %v9451_v10, %v7878_v9  ;;  %v3397_v12 = vpop.f32.mrb[35].mxu1 }
0x115f   :  { %v3415_v13 = vadd.f32 %v7878_v9, %v3397_v12  ;;  %v3783_v9 = vld [vmem:[%s14596_s13 + $0x50] sm:$0xff] }
0x1160   :  { %v3418_v14 = vmax.f32 %v3416_v11, 0.0 }
0x1161   :  { %v3417_v17 = vmax.f32 %v3415_v13, 0.0  ;;  %v3786_v13 = vld [vmem:[%s14596_s13 + $0x68] sm:$0xff] }
0x1163   :  { %v10720_v18 = vpack.c.bf16 %v3418_v14, %v3417_v17 }
0x1165   :  { %10721 = vmatprep.subr.bf16.mxu0 %v10720_v18 }
0x1166   :  { %10723 = vmatpush3.bf16.msra.mxu0 %v10720_v18 }
0x1167   :  { %10725 = vmatprep.subr.bf16.mxu0 %v10724_v19 }
0x1169   :  { %9457 = vmatmul.mubr.msk.f32.vlgmr.msra.gmra.mrb[26].mxu0 %vm2537_vm2, %v3420_v22 }
0x116a   :  { %10727 = vmatpush3.bf16.msra.mxu0 %v10724_v19 }
0x116b   :  { %10729 = vmatprep.subr.bf16.mxu0 %v10728_v23 }
0x116e   :  { %10731 = vmatpush3.bf16.msra.mxu0 %v10728_v23 }
0x116f   :  { %10733 = vmatprep.subr.bf16.mxu0 %v10732_v26 }
0x1172   :  { %10735 = vmatpush3.bf16.msra.mxu0 %v10732_v26 }
0x1173   :  { %10737 = vmatprep.subr.bf16.mxu0 %v10736_v29 }
0x1176   :  { %10739 = vmatpush3.bf16.msra.mxu0 %v10736_v29 }
0x1177   :  { %10741 = vmatprep.subr.bf16.mxu0 %v10740_v32 }
0x117a   :  { %10743 = vmatpush3.bf16.msra.mxu0 %v10740_v32 }
0x117b   :  { %10745 = vmatprep.subr.bf16.mxu0 %v10744_v35 }
0x117e   :  { %10747 = vmatpush3.bf16.msra.mxu0 %v10744_v35 }
0x117f   :  { %10749 = vmatprep.subr.bf16.mxu0 %v10748_v40 }
0x1182   :  { %10751 = vmatpush3.bf16.msra.mxu0 %v10748_v40 }
0x1183   :  { %10753 = vmatprep.subr.bf16.mxu0 %v10752_v47 }
0x1186   :  { %10755 = vmatpush3.bf16.msra.mxu0 %v10752_v47 }
0x123c   :  { %v9458_v48 = vpop.f32.mrb[26].mxu0 }
0x123d   :  { %v3509_v49 = vpop.f32.mrb[27].mxu0 }
0x123e   :  { %9491 = vmatprep.mubr.f32.mxu0 %v3509_v49 }
0x123f   :  { %9492 = vmatmul.mubr.f32.vlgmr.msra.gmra.mrb[28].mxu0 %v9458_v48  ;;  %v3803_v48 = vld [vmem:[%s14596_s13 + $0xf0] sm:$0xff] }
0x1240   :  { %9498 = vmatprep.mubr.msk.f32.mxu0 %vm2537_vm2, %v3419_v8  ;;  %v3781_v8 = vld [vmem:[%s14596_s13 + $0x40] sm:$0xff] }
0x1241   :  { %v10802_v10 = vpack.c.bf16 %v3783_v9, %v3781_v8  ;;  %v10840_v8 = vpack.c.bf16 %v4123_v6, %v4122_v5  ;;  %v4106_v9 = vld [vmem:[%s14599_s12 + $0x10] sm:$0xff] }
0x1243   :  { %10803 = vmatpush1.bf16.msra.mxu1 %v10802_v10  ;;  %v4107_v10 = vld [vmem:[%s14599_s12 + $0x18] sm:$0xff] }
0x1312   :  { %v9493_v50 = vpop.f32.mrb[28].mxu0 }
0x1313   :  { %v13732_v51 = vsub.f32 %v3418_v14, %v9493_v50  ;;  %v3584_v52 = vpop.f32.mrb[29].mxu0  ;;  %v3788_v14 = vld [vmem:[%s14596_s13 + $0x78] sm:$0xff] }
0x1314   :  { %v13734_v53 = vsub.f32 %v3417_v17, %v3584_v52  ;;  %v10804_v15 = vpack.c.bf16 %v3788_v14, %v3786_v13  ;;  %v3787_v17 = vld [vmem:[%s14596_s13 + $0x70] sm:$0xff]  ;;  %v10842_v13 = vpack.c.bf16 %v4107_v10, %v4106_v9  ;;  %v4088_v10 = vld [vmem:[%s14601_s24 + $0x80] sm:$0xff] }
0x1315   :  { %v3596_v54 = vmul.f32 %v13732_v51, %v13732_v51  ;;  %v10806_v18 = vpack.c.bf16 %v3787_v17, %v3785_v16  ;;  %v4109_v16 = vld [vmem:[%s14599_s12 + $0x28] sm:$0xff]  ;;  %v4126_v17 = vld [vmem:[%s14599_s12 + $0xb0] sm:$0xff] }
0x1316   :  { %v3595_v55 = vmul.f32 %v13734_v53, %v13734_v53  ;;  %10805 = vmatprep.subr.bf16.mxu1 %v10804_v15  ;;  %v4108_v15 = vld [vmem:[%s14599_s12 + $0x20] sm:$0xff] }
0x1317   :  { %10807 = vmatpush1.bf16.msra.mxu1 %v10806_v18  ;;  %v4127_v18 = vld [vmem:[%s14599_s12 + $0xb8] sm:$0xff] }
0x1318   :  { %v10756_v56 = vpack.c.bf16 %v3596_v54, %v3595_v55 }
0x131a   :  { %10757 = vmatprep.subr.bf16.mxu0 %v10756_v56 }
0x131b   :  { %10759 = vmatpush3.bf16.msra.mxu0 %v10756_v56 }
0x131c   :  { %10761 = vmatprep.subr.bf16.mxu0 %v10724_v19 }
0x131e   :  { %9499 = vmatmul.mubr.msk.f32.vlgmr.msra.gmra.mrb[30].mxu0 %vm2537_vm2, %v3420_v22  ;;  %v3789_v22 = vld [vmem:[%s14596_s13 + $0x80] sm:$0xff] }
0x131f   :  { %10763 = vmatpush3.bf16.msra.mxu0 %v10724_v19  ;;  %v3790_v19 = vld [vmem:[%s14596_s13 + $0x88] sm:$0xff] }
0x1320   :  { %10765 = vmatprep.subr.bf16.mxu0 %v10728_v23  ;;  %v10808_v21 = vpack.c.bf16 %v3792_v20, %v3790_v19  ;;  %v10846_v19 = vpack.c.bf16 %v4109_v16, %v4108_v15  ;;  %v10848_v20 = vpack.c.bf16 %v4127_v18, %v4126_v17  ;;  %v4072_v16 = vld [vmem:[%s14601_s24] sm:$0xff]  ;;  %v4073_v17 = vld [vmem:[%s14601_s24 + $0x8] sm:$0xff] }
0x1321   :  { %v10870_v18 = vpack.c.bf16 %v4073_v17, %v4072_v16 }
0x1322   :  { %10809 = vmatprep.subr.bf16.mxu1 %v10808_v21  ;;  %v4110_v21 = vld [vmem:[%s14599_s12 + $0x30] sm:$0xff] }
0x1323   :  { %10767 = vmatpush3.bf16.msra.mxu0 %v10728_v23  ;;  %v3791_v23 = vld [vmem:[%s14596_s13 + $0x90] sm:$0xff] }
0x1324   :  { %10769 = vmatprep.subr.bf16.mxu0 %v10732_v26  ;;  %v10810_v24 = vpack.c.bf16 %v3791_v23, %v3789_v22  ;;  %v4111_v22 = vld [vmem:[%s14599_s12 + $0x38] sm:$0xff]  ;;  %v4128_v23 = vld [vmem:[%s14599_s12 + $0xc0] sm:$0xff] }
0x1326   :  { %10811 = vmatpush1.bf16.msra.mxu1 %v10810_v24  ;;  %v4129_v24 = vld [vmem:[%s14599_s12 + $0xc8] sm:$0xff] }
0x1327   :  { %10771 = vmatpush3.bf16.msra.mxu0 %v10732_v26  ;;  %v3796_v26 = vld [vmem:[%s14596_s13 + $0xb8] sm:$0xff] }
0x1328   :  { %10773 = vmatprep.subr.bf16.mxu0 %v10736_v29  ;;  %v10812_v28 = vpack.c.bf16 %v3796_v26, %v3794_v25  ;;  %v10850_v25 = vpack.c.bf16 %v4111_v22, %v4110_v21  ;;  %v10852_v26 = vpack.c.bf16 %v4129_v24, %v4128_v23  ;;  %v13832_v21 = vld [vmem:[#allocation2] sm:$0xff]  ;;  %v4074_v23 = vld [vmem:[%s14601_s24 + $0x10] sm:$0xff]  ;;  %v4075_v24 = vld [vmem:[%s14601_s24 + $0x18] sm:$0xff] }
0x1329   :  { %v13836_v22 = vld [vmem:[#allocation4] sm:$0xff] }
0x132a   :  { %10813 = vmatprep.subr.bf16.mxu1 %v10812_v28  ;;  %v4113_v28 = vld [vmem:[%s14599_s12 + $0x48] sm:$0xff] }
0x132b   :  { %10775 = vmatpush3.bf16.msra.mxu0 %v10736_v29  ;;  %v3795_v29 = vld [vmem:[%s14596_s13 + $0xb0] sm:$0xff] }
0x132c   :  { %10777 = vmatprep.subr.bf16.mxu0 %v10740_v32  ;;  %v10814_v33 = vpack.c.bf16 %v3795_v29, %v3793_v27  ;;  %v4112_v27 = vld [vmem:[%s14599_s12 + $0x40] sm:$0xff]  ;;  %v4130_v29 = vld [vmem:[%s14599_s12 + $0xd0] sm:$0xff] }
0x132d   :  { %v10854_v31 = vpack.c.bf16 %v4113_v28, %v4112_v27  ;;  %v4092_v27 = vld [vmem:[%s14601_s24 + $0xa0] sm:$0xff]  ;;  %v4093_v28 = vld [vmem:[%s14601_s24 + $0xa8] sm:$0xff] }
0x132e   :  { %10815 = vmatpush1.bf16.msra.mxu1 %v10814_v33  ;;  %v10856_v33 = vpack.c.bf16 %v4131_v30, %v4130_v29  ;;  %v13848_v29 = vld [vmem:[#allocation2 + $0x8] sm:$0xff] }
0x132f   :  { %10779 = vmatpush3.bf16.msra.mxu0 %v10740_v32  ;;  %v12805_v32 = vmov 0.0   ;;  %10817 = vmatprep.subr.bf16.mxu1 %v10816_v34  ;;  %v4114_v34 = vld [vmem:[%s14599_s12 + $0x50] sm:$0xff]  ;;  %v13852_v30 = vld [vmem:[#allocation4 + $0x8] sm:$0xff] }
0x1330   :  { %10781 = vmatprep.subr.bf16.mxu0 %v10744_v35  ;;  %3869 = vmatprep.mubr.f32.mxu1 %v12805_v32 }
0x1333   :  { %10783 = vmatpush3.bf16.msra.mxu0 %v10744_v35  ;;  %v3797_v35 = vld [vmem:[%s14596_s13 + $0xc0] sm:$0xff] }
0x1334   :  { %10785 = vmatprep.subr.bf16.mxu0 %v10748_v40  ;;  %v10818_v41 = vpack.c.bf16 %v3799_v37, %v3797_v35  ;;  %v4115_v35 = vld [vmem:[%s14599_s12 + $0x58] sm:$0xff]  ;;  %v4132_v37 = vld [vmem:[%s14599_s12 + $0xe0] sm:$0xff] }
0x1336   :  { %10819 = vmatpush1.bf16.msra.mxu1 %v10818_v41 }
0x1337   :  { %10787 = vmatpush3.bf16.msra.mxu0 %v10748_v40  ;;  %v3804_v40 = vld [vmem:[%s14596_s13 + $0xf8] sm:$0xff] }
0x1338   :  { %10789 = vmatprep.subr.bf16.mxu0 %v10752_v47  ;;  %v10820_v46 = vpack.c.bf16 %v3804_v40, %v3802_v39  ;;  %v4133_v39 = vld [vmem:[%s14599_s12 + $0xe8] sm:$0xff]  ;;  %v10858_v40 = vpack.c.bf16 %v4115_v35, %v4114_v34  ;;  %v10876_v34 = vpack.c.bf16 %v4093_v28, %v4092_v27  ;;  %v4094_v35 = vld [vmem:[%s14601_s24 + $0xb0] sm:$0xff] }
0x1339   :  { %v10860_v41 = vpack.c.bf16 %v4133_v39, %v4132_v37  ;;  %v4095_v37 = vld [vmem:[%s14601_s24 + $0xb8] sm:$0xff] }
0x133a   :  { %10821 = vmatprep.subr.bf16.mxu1 %v10820_v46  ;;  %v4116_v46 = vld [vmem:[%s14599_s12 + $0x60] sm:$0xff] }
0x133b   :  { %10791 = vmatpush3.bf16.msra.mxu0 %v10752_v47  ;;  %v3801_v47 = vld [vmem:[%s14596_s13 + $0xe0] sm:$0xff] }
0x133c   :  { %v10822_v49 = vpack.c.bf16 %v3803_v48, %v3801_v47  ;;  %v4117_v47 = vld [vmem:[%s14599_s12 + $0x68] sm:$0xff]  ;;  %v4134_v48 = vld [vmem:[%s14599_s12 + $0xf0] sm:$0xff] }
0x133e   :  { %10823 = vmatpush1.bf16.msra.mxu1 %v10822_v49  ;;  %v4135_v49 = vld [vmem:[%s14599_s12 + $0xf8] sm:$0xff] }
0x13f1   :  { %v9500_v11 = vpop.f32.mrb[30].mxu0 }
0x13f2   :  { %v3663_v12 = vpop.f32.mrb[31].mxu0 }
0x13f3   :  { %9533 = vmatprep.mubr.f32.mxu0 %v3663_v12  ;;  %v4125_v12 = vld [vmem:[%s14599_s12 + $0xa8] sm:$0xff] }
0x13f4   :  { %9534 = vmatmul.mubr.f32.vlgmr.msra.gmra.mrb[32].mxu0 %v9500_v11  ;;  %v4124_v11 = vld [vmem:[%s14599_s12 + $0xa0] sm:$0xff] }
0x13f5   :  { %3958 = vmatprep.mubr.f32.mxu0 %v12805_v32  ;;  %v10844_v14 = vpack.c.bf16 %v4125_v12, %v4124_v11  ;;  %v4089_v11 = vld [vmem:[%s14601_s24 + $0x88] sm:$0xff] }
0x13f6   :  { %v10868_v15 = vpack.c.bf16 %v4089_v11, %v4088_v10  ;;  %v4087_v10 = vld [vmem:[%s14601_s24 + $0x78] sm:$0xff] }
0x14c7   :  { %v9535_v50 = vpop.f32.mrb[32].mxu0 }
0x14c8   :  { %v3744_v52 = vadd.f32 1e-05, %v9535_v50  ;;  %v3738_v54 = vpop.f32.mrb[33].mxu0  ;;  %v10862_v50 = vpack.c.bf16 %v4117_v47, %v4116_v46  ;;  %v10880_v46 = vpack.c.bf16 %v4095_v37, %v4094_v35  ;;  %v13873_v47 = vld [vmem:[#allocation2 + $0x18] sm:$0xff] }
0x14c9   :  { %v3739_v55 = vadd.f32 1e-05, %v3738_v54  ;;  %v4414_v35 = vld [vmem:[%s14602_s11 + $0x98] sm:$0xff] }
0x14ca   :  { %11836 = vrsqrt.f32 %v3744_v52  ;;  %v10864_v52 = vpack.c.bf16 %v4135_v49, %v4134_v48  ;;  %v13877_v48 = vld [vmem:[#allocation4 + $0x18] sm:$0xff]  ;;  %v4078_v49 = vld [vmem:[%s14601_s24 + $0x30] sm:$0xff] }
0x14cb   :  { %11838 = vrsqrt.f32 %v3739_v55 }
0x14d4   :  { %v11837_v56 = vpop.eup %11836 }
0x14d5   :  { %v11839_v57 = vpop.eup %11838  ;;  %v3750_v60 = vmul.f32 %v11837_v56, %v13732_v51  ;;  %v4105_v51 = vld [vmem:[%s14599_s12 + $0x8] sm:$0xff] }
0x14d6   :  { %v3749_v59 = vmul.f32 %v11839_v57, %v13734_v53  ;;  %v10836_v53 = vpack.c.bf16 %v4121_v3, %v4120_v2  ;;  %v10838_v7 = vpack.c.bf16 %v4105_v51, %v4104_v4 }
0x14d7   :  { %v3759_v0 = vmul.f32 %v7883_v58, %v3750_v60  ;;  %v3769_v60 = vld [vmem:[%s14600_s10] sm:$0xff] }
0x14d8   :  { %v3758_v62 = vmul.f32 %v7883_v58, %v3749_v59  ;;  %10837 = vmatprep.subr.bf16.mxu1 %v10836_v53 }
0x14d9   :  { %v3768_v1 = vadd.f32 %v7884_v61, %v3759_v0  ;;  %v4118_v0 = vld [vmem:[%s14599_s12 + $0x70] sm:$0xff] }
0x14da   :  { %v3767_v63 = vadd.f32 %v7884_v61, %v3758_v62  ;;  %v3770_v61 = vld [vmem:[%s14600_s10 + $0x8] sm:$0xff]  ;;  %v3771_v62 = vld [vmem:[%s14600_s10 + $0x10] sm:$0xff] }
0x14dc   :  { %3870 = vmatmul.mubr.f32.vlgmr.msra.gmra.mrb[36].mxu1 %v3767_v63  ;;  %v3772_v63 = vld [vmem:[%s14600_s10 + $0x18] sm:$0xff] }
0x14dd   :  { %3875 = vmatprep.mubr.f32.mxu1 %v12805_v32  ;;  %10839 = vmatpush3.bf16.msra.mxu1 %v10838_v7 }
0x14de   :  { %10841 = vmatprep.subr.bf16.mxu1 %v10840_v8 }
0x14e0   :  { %3876 = vmatmul.mubr.f32.gmra.mrb[38].mxu1 %v3768_v1  ;;  %v4119_v1 = vld [vmem:[%s14599_s12 + $0x78] sm:$0xff] }
0x14e1   :  { %10843 = vmatpush3.bf16.msra.mxu1 %v10842_v13  ;;  %v10866_v2 = vpack.c.bf16 %v4119_v1, %v4118_v0  ;;  %v4083_v0 = vld [vmem:[%s14601_s24 + $0x58] sm:$0xff] }
0x14e2   :  { %10845 = vmatprep.subr.bf16.mxu1 %v10844_v14 }
0x14e5   :  { %10847 = vmatpush3.bf16.msra.mxu1 %v10846_v19  ;;  %v4090_v19 = vld [vmem:[%s14601_s24 + $0x90] sm:$0xff] }
0x14e6   :  { %10849 = vmatprep.subr.bf16.mxu1 %v10848_v20  ;;  %v4091_v20 = vld [vmem:[%s14601_s24 + $0x98] sm:$0xff] }
0x14e9   :  { %10851 = vmatpush3.bf16.msra.mxu1 %v10850_v25  ;;  %v10872_v25 = vpack.c.bf16 %v4091_v20, %v4090_v19 }
0x14ea   :  { %10853 = vmatprep.subr.bf16.mxu1 %v10852_v26  ;;  %v10874_v26 = vpack.c.bf16 %v4075_v24, %v4074_v23 }
0x14ed   :  { %10855 = vmatpush3.bf16.msra.mxu1 %v10854_v31  ;;  %v4076_v31 = vld [vmem:[%s14601_s24 + $0x20] sm:$0xff] }
0x14ee   :  { %10857 = vmatprep.subr.bf16.mxu1 %v10856_v33  ;;  %v4077_v33 = vld [vmem:[%s14601_s24 + $0x28] sm:$0xff] }
0x14ef   :  { %v10878_v39 = vpack.c.bf16 %v4077_v33, %v4076_v31  ;;  %v4395_v31 = vld [vmem:[%s14602_s11] sm:$0xff]  ;;  %v4396_v33 = vld [vmem:[%s14602_s11 + $0x8] sm:$0xff] }
0x14f1   :  { %10859 = vmatpush3.bf16.msra.mxu1 %v10858_v40  ;;  %v13863_v40 = vld [vmem:[#allocation2 + $0x10] sm:$0xff] }
0x14f2   :  { %10861 = vmatprep.subr.bf16.mxu1 %v10860_v41  ;;  %v13867_v41 = vld [vmem:[#allocation4 + $0x10] sm:$0xff] }
0x14f5   :  { %10863 = vmatpush3.bf16.msra.mxu1 %v10862_v50  ;;  %v4079_v50 = vld [vmem:[%s14601_s24 + $0x38] sm:$0xff] }
0x14f6   :  { %10865 = vmatprep.subr.bf16.mxu1 %v10864_v52  ;;  %v10882_v52 = vpack.c.bf16 %v4079_v50, %v4078_v49 }
0x14f9   :  { %10867 = vmatpush3.bf16.msra.mxu1 %v10866_v2  ;;  %v4100_v2 = vld [vmem:[%s14601_s24 + $0xe0] sm:$0xff] }
0x15af   :  { %v3871_v54 = vpop.f32.mrb[36].mxu1 }
0x15b0   :  { %v3873_v55 = vpop.f32.mrb[37].mxu1 }
0x15b3   :  { %v3877_v56 = vpop.f32.mrb[38].mxu1 }
0x15b4   :  { %v10826_v57 = vpack.c.bf16 %v3877_v56, %v3871_v54  ;;  %v3879_v58 = vpop.f32.mrb[39].mxu1  ;;  %v4096_v54 = vld [vmem:[%s14601_s24 + $0xc0] sm:$0xff] }
0x15b5   :  { %v10824_v59 = vpack.c.bf16 %v3879_v58, %v3873_v55  ;;  %v4097_v55 = vld [vmem:[%s14601_s24 + $0xc8] sm:$0xff] }
0x15b6   :  { %v10884_v56 = vpack.c.bf16 %v4097_v55, %v4096_v54  ;;  %v4081_v58 = vld [vmem:[%s14601_s24 + $0x48] sm:$0xff]  ;;  %v4398_v54 = vld [vmem:[%s14602_s11 + $0x18] sm:$0xff] }
0x15b7   :  { %10825 = vmatprep.subr.bf16.mxu0 %v10824_v59 }
0x15b8   :  { %10827 = vmatpush1.bf16.msra.mxu0 %v10826_v57  ;;  %v4080_v57 = vld [vmem:[%s14601_s24 + $0x40] sm:$0xff] }
0x15b9   :  { %v10886_v59 = vpack.c.bf16 %v4081_v58, %v4080_v57  ;;  %v4416_v57 = vld [vmem:[%s14602_s11 + $0xa8] sm:$0xff] }
0x15bb   :  { %7885 = vmatmul.mubr.msk.f32.vlgmr.msra.gmra.mrb[34].mxu0 %vm2537_vm2, %v3769_v60  ;;  %v4098_v60 = vld [vmem:[%s14601_s24 + $0xd0] sm:$0xff] }
0x15bc   :  { %3964 = vmatprep.mubr.f32.mxu0 %v12805_v32 }
0x15bf   :  { %7886 = vmatmul.mubr.msk.f32.gmra.mrb[36].mxu0 %vm2537_vm2, %v3770_v61  ;;  %v4099_v61 = vld [vmem:[%s14601_s24 + $0xd8] sm:$0xff] }
0x15c0   :  { %3970 = vmatprep.mubr.f32.mxu0 %v12805_v32 }
0x15c3   :  { %7887 = vmatmul.mubr.msk.f32.gmra.mrb[38].mxu0 %vm2537_vm2, %v3771_v62  ;;  %v10888_v62 = vpack.c.bf16 %v4099_v61, %v4098_v60 }
0x15c4   :  { %3976 = vmatprep.mubr.f32.mxu0 %v12805_v32 }
0x15c7   :  { %7888 = vmatmul.mubr.msk.f32.gmra.mrb[40].mxu0 %vm2537_vm2, %v3772_v63  ;;  %v4082_v63 = vld [vmem:[%s14601_s24 + $0x50] sm:$0xff] }
0x15c8   :  { %4047 = vmatprep.mubr.f32.mxu0 %v12805_v32  ;;  %v10890_v1 = vpack.c.bf16 %v4083_v0, %v4082_v63  ;;  %v4399_v63 = vld [vmem:[%s14602_s11 + $0x20] sm:$0xff]  ;;  %v4400_v0 = vld [vmem:[%s14602_s11 + $0x28] sm:$0xff] }
0x168e   :  { %v3960_v3 = vpop.f32.mrb[34].mxu0 }
0x168f   :  { %v3962_v4 = vpop.f32.mrb[35].mxu0 }
0x1690   :  { %4200 = vmatprep.mubr.f32.mxu1 %v3962_v4 }
0x1691   :  { %4201 = vmatmul.mubr.f32.vlgmr.msra.gmra.mrb[40].mxu1 %v3960_v3 }
0x1692   :  { %v3966_v53 = vpop.f32.mrb[36].mxu0 }
0x1693   :  { %v10830_v51 = vpack.c.bf16 %v3966_v53, %v3960_v3  ;;  %v3968_v5 = vpop.f32.mrb[37].mxu0  ;;  %v4101_v3 = vld [vmem:[%s14601_s24 + $0xe8] sm:$0xff] }
0x1694   :  { %v10828_v6 = vpack.c.bf16 %v3968_v5, %v3962_v4  ;;  %4205 = vmatprep.mubr.f32.mxu1 %v3968_v5  ;;  %v10892_v4 = vpack.c.bf16 %v4101_v3, %v4100_v2  ;;  %v4417_v2 = vld [vmem:[%s14602_s11 + $0xb0] sm:$0xff]  ;;  %v4418_v3 = vld [vmem:[%s14602_s11 + $0xb8] sm:$0xff] }
0x1695   :  { %4206 = vmatmul.mubr.f32.gmra.mrb[42].mxu1 %v3966_v53  ;;  %v4084_v53 = vld [vmem:[%s14601_s24 + $0x60] sm:$0xff] }
0x1696   :  { %v3972_v7 = vpop.f32.mrb[38].mxu0  ;;  %10829 = vmatprep.subr.bf16.mxu0 %v10828_v6  ;;  %10901 = vmatprep.subr.bf16.mxu1 %v10828_v6  ;;  %v4102_v6 = vld [vmem:[%s14601_s24 + $0xf0] sm:$0xff] }
0x1697   :  { %v3974_v8 = vpop.f32.mrb[39].mxu0  ;;  %10831 = vmatpush1.bf16.msra.mxu0 %v10830_v51  ;;  %10903 = vmatpush1.bf16.msra.mxu1 %v10830_v51  ;;  %v4085_v51 = vld [vmem:[%s14601_s24 + $0x68] sm:$0xff] }
0x1698   :  { %4210 = vmatprep.mubr.f32.mxu1 %v3974_v8  ;;  %v10894_v5 = vpack.c.bf16 %v4085_v51, %v4084_v53  ;;  %v10918_v53 = vpack.c.bf16 %v4400_v0, %v4399_v63  ;;  %v4718_v63 = vld [vmem:[#allocation40 + $0x8] sm:$0xff]  ;;  %v4719_v0 = vld [vmem:[#allocation40 + $0x10] sm:$0xff] }
0x1699   :  { %4211 = vmatmul.mubr.f32.gmra.mrb[44].mxu1 %v3972_v7 }
0x169a   :  { %v3978_v9 = vpop.f32.mrb[40].mxu0 }
0x169b   :  { %v10834_v12 = vpack.c.bf16 %v3978_v9, %v3972_v7  ;;  %v3980_v13 = vpop.f32.mrb[41].mxu0  ;;  %v4103_v7 = vld [vmem:[%s14601_s24 + $0xf8] sm:$0xff] }
0x169c   :  { %v10832_v14 = vpack.c.bf16 %v3980_v13, %v3974_v8  ;;  %4215 = vmatprep.mubr.f32.mxu1 %v3980_v13  ;;  %v10896_v8 = vpack.c.bf16 %v4103_v7, %v4102_v6  ;;  %v4412_v13 = vld [vmem:[%s14602_s11 + $0x88] sm:$0xff]  ;;  %v10920_v6 = vpack.c.bf16 %v4418_v3, %v4417_v2  ;;  %v4401_v7 = vld [vmem:[%s14602_s11 + $0x30] sm:$0xff] }
0x169d   :  { %4216 = vmatmul.mubr.f32.gmra.mrb[46].mxu1 %v3978_v9  ;;  %v4086_v9 = vld [vmem:[%s14601_s24 + $0x70] sm:$0xff] }
0x169e   :  { %10833 = vmatprep.subr.bf16.mxu0 %v10832_v14  ;;  %10905 = vmatprep.subr.bf16.mxu1 %v10832_v14  ;;  %v10898_v11 = vpack.c.bf16 %v4087_v10, %v4086_v9  ;;  %v4419_v10 = vld [vmem:[%s14602_s11 + $0xc0] sm:$0xff] }
0x169f   :  { %10835 = vmatpush1.bf16.msra.mxu0 %v10834_v12  ;;  %10907 = vmatpush1.bf16.msra.mxu1 %v10834_v12  ;;  %v4411_v12 = vld [vmem:[%s14602_s11 + $0x80] sm:$0xff] }
0x16a0   :  { %10941 = vmatprep.subr.bf16.mxu1 %v13670_v42  ;;  %4370 = vmatprep.mubr.f32.mxu1 %v12805_v32  ;;  %v10908_v14 = vpack.c.bf16 %v4412_v13, %v4411_v12 }
0x16a1   :  { %10869 = vmatprep.subr.bf16.mxu0 %v10868_v15 }
0x16a2   :  { %7889 = vmatmul.mubr.msk.f32.vlgmr.msra.gmra.mrb[42].mxu0 %vm733_vm1, %v13832_v21  ;;  %7893 = vmatmul.mubr.msk.f32.vlgmr.msra.gmra.mrb[48].mxu1 %vm733_vm1, %v13836_v22 }
0x16a3   :  { %10943 = vmatpush3.bf16.msra.mxu1 %v13670_v42  ;;  %4053 = vmatprep.mubr.f32.mxu0 %v12805_v32 }
0x16a4   :  { %10945 = vmatprep.subr.bf16.mxu1 %v13680_v45  ;;  %4376 = vmatprep.mubr.f32.mxu1 %v12805_v32 }
0x16a5   :  { %10871 = vmatpush3.bf16.msra.mxu0 %v10870_v18 }
0x16a6   :  { %7890 = vmatmul.mubr.msk.f32.gmra.mrb[44].mxu0 %vm733_vm1, %v13848_v29  ;;  %7894 = vmatmul.mubr.msk.f32.gmra.mrb[50].mxu1 %vm733_vm1, %v13852_v30 }
0x16a7   :  { %10947 = vmatpush3.bf16.msra.mxu1 %v13680_v45  ;;  %4059 = vmatprep.mubr.f32.mxu0 %v12805_v32 }
0x16a8   :  { %4382 = vmatprep.mubr.f32.mxu1 %v12805_v32  ;;  %10873 = vmatprep.subr.bf16.mxu0 %v10872_v25 }
0x16a9   :  { %10875 = vmatpush3.bf16.msra.mxu0 %v10874_v26 }
0x16aa   :  { %7891 = vmatmul.mubr.msk.f32.gmra.mrb[46].mxu0 %vm733_vm1, %v13863_v40  ;;  %7895 = vmatmul.mubr.msk.f32.gmra.mrb[52].mxu1 %vm733_vm1, %v13867_v41 }
0x16ab   :  { %4065 = vmatprep.mubr.f32.mxu0 %v12805_v32  ;;  %4388 = vmatprep.mubr.f32.mxu1 %v12805_v32 }
0x16ac   :  { %10877 = vmatprep.subr.bf16.mxu0 %v10876_v34  ;;  %v4413_v34 = vld [vmem:[%s14602_s11 + $0x90] sm:$0xff] }
0x16ad   :  { %10879 = vmatpush3.bf16.msra.mxu0 %v10878_v39  ;;  %v10910_v39 = vpack.c.bf16 %v4396_v33, %v4395_v31  ;;  %v10912_v50 = vpack.c.bf16 %v4414_v35, %v4413_v34  ;;  %v4405_v33 = vld [vmem:[%s14602_s11 + $0x50] sm:$0xff]  ;;  %v4406_v34 = vld [vmem:[%s14602_s11 + $0x58] sm:$0xff]  ;;  %v4423_v35 = vld [vmem:[%s14602_s11 + $0xe0] sm:$0xff] }
0x16ae   :  { %7892 = vmatmul.mubr.msk.f32.gmra.mrb[48].mxu0 %vm733_vm1, %v13873_v47  ;;  %7896 = vmatmul.mubr.msk.f32.gmra.mrb[54].mxu1 %vm733_vm1, %v13877_v48 }
0x16af   :  { %10881 = vmatprep.subr.bf16.mxu0 %v10880_v46  ;;  %9544 = vmatprep.mubr.msk.f32.mxu1 %vm733_vm1, %v13832_v21 }
0x16b1   :  { %10883 = vmatpush3.bf16.msra.mxu0 %v10882_v52  ;;  %v4397_v52 = vld [vmem:[%s14602_s11 + $0x10] sm:$0xff] }
0x16b2   :  { %9545 = vmatmul.mubr.msk.f32.vlgmr.msra.gmra.mrb[56].mxu1 %vm733_vm1, %v13848_v29  ;;  %10885 = vmatprep.subr.bf16.mxu0 %v10884_v56  ;;  %v4415_v56 = vld [vmem:[%s14602_s11 + $0xa0] sm:$0xff] }
0x16b3   :  { %9547 = vmatprep.mubr.msk.f32.mxu1 %vm733_vm1, %v13863_v40 }
0x16b5   :  { %10887 = vmatpush3.bf16.msra.mxu0 %v10886_v59  ;;  %v10914_v59 = vpack.c.bf16 %v4398_v54, %v4397_v52  ;;  %v4408_v52 = vld [vmem:[%s14602_s11 + $0x68] sm:$0xff]  ;;  %v4425_v54 = vld [vmem:[%s14602_s11 + $0xf0] sm:$0xff] }
0x16b6   :  { %9548 = vmatmul.mubr.msk.f32.gmra.mrb[58].mxu1 %vm733_vm1, %v13873_v47  ;;  %10889 = vmatprep.subr.bf16.mxu0 %v10888_v62  ;;  %v10916_v62 = vpack.c.bf16 %v4416_v57, %v4415_v56  ;;  %v4426_v56 = vld [vmem:[%s14602_s11 + $0xf8] sm:$0xff] }
0x16b7   :  { %9558 = vmatprep.mubr.msk.f32.mxu1 %vm733_vm1, %v13832_v21 }
0x16b9   :  { %10891 = vmatpush3.bf16.msra.mxu0 %v10890_v1 }
0x16ba   :  { %10893 = vmatprep.subr.bf16.mxu0 %v10892_v4 }
0x16bd   :  { %10895 = vmatpush3.bf16.msra.mxu0 %v10894_v5 }
0x16be   :  { %10897 = vmatprep.subr.bf16.mxu0 %v10896_v8  ;;  %v4402_v8 = vld [vmem:[%s14602_s11 + $0x38] sm:$0xff] }
0x16bf   :  { %v10922_v13 = vpack.c.bf16 %v4402_v8, %v4401_v7  ;;  %v4722_v7 = vld [vmem:[#allocation40 + $0x28] sm:$0xff]  ;;  %v4724_v8 = vld [vmem:[#allocation40 + $0x38] sm:$0xff] }
0x16c1   :  { %10899 = vmatpush3.bf16.msra.mxu0 %v10898_v11  ;;  %v4420_v11 = vld [vmem:[%s14602_s11 + $0xc8] sm:$0xff] }
0x16c2   :  { %10909 = vmatprep.subr.bf16.mxu0 %v10908_v14 }
0x1764   :  { %v8363_v15 = vpop.f32.mrb[40].mxu1 }
0x1765   :  { %v8364_v16 = vpop.f32.mrb[41].mxu1 }
0x1766   :  { %v13911_v17 = vadd.f32 %v8364_v16, %v8363_v15  ;;  %v10924_v16 = vpack.c.bf16 %v4420_v11, %v4419_v10  ;;  %v4725_v10 = vld [vmem:[#allocation40 + $0x40] sm:$0xff]  ;;  %v4726_v11 = vld [vmem:[#allocation40 + $0x48] sm:$0xff] }
0x1768   :  { %v8366_v18 = vpop.f32.mrb[42].mxu1 }
0x1769   :  { %v8367_v19 = vpop.f32.mrb[43].mxu1 }
0x176a   :  { %v13913_v20 = vadd.f32 %v8367_v19, %v8366_v18  ;;  %v4403_v18 = vld [vmem:[%s14602_s11 + $0x40] sm:$0xff]  ;;  %v4404_v19 = vld [vmem:[%s14602_s11 + $0x48] sm:$0xff] }
0x176c   :  { %v8369_v23 = vpop.f32.mrb[44].mxu1 }
0x176d   :  { %v8370_v24 = vpop.f32.mrb[45].mxu1 }
0x176e   :  { %v13915_v25 = vadd.f32 %v8370_v24, %v8369_v23  ;;  %v4421_v24 = vld [vmem:[%s14602_s11 + $0xd0] sm:$0xff] }
0x1770   :  { %v8372_v26 = vpop.f32.mrb[46].mxu1 }
0x1771   :  { %v8373_v27 = vpop.f32.mrb[47].mxu1 }
0x1772   :  { %v13917_v28 = vadd.f32 %v8373_v27, %v8372_v26  ;;  %v4422_v26 = vld [vmem:[%s14602_s11 + $0xd8] sm:$0xff]  ;;  %v10926_v27 = vpack.c.bf16 %v4404_v19, %v4403_v18 }
0x1773   :  { %v10928_v31 = vpack.c.bf16 %v4422_v26, %v4421_v24  ;;  %v4730_v18 = vld [vmem:[#allocation40 + $0x68] sm:$0xff]  ;;  %v4732_v24 = vld [vmem:[#allocation40 + $0x78] sm:$0xff] }
0x1775   :  { %v4049_v37 = vpop.f32.mrb[42].mxu0  ;;  %v13923_v46 = vpop.f32.mrb[48].mxu1 }
0x1776   :  { %v4051_v49 = vpop.f32.mrb[43].mxu0  ;;  %v4374_v55 = vpop.f32.mrb[49].mxu1 }
0x1777   :  { %4285 = vmatprep.mubr.f32.mxu0 %v4051_v49 }
0x1778   :  { %4286 = vmatmul.mubr.f32.vlgmr.msra.gmra.mrb[50].mxu0 %v4049_v37  ;;  %v4424_v37 = vld [vmem:[%s14602_s11 + $0xe8] sm:$0xff] }
0x1779   :  { %10911 = vmatpush3.bf16.msra.mxu0 %v10910_v39  ;;  %v4055_v58 = vpop.f32.mrb[44].mxu0  ;;  %v13929_v60 = vpop.f32.mrb[50].mxu1  ;;  %v10930_v39 = vpack.c.bf16 %v4406_v34, %v4405_v33  ;;  %v10932_v49 = vpack.c.bf16 %v4424_v37, %v4423_v35 }
0x177a   :  { %v4057_v61 = vpop.f32.mrb[45].mxu0  ;;  %10913 = vmatprep.subr.bf16.mxu0 %v10912_v50  ;;  %v4380_v1 = vpop.f32.mrb[51].mxu1  ;;  %v4407_v50 = vld [vmem:[%s14602_s11 + $0x60] sm:$0xff] }
0x177b   :  { %4290 = vmatprep.mubr.f32.mxu0 %v4057_v61  ;;  %v10934_v57 = vpack.c.bf16 %v4408_v52, %v4407_v50 }
0x177c   :  { %4291 = vmatmul.mubr.f32.gmra.mrb[52].mxu0 %v4055_v58  ;;  %v4409_v58 = vld [vmem:[%s14602_s11 + $0x70] sm:$0xff] }
0x177d   :  { %10915 = vmatpush3.bf16.msra.mxu0 %v10914_v59  ;;  %v4061_v4 = vpop.f32.mrb[46].mxu0  ;;  %v4384_v51 = vpop.f32.mrb[52].mxu1  ;;  %v4410_v59 = vld [vmem:[%s14602_s11 + $0x78] sm:$0xff] }
0x177e   :  { %v4063_v5 = vpop.f32.mrb[47].mxu0  ;;  %10917 = vmatprep.subr.bf16.mxu0 %v10916_v62  ;;  %v4386_v9 = vpop.f32.mrb[53].mxu1  ;;  %v10938_v61 = vpack.c.bf16 %v4410_v59, %v4409_v58  ;;  %v4717_v62 = vld [vmem:[#allocation40] sm:$0xff] }
0x177f   :  { %4295 = vmatprep.mubr.f32.mxu0 %v4063_v5  ;;  %v10956_v3 = vpack.c.bf16 %v4718_v63, %v4717_v62 }
0x1780   :  { %4296 = vmatmul.mubr.f32.gmra.mrb[54].mxu0 %v4061_v4  ;;  %v4720_v4 = vld [vmem:[#allocation40 + $0x18] sm:$0xff] }
0x1781   :  { %10919 = vmatpush3.bf16.msra.mxu0 %v10918_v53  ;;  %v4067_v12 = vpop.f32.mrb[48].mxu0  ;;  %v4390_v14 = vpop.f32.mrb[54].mxu1  ;;  %v10960_v5 = vpack.c.bf16 %v4720_v4, %v4719_v0 }
0x1782   :  { %v4069_v15 = vpop.f32.mrb[49].mxu0  ;;  %10921 = vmatprep.subr.bf16.mxu0 %v10920_v6  ;;  %v4392_v23 = vpop.f32.mrb[55].mxu1  ;;  %v4721_v6 = vld [vmem:[#allocation40 + $0x20] sm:$0xff] }
0x1783   :  { %4300 = vmatprep.mubr.f32.mxu0 %v4069_v15 }
0x1784   :  { %4301 = vmatmul.mubr.f32.gmra.mrb[56].mxu0 %v4067_v12  ;;  %v10972_v12 = vpack.c.bf16 %v4726_v11, %v4725_v10 }
0x1785   :  { %10923 = vmatpush3.bf16.msra.mxu0 %v10922_v13  ;;  %4491 = vmatprep.mubr.f32.mxu0 %v4374_v55  ;;  %v10936_v55 = vpack.c.bf16 %v4426_v56, %v4425_v54  ;;  %v13955_v2 = vpop.f32.mrb[56].mxu1  ;;  %v4727_v13 = vld [vmem:[#allocation40 + $0x50] sm:$0xff] }
0x1786   :  { %10925 = vmatprep.subr.bf16.mxu0 %v10924_v16  ;;  %v13957_v53 = vpop.f32.mrb[57].mxu1  ;;  %v4729_v16 = vld [vmem:[#allocation40 + $0x60] sm:$0xff] }
0x1787   :  { %v10980_v19 = vpack.c.bf16 %v4730_v18, %v4729_v16 }
0x1789   :  { %10927 = vmatpush3.bf16.msra.mxu0 %v10926_v27 }
0x178a   :  { %10929 = vmatprep.subr.bf16.mxu0 %v10928_v31 }
0x178d   :  { %10931 = vmatpush3.bf16.msra.mxu0 %v10930_v39 }
0x178e   :  { %10933 = vmatprep.subr.bf16.mxu0 %v10932_v49 }
0x1791   :  { %10935 = vmatpush3.bf16.msra.mxu0 %v10934_v57 }
0x1792   :  { %10937 = vmatprep.subr.bf16.mxu0 %v10936_v55 }
0x1795   :  { %10939 = vmatpush3.bf16.msra.mxu0 %v10938_v61 }
0x1796   :  { %10957 = vmatprep.subr.bf16.mxu0 %v10956_v3 }
0x1798   :  { %4492 = vmatmul.mubr.f32.vlgmr.msra.gmra.mrb[58].mxu0 %v13923_v46  ;;  %v13959_v46 = vpop.f32.mrb[58].mxu1 }
0x1799   :  { %4496 = vmatprep.mubr.f32.mxu0 %v4380_v1  ;;  %10959 = vmatpush3.bf16.msra.mxu0 %v10956_v3  ;;  %v10964_v1 = vpack.c.bf16 %v4722_v7, %v4721_v6  ;;  %v7897_v3 = vld [vmem:[%s14603_s0] ss:$0 sm:$0xff] }
0x179a   :  { %10961 = vmatprep.subr.bf16.mxu0 %v10960_v5 }
0x179c   :  { %4497 = vmatmul.mubr.f32.gmra.mrb[60].mxu0 %v13929_v60  ;;  %v13961_v60 = vpop.f32.mrb[59].mxu1 }
0x179d   :  { %4501 = vmatprep.mubr.f32.mxu0 %v4386_v9  ;;  %10963 = vmatpush3.bf16.msra.mxu0 %v10960_v5 }
0x179e   :  { %10965 = vmatprep.subr.bf16.mxu0 %v10964_v1 }
0x17a0   :  { %4502 = vmatmul.mubr.f32.gmra.mrb[62].mxu0 %v4384_v51  ;;  %v4723_v51 = vld [vmem:[#allocation40 + $0x30] sm:$0xff] }
0x17a1   :  { %4506 = vmatprep.mubr.f32.mxu0 %v4392_v23  ;;  %v10968_v9 = vpack.c.bf16 %v4724_v8, %v4723_v51  ;;  %10967 = vmatpush3.bf16.msra.mxu0 %v10964_v1  ;;  %v4731_v23 = vld [vmem:[#allocation40 + $0x70] sm:$0xff] }
0x17a2   :  { %v10984_v26 = vpack.c.bf16 %v4732_v24, %v4731_v23 }
0x17a3   :  { %10969 = vmatprep.subr.bf16.mxu0 %v10968_v9 }
0x17a4   :  { %4507 = vmatmul.mubr.f32.gmra.mrb[64].mxu0 %v4390_v14  ;;  %v4728_v14 = vld [vmem:[#allocation40 + $0x58] sm:$0xff] }
0x17a5   :  { %10971 = vmatpush3.bf16.msra.mxu0 %v10968_v9  ;;  %v10976_v15 = vpack.c.bf16 %v4728_v14, %v4727_v13 }
0x17a6   :  { %10973 = vmatprep.subr.bf16.mxu0 %v10972_v12 }
0x17a9   :  { %10975 = vmatpush3.bf16.msra.mxu0 %v10972_v12 }
0x17aa   :  { %10977 = vmatprep.subr.bf16.mxu0 %v10976_v15 }
0x17ad   :  { %10979 = vmatpush3.bf16.msra.mxu0 %v10976_v15 }
0x17ae   :  { %10981 = vmatprep.subr.bf16.mxu0 %v10980_v19 }
0x17b1   :  { %10983 = vmatpush3.bf16.msra.mxu0 %v10980_v19 }
0x17b2   :  { %10985 = vmatprep.subr.bf16.mxu0 %v10984_v26 }
0x17b5   :  { %10987 = vmatpush3.bf16.msra.mxu0 %v10984_v26 }
0x184b   :  { %v8407_v27 = vpop.f32.mrb[50].mxu0 }
0x184c   :  { %v8408_v31 = vpop.f32.mrb[51].mxu0 }
0x184d   :  { %v8409_v33 = vadd.f32 %v8408_v31, %v8407_v27  ;;  %v4621_v27 = vld [vmem:[#allocation37 + $0x28] sm:$0xff] }
0x184f   :  { %v4288_v34 = vadd.f32 %v8409_v33, %v13911_v17  ;;  %v8410_v35 = vpop.f32.mrb[52].mxu0  ;;  %v4623_v33 = vld [vmem:[#allocation37 + $0x38] sm:$0xff] }
0x1850   :  { %v8411_v37 = vpop.f32.mrb[53].mxu0 }
0x1851   :  { %v8412_v39 = vadd.f32 %v8411_v37, %v8410_v35 }
0x1853   :  { %v4293_v49 = vadd.f32 %v8412_v39, %v13913_v20  ;;  %v8413_v50 = vpop.f32.mrb[54].mxu0  ;;  %v4624_v39 = vld [vmem:[#allocation37 + $0x40] sm:$0xff] }
0x1854   :  { %v8414_v52 = vpop.f32.mrb[55].mxu0 }
0x1855   :  { %v8415_v54 = vadd.f32 %v8414_v52, %v8413_v50 }
0x1857   :  { %v4298_v56 = vadd.f32 %v8415_v54, %v13915_v25  ;;  %v8416_v57 = vpop.f32.mrb[56].mxu0 }
0x1858   :  { %v8417_v55 = vpop.f32.mrb[57].mxu0 }
0x1859   :  { %v8418_v58 = vadd.f32 %v8417_v55, %v8416_v57  ;;  %v4627_v57 = vld [vmem:[#allocation37 + $0x58] sm:$0xff] }
0x185b   :  { %v4303_v59 = vadd.f32 %v8418_v58, %v13917_v28 }
0x186b   :  { %v8451_v61 = vpop.f32.mrb[58].mxu0 }
0x186c   :  { %v8452_v62 = vpop.f32.mrb[59].mxu0 }
0x186d   :  { %v8453_v63 = vadd.f32 %v8452_v62, %v8451_v61  ;;  %v4629_v61 = vld [vmem:[#allocation37 + $0x68] sm:$0xff] }
0x186f   :  { %v4512_v17 = vadd.f32 %v8453_v63, %v4288_v34  ;;  %v8454_v0 = vpop.f32.mrb[60].mxu0 }
0x1870   :  { %v8455_v4 = vpop.f32.mrb[61].mxu0 }
0x1871   :  { %v8456_v5 = vadd.f32 %v8455_v4, %v8454_v0  ;;  %v13968_v6 = vadd.f32 %v7897_v3, %v4512_v17  ;;  %v4630_v0 = vld [vmem:[#allocation37 + $0x70] sm:$0xff] }
0x1873   :  { %v4513_v20 = vadd.f32 %v8456_v5, %v4293_v49  ;;  %v8457_v7 = vpop.f32.mrb[62].mxu0  ;;  %v4527_v8 = vmax.f32 %v13968_v6, 0.0  ;;  %v4625_v49 = vld [vmem:[#allocation37 + $0x48] sm:$0xff]  ;;  %v4919_v5 = vld [vmem:[#allocation42] sm:$0xff]  ;;  %v4934_v6 = vld [vmem:[#allocation42 + $0x78] sm:$0xff] }
0x1874   :  { %v8458_v1 = vpop.f32.mrb[63].mxu0  ;;  %v11004_v52 = vpack.c.bf16 %v4625_v49, %v4624_v39  ;;  %v4909_v39 = vld [vmem:[#allocation39 + $0x30] sm:$0xff]  ;;  %v4910_v49 = vld [vmem:[#allocation39 + $0x38] sm:$0xff] }
0x1875   :  { %v13970_v51 = vadd.f32 %v7897_v3, %v4513_v20  ;;  %v8459_v25 = vadd.f32 %v8458_v1, %v8457_v7  ;;  %v4920_v20 = vld [vmem:[#allocation42 + $0x8] sm:$0xff]  ;;  %v4921_v1 = vld [vmem:[#allocation42 + $0x10] sm:$0xff] }
0x1876   :  { %v11020_v7 = vpack.c.bf16 %v4920_v20, %v4919_v5  ;;  %v5298_v5 = vld [vmem:[#allocation43 + $0x18] sm:$0xff] }
0x1877   :  { %v4528_v28 = vmax.f32 %v13970_v51, 0.0  ;;  %v4514_v9 = vadd.f32 %v8459_v25, %v4298_v56  ;;  %v8460_v10 = vpop.f32.mrb[64].mxu0  ;;  %v4626_v56 = vld [vmem:[#allocation37 + $0x50] sm:$0xff]  ;;  %v4922_v25 = vld [vmem:[#allocation42 + $0x18] sm:$0xff] }
0x1878   :  { %v8461_v11 = vpop.f32.mrb[65].mxu0 }
0x1879   :  { %v10948_v12 = vpack.c.bf16 %v4528_v28, %v4527_v8  ;;  %v8462_v13 = vadd.f32 %v8461_v11, %v8460_v10  ;;  %v13978_v14 = vadd.f32 %v7897_v3, %v4514_v9  ;;  %v11024_v9 = vpack.c.bf16 %v4922_v25, %v4921_v1  ;;  %v4923_v10 = vld [vmem:[#allocation42 + $0x20] sm:$0xff]  ;;  %v4924_v11 = vld [vmem:[#allocation42 + $0x28] sm:$0xff] }
0x187a   :  { %v5300_v1 = vld [vmem:[#allocation43 + $0x28] sm:$0xff] }
0x187b   :  { %v4515_v15 = vadd.f32 %v8462_v13, %v4303_v59  ;;  %10949 = vmatprep.subr.bf16.mxu1 %v10948_v12  ;;  %v4529_v18 = vmax.f32 %v13978_v14, 0.0  ;;  %v4628_v59 = vld [vmem:[#allocation37 + $0x60] sm:$0xff]  ;;  %v4925_v13 = vld [vmem:[#allocation42 + $0x30] sm:$0xff]  ;;  %v4914_v14 = vld [vmem:[#allocation39 + $0x58] sm:$0xff] }
0x187c   :  { %10951 = vmatpush3.bf16.msra.mxu1 %v10948_v12  ;;  %v11012_v63 = vpack.c.bf16 %v4629_v61, %v4628_v59  ;;  %v4916_v59 = vld [vmem:[#allocation39 + $0x68] sm:$0xff]  ;;  %v4918_v61 = vld [vmem:[#allocation39 + $0x78] sm:$0xff] }
0x187d   :  { %v13980_v16 = vadd.f32 %v7897_v3, %v4515_v15  ;;  %v4631_v3 = vld [vmem:[#allocation37 + $0x78] sm:$0xff] }
0x187e   :  { %v11016_v4 = vpack.c.bf16 %v4631_v3, %v4630_v0  ;;  %v4926_v15 = vld [vmem:[#allocation42 + $0x38] sm:$0xff]  ;;  %v5296_v0 = vld [vmem:[#allocation43 + $0x8] sm:$0xff] }
0x187f   :  { %v4530_v19 = vmax.f32 %v13980_v16, 0.0 }
0x1881   :  { %v10952_v23 = vpack.c.bf16 %v4530_v19, %v4529_v18 }
0x1883   :  { %10953 = vmatprep.subr.bf16.mxu1 %v10952_v23 }
0x1884   :  { %10955 = vmatpush3.bf16.msra.mxu1 %v10952_v23 }
0x1885   :  { %11085 = vmatprep.subr.bf16.mxu1 %v13670_v42 }
0x1887   :  { %9559 = vmatmul.mubr.msk.f32.vlgmr.msra.gmra.mrb[60].mxu1 %vm733_vm1, %v13848_v29 }
0x1888   :  { %11087 = vmatpush3.bf16.msra.mxu1 %v13670_v42  ;;  %9561 = vmatprep.mubr.msk.f32.mxu1 %vm733_vm1, %v13863_v40  ;;  %v4616_v42 = vld [vmem:[#allocation37] sm:$0xff]  ;;  %v4618_v40 = vld [vmem:[#allocation37 + $0x10] sm:$0xff] }
0x1889   :  { %11089 = vmatprep.subr.bf16.mxu1 %v13680_v45 }
0x188b   :  { %9562 = vmatmul.mubr.msk.f32.gmra.mrb[62].mxu1 %vm733_vm1, %v13873_v47  ;;  %v4619_v47 = vld [vmem:[#allocation37 + $0x18] sm:$0xff] }
0x188c   :  { %11091 = vmatpush3.bf16.msra.mxu1 %v13680_v45  ;;  %9724 = vmatprep.mubr.msk.f32.mxu1 %vm733_vm1, %v13836_v22  ;;  %v4617_v45 = vld [vmem:[#allocation37 + $0x8] sm:$0xff]  ;;  %v10992_v26 = vpack.c.bf16 %v4619_v47, %v4618_v40  ;;  %v4931_v47 = vld [vmem:[#allocation42 + $0x60] sm:$0xff] }
0x188d   :  { %11093 = vmatprep.subr.bf16.mxu1 %v10948_v12  ;;  %v10988_v29 = vpack.c.bf16 %v4617_v45, %v4616_v42  ;;  %v4927_v42 = vld [vmem:[#allocation42 + $0x40] sm:$0xff]  ;;  %v4928_v45 = vld [vmem:[#allocation42 + $0x48] sm:$0xff] }
0x188f   :  { %9725 = vmatmul.mubr.msk.f32.vlgmr.msra.gmra.mrb[64].mxu1 %vm733_vm1, %v13852_v30  ;;  %10989 = vmatprep.subr.bf16.mxu0 %v10988_v29 }
0x1890   :  { %11095 = vmatpush3.bf16.msra.mxu1 %v10948_v12  ;;  %9727 = vmatprep.mubr.msk.f32.mxu1 %vm733_vm1, %v13867_v41  ;;  %v11028_v12 = vpack.c.bf16 %v4924_v11, %v4923_v10  ;;  %v5302_v10 = vld [vmem:[#allocation43 + $0x38] sm:$0xff] }
0x1891   :  { %11097 = vmatprep.subr.bf16.mxu1 %v10952_v23 }
0x1893   :  { %9728 = vmatmul.mubr.msk.f32.gmra.mrb[66].mxu1 %vm733_vm1, %v13877_v48 }
0x1894   :  { %11099 = vmatpush3.bf16.msra.mxu1 %v10952_v23  ;;  %9738 = vmatprep.mubr.msk.f32.mxu1 %vm733_vm1, %v13836_v22  ;;  %v11032_v23 = vpack.c.bf16 %v4926_v15, %v4925_v13  ;;  %v5304_v13 = vld [vmem:[#allocation43 + $0x48] sm:$0xff] }
0x1897   :  { %9739 = vmatmul.mubr.msk.f32.vlgmr.msra.gmra.mrb[68].mxu1 %vm733_vm1, %v13852_v30  ;;  %v4620_v30 = vld [vmem:[#allocation37 + $0x20] sm:$0xff] }
0x1898   :  { %9741 = vmatprep.mubr.msk.f32.mxu1 %vm733_vm1, %v13867_v41 }
0x189b   :  { %9742 = vmatmul.mubr.msk.f32.gmra.mrb[70].mxu1 %vm733_vm1, %v13877_v48  ;;  %v10996_v48 = vpack.c.bf16 %v4621_v27, %v4620_v30  ;;  %v4904_v30 = vld [vmem:[#allocation39 + $0x8] sm:$0xff] }
0x189c   :  { %9828 = vmatprep.mubr.msk.f32.mxu1 %vm733_vm1, %v13832_v21  ;;  %v4622_v21 = vld [vmem:[#allocation37 + $0x30] sm:$0xff] }
0x189d   :  { %v11000_v35 = vpack.c.bf16 %v4623_v33, %v4622_v21  ;;  %v4907_v21 = vld [vmem:[#allocation39 + $0x20] sm:$0xff]  ;;  %v4908_v33 = vld [vmem:[#allocation39 + $0x28] sm:$0xff] }
0x195a   :  { %v9560_v24 = vpop.f32.mrb[60].mxu1 }
0x195b   :  { %v4698_v22 = vpop.f32.mrb[61].mxu1 }
0x195c   :  { %9596 = vmatprep.mubr.f32.mxu0 %v4698_v22  ;;  %v4933_v22 = vld [vmem:[#allocation42 + $0x70] sm:$0xff] }
0x195d   :  { %9597 = vmatmul.mubr.f32.vlgmr.msra.gmra.mrb[66].mxu0 %v9560_v24  ;;  %v4932_v24 = vld [vmem:[#allocation42 + $0x68] sm:$0xff] }
0x195e   :  { %10991 = vmatpush3.bf16.msra.mxu0 %v10988_v29  ;;  %v9563_v41 = vpop.f32.mrb[62].mxu1  ;;  %v4929_v29 = vld [vmem:[#allocation42 + $0x50] sm:$0xff] }
0x195f   :  { %v4708_v31 = vpop.f32.mrb[63].mxu1  ;;  %10993 = vmatprep.subr.bf16.mxu0 %v10992_v26 }
0x1960   :  { %9599 = vmatprep.mubr.f32.mxu0 %v4708_v31  ;;  %v4906_v31 = vld [vmem:[#allocation39 + $0x18] sm:$0xff] }
0x1961   :  { %9600 = vmatmul.mubr.f32.gmra.mrb[68].mxu0 %v9563_v41  ;;  %v4905_v41 = vld [vmem:[#allocation39 + $0x10] sm:$0xff] }
0x1962   :  { %10995 = vmatpush3.bf16.msra.mxu0 %v10992_v26  ;;  %9634 = vmatprep.mubr.f32.mxu0 %v13957_v53  ;;  %v14017_v34 = vpop.f32.mrb[64].mxu1  ;;  %v11008_v53 = vpack.c.bf16 %v4627_v57, %v4626_v56  ;;  %v4903_v26 = vld [vmem:[#allocation39] sm:$0xff]  ;;  %v4912_v57 = vld [vmem:[#allocation39 + $0x48] sm:$0xff] }
0x1963   :  { %10997 = vmatprep.subr.bf16.mxu0 %v10996_v48  ;;  %v14019_v37 = vpop.f32.mrb[65].mxu1  ;;  %v11052_v27 = vpack.c.bf16 %v4904_v30, %v4903_v26  ;;  %v4911_v56 = vld [vmem:[#allocation39 + $0x40] sm:$0xff] }
0x1964   :  { %v11068_v51 = vpack.c.bf16 %v4912_v57, %v4911_v56  ;;  %v5200_v30 = vld [vmem:[%s14604_s15 + $0x30] sm:$0xff]  ;;  %v14072_v56 = vld [vmem:[#allocation4] sm:$0xff] }
0x1965   :  { %v7914_v57 = vld [vmem:[%s14605_s27] ss:$0 sm:$0xff] }
0x1966   :  { %10999 = vmatpush3.bf16.msra.mxu0 %v10996_v48  ;;  %v14021_v50 = vpop.f32.mrb[66].mxu1  ;;  %v11056_v48 = vpack.c.bf16 %v4906_v31, %v4905_v41  ;;  %v5203_v31 = vld [vmem:[%s14604_s15 + $0x48] sm:$0xff] }
0x1967   :  { %11001 = vmatprep.subr.bf16.mxu0 %v11000_v35  ;;  %v14023_v54 = vpop.f32.mrb[67].mxu1 }
0x196a   :  { %11003 = vmatpush3.bf16.msra.mxu0 %v11000_v35  ;;  %v14025_v55 = vpop.f32.mrb[68].mxu1  ;;  %v11060_v35 = vpack.c.bf16 %v4908_v33, %v4907_v21  ;;  %v5205_v21 = vld [vmem:[%s14604_s15 + $0x58] sm:$0xff] }
0x196b   :  { %11005 = vmatprep.subr.bf16.mxu0 %v11004_v52  ;;  %v14027_v58 = vpop.f32.mrb[69].mxu1 }
0x196e   :  { %11007 = vmatpush3.bf16.msra.mxu0 %v11004_v52  ;;  %v14029_v62 = vpop.f32.mrb[70].mxu1  ;;  %v11064_v52 = vpack.c.bf16 %v4910_v49, %v4909_v39  ;;  %v5208_v39 = vld [vmem:[%s14604_s15 + $0x70] sm:$0xff]  ;;  %v5209_v49 = vld [vmem:[%s14604_s15 + $0x78] sm:$0xff] }
0x196f   :  { %11009 = vmatprep.subr.bf16.mxu0 %v11008_v53  ;;  %v14031_v17 = vpop.f32.mrb[71].mxu1 }
0x1972   :  { %11011 = vmatpush3.bf16.msra.mxu0 %v11008_v53  ;;  %v4915_v53 = vld [vmem:[#allocation39 + $0x60] sm:$0xff] }
0x1973   :  { %11013 = vmatprep.subr.bf16.mxu0 %v11012_v63  ;;  %v11076_v16 = vpack.c.bf16 %v4916_v59, %v4915_v53 }
0x1976   :  { %11015 = vmatpush3.bf16.msra.mxu0 %v11012_v63  ;;  %v5295_v63 = vld [vmem:[#allocation43] sm:$0xff] }
0x1977   :  { %11017 = vmatprep.subr.bf16.mxu0 %v11016_v4  ;;  %v11100_v3 = vpack.c.bf16 %v5296_v0, %v5295_v63  ;;  %v5602_v63 = vld [vmem:[#allocation46 + $0x8] sm:$0xff] }
0x197a   :  { %11019 = vmatpush3.bf16.msra.mxu0 %v11016_v4  ;;  %v5297_v4 = vld [vmem:[#allocation43 + $0x10] sm:$0xff] }
0x197b   :  { %11021 = vmatprep.subr.bf16.mxu0 %v11020_v7  ;;  %v11104_v20 = vpack.c.bf16 %v5298_v5, %v5297_v4  ;;  %v5603_v5 = vld [vmem:[#allocation46 + $0x10] sm:$0xff] }
0x197d   :  { %9635 = vmatmul.mubr.f32.vlgmr.msra.gmra.mrb[66].mxu0 %v13955_v2  ;;  %v11036_v2 = vpack.c.bf16 %v4928_v45, %v4927_v42  ;;  %v5307_v42 = vld [vmem:[#allocation43 + $0x60] sm:$0xff]  ;;  %v5309_v45 = vld [vmem:[#allocation43 + $0x70] sm:$0xff] }
0x197e   :  { %9637 = vmatprep.mubr.f32.mxu0 %v13961_v60  ;;  %11023 = vmatpush3.bf16.msra.mxu0 %v11020_v7  ;;  %v4930_v60 = vld [vmem:[#allocation42 + $0x58] sm:$0xff]  ;;  %v5299_v7 = vld [vmem:[#allocation43 + $0x20] sm:$0xff] }
0x197f   :  { %11025 = vmatprep.subr.bf16.mxu0 %v11024_v9  ;;  %v11040_v40 = vpack.c.bf16 %v4930_v60, %v4929_v29  ;;  %v11108_v25 = vpack.c.bf16 %v5300_v1, %v5299_v7  ;;  %v5194_v60 = vld [vmem:[%s14604_s15] sm:$0xff]  ;;  %v5605_v1 = vld [vmem:[#allocation46 + $0x20] sm:$0xff] }
0x1981   :  { %9638 = vmatmul.mubr.f32.gmra.mrb[68].mxu0 %v13959_v46  ;;  %v11044_v46 = vpack.c.bf16 %v4932_v24, %v4931_v47  ;;  %v5196_v24 = vld [vmem:[%s14604_s15 + $0x10] sm:$0xff] }
0x1982   :  { %11027 = vmatpush3.bf16.msra.mxu0 %v11024_v9  ;;  %9672 = vmatprep.mubr.f32.mxu0 %v4527_v8  ;;  %v11048_v8 = vpack.c.bf16 %v4934_v6, %v4933_v22  ;;  %v5301_v9 = vld [vmem:[#allocation43 + $0x30] sm:$0xff] }
0x1983   :  { %11029 = vmatprep.subr.bf16.mxu0 %v11028_v12  ;;  %v11112_v11 = vpack.c.bf16 %v5302_v10, %v5301_v9  ;;  %v5198_v6 = vld [vmem:[%s14604_s15 + $0x20] sm:$0xff]  ;;  %v14098_v9 = vld [vmem:[#allocation2 + $0x8] sm:$0xff]  ;;  %v14102_v10 = vld [vmem:[#allocation2 + $0x10] sm:$0xff] }
0x1986   :  { %11031 = vmatpush3.bf16.msra.mxu0 %v11028_v12  ;;  %v5303_v12 = vld [vmem:[#allocation43 + $0x40] sm:$0xff] }
0x1987   :  { %11033 = vmatprep.subr.bf16.mxu0 %v11032_v23  ;;  %v11116_v15 = vpack.c.bf16 %v5304_v13, %v5303_v12  ;;  %v5607_v12 = vld [vmem:[#allocation46 + $0x30] sm:$0xff]  ;;  %v5608_v13 = vld [vmem:[#allocation46 + $0x38] sm:$0xff] }
0x198a   :  { %11035 = vmatpush3.bf16.msra.mxu0 %v11032_v23 }
0x198b   :  { %11037 = vmatprep.subr.bf16.mxu0 %v11036_v2 }
0x198e   :  { %11039 = vmatpush3.bf16.msra.mxu0 %v11036_v2  ;;  %v5310_v2 = vld [vmem:[#allocation43 + $0x78] sm:$0xff] }
0x198f   :  { %11041 = vmatprep.subr.bf16.mxu0 %v11040_v40  ;;  %v11128_v29 = vpack.c.bf16 %v5310_v2, %v5309_v45  ;;  %v5613_v2 = vld [vmem:[#allocation46 + $0x60] sm:$0xff] }
0x1992   :  { %11043 = vmatpush3.bf16.msra.mxu0 %v11040_v40  ;;  %v5195_v40 = vld [vmem:[%s14604_s15 + $0x8] sm:$0xff] }
0x1993   :  { %11045 = vmatprep.subr.bf16.mxu0 %v11044_v46  ;;  %v11132_v47 = vpack.c.bf16 %v5195_v40, %v5194_v60  ;;  %v5615_v40 = vld [vmem:[#allocation46 + $0x70] sm:$0xff] }
0x1996   :  { %11047 = vmatpush3.bf16.msra.mxu0 %v11044_v46  ;;  %v5197_v46 = vld [vmem:[%s14604_s15 + $0x18] sm:$0xff] }
0x1997   :  { %11049 = vmatprep.subr.bf16.mxu0 %v11048_v8  ;;  %v11136_v22 = vpack.c.bf16 %v5197_v46, %v5196_v24  ;;  %v5585_v46 = vld [vmem:[#allocation45] sm:$0xff] }
0x199a   :  { %11051 = vmatpush3.bf16.msra.mxu0 %v11048_v8  ;;  %v5199_v8 = vld [vmem:[%s14604_s15 + $0x28] sm:$0xff] }
0x199b   :  { %11053 = vmatprep.subr.bf16.mxu0 %v11052_v27  ;;  %v11140_v26 = vpack.c.bf16 %v5199_v8, %v5198_v6  ;;  %v5587_v8 = vld [vmem:[#allocation45 + $0x10] sm:$0xff] }
0x199d   :  { %9673 = vmatmul.mubr.f32.vlgmr.msra.gmra.mrb[66].mxu0 %v4528_v28  ;;  %v4913_v28 = vld [vmem:[#allocation39 + $0x50] sm:$0xff] }
0x199e   :  { %9675 = vmatprep.mubr.f32.mxu0 %v4529_v18  ;;  %11055 = vmatpush3.bf16.msra.mxu0 %v11052_v27  ;;  %v11072_v18 = vpack.c.bf16 %v4914_v14, %v4913_v28  ;;  %v5201_v27 = vld [vmem:[%s14604_s15 + $0x38] sm:$0xff] }
0x199f   :  { %11057 = vmatprep.subr.bf16.mxu0 %v11056_v48  ;;  %v11144_v41 = vpack.c.bf16 %v5201_v27, %v5200_v30  ;;  %v5589_v27 = vld [vmem:[#allocation45 + $0x20] sm:$0xff] }
0x19a1   :  { %9676 = vmatmul.mubr.f32.gmra.mrb[68].mxu0 %v4530_v19  ;;  %v4917_v19 = vld [vmem:[#allocation39 + $0x70] sm:$0xff] }
0x19a2   :  { %11059 = vmatpush3.bf16.msra.mxu0 %v11056_v48  ;;  %9710 = vmatprep.mubr.f32.mxu0 %v13665_v38  ;;  %v11080_v38 = vpack.c.bf16 %v4918_v61, %v4917_v19  ;;  %v5204_v48 = vld [vmem:[%s14604_s15 + $0x50] sm:$0xff] }
0x19a3   :  { %11061 = vmatprep.subr.bf16.mxu0 %v11060_v35  ;;  %v11152_v33 = vpack.c.bf16 %v5205_v21, %v5204_v48  ;;  %v5593_v21 = vld [vmem:[#allocation45 + $0x40] sm:$0xff] }
0x19a6   :  { %11063 = vmatpush3.bf16.msra.mxu0 %v11060_v35  ;;  %v5206_v35 = vld [vmem:[%s14604_s15 + $0x60] sm:$0xff] }
0x19a7   :  { %11065 = vmatprep.subr.bf16.mxu0 %v11064_v52 }
0x19aa   :  { %11067 = vmatpush3.bf16.msra.mxu0 %v11064_v52  ;;  %v11160_v52 = vpack.c.bf16 %v5209_v49, %v5208_v39  ;;  %v5597_v49 = vld [vmem:[#allocation45 + $0x60] sm:$0xff] }
0x19ab   :  { %11069 = vmatprep.subr.bf16.mxu0 %v11068_v51 }
0x19ae   :  { %11071 = vmatpush3.bf16.msra.mxu0 %v11068_v51 }
0x19af   :  { %11073 = vmatprep.subr.bf16.mxu0 %v11072_v18 }
0x19b2   :  { %11075 = vmatpush3.bf16.msra.mxu0 %v11072_v18 }
0x19b3   :  { %11077 = vmatprep.subr.bf16.mxu0 %v11076_v16 }
0x19b6   :  { %11079 = vmatpush3.bf16.msra.mxu0 %v11076_v16 }
0x19b7   :  { %11081 = vmatprep.subr.bf16.mxu0 %v11080_v38 }
0x19ba   :  { %11083 = vmatpush3.bf16.msra.mxu0 %v11080_v38  ;;  %v5601_v38 = vld [vmem:[#allocation46] sm:$0xff] }
0x19bb   :  { %11101 = vmatprep.subr.bf16.mxu0 %v11100_v3  ;;  %v11172_v4 = vpack.c.bf16 %v5602_v63, %v5601_v38  ;;  %v5875_v38 = vld [vmem:[#allocation48 + $0x18] sm:$0xff] }
0x19bd   :  { %9711 = vmatmul.mubr.f32.vlgmr.msra.gmra.mrb[66].mxu0 %v13662_v36  ;;  %v5305_v36 = vld [vmem:[#allocation43 + $0x50] sm:$0xff] }
0x19be   :  { %9713 = vmatprep.mubr.f32.mxu0 %v13674_v44  ;;  %11103 = vmatpush3.bf16.msra.mxu0 %v11100_v3  ;;  %v5306_v44 = vld [vmem:[#allocation43 + $0x58] sm:$0xff] }
0x19bf   :  { %11105 = vmatprep.subr.bf16.mxu0 %v11104_v20  ;;  %v11120_v23 = vpack.c.bf16 %v5306_v44, %v5305_v36  ;;  %v11184_v36 = vpack.c.bf16 %v5608_v13, %v5607_v12  ;;  %v5609_v44 = vld [vmem:[#allocation46 + $0x40] sm:$0xff]  ;;  %v5881_v12 = vld [vmem:[#allocation48 + $0x48] sm:$0xff] }
0x19c1   :  { %9714 = vmatmul.mubr.f32.gmra.mrb[68].mxu0 %v13672_v43  ;;  %v5308_v43 = vld [vmem:[#allocation43 + $0x68] sm:$0xff] }
0x19c2   :  { %11107 = vmatpush3.bf16.msra.mxu0 %v11104_v20  ;;  %9776 = vmatprep.mubr.f32.mxu0 %v14027_v58  ;;  %v11124_v58 = vpack.c.bf16 %v5308_v43, %v5307_v42  ;;  %v5604_v20 = vld [vmem:[#allocation46 + $0x18] sm:$0xff]  ;;  %v5611_v43 = vld [vmem:[#allocation46 + $0x50] sm:$0xff] }
0x19c3   :  { %11109 = vmatprep.subr.bf16.mxu0 %v11108_v25  ;;  %v11176_v7 = vpack.c.bf16 %v5604_v20, %v5603_v5  ;;  %v14120_v5 = vld [vmem:[#allocation4 + $0x8] sm:$0xff] }
0x19c4   :  { %v5878_v20 = vld [vmem:[#allocation48 + $0x30] sm:$0xff] }
0x19c6   :  { %11111 = vmatpush3.bf16.msra.mxu0 %v11108_v25  ;;  %v5606_v25 = vld [vmem:[#allocation46 + $0x28] sm:$0xff] }
0x19c7   :  { %11113 = vmatprep.subr.bf16.mxu0 %v11112_v11 }
0x19ca   :  { %11115 = vmatpush3.bf16.msra.mxu0 %v11112_v11  ;;  %v11180_v11 = vpack.c.bf16 %v5606_v25, %v5605_v1  ;;  %v14128_v1 = vld [vmem:[#allocation4 + $0x18] sm:$0xff] }
0x19cb   :  { %11117 = vmatprep.subr.bf16.mxu0 %v11116_v15 }
0x19ce   :  { %11119 = vmatpush3.bf16.msra.mxu0 %v11116_v15  ;;  %v14106_v15 = vld [vmem:[#allocation2 + $0x18] sm:$0xff] }
0x19cf   :  { %11121 = vmatprep.subr.bf16.mxu0 %v11120_v23 }
0x19d2   :  { %11123 = vmatpush3.bf16.msra.mxu0 %v11120_v23  ;;  %v5610_v23 = vld [vmem:[#allocation46 + $0x48] sm:$0xff] }
0x19d3   :  { %11125 = vmatprep.subr.bf16.mxu0 %v11124_v58  ;;  %v11188_v42 = vpack.c.bf16 %v5610_v23, %v5609_v44  ;;  %v5883_v44 = vld [vmem:[#allocation48 + $0x58] sm:$0xff] }
0x19d6   :  { %11127 = vmatpush3.bf16.msra.mxu0 %v11124_v58  ;;  %v5612_v58 = vld [vmem:[#allocation46 + $0x58] sm:$0xff] }
0x19d7   :  { %11129 = vmatprep.subr.bf16.mxu0 %v11128_v29  ;;  %v11192_v45 = vpack.c.bf16 %v5612_v58, %v5611_v43  ;;  %v5885_v43 = vld [vmem:[#allocation48 + $0x68] sm:$0xff] }
0x19da   :  { %11131 = vmatpush3.bf16.msra.mxu0 %v11128_v29  ;;  %v5614_v29 = vld [vmem:[#allocation46 + $0x68] sm:$0xff] }
0x19db   :  { %11133 = vmatprep.subr.bf16.mxu0 %v11132_v47  ;;  %v11196_v60 = vpack.c.bf16 %v5614_v29, %v5613_v2  ;;  %v5887_v2 = vld [vmem:[#allocation48 + $0x78] sm:$0xff] }
0x19dd   :  { %9777 = vmatmul.mubr.f32.vlgmr.msra.gmra.mrb[66].mxu0 %v14025_v55  ;;  %v5202_v55 = vld [vmem:[%s14604_s15 + $0x40] sm:$0xff] }
0x19de   :  { %11135 = vmatpush3.bf16.msra.mxu0 %v11132_v47  ;;  %9779 = vmatprep.mubr.f32.mxu0 %v14031_v17  ;;  %v11148_v17 = vpack.c.bf16 %v5203_v31, %v5202_v55  ;;  %v5616_v47 = vld [vmem:[#allocation46 + $0x78] sm:$0xff]  ;;  %v5591_v31 = vld [vmem:[#allocation45 + $0x30] sm:$0xff] }
0x19df   :  { %11137 = vmatprep.subr.bf16.mxu0 %v11136_v22  ;;  %v11200_v24 = vpack.c.bf16 %v5616_v47, %v5615_v40 }
0x19e1   :  { %9780 = vmatmul.mubr.f32.gmra.mrb[68].mxu0 %v14029_v62  ;;  %v5207_v62 = vld [vmem:[%s14604_s15 + $0x68] sm:$0xff] }
0x19e2   :  { %11139 = vmatpush3.bf16.msra.mxu0 %v11136_v22  ;;  %9814 = vmatprep.mubr.f32.mxu0 %v14019_v37  ;;  %v11156_v37 = vpack.c.bf16 %v5207_v62, %v5206_v35  ;;  %v5586_v22 = vld [vmem:[#allocation45 + $0x8] sm:$0xff]  ;;  %v5595_v62 = vld [vmem:[#allocation45 + $0x50] sm:$0xff] }
0x19e3   :  { %11141 = vmatprep.subr.bf16.mxu0 %v11140_v26  ;;  %v11204_v6 = vpack.c.bf16 %v5586_v22, %v5585_v46  ;;  %v14132_v46 = vld [vmem:[#allocation2] sm:$0xff] }
0x19e4   :  { %v7923_v22 = vld [vmem:[%s14606_s21] ss:$0 sm:$0xff] }
0x19e6   :  { %11143 = vmatpush3.bf16.msra.mxu0 %v11140_v26  ;;  %v5588_v26 = vld [vmem:[#allocation45 + $0x18] sm:$0xff] }
0x19e7   :  { %11145 = vmatprep.subr.bf16.mxu0 %v11144_v41  ;;  %v11208_v30 = vpack.c.bf16 %v5588_v26, %v5587_v8 }
0x19ea   :  { %11147 = vmatpush3.bf16.msra.mxu0 %v11144_v41  ;;  %v5590_v41 = vld [vmem:[#allocation45 + $0x28] sm:$0xff] }
0x19eb   :  { %11149 = vmatprep.subr.bf16.mxu0 %v11148_v17  ;;  %v11212_v55 = vpack.c.bf16 %v5590_v41, %v5589_v27 }
0x19ee   :  { %11151 = vmatpush3.bf16.msra.mxu0 %v11148_v17  ;;  %v5592_v17 = vld [vmem:[#allocation45 + $0x38] sm:$0xff] }
0x19ef   :  { %11153 = vmatprep.subr.bf16.mxu0 %v11152_v33  ;;  %v11216_v48 = vpack.c.bf16 %v5592_v17, %v5591_v31 }
0x19f2   :  { %11155 = vmatpush3.bf16.msra.mxu0 %v11152_v33  ;;  %v5594_v33 = vld [vmem:[#allocation45 + $0x48] sm:$0xff] }
0x19f3   :  { %11157 = vmatprep.subr.bf16.mxu0 %v11156_v37  ;;  %v11220_v35 = vpack.c.bf16 %v5594_v33, %v5593_v21 }
0x19f6   :  { %11159 = vmatpush3.bf16.msra.mxu0 %v11156_v37  ;;  %v5596_v37 = vld [vmem:[#allocation45 + $0x58] sm:$0xff] }
0x19f7   :  { %11161 = vmatprep.subr.bf16.mxu0 %v11160_v52  ;;  %v11224_v39 = vpack.c.bf16 %v5596_v37, %v5595_v62  ;;  %v6094_v62 = vld [vmem:[#allocation51 + $0x8] sm:$0xff] }
0x19fa   :  { %11163 = vmatpush3.bf16.msra.mxu0 %v11160_v52  ;;  %v5598_v52 = vld [vmem:[#allocation45 + $0x68] sm:$0xff] }
0x19fd   :  { %9815 = vmatmul.mubr.f32.vlgmr.msra.gmra.mrb[66].mxu0 %v14017_v34 }
0x19fe   :  { %9817 = vmatprep.mubr.f32.mxu0 %v14023_v54 }
0x1a01   :  { %9818 = vmatmul.mubr.f32.gmra.mrb[68].mxu0 %v14021_v50 }
0x1a02   :  { %10060 = vmatprep.mubr.msk.f32.mxu0 %vm733_vm1, %v14072_v56 }
0x1ad0   :  { %v9816_v51 = vpop.f32.mrb[66].mxu0 }
0x1ad1   :  { %v14077_v28 = vadd.f32 %v9816_v51, %v7914_v57  ;;  %v5462_v14 = vpop.f32.mrb[67].mxu0  ;;  %v5599_v51 = vld [vmem:[#allocation45 + $0x70] sm:$0xff] }
0x1ad2   :  { %v5492_v18 = vadd.f32 %v7914_v57, %v5462_v14 }
0x1ad3   :  { %v5497_v53 = vmax.f32 %v14077_v28, 0.0  ;;  %v5600_v28 = vld [vmem:[#allocation45 + $0x78] sm:$0xff] }
0x1ad4   :  { %v5496_v59 = vmax.f32 %v5492_v18, 0.0  ;;  %v9819_v16 = vpop.f32.mrb[68].mxu0  ;;  %v11232_v14 = vpack.c.bf16 %v5600_v28, %v5599_v51  ;;  %v6097_v28 = vld [vmem:[#allocation51 + $0x20] sm:$0xff] }
0x1ad5   :  { %v14080_v34 = vadd.f32 %v9819_v16, %v7914_v57  ;;  %v5472_v54 = vpop.f32.mrb[69].mxu0  ;;  %v5873_v16 = vld [vmem:[#allocation48 + $0x8] sm:$0xff] }
0x1ad6   :  { %v14084_v50 = vpack.c.bf16 %v5497_v53, %v5496_v59  ;;  %v14086_v19 = vadd.f32 %v7914_v57, %v5472_v54  ;;  %v11228_v57 = vpack.c.bf16 %v5598_v52, %v5597_v49  ;;  %v6095_v52 = vld [vmem:[#allocation51 + $0x10] sm:$0xff] }
0x1ad7   :  { %v5499_v61 = vmax.f32 %v14080_v34, 0.0 }
0x1ad8   :  { %v5498_v0 = vmax.f32 %v14086_v19, 0.0  ;;  %11165 = vmatprep.subr.bf16.mxu1 %v14084_v50 }
0x1ad9   :  { %11167 = vmatpush3.bf16.msra.mxu1 %v14084_v50 }
0x1ada   :  { %v14094_v3 = vpack.c.bf16 %v5499_v61, %v5498_v0 }
0x1adc   :  { %11169 = vmatprep.subr.bf16.mxu1 %v14094_v3 }
0x1add   :  { %11171 = vmatpush3.bf16.msra.mxu1 %v14094_v3 }
0x1ade   :  { %11173 = vmatprep.subr.bf16.mxu1 %v11172_v4 }
0x1ae0   :  { %9829 = vmatmul.mubr.msk.f32.vlgmr.msra.gmra.mrb[72].mxu1 %vm733_vm1, %v14098_v9 }
0x1ae1   :  { %11175 = vmatpush3.bf16.msra.mxu1 %v11172_v4  ;;  %9831 = vmatprep.mubr.msk.f32.mxu1 %vm733_vm1, %v14102_v10  ;;  %v5877_v4 = vld [vmem:[#allocation48 + $0x28] sm:$0xff] }
0x1ae2   :  { %11177 = vmatprep.subr.bf16.mxu1 %v11176_v7 }
0x1ae4   :  { %9832 = vmatmul.mubr.msk.f32.gmra.mrb[74].mxu1 %vm733_vm1, %v14106_v15 }
0x1ae5   :  { %11179 = vmatpush3.bf16.msra.mxu1 %v11176_v7  ;;  %9866 = vmatprep.mubr.f32.mxu1 %v5496_v59  ;;  %v5872_v59 = vld [vmem:[#allocation48] sm:$0xff]  ;;  %v5879_v7 = vld [vmem:[#allocation48 + $0x38] sm:$0xff] }
0x1ae6   :  { %11181 = vmatprep.subr.bf16.mxu1 %v11180_v11  ;;  %v11244_v19 = vpack.c.bf16 %v5873_v16, %v5872_v59  ;;  %v11256_v25 = vpack.c.bf16 %v5879_v7, %v5878_v20  ;;  %v6100_v59 = vld [vmem:[#allocation51 + $0x38] sm:$0xff]  ;;  %v6107_v7 = vld [vmem:[#allocation51 + $0x70] sm:$0xff] }
0x1ae9   :  { %11183 = vmatpush3.bf16.msra.mxu1 %v11180_v11  ;;  %v5880_v11 = vld [vmem:[#allocation48 + $0x40] sm:$0xff] }
0x1aea   :  { %11185 = vmatprep.subr.bf16.mxu1 %v11184_v36  ;;  %v11260_v13 = vpack.c.bf16 %v5881_v12, %v5880_v11  ;;  %v6077_v12 = vld [vmem:[#allocation49] sm:$0xff] }
0x1aed   :  { %11187 = vmatpush3.bf16.msra.mxu1 %v11184_v36  ;;  %v5882_v36 = vld [vmem:[#allocation48 + $0x50] sm:$0xff] }
0x1aee   :  { %11189 = vmatprep.subr.bf16.mxu1 %v11188_v42  ;;  %v11264_v23 = vpack.c.bf16 %v5883_v44, %v5882_v36  ;;  %v6079_v44 = vld [vmem:[#allocation49 + $0x10] sm:$0xff] }
0x1af1   :  { %11191 = vmatpush3.bf16.msra.mxu1 %v11188_v42  ;;  %v5884_v42 = vld [vmem:[#allocation48 + $0x60] sm:$0xff] }
0x1af2   :  { %11193 = vmatprep.subr.bf16.mxu1 %v11192_v45  ;;  %v11268_v58 = vpack.c.bf16 %v5885_v43, %v5884_v42  ;;  %v6081_v43 = vld [vmem:[#allocation49 + $0x20] sm:$0xff] }
0x1af5   :  { %11195 = vmatpush3.bf16.msra.mxu1 %v11192_v45  ;;  %v5886_v45 = vld [vmem:[#allocation48 + $0x70] sm:$0xff] }
0x1af6   :  { %11197 = vmatprep.subr.bf16.mxu1 %v11196_v60  ;;  %v11272_v29 = vpack.c.bf16 %v5887_v2, %v5886_v45  ;;  %v6083_v2 = vld [vmem:[#allocation49 + $0x30] sm:$0xff] }
0x1af9   :  { %11199 = vmatpush3.bf16.msra.mxu1 %v11196_v60 }
0x1afa   :  { %11201 = vmatprep.subr.bf16.mxu1 %v11200_v24 }
0x1afd   :  { %11203 = vmatpush3.bf16.msra.mxu1 %v11200_v24 }
0x1afe   :  { %11205 = vmatprep.subr.bf16.mxu1 %v11204_v6 }
0x1b00   :  { %9867 = vmatmul.mubr.f32.vlgmr.msra.gmra.mrb[76].mxu1 %v5497_v53 }
0x1b01   :  { %9869 = vmatprep.mubr.f32.mxu1 %v5498_v0  ;;  %11207 = vmatpush3.bf16.msra.mxu1 %v11204_v6  ;;  %v5876_v0 = vld [vmem:[#allocation48 + $0x20] sm:$0xff] }
0x1b02   :  { %11209 = vmatprep.subr.bf16.mxu1 %v11208_v30 }
0x1b04   :  { %9870 = vmatmul.mubr.f32.gmra.mrb[78].mxu1 %v5499_v61  ;;  %v5874_v61 = vld [vmem:[#allocation48 + $0x10] sm:$0xff] }
0x1b05   :  { %11211 = vmatpush3.bf16.msra.mxu1 %v11208_v30  ;;  %v11248_v63 = vpack.c.bf16 %v5875_v38, %v5874_v61  ;;  %v6103_v38 = vld [vmem:[#allocation51 + $0x50] sm:$0xff] }
0x1b06   :  { %11213 = vmatprep.subr.bf16.mxu1 %v11212_v55 }
0x1b09   :  { %11215 = vmatpush3.bf16.msra.mxu1 %v11212_v55 }
0x1b0a   :  { %11217 = vmatprep.subr.bf16.mxu1 %v11216_v48 }
0x1b0d   :  { %11219 = vmatpush3.bf16.msra.mxu1 %v11216_v48 }
0x1b0e   :  { %11221 = vmatprep.subr.bf16.mxu1 %v11220_v35 }
0x1b11   :  { %11223 = vmatpush3.bf16.msra.mxu1 %v11220_v35  ;;  %v6093_v35 = vld [vmem:[#allocation51] sm:$0xff] }
0x1b12   :  { %11225 = vmatprep.subr.bf16.mxu1 %v11224_v39  ;;  %v11284_v49 = vpack.c.bf16 %v6094_v62, %v6093_v35  ;;  %v6367_v35 = vld [vmem:[#allocation52 + $0x18] sm:$0xff] }
0x1b15   :  { %11227 = vmatpush3.bf16.msra.mxu1 %v11224_v39 }
0x1b16   :  { %11229 = vmatprep.subr.bf16.mxu1 %v11228_v57 }
0x1b19   :  { %11231 = vmatpush3.bf16.msra.mxu1 %v11228_v57  ;;  %v6096_v57 = vld [vmem:[#allocation51 + $0x18] sm:$0xff] }
0x1b1a   :  { %11233 = vmatprep.subr.bf16.mxu1 %v11232_v14  ;;  %v11288_v51 = vpack.c.bf16 %v6096_v57, %v6095_v52  ;;  %v6368_v57 = vld [vmem:[#allocation52 + $0x20] sm:$0xff] }
0x1b1d   :  { %11235 = vmatpush3.bf16.msra.mxu1 %v11232_v14  ;;  %v6098_v14 = vld [vmem:[#allocation51 + $0x28] sm:$0xff] }
0x1b1e   :  { %11237 = vmatprep.subr.bf16.mxu1 %v14084_v50 }
0x1bb3   :  { %v9830_v18 = vpop.f32.mrb[72].mxu1 }
0x1bb4   :  { %v5566_v53 = vpop.f32.mrb[73].mxu1 }
0x1bb5   :  { %9904 = vmatprep.mubr.f32.mxu1 %v5566_v53  ;;  %v6099_v53 = vld [vmem:[#allocation51 + $0x30] sm:$0xff] }
0x1bb6   :  { %9905 = vmatmul.mubr.f32.vlgmr.msra.gmra.mrb[76].mxu1 %v9830_v18  ;;  %v11292_v18 = vpack.c.bf16 %v6098_v14, %v6097_v28  ;;  %v11296_v16 = vpack.c.bf16 %v6100_v59, %v6099_v53 }
0x1bb7   :  { %11239 = vmatpush3.bf16.msra.mxu1 %v14084_v50  ;;  %v9833_v34 = vpop.f32.mrb[74].mxu1  ;;  %v14124_v50 = vld [vmem:[#allocation4 + $0x10] sm:$0xff] }
0x1bb8   :  { %11241 = vmatprep.subr.bf16.mxu1 %v14094_v3  ;;  %v5576_v54 = vpop.f32.mrb[75].mxu1 }
0x1bb9   :  { %9907 = vmatprep.mubr.f32.mxu1 %v5576_v54  ;;  %v6101_v54 = vld [vmem:[#allocation51 + $0x40] sm:$0xff] }
0x1bba   :  { %9908 = vmatmul.mubr.f32.gmra.mrb[78].mxu1 %v9833_v34  ;;  %v14164_v34 = vld [vmem:[#allocation6] sm:$0xff] }
0x1bbb   :  { %11243 = vmatpush3.bf16.msra.mxu1 %v14094_v3  ;;  %9918 = vmatprep.mubr.msk.f32.mxu1 %vm733_vm1, %v14072_v56  ;;  %v11252_v3 = vpack.c.bf16 %v5877_v4, %v5876_v0  ;;  %v6105_v4 = vld [vmem:[#allocation51 + $0x60] sm:$0xff] }
0x1bbc   :  { %11245 = vmatprep.subr.bf16.mxu1 %v11244_v19 }
0x1bbe   :  { %9919 = vmatmul.mubr.msk.f32.vlgmr.msra.gmra.mrb[80].mxu1 %vm733_vm1, %v14120_v5 }
0x1bbf   :  { %9921 = vmatprep.mubr.msk.f32.mxu1 %vm733_vm1, %v14124_v50  ;;  %11247 = vmatpush3.bf16.msra.mxu1 %v11244_v19  ;;  %v6102_v19 = vld [vmem:[#allocation51 + $0x48] sm:$0xff] }
0x1bc0   :  { %11249 = vmatprep.subr.bf16.mxu1 %v11248_v63  ;;  %v11300_v61 = vpack.c.bf16 %v6102_v19, %v6101_v54  ;;  %v6371_v54 = vld [vmem:[#allocation52 + $0x38] sm:$0xff] }
0x1bc2   :  { %9922 = vmatmul.mubr.msk.f32.gmra.mrb[82].mxu1 %vm733_vm1, %v14128_v1 }
0x1bc3   :  { %11251 = vmatpush3.bf16.msra.mxu1 %v11248_v63  ;;  %v6104_v63 = vld [vmem:[#allocation51 + $0x58] sm:$0xff] }
0x1bc4   :  { %11253 = vmatprep.subr.bf16.mxu1 %v11252_v3  ;;  %v11304_v0 = vpack.c.bf16 %v6104_v63, %v6103_v38  ;;  %v6373_v38 = vld [vmem:[#allocation52 + $0x48] sm:$0xff] }
0x1bc7   :  { %11255 = vmatpush3.bf16.msra.mxu1 %v11252_v3  ;;  %v6106_v3 = vld [vmem:[#allocation51 + $0x68] sm:$0xff] }
0x1bc8   :  { %11257 = vmatprep.subr.bf16.mxu1 %v11256_v25  ;;  %v11308_v20 = vpack.c.bf16 %v6106_v3, %v6105_v4  ;;  %v6375_v4 = vld [vmem:[#allocation52 + $0x58] sm:$0xff] }
0x1bcb   :  { %11259 = vmatpush3.bf16.msra.mxu1 %v11256_v25  ;;  %v6108_v25 = vld [vmem:[#allocation51 + $0x78] sm:$0xff] }
0x1bcc   :  { %11261 = vmatprep.subr.bf16.mxu1 %v11260_v13  ;;  %v11312_v11 = vpack.c.bf16 %v6108_v25, %v6107_v7  ;;  %v6377_v7 = vld [vmem:[#allocation52 + $0x68] sm:$0xff] }
0x1bcf   :  { %11263 = vmatpush3.bf16.msra.mxu1 %v11260_v13  ;;  %v6078_v13 = vld [vmem:[#allocation49 + $0x8] sm:$0xff] }
0x1bd0   :  { %11265 = vmatprep.subr.bf16.mxu1 %v11264_v23  ;;  %v11316_v36 = vpack.c.bf16 %v6078_v13, %v6077_v12  ;;  %v6379_v12 = vld [vmem:[#allocation52 + $0x78] sm:$0xff] }
0x1bd3   :  { %11267 = vmatpush3.bf16.msra.mxu1 %v11264_v23  ;;  %v6080_v23 = vld [vmem:[#allocation49 + $0x18] sm:$0xff] }
0x1bd4   :  { %11269 = vmatprep.subr.bf16.mxu1 %v11268_v58  ;;  %v11320_v42 = vpack.c.bf16 %v6080_v23, %v6079_v44 }
0x1bd7   :  { %11271 = vmatpush3.bf16.msra.mxu1 %v11268_v58  ;;  %v6082_v58 = vld [vmem:[#allocation49 + $0x28] sm:$0xff] }
0x1bd8   :  { %11273 = vmatprep.subr.bf16.mxu1 %v11272_v29  ;;  %v11324_v45 = vpack.c.bf16 %v6082_v58, %v6081_v43 }
0x1bdb   :  { %11275 = vmatpush3.bf16.msra.mxu1 %v11272_v29  ;;  %v6084_v29 = vld [vmem:[#allocation49 + $0x38] sm:$0xff] }
0x1c91   :  { %v9920_v60 = vpop.f32.mrb[80].mxu1 }
0x1c92   :  { %v5853_v40 = vpop.f32.mrb[81].mxu1 }
0x1c93   :  { %9956 = vmatprep.mubr.f32.mxu1 %v5853_v40  ;;  %v6085_v40 = vld [vmem:[#allocation49 + $0x40] sm:$0xff] }
0x1c94   :  { %9957 = vmatmul.mubr.f32.vlgmr.msra.gmra.mrb[76].mxu1 %v9920_v60  ;;  %v11328_v60 = vpack.c.bf16 %v6084_v29, %v6083_v2 }
0x1c95   :  { %v9923_v47 = vpop.f32.mrb[82].mxu1 }
0x1c96   :  { %v5863_v24 = vpop.f32.mrb[83].mxu1 }
0x1c97   :  { %9959 = vmatprep.mubr.f32.mxu1 %v5863_v24 }
0x1c98   :  { %9960 = vmatmul.mubr.f32.gmra.mrb[78].mxu1 %v9923_v47  ;;  %v6086_v47 = vld [vmem:[#allocation49 + $0x48] sm:$0xff] }
0x1c99   :  { %9970 = vmatprep.mubr.msk.f32.mxu1 %vm733_vm1, %v14132_v46  ;;  %v11332_v24 = vpack.c.bf16 %v6086_v47, %v6085_v40 }
0x1d67   :  { %v9958_v6 = vpop.f32.mrb[76].mxu1 }
0x1d68   :  { %v14137_v8 = vadd.f32 %v9958_v6, %v7923_v22  ;;  %v5954_v26 = vpop.f32.mrb[77].mxu1  ;;  %v6088_v6 = vld [vmem:[#allocation49 + $0x58] sm:$0xff] }
0x1d69   :  { %v5984_v30 = vadd.f32 %v7923_v22, %v5954_v26  ;;  %v6089_v26 = vld [vmem:[#allocation49 + $0x60] sm:$0xff] }
0x1d6a   :  { %v5989_v27 = vmax.f32 %v14137_v8, 0.0 }
0x1d6b   :  { %v5988_v41 = vmax.f32 %v5984_v30, 0.0  ;;  %v9961_v55 = vpop.f32.mrb[78].mxu1  ;;  %v6090_v30 = vld [vmem:[#allocation49 + $0x68] sm:$0xff] }
0x1d6c   :  { %v14140_v31 = vadd.f32 %v9961_v55, %v7923_v22  ;;  %v5964_v17 = vpop.f32.mrb[79].mxu1  ;;  %v6092_v55 = vld [vmem:[#allocation49 + $0x78] sm:$0xff] }
0x1d6d   :  { %v11276_v48 = vpack.c.bf16 %v5989_v27, %v5988_v41  ;;  %v14144_v21 = vadd.f32 %v7923_v22, %v5964_v17  ;;  %v6087_v22 = vld [vmem:[#allocation49 + $0x50] sm:$0xff]  ;;  %v6364_v17 = vld [vmem:[#allocation52] sm:$0xff] }
0x1d6e   :  { %v5991_v33 = vmax.f32 %v14140_v31, 0.0  ;;  %v11336_v8 = vpack.c.bf16 %v6088_v6, %v6087_v22  ;;  %v6485_v22 = vld [vmem:[#allocation54 + $0x8] sm:$0xff] }
0x1d6f   :  { %v5990_v37 = vmax.f32 %v14144_v21, 0.0  ;;  %11277 = vmatprep.subr.bf16.mxu1 %v11276_v48  ;;  %11349 = vmatprep.subr.bf16.mxu0 %v11276_v48 }
0x1d70   :  { %11279 = vmatpush3.bf16.msra.mxu1 %v11276_v48  ;;  %11351 = vmatpush3.bf16.msra.mxu0 %v11276_v48  ;;  %v6365_v48 = vld [vmem:[#allocation52 + $0x8] sm:$0xff] }
0x1d71   :  { %v11280_v39 = vpack.c.bf16 %v5991_v33, %v5990_v37  ;;  %v11356_v21 = vpack.c.bf16 %v6365_v48, %v6364_v17  ;;  %v14197_v17 = vld [vmem:[#allocation6 + $0x8] sm:$0xff]  ;;  %v14201_v48 = vld [vmem:[#allocation6 + $0x10] sm:$0xff] }
0x1d73   :  { %11281 = vmatprep.subr.bf16.mxu1 %v11280_v39  ;;  %11353 = vmatprep.subr.bf16.mxu0 %v11280_v39 }
0x1d74   :  { %11283 = vmatpush3.bf16.msra.mxu1 %v11280_v39  ;;  %11355 = vmatpush3.bf16.msra.mxu0 %v11280_v39 }
0x1d75   :  { %11285 = vmatprep.subr.bf16.mxu1 %v11284_v49 }
0x1d77   :  { %9971 = vmatmul.mubr.msk.f32.vlgmr.msra.gmra.mrb[84].mxu1 %vm733_vm1, %v14098_v9  ;;  %10061 = vmatmul.mubr.msk.f32.vlgmr.msra.gmra.mrb[70].mxu0 %vm733_vm1, %v14120_v5 }
0x1d78   :  { %11287 = vmatpush3.bf16.msra.mxu1 %v11284_v49  ;;  %9973 = vmatprep.mubr.msk.f32.mxu1 %vm733_vm1, %v14102_v10 }
0x1d79   :  { %11289 = vmatprep.subr.bf16.mxu1 %v11288_v51  ;;  %10063 = vmatprep.mubr.msk.f32.mxu0 %vm733_vm1, %v14124_v50 }
0x1d7b   :  { %9974 = vmatmul.mubr.msk.f32.gmra.mrb[86].mxu1 %vm733_vm1, %v14106_v15  ;;  %10064 = vmatmul.mubr.msk.f32.gmra.mrb[72].mxu0 %vm733_vm1, %v14128_v1 }
0x1d7c   :  { %11291 = vmatpush3.bf16.msra.mxu1 %v11288_v51  ;;  %10008 = vmatprep.mubr.f32.mxu1 %v5988_v41  ;;  %v6091_v41 = vld [vmem:[#allocation49 + $0x70] sm:$0xff]  ;;  %v6369_v51 = vld [vmem:[#allocation52 + $0x28] sm:$0xff] }
0x1d7d   :  { %11293 = vmatprep.subr.bf16.mxu1 %v11292_v18  ;;  %10112 = vmatprep.mubr.msk.f32.mxu0 %vm733_vm1, %v14164_v34  ;;  %v11344_v31 = vpack.c.bf16 %v6092_v55, %v6091_v41  ;;  %v6488_v55 = vld [vmem:[#allocation54 + $0x20] sm:$0xff] }
0x1d80   :  { %11295 = vmatpush3.bf16.msra.mxu1 %v11292_v18  ;;  %v11364_v18 = vpack.c.bf16 %v6369_v51, %v6368_v57  ;;  %v6494_v57 = vld [vmem:[#allocation54 + $0x50] sm:$0xff]  ;;  %v6495_v51 = vld [vmem:[#allocation54 + $0x58] sm:$0xff] }
0x1d81   :  { %11297 = vmatprep.subr.bf16.mxu1 %v11296_v16 }
0x1d84   :  { %11299 = vmatpush3.bf16.msra.mxu1 %v11296_v16  ;;  %v6370_v16 = vld [vmem:[#allocation52 + $0x30] sm:$0xff] }
0x1d85   :  { %11301 = vmatprep.subr.bf16.mxu1 %v11300_v61  ;;  %v11368_v19 = vpack.c.bf16 %v6371_v54, %v6370_v16  ;;  %v6499_v16 = vld [vmem:[#allocation54 + $0x78] sm:$0xff] }
0x1d88   :  { %11303 = vmatpush3.bf16.msra.mxu1 %v11300_v61  ;;  %v6372_v61 = vld [vmem:[#allocation52 + $0x40] sm:$0xff] }
0x1d89   :  { %11305 = vmatprep.subr.bf16.mxu1 %v11304_v0  ;;  %v11372_v63 = vpack.c.bf16 %v6373_v38, %v6372_v61 }
0x1d8c   :  { %11307 = vmatpush3.bf16.msra.mxu1 %v11304_v0  ;;  %v6374_v0 = vld [vmem:[#allocation52 + $0x50] sm:$0xff] }
0x1d8d   :  { %11309 = vmatprep.subr.bf16.mxu1 %v11308_v20  ;;  %v11376_v3 = vpack.c.bf16 %v6375_v4, %v6374_v0 }
0x1d90   :  { %11311 = vmatpush3.bf16.msra.mxu1 %v11308_v20  ;;  %v6376_v20 = vld [vmem:[#allocation52 + $0x60] sm:$0xff] }
0x1d91   :  { %11313 = vmatprep.subr.bf16.mxu1 %v11312_v11  ;;  %v11380_v25 = vpack.c.bf16 %v6377_v7, %v6376_v20 }
0x1d94   :  { %11315 = vmatpush3.bf16.msra.mxu1 %v11312_v11  ;;  %v6378_v11 = vld [vmem:[#allocation52 + $0x70] sm:$0xff] }
0x1d95   :  { %11317 = vmatprep.subr.bf16.mxu1 %v11316_v36  ;;  %v11384_v13 = vpack.c.bf16 %v6379_v12, %v6378_v11 }
0x1d97   :  { %10009 = vmatmul.mubr.f32.vlgmr.msra.gmra.mrb[88].mxu1 %v5989_v27  ;;  %v11340_v27 = vpack.c.bf16 %v6090_v30, %v6089_v26  ;;  %v6486_v30 = vld [vmem:[#allocation54 + $0x10] sm:$0xff] }
0x1d98   :  { %10011 = vmatprep.mubr.f32.mxu1 %v5990_v37  ;;  %11319 = vmatpush3.bf16.msra.mxu1 %v11316_v36  ;;  %v7932_v36 = vld [vmem:[%s14607_s20] ss:$0 sm:$0xff] }
0x1d99   :  { %11321 = vmatprep.subr.bf16.mxu1 %v11320_v42 }
0x1d9b   :  { %10012 = vmatmul.mubr.f32.gmra.mrb[90].mxu1 %v5991_v33  ;;  %v6366_v33 = vld [vmem:[#allocation52 + $0x10] sm:$0xff] }
0x1d9c   :  { %11323 = vmatpush3.bf16.msra.mxu1 %v11320_v42  ;;  %v11360_v49 = vpack.c.bf16 %v6367_v35, %v6366_v33  ;;  %v6490_v33 = vld [vmem:[#allocation54 + $0x30] sm:$0xff]  ;;  %v6491_v35 = vld [vmem:[#allocation54 + $0x38] sm:$0xff] }
0x1d9d   :  { %11325 = vmatprep.subr.bf16.mxu1 %v11324_v45 }
0x1da0   :  { %11327 = vmatpush3.bf16.msra.mxu1 %v11324_v45 }
0x1da1   :  { %11329 = vmatprep.subr.bf16.mxu1 %v11328_v60 }
0x1da4   :  { %11331 = vmatpush3.bf16.msra.mxu1 %v11328_v60 }
0x1da5   :  { %11333 = vmatprep.subr.bf16.mxu1 %v11332_v24 }
0x1da8   :  { %11335 = vmatpush3.bf16.msra.mxu1 %v11332_v24  ;;  %v6484_v24 = vld [vmem:[#allocation54] sm:$0xff] }
0x1da9   :  { %11337 = vmatprep.subr.bf16.mxu1 %v11336_v8  ;;  %v11396_v26 = vpack.c.bf16 %v6485_v22, %v6484_v24 }
0x1dac   :  { %11339 = vmatpush3.bf16.msra.mxu1 %v11336_v8 }
0x1dad   :  { %11341 = vmatprep.subr.bf16.mxu1 %v11340_v27 }
0x1db0   :  { %11343 = vmatpush3.bf16.msra.mxu1 %v11340_v27  ;;  %v6487_v27 = vld [vmem:[#allocation54 + $0x18] sm:$0xff] }
0x1db1   :  { %11345 = vmatprep.subr.bf16.mxu1 %v11344_v31  ;;  %v11400_v41 = vpack.c.bf16 %v6487_v27, %v6486_v30 }
0x1db4   :  { %11347 = vmatpush3.bf16.msra.mxu1 %v11344_v31  ;;  %v6489_v31 = vld [vmem:[#allocation54 + $0x28] sm:$0xff] }
0x1db5   :  { %11357 = vmatprep.subr.bf16.mxu1 %v11356_v21 }
0x1e4a   :  { %v9972_v62 = vpop.f32.mrb[84].mxu1  ;;  %v10062_v37 = vpop.f32.mrb[70].mxu0 }
0x1e4b   :  { %v6058_v39 = vpop.f32.mrb[85].mxu1  ;;  %v6345_v52 = vpop.f32.mrb[71].mxu0 }
0x1e4c   :  { %10046 = vmatprep.mubr.f32.mxu1 %v6058_v39  ;;  %v6492_v39 = vld [vmem:[#allocation54 + $0x40] sm:$0xff] }
0x1e4d   :  { %10047 = vmatmul.mubr.f32.vlgmr.msra.gmra.mrb[88].mxu1 %v9972_v62  ;;  %v14205_v62 = vld [vmem:[#allocation6 + $0x18] sm:$0xff] }
0x1e4e   :  { %11359 = vmatpush3.bf16.msra.mxu1 %v11356_v21  ;;  %v9975_v28 = vpop.f32.mrb[86].mxu1  ;;  %v10065_v14 = vpop.f32.mrb[72].mxu0  ;;  %v11404_v21 = vpack.c.bf16 %v6489_v31, %v6488_v55 }
0x1e4f   :  { %11361 = vmatprep.subr.bf16.mxu1 %v11360_v49  ;;  %v6068_v53 = vpop.f32.mrb[87].mxu1  ;;  %v6355_v59 = vpop.f32.mrb[73].mxu0 }
0x1e50   :  { %10049 = vmatprep.mubr.f32.mxu1 %v6068_v53 }
0x1e51   :  { %10050 = vmatmul.mubr.f32.gmra.mrb[90].mxu1 %v9975_v28  ;;  %v11416_v28 = vpack.c.bf16 %v6495_v51, %v6494_v57  ;;  %v6996_v57 = vld [vmem:[%s14610_s16 + $0x8] sm:$0xff]  ;;  %v6998_v51 = vld [vmem:[%s14610_s16 + $0x18] sm:$0xff] }
0x1e52   :  { %11363 = vmatpush3.bf16.msra.mxu1 %v11360_v49  ;;  %10098 = vmatprep.mubr.f32.mxu1 %v6345_v52  ;;  %v6493_v49 = vld [vmem:[#allocation54 + $0x48] sm:$0xff] }
0x1e53   :  { %11365 = vmatprep.subr.bf16.mxu1 %v11364_v18  ;;  %v11412_v52 = vpack.c.bf16 %v6493_v49, %v6492_v39 }
0x1e56   :  { %11367 = vmatpush3.bf16.msra.mxu1 %v11364_v18  ;;  %v6497_v18 = vld [vmem:[#allocation54 + $0x68] sm:$0xff] }
0x1e57   :  { %11369 = vmatprep.subr.bf16.mxu1 %v11368_v19 }
0x1e5a   :  { %11371 = vmatpush3.bf16.msra.mxu1 %v11368_v19 }
0x1e5b   :  { %11373 = vmatprep.subr.bf16.mxu1 %v11372_v63 }
0x1e5e   :  { %11375 = vmatpush3.bf16.msra.mxu1 %v11372_v63 }
0x1e5f   :  { %11377 = vmatprep.subr.bf16.mxu1 %v11376_v3 }
0x1e62   :  { %11379 = vmatpush3.bf16.msra.mxu1 %v11376_v3 }
0x1e63   :  { %11381 = vmatprep.subr.bf16.mxu1 %v11380_v25 }
0x1e66   :  { %11383 = vmatpush3.bf16.msra.mxu1 %v11380_v25 }
0x1e67   :  { %11385 = vmatprep.subr.bf16.mxu1 %v11384_v13 }
0x1e6a   :  { %11387 = vmatpush3.bf16.msra.mxu1 %v11384_v13 }
0x1e6d   :  { %10099 = vmatmul.mubr.f32.vlgmr.msra.gmra.mrb[88].mxu1 %v10062_v37  ;;  %v11408_v37 = vpack.c.bf16 %v6491_v35, %v6490_v33 }
0x1e6e   :  { %10101 = vmatprep.mubr.f32.mxu1 %v6355_v59  ;;  %v6498_v59 = vld [vmem:[#allocation54 + $0x70] sm:$0xff] }
0x1e6f   :  { %v11424_v54 = vpack.c.bf16 %v6499_v16, %v6498_v59  ;;  %v6997_v59 = vld [vmem:[%s14610_s16 + $0x10] sm:$0xff]  ;;  %v7000_v16 = vld [vmem:[%s14610_s16 + $0x28] sm:$0xff] }
0x1e71   :  { %10102 = vmatmul.mubr.f32.gmra.mrb[90].mxu1 %v10065_v14  ;;  %v6496_v14 = vld [vmem:[#allocation54 + $0x60] sm:$0xff] }
0x1e72   :  { %10164 = vmatprep.mubr.msk.f32.mxu1 %vm733_vm1, %v14164_v34  ;;  %v11420_v53 = vpack.c.bf16 %v6497_v18, %v6496_v14  ;;  %v11476_v18 = vpack.c.bf16 %v6998_v51, %v6996_v57  ;;  %v6969_v57 = vld [vmem:[%s14611_s29 + $0x30] sm:$0xff]  ;;  %v6972_v51 = vld [vmem:[%s14611_s29 + $0x48] sm:$0xff] }
0x1f40   :  { %v10100_v44 = vpop.f32.mrb[88].mxu1 }
0x1f41   :  { %v14177_v23 = vadd.f32 %v10100_v44, %v7932_v36  ;;  %v6446_v42 = vpop.f32.mrb[89].mxu1 }
0x1f42   :  { %v14179_v43 = vadd.f32 %v7932_v36, %v6446_v42 }
0x1f43   :  { %v6481_v58 = vmax.f32 %v14177_v23, 0.0 }
0x1f44   :  { %v6480_v45 = vmax.f32 %v14179_v43, 0.0  ;;  %v10103_v2 = vpop.f32.mrb[90].mxu1 }
0x1f45   :  { %v14183_v29 = vadd.f32 %v10103_v2, %v7932_v36  ;;  %v6456_v60 = vpop.f32.mrb[91].mxu1 }
0x1f46   :  { %v11388_v34 = vpack.c.bf16 %v6481_v58, %v6480_v45  ;;  %v14189_v40 = vadd.f32 %v7932_v36, %v6456_v60 }
0x1f47   :  { %v6483_v47 = vmax.f32 %v14183_v29, 0.0 }
0x1f48   :  { %v6482_v6 = vmax.f32 %v14189_v40, 0.0  ;;  %11389 = vmatprep.subr.bf16.mxu0 %v11388_v34 }
0x1f49   :  { %11391 = vmatpush3.bf16.msra.mxu0 %v11388_v34 }
0x1f4a   :  { %v11392_v8 = vpack.c.bf16 %v6483_v47, %v6482_v6 }
0x1f4c   :  { %11393 = vmatprep.subr.bf16.mxu0 %v11392_v8 }
0x1f4d   :  { %11395 = vmatpush3.bf16.msra.mxu0 %v11392_v8 }
0x1f4e   :  { %11397 = vmatprep.subr.bf16.mxu0 %v11396_v26 }
0x1f50   :  { %10113 = vmatmul.mubr.msk.f32.vlgmr.msra.gmra.mrb[74].mxu0 %vm733_vm1, %v14197_v17 }
0x1f51   :  { %10115 = vmatprep.mubr.msk.f32.mxu0 %vm733_vm1, %v14201_v48  ;;  %11399 = vmatpush3.bf16.msra.mxu0 %v11396_v26 }
0x1f52   :  { %11401 = vmatprep.subr.bf16.mxu0 %v11400_v41 }
0x1f54   :  { %10116 = vmatmul.mubr.msk.f32.gmra.mrb[76].mxu0 %vm733_vm1, %v14205_v62 }
0x1f55   :  { %11403 = vmatpush3.bf16.msra.mxu0 %v11400_v41 }
0x1f56   :  { %11405 = vmatprep.subr.bf16.mxu0 %v11404_v21 }
0x1f59   :  { %11407 = vmatpush3.bf16.msra.mxu0 %v11404_v21 }
0x1f5a   :  { %11409 = vmatprep.subr.bf16.mxu0 %v11408_v37 }
0x1f5d   :  { %11411 = vmatpush3.bf16.msra.mxu0 %v11408_v37 }
0x1f5e   :  { %11413 = vmatprep.subr.bf16.mxu0 %v11412_v52 }
0x1f61   :  { %11415 = vmatpush3.bf16.msra.mxu0 %v11412_v52 }
0x1f62   :  { %11417 = vmatprep.subr.bf16.mxu0 %v11416_v28 }
0x1f65   :  { %11419 = vmatpush3.bf16.msra.mxu0 %v11416_v28 }
0x1f66   :  { %11421 = vmatprep.subr.bf16.mxu0 %v11420_v53 }
0x1f69   :  { %11423 = vmatpush3.bf16.msra.mxu0 %v11420_v53 }
0x1f6a   :  { %11425 = vmatprep.subr.bf16.mxu0 %v11424_v54 }
0x1f6d   :  { %11427 = vmatpush3.bf16.msra.mxu0 %v11424_v54 }
0x1f6e   :  { %11437 = vmatprep.subr.bf16.mxu0 %v11396_v26 }
0x2023   :  { %v10114_v19 = vpop.f32.mrb[74].mxu0 }
0x2024   :  { %v6566_v61 = vpop.f32.mrb[75].mxu0 }
0x2025   :  { %10150 = vmatprep.mubr.f32.mxu0 %v6566_v61 }
0x2026   :  { %10151 = vmatmul.mubr.f32.vlgmr.msra.gmra.mrb[78].mxu0 %v10114_v19 }
0x2027   :  { %v10117_v38 = vpop.f32.mrb[76].mxu0  ;;  %11439 = vmatpush3.bf16.msra.mxu0 %v11396_v26  ;;  %v7941_v26 = vld [vmem:[%s14608_s6] ss:$0 sm:$0xff] }
0x2028   :  { %v6576_v63 = vpop.f32.mrb[77].mxu0  ;;  %11441 = vmatprep.subr.bf16.mxu0 %v11400_v41 }
0x2029   :  { %10153 = vmatprep.mubr.f32.mxu0 %v6576_v63  ;;  %v7001_v63 = vld [vmem:[%s14610_s16 + $0x30] sm:$0xff] }
0x202a   :  { %10154 = vmatmul.mubr.f32.gmra.mrb[80].mxu0 %v10117_v38  ;;  %v6999_v38 = vld [vmem:[%s14610_s16 + $0x20] sm:$0xff] }
0x202b   :  { %11443 = vmatpush3.bf16.msra.mxu0 %v11400_v41  ;;  %v7942_v41 = vld [vmem:[%s14609_s19] ss:$0 sm:$0xff] }
0x202c   :  { %11445 = vmatprep.subr.bf16.mxu0 %v11404_v21 }
0x202f   :  { %11447 = vmatpush3.bf16.msra.mxu0 %v11404_v21 }
0x2030   :  { %11449 = vmatprep.subr.bf16.mxu0 %v11408_v37 }
0x2033   :  { %11451 = vmatpush3.bf16.msra.mxu0 %v11408_v37 }
0x2034   :  { %11453 = vmatprep.subr.bf16.mxu0 %v11412_v52 }
0x2037   :  { %11455 = vmatpush3.bf16.msra.mxu0 %v11412_v52 }
0x2038   :  { %11457 = vmatprep.subr.bf16.mxu0 %v11416_v28 }
0x203b   :  { %11459 = vmatpush3.bf16.msra.mxu0 %v11416_v28 }
0x203c   :  { %11461 = vmatprep.subr.bf16.mxu0 %v11420_v53 }
0x203f   :  { %11463 = vmatpush3.bf16.msra.mxu0 %v11420_v53  ;;  %v6995_v53 = vld [vmem:[%s14610_s16] sm:$0xff] }
0x2040   :  { %11465 = vmatprep.subr.bf16.mxu0 %v11424_v54  ;;  %v11478_v19 = vpack.c.bf16 %v6997_v59, %v6995_v53  ;;  %v6971_v59 = vld [vmem:[%s14611_s29 + $0x40] sm:$0xff] }
0x2043   :  { %11467 = vmatpush3.bf16.msra.mxu0 %v11424_v54  ;;  %v7002_v54 = vld [vmem:[%s14610_s16 + $0x38] sm:$0xff] }
0x2044   :  { %v11480_v61 = vpack.c.bf16 %v7002_v54, %v7000_v16  ;;  %v6973_v16 = vld [vmem:[%s14611_s29 + $0x50] sm:$0xff]  ;;  %v6976_v54 = vld [vmem:[%s14611_s29 + $0x68] sm:$0xff] }
0x20f9   :  { %v10152_v0 = vpop.f32.mrb[78].mxu0 }
0x20fa   :  { %v6671_v4 = vsub.f32 %v6481_v58, %v10152_v0  ;;  %v6651_v3 = vpop.f32.mrb[79].mxu0  ;;  %v7004_v0 = vld [vmem:[%s14610_s16 + $0x48] sm:$0xff] }
0x20fb   :  { %v6670_v20 = vsub.f32 %v6480_v45, %v6651_v3  ;;  %v11482_v3 = vpack.c.bf16 %v7001_v63, %v6999_v38  ;;  %v6975_v38 = vld [vmem:[%s14611_s29 + $0x60] sm:$0xff]  ;;  %v6977_v63 = vld [vmem:[%s14611_s29 + $0x70] sm:$0xff] }
0x20fc   :  { %v6675_v7 = vmul.f32 %v6671_v4, %v6671_v4 }
0x20fd   :  { %v6674_v25 = vmul.f32 %v6670_v20, %v6670_v20  ;;  %v10155_v11 = vpop.f32.mrb[80].mxu0 }
0x20fe   :  { %v6673_v12 = vsub.f32 %v6483_v47, %v10155_v11  ;;  %v6661_v13 = vpop.f32.mrb[81].mxu0  ;;  %v7010_v11 = vld [vmem:[%s14610_s16 + $0x78] sm:$0xff] }
0x20ff   :  { %v6672_v36 = vsub.f32 %v6482_v6, %v6661_v13  ;;  %v11428_v44 = vpack.c.bf16 %v6675_v7, %v6674_v25  ;;  %v7003_v7 = vld [vmem:[%s14610_s16 + $0x40] sm:$0xff]  ;;  %v7005_v25 = vld [vmem:[%s14610_s16 + $0x50] sm:$0xff]  ;;  %v7012_v13 = vld [vmem:[%s14610_s16 + $0x88] sm:$0xff] }
0x2100   :  { %v6677_v42 = vmul.f32 %v6673_v12, %v6673_v12 }
0x2101   :  { %v6676_v2 = vmul.f32 %v6672_v36, %v6672_v36  ;;  %11429 = vmatprep.subr.bf16.mxu1 %v11428_v44 }
0x2102   :  { %11431 = vmatpush3.bf16.msra.mxu1 %v11428_v44  ;;  %v7011_v44 = vld [vmem:[%s14610_s16 + $0x80] sm:$0xff] }
0x2103   :  { %v11432_v23 = vpack.c.bf16 %v6677_v42, %v6676_v2  ;;  %v7013_v42 = vld [vmem:[%s14610_s16 + $0x90] sm:$0xff]  ;;  %v7016_v2 = vld [vmem:[%s14610_s16 + $0xa8] sm:$0xff] }
0x2105   :  { %11433 = vmatprep.subr.bf16.mxu1 %v11432_v23 }
0x2106   :  { %11435 = vmatpush3.bf16.msra.mxu1 %v11432_v23  ;;  %v7018_v23 = vld [vmem:[%s14610_s16 + $0xb8] sm:$0xff] }
0x2109   :  { %10165 = vmatmul.mubr.msk.f32.vlgmr.msra.gmra.mrb[92].mxu1 %vm733_vm1, %v14197_v17 }
0x210a   :  { %10167 = vmatprep.mubr.msk.f32.mxu1 %vm733_vm1, %v14201_v48 }
0x210d   :  { %10168 = vmatmul.mubr.msk.f32.gmra.mrb[94].mxu1 %vm733_vm1, %v14205_v62 }
0x210e   :  { %10216 = vmatprep.mubr.msk.f32.mxu1 %vm733_vm1, %v14132_v46 }
0x21dc   :  { %v10166_v43 = vpop.f32.mrb[92].mxu1 }
0x21dd   :  { %v6744_v58 = vpop.f32.mrb[93].mxu1 }
0x21de   :  { %10202 = vmatprep.mubr.f32.mxu0 %v6744_v58  ;;  %v11496_v58 = vpack.c.bf16 %v7018_v23, %v7016_v2  ;;  %v6991_v23 = vld [vmem:[%s14611_s29 + $0xe0] sm:$0xff] }
0x21df   :  { %10203 = vmatmul.mubr.f32.vlgmr.msra.gmra.mrb[82].mxu0 %v10166_v43  ;;  %v11494_v43 = vpack.c.bf16 %v7013_v42, %v7011_v44  ;;  %v6994_v44 = vld [vmem:[%s14611_s29 + $0xf8] sm:$0xff] }
0x21e0   :  { %v10169_v45 = vpop.f32.mrb[94].mxu1 }
0x21e1   :  { %v6754_v29 = vpop.f32.mrb[95].mxu1 }
0x21e2   :  { %10205 = vmatprep.mubr.f32.mxu0 %v6754_v29  ;;  %v7017_v29 = vld [vmem:[%s14610_s16 + $0xb0] sm:$0xff] }
0x21e3   :  { %10206 = vmatmul.mubr.f32.gmra.mrb[84].mxu0 %v10169_v45  ;;  %v7015_v45 = vld [vmem:[%s14610_s16 + $0xa0] sm:$0xff] }
0x21e4   :  { %10230 = vmatprep.mubr.msk.f32.mxu0 %vm733_vm1, %v14072_v56 }
0x22b2   :  { %v10204_v60 = vpop.f32.mrb[82].mxu0 }
0x22b3   :  { %v6835_v34 = vadd.f32 1e-05, %v10204_v60  ;;  %v6829_v40 = vpop.f32.mrb[83].mxu0  ;;  %v7020_v60 = vld [vmem:[%s14610_s16 + $0xc8] sm:$0xff] }
0x22b4   :  { %v6830_v47 = vadd.f32 1e-05, %v6829_v40  ;;  %v11498_v40 = vpack.c.bf16 %v7017_v29, %v7015_v45  ;;  %v7291_v45 = vld [vmem:[%s13109_s25 + $0x8] sm:$0xff]  ;;  %v7293_v29 = vld [vmem:[%s13109_s25 + $0x18] sm:$0xff] }
0x22b5   :  { %11840 = vrsqrt.f32 %v6835_v34  ;;  %v7022_v34 = vld [vmem:[%s14610_s16 + $0xd8] sm:$0xff] }
0x22b6   :  { %11842 = vrsqrt.f32 %v6830_v47  ;;  %v10207_v46 = vpop.f32.mrb[84].mxu0  ;;  %v11500_v47 = vpack.c.bf16 %v7022_v34, %v7020_v60  ;;  %v11548_v60 = vpack.c.bf16 %v7293_v29, %v7291_v45  ;;  %v7440_v34 = vld [vmem:[%s13119_s4 + $0x8] sm:$0xff]  ;;  %v7301_v45 = vld [vmem:[%s13109_s25 + $0x58] sm:$0xff] }
0x22b7   :  { %v6845_v24 = vadd.f32 1e-05, %v10207_v46  ;;  %v6839_v22 = vpop.f32.mrb[85].mxu0  ;;  %v7019_v46 = vld [vmem:[%s14610_s16 + $0xc0] sm:$0xff] }
0x22b8   :  { %v6840_v6 = vadd.f32 1e-05, %v6839_v22  ;;  %v7024_v22 = vld [vmem:[%s14610_s16 + $0xe8] sm:$0xff] }
0x22b9   :  { %11844 = vrsqrt.f32 %v6845_v24  ;;  %v7021_v24 = vld [vmem:[%s14610_s16 + $0xd0] sm:$0xff] }
0x22ba   :  { %11846 = vrsqrt.f32 %v6840_v6  ;;  %v7026_v6 = vld [vmem:[%s14610_s16 + $0xf8] sm:$0xff] }
0x22bf   :  { %v11841_v8 = vpop.eup %11840 }
0x22c0   :  { %v11843_v30 = vpop.eup %11842  ;;  %v6853_v27 = vmul.f32 %v11841_v8, %v6671_v4  ;;  %v7006_v4 = vld [vmem:[%s14610_s16 + $0x58] sm:$0xff]  ;;  %v11502_v8 = vpack.c.bf16 %v7021_v24, %v7019_v46  ;;  %v7441_v24 = vld [vmem:[%s13119_s4 + $0x10] sm:$0xff] }
0x22c1   :  { %v6852_v56 = vmul.f32 %v11843_v30, %v6670_v20  ;;  %v11484_v20 = vpack.c.bf16 %v7006_v4, %v7004_v0  ;;  %v7023_v30 = vld [vmem:[%s14610_s16 + $0xe0] sm:$0xff]  ;;  %v6980_v0 = vld [vmem:[%s14611_s29 + $0x88] sm:$0xff]  ;;  %v6982_v4 = vld [vmem:[%s14611_s29 + $0x98] sm:$0xff] }
0x22c2   :  { %v6864_v55 = vmul.f32 %v7941_v26, %v6853_v27  ;;  %v7025_v27 = vld [vmem:[%s14610_s16 + $0xf0] sm:$0xff] }
0x22c3   :  { %v11845_v31 = vpop.eup %11844  ;;  %v6863_v17 = vmul.f32 %v7941_v26, %v6852_v56  ;;  %v6964_v56 = vld [vmem:[%s14611_s29 + $0x8] sm:$0xff] }
0x22c4   :  { %v11847_v48 = vpop.eup %11846  ;;  %v6855_v21 = vmul.f32 %v11845_v31, %v6673_v12  ;;  %v14229_v33 = vadd.f32 %v7942_v41, %v6864_v55  ;;  %v7007_v12 = vld [vmem:[%s14610_s16 + $0x60] sm:$0xff]  ;;  %v11506_v55 = vpack.c.bf16 %v7025_v27, %v7023_v30  ;;  %v7445_v27 = vld [vmem:[%s13119_s4 + $0x30] sm:$0xff] }
0x22c5   :  { %v6854_v35 = vmul.f32 %v11847_v48, %v6672_v36  ;;  %v14231_v62 = vadd.f32 %v7942_v41, %v6863_v17  ;;  %v7014_v36 = vld [vmem:[%s14610_s16 + $0x98] sm:$0xff]  ;;  %v6963_v17 = vld [vmem:[%s14611_s29] sm:$0xff]  ;;  %v6965_v48 = vld [vmem:[%s14611_s29 + $0x10] sm:$0xff] }
0x22c6   :  { %v6866_v37 = vmul.f32 %v7941_v26, %v6855_v21  ;;  %v6968_v21 = vld [vmem:[%s14611_s29 + $0x28] sm:$0xff]  ;;  %v7443_v30 = vld [vmem:[%s13119_s4 + $0x20] sm:$0xff] }
0x22c7   :  { %v11468_v39 = vpack.c.bf16 %v14229_v33, %v14231_v62  ;;  %v6865_v49 = vmul.f32 %v7941_v26, %v6854_v35  ;;  %v11504_v26 = vpack.c.bf16 %v7026_v6, %v7024_v22  ;;  %v6970_v35 = vld [vmem:[%s14611_s29 + $0x38] sm:$0xff]  ;;  %v7444_v22 = vld [vmem:[%s13119_s4 + $0x28] sm:$0xff] }
0x22c8   :  { %v14235_v52 = vadd.f32 %v7942_v41, %v6866_v37  ;;  %v11510_v37 = vpack.c.bf16 %v6965_v48, %v6963_v17  ;;  %v7446_v6 = vld [vmem:[%s13119_s4 + $0x38] sm:$0xff]  ;;  %v7447_v17 = vld [vmem:[%s13119_s4 + $0x40] sm:$0xff]  ;;  %v7449_v48 = vld [vmem:[%s13119_s4 + $0x50] sm:$0xff] }
0x22c9   :  { %11469 = vmatprep.subr.bf16.mxu1 %v11468_v39  ;;  %11541 = vmatprep.subr.bf16.mxu0 %v11468_v39  ;;  %v14239_v28 = vadd.f32 %v7942_v41, %v6865_v49  ;;  %v6966_v41 = vld [vmem:[%s14611_s29 + $0x18] sm:$0xff]  ;;  %v6967_v49 = vld [vmem:[%s14611_s29 + $0x20] sm:$0xff] }
0x22ca   :  { %11471 = vmatpush3.bf16.msra.mxu1 %v11468_v39  ;;  %11543 = vmatpush3.bf16.msra.mxu0 %v11468_v39  ;;  %v11508_v31 = vpack.c.bf16 %v6966_v41, %v6964_v56  ;;  %v11512_v39 = vpack.c.bf16 %v6970_v35, %v6968_v21  ;;  %v7448_v56 = vld [vmem:[%s13119_s4 + $0x48] sm:$0xff]  ;;  %v7450_v41 = vld [vmem:[%s13119_s4 + $0x58] sm:$0xff] }
0x22cb   :  { %v11472_v14 = vpack.c.bf16 %v14235_v52, %v14239_v28  ;;  %v7452_v21 = vld [vmem:[%s13119_s4 + $0x68] sm:$0xff]  ;;  %v7454_v35 = vld [vmem:[%s13119_s4 + $0x78] sm:$0xff] }
0x22cd   :  { %11473 = vmatprep.subr.bf16.mxu1 %v11472_v14  ;;  %11545 = vmatprep.subr.bf16.mxu0 %v11472_v14 }
0x22ce   :  { %11475 = vmatpush3.bf16.msra.mxu1 %v11472_v14  ;;  %11547 = vmatpush3.bf16.msra.mxu0 %v11472_v14  ;;  %v6974_v14 = vld [vmem:[%s14611_s29 + $0x58] sm:$0xff] }
0x22cf   :  { %11477 = vmatprep.subr.bf16.mxu1 %v11476_v18  ;;  %v11514_v18 = vpack.c.bf16 %v6969_v57, %v6967_v49  ;;  %v11516_v53 = vpack.c.bf16 %v6974_v14, %v6972_v51  ;;  %v7451_v49 = vld [vmem:[%s13119_s4 + $0x60] sm:$0xff]  ;;  %v7453_v57 = vld [vmem:[%s13119_s4 + $0x70] sm:$0xff]  ;;  %v7456_v51 = vld [vmem:[%s13119_s4 + $0x88] sm:$0xff] }
0x22d0   :  { %v7458_v14 = vld [vmem:[%s13119_s4 + $0x98] sm:$0xff] }
0x22d1   :  { %10217 = vmatmul.mubr.msk.f32.vlgmr.msra.gmra.mrb[96].mxu1 %vm733_vm1, %v14098_v9  ;;  %10231 = vmatmul.mubr.msk.f32.vlgmr.msra.gmra.mrb[86].mxu0 %vm733_vm1, %v14120_v5  ;;  %v7008_v9 = vld [vmem:[%s14610_s16 + $0x68] sm:$0xff] }
0x22d2   :  { %11479 = vmatpush1.bf16.msra.mxu1 %v11478_v19  ;;  %10219 = vmatprep.mubr.msk.f32.mxu1 %vm733_vm1, %v14102_v10  ;;  %v11486_v10 = vpack.c.bf16 %v7005_v25, %v7003_v7  ;;  %v11488_v5 = vpack.c.bf16 %v7010_v11, %v7008_v9  ;;  %v6978_v19 = vld [vmem:[%s14611_s29 + $0x78] sm:$0xff]  ;;  %v6981_v7 = vld [vmem:[%s14611_s29 + $0x90] sm:$0xff]  ;;  %v6984_v25 = vld [vmem:[%s14611_s29 + $0xa8] sm:$0xff] }
0x22d3   :  { %11481 = vmatprep.subr.bf16.mxu1 %v11480_v61  ;;  %10233 = vmatprep.mubr.msk.f32.mxu0 %vm733_vm1, %v14124_v50  ;;  %v7009_v50 = vld [vmem:[%s14610_s16 + $0x70] sm:$0xff]  ;;  %v11520_v61 = vpack.c.bf16 %v6978_v19, %v6976_v54  ;;  %v6986_v9 = vld [vmem:[%s14611_s29 + $0xb8] sm:$0xff]  ;;  %v7460_v54 = vld [vmem:[%s13119_s4 + $0xa8] sm:$0xff] }
0x22d4   :  { %v11528_v11 = vpack.c.bf16 %v6986_v9, %v6984_v25  ;;  %v7462_v19 = vld [vmem:[%s13119_s4 + $0xb8] sm:$0xff]  ;;  %v7468_v25 = vld [vmem:[%s13119_s4 + $0xe8] sm:$0xff] }
0x22d5   :  { %10220 = vmatmul.mubr.msk.f32.gmra.mrb[98].mxu1 %vm733_vm1, %v14106_v15  ;;  %10234 = vmatmul.mubr.msk.f32.gmra.mrb[88].mxu0 %vm733_vm1, %v14128_v1  ;;  %v11490_v15 = vpack.c.bf16 %v7009_v50, %v7007_v12  ;;  %v11492_v1 = vpack.c.bf16 %v7014_v36, %v7012_v13  ;;  %v6988_v12 = vld [vmem:[%s14611_s29 + $0xc8] sm:$0xff]  ;;  %v6990_v50 = vld [vmem:[%s14611_s29 + $0xd8] sm:$0xff] }
0x22d6   :  { %11483 = vmatpush1.bf16.msra.mxu1 %v11482_v3  ;;  %7091 = vmatprep.mubr.f32.mxu1 %v12805_v32  ;;  %v11524_v3 = vpack.c.bf16 %v6982_v4, %v6980_v0  ;;  %v11532_v36 = vpack.c.bf16 %v6990_v50, %v6988_v12  ;;  %v7464_v0 = vld [vmem:[%s13119_s4 + $0xc8] sm:$0xff]  ;;  %v7466_v4 = vld [vmem:[%s13119_s4 + $0xd8] sm:$0xff]  ;;  %v7290_v50 = vld [vmem:[%s13109_s25] sm:$0xff] }
0x22d7   :  { %11485 = vmatprep.subr.bf16.mxu1 %v11484_v20  ;;  %v6979_v20 = vld [vmem:[%s14611_s29 + $0x80] sm:$0xff]  ;;  %v7470_v9 = vld [vmem:[%s13119_s4 + $0xf8] sm:$0xff] }
0x22da   :  { %11487 = vmatpush1.bf16.msra.mxu1 %v11486_v10  ;;  %v6983_v10 = vld [vmem:[%s14611_s29 + $0xa0] sm:$0xff] }
0x22db   :  { %11489 = vmatprep.subr.bf16.mxu1 %v11488_v5  ;;  %v6985_v5 = vld [vmem:[%s14611_s29 + $0xb0] sm:$0xff] }
0x22dc   :  { %v11530_v13 = vpack.c.bf16 %v6985_v5, %v6983_v10  ;;  %v7467_v10 = vld [vmem:[%s13119_s4 + $0xe0] sm:$0xff]  ;;  %v7469_v5 = vld [vmem:[%s13119_s4 + $0xf0] sm:$0xff] }
0x22dd   :  { %v14404_v12 = vpack.c.bf16 %v7469_v5, %v7467_v10  ;;  %v7316_v10 = vld [vmem:[%s13109_s25 + $0xd0] sm:$0xff]  ;;  %v7319_v5 = vld [vmem:[%s13109_s25 + $0xe8] sm:$0xff] }
0x22de   :  { %11491 = vmatpush1.bf16.msra.mxu1 %v11490_v15  ;;  %v6989_v15 = vld [vmem:[%s14611_s29 + $0xd0] sm:$0xff] }
0x22df   :  { %11493 = vmatprep.subr.bf16.mxu1 %v11492_v1  ;;  %v6992_v1 = vld [vmem:[%s14611_s29 + $0xe8] sm:$0xff] }
0x22e0   :  { %v11536_v2 = vpack.c.bf16 %v6994_v44, %v6992_v1 }
0x22e2   :  { %11495 = vmatpush1.bf16.msra.mxu1 %v11494_v43  ;;  %v6993_v43 = vld [vmem:[%s14611_s29 + $0xf0] sm:$0xff] }
0x22e3   :  { %11497 = vmatprep.subr.bf16.mxu1 %v11496_v58  ;;  %v11538_v58 = vpack.c.bf16 %v6993_v43, %v6991_v23 }
0x22e6   :  { %11499 = vmatpush1.bf16.msra.mxu1 %v11498_v40  ;;  %v7442_v40 = vld [vmem:[%s13119_s4 + $0x18] sm:$0xff] }
0x22e7   :  { %11501 = vmatprep.subr.bf16.mxu1 %v11500_v47  ;;  %v7439_v47 = vld [vmem:[%s13119_s4] sm:$0xff]  ;;  %v14331_v46 = vpack.c.bf16 %v7442_v40, %v7440_v34 }
0x22e8   :  { %v7298_v40 = vld [vmem:[%s13109_s25 + $0x40] sm:$0xff] }
0x22e9   :  { %11581 = vmatprep.subr.bf16.mxu0 %v14331_v46 }
0x22ea   :  { %11503 = vmatpush1.bf16.msra.mxu1 %v11502_v8  ;;  %v14336_v8 = vpack.c.bf16 %v7441_v24, %v7439_v47  ;;  %v7300_v47 = vld [vmem:[%s13109_s25 + $0x50] sm:$0xff] }
0x22eb   :  { %11505 = vmatprep.subr.bf16.mxu1 %v11504_v26  ;;  %v14338_v26 = vpack.c.bf16 %v7446_v6, %v7444_v22  ;;  %v7303_v6 = vld [vmem:[%s13109_s25 + $0x68] sm:$0xff] }
0x22ec   :  { %11583 = vmatpush1.bf16.msra.mxu0 %v14336_v8 }
0x22ed   :  { %11585 = vmatprep.subr.bf16.mxu0 %v14338_v26 }
0x22ee   :  { %11507 = vmatpush1.bf16.msra.mxu1 %v11506_v55  ;;  %v14346_v55 = vpack.c.bf16 %v7445_v27, %v7443_v30  ;;  %v7305_v30 = vld [vmem:[%s13109_s25 + $0x78] sm:$0xff] }
0x22ef   :  { %11509 = vmatprep.subr.bf16.mxu1 %v11508_v31  ;;  %v14349_v31 = vpack.c.bf16 %v7450_v41, %v7448_v56  ;;  %v11558_v41 = vpack.c.bf16 %v7300_v47, %v7298_v40 }
0x22f0   :  { %11587 = vmatpush1.bf16.msra.mxu0 %v14346_v55 }
0x22f1   :  { %7092 = vmatmul.mubr.f32.vlgmr.msra.gmra.mrb[100].mxu1 %v14231_v62  ;;  %v11518_v62 = vpack.c.bf16 %v6973_v16, %v6971_v59  ;;  %11589 = vmatprep.subr.bf16.mxu0 %v14349_v31  ;;  %v7455_v59 = vld [vmem:[%s13119_s4 + $0x80] sm:$0xff]  ;;  %v7457_v16 = vld [vmem:[%s13119_s4 + $0x90] sm:$0xff] }
0x22f2   :  { %7097 = vmatprep.mubr.f32.mxu1 %v12805_v32  ;;  %11511 = vmatpush1.bf16.msra.mxu1 %v11510_v37  ;;  %v14356_v37 = vpack.c.bf16 %v7449_v48, %v7447_v17  ;;  %v11560_v17 = vpack.c.bf16 %v7305_v30, %v7303_v6  ;;  %v7302_v48 = vld [vmem:[%s13109_s25 + $0x60] sm:$0xff] }
0x22f3   :  { %11513 = vmatprep.subr.bf16.mxu1 %v11512_v39  ;;  %v14359_v39 = vpack.c.bf16 %v7454_v35, %v7452_v21  ;;  %v7304_v21 = vld [vmem:[%s13109_s25 + $0x70] sm:$0xff]  ;;  %v7307_v35 = vld [vmem:[%s13109_s25 + $0x88] sm:$0xff] }
0x22f4   :  { %11591 = vmatpush1.bf16.msra.mxu0 %v14356_v37 }
0x22f5   :  { %7098 = vmatmul.mubr.f32.gmra.mrb[102].mxu1 %v14229_v33  ;;  %v11522_v33 = vpack.c.bf16 %v6977_v63, %v6975_v38  ;;  %11593 = vmatprep.subr.bf16.mxu0 %v14359_v39  ;;  %v7459_v38 = vld [vmem:[%s13119_s4 + $0xa0] sm:$0xff]  ;;  %v7461_v63 = vld [vmem:[%s13119_s4 + $0xb0] sm:$0xff] }
0x22f6   :  { %7103 = vmatprep.mubr.f32.mxu1 %v12805_v32  ;;  %11515 = vmatpush1.bf16.msra.mxu1 %v11514_v18  ;;  %v14366_v18 = vpack.c.bf16 %v7453_v57, %v7451_v49  ;;  %v7309_v49 = vld [vmem:[%s13109_s25 + $0x98] sm:$0xff]  ;;  %v11562_v57 = vpack.c.bf16 %v7304_v21, %v7302_v48 }
0x22f7   :  { %11517 = vmatprep.subr.bf16.mxu1 %v11516_v53  ;;  %v14369_v53 = vpack.c.bf16 %v7458_v14, %v7456_v51  ;;  %v11564_v51 = vpack.c.bf16 %v7309_v49, %v7307_v35  ;;  %v7306_v14 = vld [vmem:[%s13109_s25 + $0x80] sm:$0xff] }
0x22f8   :  { %11595 = vmatpush1.bf16.msra.mxu0 %v14366_v18 }
0x22f9   :  { %7104 = vmatmul.mubr.f32.gmra.mrb[104].mxu1 %v14239_v28  ;;  %v11526_v28 = vpack.c.bf16 %v6981_v7, %v6979_v20  ;;  %11597 = vmatprep.subr.bf16.mxu0 %v14369_v53  ;;  %v7463_v20 = vld [vmem:[%s13119_s4 + $0xc0] sm:$0xff]  ;;  %v7465_v7 = vld [vmem:[%s13119_s4 + $0xd0] sm:$0xff] }
0x22fa   :  { %7109 = vmatprep.mubr.f32.mxu1 %v12805_v32  ;;  %11519 = vmatpush1.bf16.msra.mxu1 %v11518_v62  ;;  %v14376_v62 = vpack.c.bf16 %v7457_v16, %v7455_v59  ;;  %v7308_v59 = vld [vmem:[%s13109_s25 + $0x90] sm:$0xff]  ;;  %v7311_v16 = vld [vmem:[%s13109_s25 + $0xa8] sm:$0xff] }
0x22fb   :  { %11521 = vmatprep.subr.bf16.mxu1 %v11520_v61  ;;  %v14379_v61 = vpack.c.bf16 %v7462_v19, %v7460_v54  ;;  %v7313_v54 = vld [vmem:[%s13109_s25 + $0xb8] sm:$0xff]  ;;  %v11566_v19 = vpack.c.bf16 %v7308_v59, %v7306_v14 }
0x22fc   :  { %11599 = vmatpush1.bf16.msra.mxu0 %v14376_v62 }
0x22fd   :  { %7110 = vmatmul.mubr.f32.gmra.mrb[106].mxu1 %v14235_v52  ;;  %v6987_v52 = vld [vmem:[%s14611_s29 + $0xc0] sm:$0xff]  ;;  %11601 = vmatprep.subr.bf16.mxu0 %v14379_v61 }
0x22fe   :  { %11523 = vmatpush1.bf16.msra.mxu1 %v11522_v33  ;;  %7180 = vmatprep.mubr.f32.mxu1 %v12805_v32  ;;  %v11534_v42 = vpack.c.bf16 %v6989_v15, %v6987_v52  ;;  %v14386_v33 = vpack.c.bf16 %v7461_v63, %v7459_v38  ;;  %v7297_v52 = vld [vmem:[%s13109_s25 + $0x38] sm:$0xff]  ;;  %v11568_v38 = vpack.c.bf16 %v7313_v54, %v7311_v16  ;;  %v7310_v63 = vld [vmem:[%s13109_s25 + $0xa0] sm:$0xff] }
0x22ff   :  { %11525 = vmatprep.subr.bf16.mxu1 %v11524_v3  ;;  %v14389_v3 = vpack.c.bf16 %v7466_v4, %v7464_v0  ;;  %v7312_v0 = vld [vmem:[%s13109_s25 + $0xb0] sm:$0xff]  ;;  %v7315_v4 = vld [vmem:[%s13109_s25 + $0xc8] sm:$0xff] }
0x2300   :  { %11603 = vmatpush1.bf16.msra.mxu0 %v14386_v33 }
0x2301   :  { %11605 = vmatprep.subr.bf16.mxu0 %v14389_v3 }
0x2302   :  { %11527 = vmatpush1.bf16.msra.mxu1 %v11526_v28  ;;  %v14396_v28 = vpack.c.bf16 %v7465_v7, %v7463_v20  ;;  %v7317_v20 = vld [vmem:[%s13109_s25 + $0xd8] sm:$0xff]  ;;  %v11570_v7 = vpack.c.bf16 %v7312_v0, %v7310_v63 }
0x2303   :  { %11529 = vmatprep.subr.bf16.mxu1 %v11528_v11  ;;  %v14399_v11 = vpack.c.bf16 %v7470_v9, %v7468_v25  ;;  %v11572_v25 = vpack.c.bf16 %v7317_v20, %v7315_v4  ;;  %v7314_v9 = vld [vmem:[%s13109_s25 + $0xc0] sm:$0xff] }
0x2304   :  { %11607 = vmatpush1.bf16.msra.mxu0 %v14396_v28 }
0x2305   :  { %11609 = vmatprep.subr.bf16.mxu0 %v14399_v11 }
0x2306   :  { %11531 = vmatpush1.bf16.msra.mxu1 %v11530_v13  ;;  %v7292_v13 = vld [vmem:[%s13109_s25 + $0x10] sm:$0xff] }
0x2307   :  { %11533 = vmatprep.subr.bf16.mxu1 %v11532_v36  ;;  %v7295_v36 = vld [vmem:[%s13109_s25 + $0x28] sm:$0xff]  ;;  %v11550_v15 = vpack.c.bf16 %v7292_v13, %v7290_v50  ;;  %v7321_v50 = vld [vmem:[%s13109_s25 + $0xf8] sm:$0xff]  ;;  %v11574_v13 = vpack.c.bf16 %v7316_v10, %v7314_v9 }
0x2308   :  { %11611 = vmatpush1.bf16.msra.mxu0 %v14404_v12  ;;  %v11552_v44 = vpack.c.bf16 %v7297_v52, %v7295_v36  ;;  %v11576_v36 = vpack.c.bf16 %v7321_v50, %v7319_v5  ;;  %v7318_v52 = vld [vmem:[%s13109_s25 + $0xe0] sm:$0xff] }
0x230a   :  { %11535 = vmatpush1.bf16.msra.mxu1 %v11534_v42  ;;  %v7294_v42 = vld [vmem:[%s13109_s25 + $0x20] sm:$0xff] }
0x230b   :  { %11537 = vmatprep.subr.bf16.mxu1 %v11536_v2  ;;  %v7296_v2 = vld [vmem:[%s13109_s25 + $0x30] sm:$0xff] }
0x230e   :  { %11539 = vmatpush1.bf16.msra.mxu1 %v11538_v58  ;;  %v7299_v58 = vld [vmem:[%s13109_s25 + $0x48] sm:$0xff] }
0x230f   :  { %11549 = vmatprep.subr.bf16.mxu1 %v11548_v60  ;;  %v11554_v60 = vpack.c.bf16 %v7296_v2, %v7294_v42  ;;  %v11556_v34 = vpack.c.bf16 %v7301_v45, %v7299_v58  ;;  %v7474_v42 = vld [vmem:[%s13119_s4 + $0x118] sm:$0xff]  ;;  %v7473_v58 = vld [vmem:[%s13119_s4 + $0x110] sm:$0xff] }
0x23a4   :  { %v10218_v1 = vpop.f32.mrb[96].mxu1  ;;  %v14414_v23 = vpop.f32.mrb[86].mxu0 }
0x23a5   :  { %v6944_v43 = vpop.f32.mrb[97].mxu1  ;;  %v7271_v29 = vpop.f32.mrb[87].mxu0 }
0x23a6   :  { %7181 = vmatmul.mubr.f32.vlgmr.msra.gmra.mrb[100].mxu1 %v6944_v43  ;;  %v7471_v43 = vld [vmem:[%s13119_s4 + $0x100] sm:$0xff] }
0x23a7   :  { %11551 = vmatpush1.bf16.msra.mxu1 %v11550_v15  ;;  %7186 = vmatprep.mubr.f32.mxu1 %v12805_v32  ;;  %v7320_v15 = vld [vmem:[%s13109_s25 + $0xf0] sm:$0xff]  ;;  %v11614_v45 = vpack.c.bf16 %v7473_v58, %v7471_v43 }
0x23a8   :  { %11553 = vmatprep.subr.bf16.mxu1 %v11552_v44  ;;  %v10221_v24 = vpop.f32.mrb[98].mxu1  ;;  %v10235_v22 = vpop.f32.mrb[88].mxu0  ;;  %v7472_v44 = vld [vmem:[%s13119_s4 + $0x108] sm:$0xff] }
0x23a9   :  { %v6954_v27 = vpop.f32.mrb[99].mxu1  ;;  %v7281_v56 = vpop.f32.mrb[89].mxu0  ;;  %v11612_v2 = vpack.c.bf16 %v7474_v42, %v7472_v44 }
0x23aa   :  { %7187 = vmatmul.mubr.f32.gmra.mrb[102].mxu1 %v10218_v1  ;;  %v11578_v1 = vpack.c.bf16 %v7320_v15, %v7318_v52 }
0x23ab   :  { %11555 = vmatpush1.bf16.msra.mxu1 %v11554_v60  ;;  %7192 = vmatprep.mubr.f32.mxu1 %v12805_v32 }
0x23ac   :  { %11557 = vmatprep.subr.bf16.mxu1 %v11556_v34  ;;  %11613 = vmatprep.subr.bf16.mxu0 %v11612_v2  ;;  %v7419_v34 = vld [vmem:[%s13114_s9] sm:$0x3] }
0x23ad   :  { %11615 = vmatpush1.bf16.msra.mxu0 %v11614_v45 }
0x23ae   :  { %7193 = vmatmul.mubr.f32.gmra.mrb[104].mxu1 %v6954_v27  ;;  %11617 = vmatprep.subr.bf16.mxu0 %v14331_v46 }
0x23af   :  { %11559 = vmatpush1.bf16.msra.mxu1 %v11558_v41  ;;  %7198 = vmatprep.mubr.f32.mxu1 %v12805_v32 }
0x23b0   :  { %11561 = vmatprep.subr.bf16.mxu1 %v11560_v17 }
0x23b2   :  { %7199 = vmatmul.mubr.f32.gmra.mrb[106].mxu1 %v10221_v24 }
0x23b3   :  { %11563 = vmatpush1.bf16.msra.mxu1 %v11562_v57  ;;  %7386 = vmatprep.mubr.f32.mxu1 %v12805_v32 }
0x23b4   :  { %11565 = vmatprep.subr.bf16.mxu1 %v11564_v51 }
0x23b7   :  { %11567 = vmatpush1.bf16.msra.mxu1 %v11566_v19 }
0x23b8   :  { %11569 = vmatprep.subr.bf16.mxu1 %v11568_v38 }
0x23bb   :  { %11571 = vmatpush1.bf16.msra.mxu1 %v11570_v7 }
0x23bc   :  { %11573 = vmatprep.subr.bf16.mxu1 %v11572_v25 }
0x23bf   :  { %11575 = vmatpush1.bf16.msra.mxu1 %v11574_v13 }
0x23c0   :  { %11577 = vmatprep.subr.bf16.mxu1 %v11576_v36 }
0x23c3   :  { %11579 = vmatpush1.bf16.msra.mxu1 %v11578_v1 }
0x23c6   :  { %7387 = vmatmul.mubr.f32.vlgmr.msra.gmra.mrb[100].mxu1 %v7271_v29  ;;  %v7421_v29 = vlaneseq }
0x23c7   :  { %7392 = vmatprep.mubr.f32.mxu1 %v12805_v32 }
0x23c8   :  { %v7422_v60 = vshrl.u32 %v7421_v29, 7 }
0x23ca   :  { %7393 = vmatmul.mubr.f32.gmra.mrb[102].mxu1 %v14414_v23  ;;  %v7427_v23 = vsub.s32 1, %v7422_v60  ;;  %v7423_v40 = vsub.s32 0, %v7422_v60 }
0x23cb   :  { %7398 = vmatprep.mubr.f32.mxu1 %v12805_v32 }
0x23cc   :  { %v7428_v47 = vrot.slane %v7419_v34, %v7427_v23  ;;  %v7424_v24 = vrot.slane %v7419_v34, %v7423_v40 }
0x23ce   :  { %7399 = vmatmul.mubr.f32.gmra.mrb[104].mxu1 %v7281_v56 }
0x23cf   :  { %7404 = vmatprep.mubr.f32.mxu1 %v12805_v32 }
0x23d2   :  { %7405 = vmatmul.mubr.f32.gmra.mrb[106].mxu1 %v10235_v22 }
0x2499   :  { %v7388_v6 = vpop.f32.mrb[100].mxu1 }
0x249a   :  { %v7390_v32 = vpop.f32.mrb[101].mxu1  ;;  %v7431_v30 = vadd.f32 %v7424_v24, %v7388_v6 }
0x249b   :  { %v7432_v22 = vadd.f32 %v7428_v47, %v7390_v32 }
0x249d   :  { %v7394_v27 = vpop.f32.mrb[102].mxu1  ;;  %7951 = vmatprep.mubr.msk.f32.mxu0 %vm2537_vm2, %v7432_v22 }
0x249e   :  { %v7396_v56 = vpop.f32.mrb[103].mxu1  ;;  %7552 = vmatmul.mubr.f32.vlgmr.msra.gmra.mrb[90].mxu0 %v7431_v30  ;;  %v7433_v46 = vadd.f32 %v7424_v24, %v7394_v27 }
0x249f   :  { %v7434_v41 = vadd.f32 %v7428_v47, %v7396_v56  ;;  %11619 = vmatpush1.bf16.msra.mxu0 %v14336_v8 }
0x24a0   :  { %11621 = vmatprep.subr.bf16.mxu0 %v14338_v26 }
0x24a1   :  { %v7400_v17 = vpop.f32.mrb[104].mxu1  ;;  %7952 = vmatprep.mubr.msk.f32.mxu0 %vm2537_vm2, %v7434_v41 }
0x24a2   :  { %v7402_v48 = vpop.f32.mrb[105].mxu1  ;;  %7558 = vmatmul.mubr.f32.gmra.mrb[92].mxu0 %v7433_v46  ;;  %v7435_v35 = vadd.f32 %v7424_v24, %v7400_v17 }
0x24a3   :  { %v7436_v21 = vadd.f32 %v7428_v47, %v7402_v48  ;;  %11623 = vmatpush1.bf16.msra.mxu0 %v14346_v55 }
0x24a4   :  { %11625 = vmatprep.subr.bf16.mxu0 %v14349_v31 }
0x24a5   :  { %v7406_v49 = vpop.f32.mrb[106].mxu1  ;;  %7953 = vmatprep.mubr.msk.f32.mxu0 %vm2537_vm2, %v7436_v21 }
0x24a6   :  { %v7408_v57 = vpop.f32.mrb[107].mxu1  ;;  %7564 = vmatmul.mubr.f32.gmra.mrb[94].mxu0 %v7435_v35  ;;  %v7437_v26 = vadd.f32 %v7424_v24, %v7406_v49 }
0x24a7   :  { %v7438_v8 = vadd.f32 %v7428_v47, %v7408_v57  ;;  %11627 = vmatpush1.bf16.msra.mxu0 %v14356_v37 }
0x24a8   :  { %11629 = vmatprep.subr.bf16.mxu0 %v14359_v39 }
0x24a9   :  { %7954 = vmatprep.mubr.msk.f32.mxu0 %vm2537_vm2, %v7438_v8 }
0x24aa   :  { %7570 = vmatmul.mubr.f32.gmra.mrb[96].mxu0 %v7437_v26 }
0x24ab   :  { %11631 = vmatpush1.bf16.msra.mxu0 %v14366_v18 }
0x24ac   :  { %11633 = vmatprep.subr.bf16.mxu0 %v14369_v53 }
0x24af   :  { %11635 = vmatpush1.bf16.msra.mxu0 %v14376_v62 }
0x24b0   :  { %11637 = vmatprep.subr.bf16.mxu0 %v14379_v61 }
0x24b3   :  { %11639 = vmatpush1.bf16.msra.mxu0 %v14386_v33 }
0x24b4   :  { %11641 = vmatprep.subr.bf16.mxu0 %v14389_v3 }
0x24b7   :  { %11643 = vmatpush1.bf16.msra.mxu0 %v14396_v28 }
0x24b8   :  { %11645 = vmatprep.subr.bf16.mxu0 %v14399_v11 }
0x24bb   :  { %11647 = vmatpush1.bf16.msra.mxu0 %v14404_v12 }
0x24bc   :  { %11649 = vmatprep.subr.bf16.mxu0 %v11612_v2 }
0x24bf   :  { %11651 = vmatpush1.bf16.msra.mxu0 %v11614_v45 }
0x2571   :  { %v7553_v55 = vpop.f32.mrb[90].mxu0 }
0x2572   :  { %v7576_v31 = vmul.f32 0.11111111, %v7553_v55  ;;  %v7555_v37 = vpop.f32.mrb[91].mxu0 }
0x2573   :  { %v7577_v39 = vmul.f32 0.11111111, %v7555_v37 }
0x2574   :  { %v7584_v18 = vsub.f32 %v7431_v30, %v7576_v31 }
0x2575   :  { %v7585_v53 = vsub.f32 %v7432_v22, %v7577_v39  ;;  %v7559_v62 = vpop.f32.mrb[92].mxu0 }
0x2576   :  { %v7592_v61 = vmul.f32 1.442695, %v7584_v18  ;;  %v7578_v51 = vmul.f32 0.11111111, %v7559_v62  ;;  %v7561_v33 = vpop.f32.mrb[93].mxu0 }
0x2577   :  { %v7594_v14 = vmul.f32 1.442695, %v7585_v53  ;;  %v7579_v3 = vmul.f32 0.11111111, %v7561_v33 }
0x2578   :  { %v7586_v59 = vsub.f32 %v7433_v46, %v7578_v51 }
0x2579   :  { %11848 = vpow2.f32 %v7594_v14  ;;  %v7587_v28 = vsub.f32 %v7434_v41, %v7579_v3  ;;  %v7565_v11 = vpop.f32.mrb[94].mxu0 }
0x257a   :  { %11850 = vpow2.f32 %v7592_v61  ;;  %v7596_v12 = vmul.f32 1.442695, %v7586_v59  ;;  %v7580_v16 = vmul.f32 0.11111111, %v7565_v11  ;;  %v7567_v54 = vpop.f32.mrb[95].mxu0 }
0x257b   :  { %v7598_v19 = vmul.f32 1.442695, %v7587_v28  ;;  %v7581_v38 = vmul.f32 0.11111111, %v7567_v54 }
0x257c   :  { %v7588_v63 = vsub.f32 %v7435_v35, %v7580_v16 }
0x257d   :  { %11852 = vpow2.f32 %v7598_v19  ;;  %v7589_v0 = vsub.f32 %v7436_v21, %v7581_v38  ;;  %v7571_v4 = vpop.f32.mrb[96].mxu0 }
0x257e   :  { %11854 = vpow2.f32 %v7596_v12  ;;  %v7600_v20 = vmul.f32 1.442695, %v7588_v63  ;;  %v7582_v7 = vmul.f32 0.11111111, %v7571_v4  ;;  %v7573_v25 = vpop.f32.mrb[97].mxu0 }
0x257f   :  { %v7602_v9 = vmul.f32 1.442695, %v7589_v0  ;;  %v7583_v10 = vmul.f32 0.11111111, %v7573_v25 }
0x2580   :  { %v7590_v5 = vsub.f32 %v7437_v26, %v7582_v7 }
0x2581   :  { %11856 = vpow2.f32 %v7602_v9  ;;  %v7591_v50 = vsub.f32 %v7438_v8, %v7583_v10 }
0x2582   :  { %11858 = vpow2.f32 %v7600_v20  ;;  %v7604_v13 = vmul.f32 1.442695, %v7590_v5 }
0x2583   :  { %v11849_v36 = vpop.eup %11848  ;;  %v7606_v52 = vmul.f32 1.442695, %v7591_v50 }
0x2584   :  { %v11851_v15 = vpop.eup %11850  ;;  %7955 = vmatprep.mubr.msk.f32.mxu0 %vm2537_vm2, %v11849_v36 }
0x2585   :  { %11860 = vpow2.f32 %v7606_v52  ;;  %7685 = vmatmul.mubr.f32.vlgmr.msra.gmra.mrb[98].mxu0 %v11851_v15 }
0x2586   :  { %11862 = vpow2.f32 %v7604_v13 }
0x2587   :  { %v11853_v1 = vpop.eup %11852 }
0x2588   :  { %v11855_v44 = vpop.eup %11854  ;;  %7956 = vmatprep.mubr.msk.f32.mxu0 %vm2537_vm2, %v11853_v1 }
0x2589   :  { %7691 = vmatmul.mubr.f32.gmra.mrb[100].mxu0 %v11855_v44 }
0x258b   :  { %v11857_v42 = vpop.eup %11856 }
0x258c   :  { %v11859_v2 = vpop.eup %11858  ;;  %7957 = vmatprep.mubr.msk.f32.mxu0 %vm2537_vm2, %v11857_v42 }
0x258d   :  { %7697 = vmatmul.mubr.f32.gmra.mrb[102].mxu0 %v11859_v2 }
0x258f   :  { %v11861_v43 = vpop.eup %11860 }
0x2590   :  { %v11863_v58 = vpop.eup %11862  ;;  %7958 = vmatprep.mubr.msk.f32.mxu0 %vm2537_vm2, %v11861_v43 }
0x2591   :  { %7703 = vmatmul.mubr.f32.gmra.mrb[104].mxu0 %v11863_v58 }
0x2658   :  { %v7686_v45 = vpop.f32.mrb[98].mxu0 }
0x2659   :  { %11864 = vrcp.f32 %v7686_v45  ;;  %v7688_v29 = vpop.f32.mrb[99].mxu0 }
0x265a   :  { %11866 = vrcp.f32 %v7688_v29 }
0x265c   :  { %v7692_v60 = vpop.f32.mrb[100].mxu0 }
0x265d   :  { %11868 = vrcp.f32 %v7692_v60  ;;  %v7694_v23 = vpop.f32.mrb[101].mxu0 }
0x265e   :  { %11870 = vrcp.f32 %v7694_v23 }
0x2660   :  { %v7698_v34 = vpop.f32.mrb[102].mxu0 }
0x2661   :  { %11872 = vrcp.f32 %v7698_v34  ;;  %v7700_v40 = vpop.f32.mrb[103].mxu0 }
0x2662   :  { %11874 = vrcp.f32 %v7700_v40 }
0x2663   :  { %v11865_v47 = vpop.eup %11864 }
0x2664   :  { %v11867_v24 = vpop.eup %11866  ;;  %v7710_v6 = vmul.f32 %v11865_v47, %v11851_v15  ;;  %v7704_v32 = vpop.f32.mrb[104].mxu0 }
0x2665   :  { %v7712_v22 = vmul.f32 %v11867_v24, %v11849_v36  ;;  %11876 = vrcp.f32 %v7704_v32  ;;  %v7706_v30 = vpop.f32.mrb[105].mxu0 }
0x2666   :  { %7725 = vst [vmem:[%s13124_s17] sm:$0xff] %v7710_v6  ;;  %11878 = vrcp.f32 %v7706_v30 }
0x2667   :  { %v11869_v27 = vpop.eup %11868  ;;  %7726 = vst.msk [vmem:[%s13124_s17 + $0x8] sm:$0xff] %vm2537_vm2, %v7712_v22 }
0x2668   :  { %v11871_v56 = vpop.eup %11870  ;;  %v7714_v41 = vmul.f32 %v11869_v27, %v11855_v44 }
0x2669   :  { %v7716_v46 = vmul.f32 %v11871_v56, %v11853_v1 }
0x266a   :  { %7727 = vst [vmem:[%s13124_s17 + $0x10] sm:$0xff] %v7714_v41 }
0x266b   :  { %v11873_v17 = vpop.eup %11872  ;;  %7728 = vst.msk [vmem:[%s13124_s17 + $0x18] sm:$0xff] %vm2537_vm2, %v7716_v46 }
0x266c   :  { %v11875_v48 = vpop.eup %11874  ;;  %v7718_v21 = vmul.f32 %v11873_v17, %v11859_v2 }
0x266d   :  { %v7720_v35 = vmul.f32 %v11875_v48, %v11857_v42 }
0x266e   :  { %7729 = vst [vmem:[%s13124_s17 + $0x20] sm:$0xff] %v7718_v21 }
0x266f   :  { %v11877_v49 = vpop.eup %11876  ;;  %7730 = vst.msk [vmem:[%s13124_s17 + $0x28] sm:$0xff] %vm2537_vm2, %v7720_v35 }
0x2670   :  { %v11879_v57 = vpop.eup %11878  ;;  %v7722_v8 = vmul.f32 %v11877_v49, %v11863_v58 }
0x2671   :  { %v7724_v26 = vmul.f32 %v11879_v57, %v11861_v43 }
0x2672   :  { %7731 = vst [vmem:[%s13124_s17 + $0x30] sm:$0xff] %v7722_v8 }
0x2673   :  { %7732 = vst.msk [vmem:[%s13124_s17 + $0x38] sm:$0xff] %vm2537_vm2, %v7724_v26 }
0x2674   :  { %7737 = vsyncpa [#allocation3], 1 }
0x2675   :  { %7738 = vsyncpa [#allocation5], 1 }
0x2676   :  { %7739 = vsyncpa [#allocation8], 1 }
0x2677   :  { %7740 = vsyncpa [#allocation11], 1 }
0x2678   :  { %7741 = vsyncpa [#allocation14], 1 }
0x2679   :  { %7742 = vsyncpa [#allocation17], 1 }
0x267a   :  { %7743 = vsyncpa [#allocation20], 1 }
0x267b   :  { %7744 = vsyncpa [#allocation23], 1 }
0x267c   :  { %7745 = vsyncpa [#allocation26], 1 }
0x267d   :  { %7746 = vsyncpa [#allocation29], 1 }
0x267e   :  { %7747 = vsyncpa [#allocation32], 1 }
0x267f   :  { %7748 = vsyncpa [#allocation35], 1 }
0x2680   :  { %7749 = vsyncpa [#allocation38], 1 }
0x2681   :  { %7750 = vsyncpa [#allocation41], 1 }
0x2682   :  { %7751 = vsyncpa [#allocation44], 1 }
0x2683   :  { %7752 = vsyncpa [#allocation47], 1 }
0x2684   :  { %7753 = vsyncpa [#allocation50], 1 }
0x2685   :  { %7754 = vsyncpa [#allocation53], 1 }

</bundles_post_ra>
